<compile_context>
chip_gen: v5e
topology: v5e:2x2
jax: 0.10.0
libtpu: 0.0.40
codegen_flags: <defaults>
</compile_context>

<pallas_src>
import functools

import jax
import jax.numpy as jnp
from jax import lax
from jax.experimental import pallas as pl
from jax.experimental.pallas import tpu as pltpu


def _round_up(v, m):
    return ((v + m - 1) // m) * m


def _should_fuse_recurrent():
    """v6e/v7x: 256-deep MXU -> fuse the two recurrent matmuls (K=2*Hp block-diagonal).
    v4/v5: 128-deep MXU -> keep two K=Hp matmuls (fusion wastes half the passes)."""
    try:
        kind = jax.devices()[0].device_kind.lower()
    except Exception:
        return True
    return ("v5" not in kind) and ("v4" not in kind)


def _bilstm_kernel(fuse, t_real, t_padded,
                   xf_ref, xb_ref, wx_ref, bg_ref, whh_ref, wlf_ref, wlb_ref, bl_ref,
                   outf_ref, outb_ref,
                   gxf_scr, gxb_scr, hf_scr, hb_scr, state_scr):
    """One (batch-block, time-chunk) grid step of bidirectional LSTM + output Linear.

    xf_ref : [Tc, Bb, D]   input chunk for the forward direction  (time-chunk c)
    xb_ref : [Tc, Bb, D]   input chunk for the backward direction (time-chunk Nc-1-c)
    wx_ref : [2, D, 4*Hp]  input->gate weights, bf16 ([0]=fwd, [1]=bwd), padded
    bg_ref : [2, 1, 4*Hp]  fused gate biases (b_ih + b_hh), f32, padded
    whh_ref: fused: [2*Hp, 8*Hp] block-diagonal bf16 ; unfused: [2, Hp, 4*Hp] bf16
    wlf_ref: [Hp, Op] bf16  output-Linear weights, forward half (padded)
    wlb_ref: [Hp, Op] bf16  output-Linear weights, backward half (padded)
    bl_ref : [1, Op]  f32   output-Linear bias (added to the forward partial only)
    outf_ref / outb_ref : [Tc, Bb, Op] f32 per-direction partial outputs
    scratch: gxf/gxb [Tc,Bb,4Hp] bf16, hf/hb [Tc,Bb,Hp] bf16,
             state [4,Bb,Hp] f32 = carried (h_f, c_f, h_b, c_b) across time chunks.
    """
    Tc, Bb, D = xf_ref.shape
    Hp = hf_scr.shape[-1]
    G = 4 * Hp
    c_idx = pl.program_id(1)
    nc = t_padded // Tc

    # Reset the carried recurrent state at the first time-chunk of every batch block.
    @pl.when(c_idx == 0)
    def _():
        state_scr[...] = jnp.zeros_like(state_scr)

    # ---- Hoisted per-chunk input projection (throughput MXU work, biases fused) ----
    xf = xf_ref[...].reshape(Tc * Bb, D).astype(jnp.bfloat16)
    xb = xb_ref[...].reshape(Tc * Bb, D).astype(jnp.bfloat16)
    gxf = jnp.dot(xf, wx_ref[0], preferred_element_type=jnp.float32) + bg_ref[0]
    gxb = jnp.dot(xb, wx_ref[1], preferred_element_type=jnp.float32) + bg_ref[1]
    gxf_scr[...] = gxf.reshape(Tc, Bb, G).astype(jnp.bfloat16)
    gxb_scr[...] = gxb.reshape(Tc, Bb, G).astype(jnp.bfloat16)

    if fuse:
        whh = whh_ref[...]          # [2*Hp, 8*Hp] block-diagonal, bf16
    else:
        whh_f = whh_ref[0]          # [Hp, 4*Hp] bf16
        whh_b = whh_ref[1]

    def lstm_gates(g, c):
        # PyTorch gate order i, f, g, o; slices are 128-lane aligned (Hp = 128*k).
        # sigmoid(x) = 0.5*tanh(0.5*x) + 0.5  (1 EUP op; scale/add ride free VPU slots).
        i = 0.5 * jnp.tanh(0.5 * g[:, 0 * Hp:1 * Hp]) + 0.5
        f = 0.5 * jnp.tanh(0.5 * g[:, 1 * Hp:2 * Hp]) + 0.5
        gg = jnp.tanh(g[:, 2 * Hp:3 * Hp])
        o = 0.5 * jnp.tanh(0.5 * g[:, 3 * Hp:4 * Hp]) + 0.5
        c_new = f * c + i * gg
        h_new = o * jnp.tanh(c_new)
        return h_new, c_new

    # With time padding (t_padded > t_real) the backward sweep visits the padded steps
    # first; its carried state must be zeroed right before the first *real* step, i.e.
    # at local backward index reset_lb (only ever in range for the chunk holding T-1).
    needs_reset = t_padded > t_real                      # static Python bool
    reset_lb = (t_real - 1) - (nc - 1 - c_idx) * Tc

    def step(s, carry):
        h_f, c_f, h_b, c_b = carry
        lb = Tc - 1 - s                                  # backward local time index
        if needs_reset:
            keep = lb != reset_lb
            h_b = jnp.where(keep, h_b, 0.0)
            c_b = jnp.where(keep, c_b, 0.0)
        if fuse:
            # One K=2*Hp bf16 matmul per step; the block-diagonal RHS keeps gf a
            # function of h_f only and gb of h_b only (off-diagonal blocks are zero).
            hcat = jnp.concatenate([h_f, h_b], axis=1).astype(jnp.bfloat16)
            g = jnp.dot(hcat, whh, preferred_element_type=jnp.float32)
            gf = gxf_scr[s] + g[:, :G]
            gb = gxb_scr[lb] + g[:, G:]
        else:
            gf = gxf_scr[s] + jnp.dot(h_f.astype(jnp.bfloat16), whh_f,
                                      preferred_element_type=jnp.float32)
            gb = gxb_scr[lb] + jnp.dot(h_b.astype(jnp.bfloat16), whh_b,
                                       preferred_element_type=jnp.float32)
        h_f, c_f = lstm_gates(gf, c_f)
        h_b, c_b = lstm_gates(gb, c_b)
        hf_scr[s] = h_f.astype(jnp.bfloat16)             # deferred-Linear inputs (bf16)
        hb_scr[lb] = h_b.astype(jnp.bfloat16)
        return (h_f, c_f, h_b, c_b)

    carry0 = (state_scr[0], state_scr[1], state_scr[2], state_scr[3])
    h_f, c_f, h_b, c_b = lax.fori_loop(0, Tc, step, carry0,
                                       unroll=(True if Tc <= 16 else 4))
    state_scr[0] = h_f
    state_scr[1] = c_f
    state_scr[2] = h_b
    state_scr[3] = c_b

    # ---- Per-chunk deferred Linear: lane-dense bf16 matmuls + single wide stores ----
    hf2 = hf_scr[...].reshape(Tc * Bb, Hp)
    hb2 = hb_scr[...].reshape(Tc * Bb, Hp)
    out_f = jnp.dot(hf2, wlf_ref[...], preferred_element_type=jnp.float32) + bl_ref[...]
    out_b = jnp.dot(hb2, wlb_ref[...], preferred_element_type=jnp.float32)
    outf_ref[...] = out_f.reshape(Tc, Bb, -1)
    outb_ref[...] = out_b.reshape(Tc, Bb, -1)


def _pack_params(params, Hp, Op, fuse):
    """Pre-transpose, zero-pad (H->Hp, O->Op), fuse biases, and (on v6e/v7x) build the
    block-diagonal recurrent weight, so the kernel does plain row-major matmuls with
    128-lane-aligned gate slots and bf16 MXU operands. Zero padding keeps the padded
    lanes of h/c exactly 0 throughout the recurrence."""
    H = params["whh_f"].shape[1]
    O = params["wl"].shape[0]

    def pack_gate_cols(w):                  # w: [4H, in_dim] -> [in_dim, 4*Hp] (f32)
        in_dim = w.shape[1]
        out = jnp.zeros((in_dim, 4 * Hp), jnp.float32)
        for k in range(4):
            out = out.at[:, k * Hp:k * Hp + H].set(w[k * H:(k + 1) * H, :].T)
        return out

    def pack_bias(bih, bhh):                # -> [4*Hp] (f32)
        b = (bih + bhh).astype(jnp.float32)
        out = jnp.zeros((4 * Hp,), jnp.float32)
        for k in range(4):
            out = out.at[k * Hp:k * Hp + H].set(b[k * H:(k + 1) * H])
        return out

    wx = jnp.stack([pack_gate_cols(params["wih_f"]),
                    pack_gate_cols(params["wih_b"])]).astype(jnp.bfloat16)   # [2,D,4Hp]
    bg = jnp.stack([pack_bias(params["bih_f"], params["bhh_f"])[None, :],
                    pack_bias(params["bih_b"], params["bhh_b"])[None, :]])   # [2,1,4Hp]

    whh_f_cols = pack_gate_cols(params["whh_f"])    # [H, 4Hp]
    whh_b_cols = pack_gate_cols(params["whh_b"])
    if fuse:
        whh = jnp.zeros((2 * Hp, 8 * Hp), jnp.float32)
        whh = whh.at[:H, :4 * Hp].set(whh_f_cols)
        whh = whh.at[Hp:Hp + H, 4 * Hp:].set(whh_b_cols)
    else:
        whh = jnp.zeros((2, Hp, 4 * Hp), jnp.float32)
        whh = whh.at[0, :H, :].set(whh_f_cols)
        whh = whh.at[1, :H, :].set(whh_b_cols)
    whh = whh.astype(jnp.bfloat16)

    wl = params["wl"]                                # [O, 2H]
    wlf = jnp.zeros((Hp, Op), jnp.float32).at[:H, :O].set(wl[:, :H].T)
    wlb = jnp.zeros((Hp, Op), jnp.float32).at[:H, :O].set(wl[:, H:].T)
    bl = jnp.zeros((1, Op), jnp.float32).at[0, :O].set(params["bl"])
    return wx, bg, whh, wlf.astype(jnp.bfloat16), wlb.astype(jnp.bfloat16), bl


def _vmem_limit_bytes(Tc, Bb, D, Hp, Op):
    """Approximate VMEM footprint (double-buffered I/O blocks + weights + scratch)."""
    f32, bf16 = 4, 2
    G = 4 * Hp
    need = 0
    need += 2 * (Tc * Bb * D * f32) * 2          # two x chunk inputs, double-buffered
    need += (2 * D * G * bf16) * 2               # wx
    need += (2 * 8 * G * f32) * 2                # bg (sublane-padded)
    need += (2 * Hp * G * bf16) * 2              # whh (same bytes fused or split)
    need += 2 * (Hp * Op * bf16) * 2             # wlf, wlb
    need += (8 * Op * f32) * 2                   # bl (sublane-padded)
    need += 2 * (Tc * Bb * Op * f32) * 2         # two output chunks, double-buffered
    need += 2 * (Tc * Bb * G * bf16)             # gx scratches
    need += 2 * (Tc * Bb * Hp * bf16)            # h scratches
    need += 4 * Bb * Hp * f32                    # carried state
    return min(64 << 20, max(32 << 20, int(need * 1.5) + (8 << 20)))


def bidirectional_lstm(x, params, *, t_chunk=128):
    """x: [B, T, D] float32  ->  [B, T, O] float32 (matches the PyTorch module)."""
    B, T, D = x.shape
    H = params["whh_f"].shape[1]                 # weight_hh is [4H, H]
    O = params["wl"].shape[0]

    Hp = _round_up(H, 128)                       # lane-align hidden size
    Op = _round_up(O, 128)                       # lane-dense output stores
    B_BLK = 8                                    # sublane-align batch block
    Bp = _round_up(max(B, B_BLK), B_BLK)

    Tc = min(T, t_chunk)                         # VMEM / DMA bounded by Tc, not T
    Tp = _round_up(T, Tc)
    Nc = Tp // Tc

    fuse = _should_fuse_recurrent()
    wx, bg, whh, wlf, wlb, bl = _pack_params(params, Hp, Op, fuse)

    # Time-major + pad T to a chunk multiple and B to a sublane multiple (XLA glue).
    x_tm = jnp.transpose(x.astype(jnp.float32), (1, 0, 2))               # [T, B, D]
    x_tm = jnp.pad(x_tm, ((0, Tp - T), (0, Bp - B), (0, 0)))             # [Tp, Bp, D]

    def full_spec(shape):
        nd = len(shape)
        return pl.BlockSpec(shape, lambda b, c, _nd=nd: (0,) * _nd)

    kernel = functools.partial(_bilstm_kernel, fuse, T, Tp)

    out_f, out_b = pl.pallas_call(
        kernel,
        out_shape=(jax.ShapeDtypeStruct((Tp, Bp, Op), jnp.float32),
                   jax.ShapeDtypeStruct((Tp, Bp, Op), jnp.float32)),
        grid_spec=pltpu.PrefetchScalarGridSpec(
            num_scalar_prefetch=0,
            grid=(Bp // B_BLK, Nc),              # (batch blocks, time chunks)
            in_specs=[
                pl.BlockSpec((Tc, B_BLK, D), lambda b, c: (c, b, 0)),            # x fwd
                pl.BlockSpec((Tc, B_BLK, D), lambda b, c: (Nc - 1 - c, b, 0)),   # x bwd
                full_spec(wx.shape), full_spec(bg.shape), full_spec(whh.shape),
                full_spec(wlf.shape), full_spec(wlb.shape), full_spec(bl.shape),
            ],
            out_specs=[
                pl.BlockSpec((Tc, B_BLK, Op), lambda b, c: (c, b, 0)),           # fwd part
                pl.BlockSpec((Tc, B_BLK, Op), lambda b, c: (Nc - 1 - c, b, 0)),  # bwd part
            ],
            scratch_shapes=[
                pltpu.VMEM((Tc, B_BLK, 4 * Hp), jnp.bfloat16),   # gxf
                pltpu.VMEM((Tc, B_BLK, 4 * Hp), jnp.bfloat16),   # gxb
                pltpu.VMEM((Tc, B_BLK, Hp), jnp.bfloat16),       # hf
                pltpu.VMEM((Tc, B_BLK, Hp), jnp.bfloat16),       # hb
                pltpu.VMEM((4, B_BLK, Hp), jnp.float32),         # carried (h,c) x 2 dirs
            ]),
        compiler_params=pltpu.CompilerParams(
            dimension_semantics=("parallel", "arbitrary"),
            vmem_limit_bytes=_vmem_limit_bytes(Tc, B_BLK, D, Hp, Op)),
    )(x_tm, x_tm, wx, bg, whh, wlf, wlb, bl)

    # Sum the per-direction partials, un-pad, back to batch-major [B, T, O].
    out_tm = out_f[:T, :B, :O] + out_b[:T, :B, :O]
    return jnp.transpose(out_tm, (1, 0, 2))


def _reference(x, params):
    """Pure-JAX f32 reference of nn.LSTM(bidirectional, batch_first) + Linear."""
    B, T, D = x.shape
    H = params["whh_f"].shape[1]

    def run_dir(xs, wih, whh, bih, bhh):
        h = jnp.zeros((B, H), jnp.float32)
        c = jnp.zeros((B, H), jnp.float32)
        outs = []
        for t in range(T):
            gates = xs[:, t] @ wih.T + bih + h @ whh.T + bhh
            i = jax.nn.sigmoid(gates[:, :H])
            f = jax.nn.sigmoid(gates[:, H:2 * H])
            g = jnp.tanh(gates[:, 2 * H:3 * H])
            o = jax.nn.sigmoid(gates[:, 3 * H:])
            c = f * c + i * g
            h = o * jnp.tanh(c)
            outs.append(h)
        return jnp.stack(outs, axis=1)

    hf = run_dir(x, params["wih_f"], params["whh_f"],
                 params["bih_f"], params["bhh_f"])
    hb = run_dir(x[:, ::-1], params["wih_b"], params["whh_b"],
                 params["bih_b"], params["bhh_b"])[:, ::-1]
    rec = jnp.concatenate([hf, hb], axis=-1)
    return rec @ params["wl"].T + params["bl"]


def _init_params(key, input_size, hidden_size, output_size):
    H, D, O = hidden_size, input_size, output_size
    k = 1.0 / jnp.sqrt(H)
    kl = 1.0 / jnp.sqrt(2 * H)
    keys = jax.random.split(key, 10)
    u = lambda kk, shape, s: jax.random.uniform(kk, shape, jnp.float32, -s, s)
    return {
        "wih_f": u(keys[0], (4 * H, D), k),
        "whh_f": u(keys[1], (4 * H, H), k),
        "bih_f": u(keys[2], (4 * H,), k),
        "bhh_f": u(keys[3], (4 * H,), k),
        "wih_b": u(keys[4], (4 * H, D), k),
        "whh_b": u(keys[5], (4 * H, H), k),
        "bih_b": u(keys[6], (4 * H,), k),
        "bhh_b": u(keys[7], (4 * H,), k),
        "wl":    u(keys[8], (O, 2 * H), kl),
        "bl":    u(keys[9], (O,), kl),
    }


if __name__ == "__main__":
    D, H, O = 16, 32, 16
    key = jax.random.PRNGKey(0)
    kx1, kx2, kp = jax.random.split(key, 3)
    params = _init_params(kp, D, H, O)

    # Case 1: small shapes implied by the module (B=2, T=8) -> single time chunk.
    x1 = jax.random.normal(kx1, (2, 8, D), jnp.float32)
    out1 = jax.block_until_ready(jax.jit(bidirectional_lstm)(x1, params))
    ref1 = _reference(x1, params)
    assert out1.shape == (2, 8, O), out1.shape
    # bf16 MXU operands (x-projection, recurrent matmul, Linear) vs pure-f32 reference.
    err1 = float(jnp.max(jnp.abs(out1 - ref1)))
    assert err1 < 2e-2, err1

    # Case 2: exercises the T-chunked grid (carried state across chunks, time padding
    # with backward-state reset) and multiple batch blocks.
    x2 = jax.random.normal(kx2, (10, 20, D), jnp.float32)
    run2 = jax.jit(functools.partial(bidirectional_lstm, t_chunk=8))
    out2 = jax.block_until_ready(run2(x2, params))
    ref2 = _reference(x2, params)
    assert out2.shape == (10, 20, O), out2.shape
    err2 = float(jnp.max(jnp.abs(out2 - ref2)))   # bf16 error compounds mildly with T
    assert err2 < 3e-2, err2

    print("KERNEL_OK")
</pallas_src>

<mosaic_0001>
module attributes {stable_mosaic.version = 11 : i64} {
  func.func @_bilstm_kernel(%arg0: i32, %arg1: i32, %arg2: memref<8x8x16xf32, #tpu.memory_space<vmem>>, %arg3: memref<8x8x16xf32, #tpu.memory_space<vmem>>, %arg4: memref<2x16x512xbf16, #tpu.memory_space<vmem>>, %arg5: memref<2x1x512xf32, #tpu.memory_space<vmem>>, %arg6: memref<256x1024xbf16, #tpu.memory_space<vmem>>, %arg7: memref<128x128xbf16, #tpu.memory_space<vmem>>, %arg8: memref<128x128xbf16, #tpu.memory_space<vmem>>, %arg9: memref<1x128xf32, #tpu.memory_space<vmem>>, %arg10: memref<8x8x128xf32, #tpu.memory_space<vmem>>, %arg11: memref<8x8x128xf32, #tpu.memory_space<vmem>>, %arg12: memref<8x8x512xbf16, #tpu.memory_space<vmem>>, %arg13: memref<8x8x512xbf16, #tpu.memory_space<vmem>>, %arg14: memref<8x8x128xbf16, #tpu.memory_space<vmem>>, %arg15: memref<8x8x128xbf16, #tpu.memory_space<vmem>>, %arg16: memref<4x8x128xf32, #tpu.memory_space<vmem>>) attributes {dimension_semantics = [#tpu.dimension_semantics<parallel>, #tpu.dimension_semantics<arbitrary>], iteration_bounds = array<i64: 1, 1>, scalar_prefetch = 0 : i64, scratch_operands = 5 : i64, tpu.core_type = #tpu.core_type<tc>, window_params = [{transform_indices = @transform_0, window_bounds = array<i64: 8, 8, 16>}, {transform_indices = @transform_1, window_bounds = array<i64: 8, 8, 16>}, {pipeline_mode = #tpu.pipeline_mode<synchronous>, transform_indices = @transform_2, window_bounds = array<i64: 2, 16, 512>}, {pipeline_mode = #tpu.pipeline_mode<synchronous>, transform_indices = @transform_3, window_bounds = array<i64: 2, 1, 512>}, {pipeline_mode = #tpu.pipeline_mode<synchronous>, transform_indices = @transform_4, window_bounds = array<i64: 256, 1024>}, {pipeline_mode = #tpu.pipeline_mode<synchronous>, transform_indices = @transform_5, window_bounds = array<i64: 128, 128>}, {pipeline_mode = #tpu.pipeline_mode<synchronous>, transform_indices = @transform_6, window_bounds = array<i64: 128, 128>}, {pipeline_mode = #tpu.pipeline_mode<synchronous>, transform_indices = @transform_7, window_bounds = array<i64: 1, 128>}, {transform_indices = @transform_8, window_bounds = array<i64: 8, 8, 128>}, {transform_indices = @transform_9, window_bounds = array<i64: 8, 8, 128>}]} {
    %c0_i32 = arith.constant 0 : i32
    %0 = arith.cmpi eq, %arg1, %c0_i32 : i32
    %1 = arith.extui %0 : i1 to i32
    %c0_i32_0 = arith.constant 0 : i32
    %2 = arith.cmpi ne, %1, %c0_i32_0 : i32
    scf.if %2 {
      %cst_293 = arith.constant 0.000000e+00 : f32
      %769 = vector.broadcast %cst_293 : f32 to vector<4x8x128xf32>
      %c0_294 = arith.constant 0 : index
      %c0_295 = arith.constant 0 : index
      %c0_296 = arith.constant 0 : index
      %770 = vector.load %arg16[%c0_294, %c0_295, %c0_296] : memref<4x8x128xf32, #tpu.memory_space<vmem>>, vector<4x8x128xf32>
      tpu.vector_store %arg16[%c0_294, %c0_295, %c0_296], %769 {strides = array<i32>} : memref<4x8x128xf32, #tpu.memory_space<vmem>>, vector<4x8x128xf32>,
    } else {
    }
    %c0 = arith.constant 0 : index
    %c0_1 = arith.constant 0 : index
    %c0_2 = arith.constant 0 : index
    %3 = vector.load %arg2[%c0, %c0_1, %c0_2] : memref<8x8x16xf32, #tpu.memory_space<vmem>>, vector<8x8x16xf32>
    %4 = vector.shape_cast %3 : vector<8x8x16xf32> to vector<64x16xf32>
    %5 = arith.truncf %4 : vector<64x16xf32> to vector<64x16xbf16>
    %c0_3 = arith.constant 0 : index
    %c0_4 = arith.constant 0 : index
    %c0_5 = arith.constant 0 : index
    %6 = vector.load %arg3[%c0_3, %c0_4, %c0_5] : memref<8x8x16xf32, #tpu.memory_space<vmem>>, vector<8x8x16xf32>
    %7 = vector.shape_cast %6 : vector<8x8x16xf32> to vector<64x16xf32>
    %8 = arith.truncf %7 : vector<64x16xf32> to vector<64x16xbf16>
    %c0_6 = arith.constant 0 : index
    %c0_7 = arith.constant 0 : index
    %c0_8 = arith.constant 0 : index
    %9 = vector.load %arg4[%c0_6, %c0_7, %c0_8] : memref<2x16x512xbf16, #tpu.memory_space<vmem>>, vector<1x16x512xbf16>
    %10 = vector.shape_cast %9 : vector<1x16x512xbf16> to vector<16x512xbf16>
    %cst = arith.constant dense<0.000000e+00> : vector<64x512xf32>
    %11 = tpu.matmul %5, %10, %cst {dimension_numbers = #tpu.dot_dimension_numbers<[1], [0], [0], [1], [0, 0, 1, 1], [], []>} : vector<64x16xbf16>, vector<16x512xbf16>, vector<64x512xf32> -> vector<64x512xf32>
    %c0_9 = arith.constant 0 : index
    %c0_10 = arith.constant 0 : index
    %c0_11 = arith.constant 0 : index
    %12 = vector.load %arg5[%c0_9, %c0_10, %c0_11] : memref<2x1x512xf32, #tpu.memory_space<vmem>>, vector<1x1x512xf32>
    %13 = vector.shape_cast %12 : vector<1x1x512xf32> to vector<1x512xf32>
    %14 = vector.broadcast %13 : vector<1x512xf32> to vector<64x512xf32>
    %15 = arith.addf %11, %14 : vector<64x512xf32>
    %c1 = arith.constant 1 : index
    %c0_12 = arith.constant 0 : index
    %c0_13 = arith.constant 0 : index
    %16 = vector.load %arg4[%c1, %c0_12, %c0_13] : memref<2x16x512xbf16, #tpu.memory_space<vmem>>, vector<1x16x512xbf16>
    %17 = vector.shape_cast %16 : vector<1x16x512xbf16> to vector<16x512xbf16>
    %cst_14 = arith.constant dense<0.000000e+00> : vector<64x512xf32>
    %18 = tpu.matmul %8, %17, %cst_14 {dimension_numbers = #tpu.dot_dimension_numbers<[1], [0], [0], [1], [0, 0, 1, 1], [], []>} : vector<64x16xbf16>, vector<16x512xbf16>, vector<64x512xf32> -> vector<64x512xf32>
    %c1_15 = arith.constant 1 : index
    %c0_16 = arith.constant 0 : index
    %c0_17 = arith.constant 0 : index
    %19 = vector.load %arg5[%c1_15, %c0_16, %c0_17] : memref<2x1x512xf32, #tpu.memory_space<vmem>>, vector<1x1x512xf32>
    %20 = vector.shape_cast %19 : vector<1x1x512xf32> to vector<1x512xf32>
    %21 = vector.broadcast %20 : vector<1x512xf32> to vector<64x512xf32>
    %22 = arith.addf %18, %21 : vector<64x512xf32>
    %23 = vector.shape_cast %15 : vector<64x512xf32> to vector<8x8x512xf32>
    %24 = arith.truncf %23 : vector<8x8x512xf32> to vector<8x8x512xbf16>
    %c0_18 = arith.constant 0 : index
    %c0_19 = arith.constant 0 : index
    %c0_20 = arith.constant 0 : index
    %25 = vector.load %arg12[%c0_18, %c0_19, %c0_20] : memref<8x8x512xbf16, #tpu.memory_space<vmem>>, vector<8x8x512xbf16>
    tpu.vector_store %arg12[%c0_18, %c0_19, %c0_20], %24 {strides = array<i32>} : memref<8x8x512xbf16, #tpu.memory_space<vmem>>, vector<8x8x512xbf16>,
    %26 = vector.shape_cast %22 : vector<64x512xf32> to vector<8x8x512xf32>
    %27 = arith.truncf %26 : vector<8x8x512xf32> to vector<8x8x512xbf16>
    %c0_21 = arith.constant 0 : index
    %c0_22 = arith.constant 0 : index
    %c0_23 = arith.constant 0 : index
    %28 = vector.load %arg13[%c0_21, %c0_22, %c0_23] : memref<8x8x512xbf16, #tpu.memory_space<vmem>>, vector<8x8x512xbf16>
    tpu.vector_store %arg13[%c0_21, %c0_22, %c0_23], %27 {strides = array<i32>} : memref<8x8x512xbf16, #tpu.memory_space<vmem>>, vector<8x8x512xbf16>,
    %c0_24 = arith.constant 0 : index
    %c0_25 = arith.constant 0 : index
    %29 = vector.load %arg6[%c0_24, %c0_25] : memref<256x1024xbf16, #tpu.memory_space<vmem>>, vector<256x1024xbf16>
    %c0_26 = arith.constant 0 : index
    %c0_27 = arith.constant 0 : index
    %c0_28 = arith.constant 0 : index
    %30 = vector.load %arg16[%c0_26, %c0_27, %c0_28] : memref<4x8x128xf32, #tpu.memory_space<vmem>>, vector<1x8x128xf32>
    %31 = vector.shape_cast %30 : vector<1x8x128xf32> to vector<8x128xf32>
    %c1_29 = arith.constant 1 : index
    %c0_30 = arith.constant 0 : index
    %c0_31 = arith.constant 0 : index
    %32 = vector.load %arg16[%c1_29, %c0_30, %c0_31] : memref<4x8x128xf32, #tpu.memory_space<vmem>>, vector<1x8x128xf32>
    %33 = vector.shape_cast %32 : vector<1x8x128xf32> to vector<8x128xf32>
    %c2 = arith.constant 2 : index
    %c0_32 = arith.constant 0 : index
    %c0_33 = arith.constant 0 : index
    %34 = vector.load %arg16[%c2, %c0_32, %c0_33] : memref<4x8x128xf32, #tpu.memory_space<vmem>>, vector<1x8x128xf32>
    %35 = vector.shape_cast %34 : vector<1x8x128xf32> to vector<8x128xf32>
    %c3 = arith.constant 3 : index
    %c0_34 = arith.constant 0 : index
    %c0_35 = arith.constant 0 : index
    %36 = vector.load %arg16[%c3, %c0_34, %c0_35] : memref<4x8x128xf32, #tpu.memory_space<vmem>>, vector<1x8x128xf32>
    %37 = vector.shape_cast %36 : vector<1x8x128xf32> to vector<8x128xf32>
    %c0_i32_36 = arith.constant 0 : i32
    %c7_i32 = arith.constant 7 : i32
    %38 = arith.subi %c7_i32, %c0_i32_36 : i32
    %39 = tpu.concatenate %31, %35 in 1 : vector<8x128xf32>, vector<8x128xf32> -> vector<8x256xf32>
    %40 = arith.truncf %39 : vector<8x256xf32> to vector<8x256xbf16>
    %cst_37 = arith.constant dense<0.000000e+00> : vector<8x1024xf32>
    %41 = tpu.matmul %40, %29, %cst_37 {dimension_numbers = #tpu.dot_dimension_numbers<[1], [0], [0], [1], [0, 0, 1, 1], [], []>} : vector<8x256xbf16>, vector<256x1024xbf16>, vector<8x1024xf32> -> vector<8x1024xf32>
    %42 = arith.index_cast %c0_i32_36 : i32 to index
    %c0_38 = arith.constant 0 : index
    %c0_39 = arith.constant 0 : index
    %43 = vector.load %arg12[%42, %c0_38, %c0_39] : memref<8x8x512xbf16, #tpu.memory_space<vmem>>, vector<1x8x512xbf16>
    %44 = vector.shape_cast %43 : vector<1x8x512xbf16> to vector<8x512xbf16>
    %45 = vector.extract_strided_slice %41 {offsets = [0, 0], sizes = [8, 512], strides = [1, 1]} : vector<8x1024xf32> to vector<8x512xf32>
    %46 = arith.extf %44 : vector<8x512xbf16> to vector<8x512xf32>
    %47 = arith.addf %46, %45 : vector<8x512xf32>
    %48 = arith.index_cast %38 : i32 to index
    %c0_40 = arith.constant 0 : index
    %c0_41 = arith.constant 0 : index
    %49 = vector.load %arg13[%48, %c0_40, %c0_41] : memref<8x8x512xbf16, #tpu.memory_space<vmem>>, vector<1x8x512xbf16>
    %50 = vector.shape_cast %49 : vector<1x8x512xbf16> to vector<8x512xbf16>
    %51 = vector.extract_strided_slice %41 {offsets = [0, 512], sizes = [8, 512], strides = [1, 1]} : vector<8x1024xf32> to vector<8x512xf32>
    %52 = arith.extf %50 : vector<8x512xbf16> to vector<8x512xf32>
    %53 = arith.addf %52, %51 : vector<8x512xf32>
    %54 = vector.extract_strided_slice %47 {offsets = [0, 0], sizes = [8, 128], strides = [1, 1]} : vector<8x512xf32> to vector<8x128xf32>
    %cst_42 = arith.constant 5.000000e-01 : f32
    %55 = vector.broadcast %cst_42 : f32 to vector<8x128xf32>
    %56 = arith.mulf %55, %54 : vector<8x128xf32>
    %57 = math.tanh %56 : vector<8x128xf32>
    %cst_43 = arith.constant 5.000000e-01 : f32
    %58 = vector.broadcast %cst_43 : f32 to vector<8x128xf32>
    %59 = arith.mulf %58, %57 : vector<8x128xf32>
    %cst_44 = arith.constant 5.000000e-01 : f32
    %60 = vector.broadcast %cst_44 : f32 to vector<8x128xf32>
    %61 = arith.addf %59, %60 : vector<8x128xf32>
    %62 = vector.extract_strided_slice %47 {offsets = [0, 128], sizes = [8, 128], strides = [1, 1]} : vector<8x512xf32> to vector<8x128xf32>
    %cst_45 = arith.constant 5.000000e-01 : f32
    %63 = vector.broadcast %cst_45 : f32 to vector<8x128xf32>
    %64 = arith.mulf %63, %62 : vector<8x128xf32>
    %65 = math.tanh %64 : vector<8x128xf32>
    %cst_46 = arith.constant 5.000000e-01 : f32
    %66 = vector.broadcast %cst_46 : f32 to vector<8x128xf32>
    %67 = arith.mulf %66, %65 : vector<8x128xf32>
    %cst_47 = arith.constant 5.000000e-01 : f32
    %68 = vector.broadcast %cst_47 : f32 to vector<8x128xf32>
    %69 = arith.addf %67, %68 : vector<8x128xf32>
    %70 = vector.extract_strided_slice %47 {offsets = [0, 256], sizes = [8, 128], strides = [1, 1]} : vector<8x512xf32> to vector<8x128xf32>
    %71 = math.tanh %70 : vector<8x128xf32>
    %72 = vector.extract_strided_slice %47 {offsets = [0, 384], sizes = [8, 128], strides = [1, 1]} : vector<8x512xf32> to vector<8x128xf32>
    %cst_48 = arith.constant 5.000000e-01 : f32
    %73 = vector.broadcast %cst_48 : f32 to vector<8x128xf32>
    %74 = arith.mulf %73, %72 : vector<8x128xf32>
    %75 = math.tanh %74 : vector<8x128xf32>
    %cst_49 = arith.constant 5.000000e-01 : f32
    %76 = vector.broadcast %cst_49 : f32 to vector<8x128xf32>
    %77 = arith.mulf %76, %75 : vector<8x128xf32>
    %cst_50 = arith.constant 5.000000e-01 : f32
    %78 = vector.broadcast %cst_50 : f32 to vector<8x128xf32>
    %79 = arith.addf %77, %78 : vector<8x128xf32>
    %80 = arith.mulf %69, %33 : vector<8x128xf32>
    %81 = arith.mulf %61, %71 : vector<8x128xf32>
    %82 = arith.addf %80, %81 : vector<8x128xf32>
    %83 = math.tanh %82 : vector<8x128xf32>
    %84 = arith.mulf %79, %83 : vector<8x128xf32>
    %85 = vector.extract_strided_slice %53 {offsets = [0, 0], sizes = [8, 128], strides = [1, 1]} : vector<8x512xf32> to vector<8x128xf32>
    %cst_51 = arith.constant 5.000000e-01 : f32
    %86 = vector.broadcast %cst_51 : f32 to vector<8x128xf32>
    %87 = arith.mulf %86, %85 : vector<8x128xf32>
    %88 = math.tanh %87 : vector<8x128xf32>
    %cst_52 = arith.constant 5.000000e-01 : f32
    %89 = vector.broadcast %cst_52 : f32 to vector<8x128xf32>
    %90 = arith.mulf %89, %88 : vector<8x128xf32>
    %cst_53 = arith.constant 5.000000e-01 : f32
    %91 = vector.broadcast %cst_53 : f32 to vector<8x128xf32>
    %92 = arith.addf %90, %91 : vector<8x128xf32>
    %93 = vector.extract_strided_slice %53 {offsets = [0, 128], sizes = [8, 128], strides = [1, 1]} : vector<8x512xf32> to vector<8x128xf32>
    %cst_54 = arith.constant 5.000000e-01 : f32
    %94 = vector.broadcast %cst_54 : f32 to vector<8x128xf32>
    %95 = arith.mulf %94, %93 : vector<8x128xf32>
    %96 = math.tanh %95 : vector<8x128xf32>
    %cst_55 = arith.constant 5.000000e-01 : f32
    %97 = vector.broadcast %cst_55 : f32 to vector<8x128xf32>
    %98 = arith.mulf %97, %96 : vector<8x128xf32>
    %cst_56 = arith.constant 5.000000e-01 : f32
    %99 = vector.broadcast %cst_56 : f32 to vector<8x128xf32>
    %100 = arith.addf %98, %99 : vector<8x128xf32>
    %101 = vector.extract_strided_slice %53 {offsets = [0, 256], sizes = [8, 128], strides = [1, 1]} : vector<8x512xf32> to vector<8x128xf32>
    %102 = math.tanh %101 : vector<8x128xf32>
    %103 = vector.extract_strided_slice %53 {offsets = [0, 384], sizes = [8, 128], strides = [1, 1]} : vector<8x512xf32> to vector<8x128xf32>
    %cst_57 = arith.constant 5.000000e-01 : f32
    %104 = vector.broadcast %cst_57 : f32 to vector<8x128xf32>
    %105 = arith.mulf %104, %103 : vector<8x128xf32>
    %106 = math.tanh %105 : vector<8x128xf32>
    %cst_58 = arith.constant 5.000000e-01 : f32
    %107 = vector.broadcast %cst_58 : f32 to vector<8x128xf32>
    %108 = arith.mulf %107, %106 : vector<8x128xf32>
    %cst_59 = arith.constant 5.000000e-01 : f32
    %109 = vector.broadcast %cst_59 : f32 to vector<8x128xf32>
    %110 = arith.addf %108, %109 : vector<8x128xf32>
    %111 = arith.mulf %100, %37 : vector<8x128xf32>
    %112 = arith.mulf %92, %102 : vector<8x128xf32>
    %113 = arith.addf %111, %112 : vector<8x128xf32>
    %114 = math.tanh %113 : vector<8x128xf32>
    %115 = arith.mulf %110, %114 : vector<8x128xf32>
    %116 = arith.truncf %84 : vector<8x128xf32> to vector<8x128xbf16>
    %117 = arith.index_cast %c0_i32_36 : i32 to index
    %c0_60 = arith.constant 0 : index
    %c0_61 = arith.constant 0 : index
    %118 = vector.load %arg14[%117, %c0_60, %c0_61] : memref<8x8x128xbf16, #tpu.memory_space<vmem>>, vector<1x8x128xbf16>
    %119 = vector.shape_cast %118 : vector<1x8x128xbf16> to vector<8x128xbf16>
    %120 = vector.shape_cast %116 : vector<8x128xbf16> to vector<1x8x128xbf16>
    tpu.vector_store %arg14[%117, %c0_60, %c0_61], %120 {strides = array<i32>} : memref<8x8x128xbf16, #tpu.memory_space<vmem>>, vector<1x8x128xbf16>,
    %121 = arith.truncf %115 : vector<8x128xf32> to vector<8x128xbf16>
    %122 = arith.index_cast %38 : i32 to index
    %c0_62 = arith.constant 0 : index
    %c0_63 = arith.constant 0 : index
    %123 = vector.load %arg15[%122, %c0_62, %c0_63] : memref<8x8x128xbf16, #tpu.memory_space<vmem>>, vector<1x8x128xbf16>
    %124 = vector.shape_cast %123 : vector<1x8x128xbf16> to vector<8x128xbf16>
    %125 = vector.shape_cast %121 : vector<8x128xbf16> to vector<1x8x128xbf16>
    tpu.vector_store %arg15[%122, %c0_62, %c0_63], %125 {strides = array<i32>} : memref<8x8x128xbf16, #tpu.memory_space<vmem>>, vector<1x8x128xbf16>,
    %c1_i32 = arith.constant 1 : i32
    %c7_i32_64 = arith.constant 7 : i32
    %126 = arith.subi %c7_i32_64, %c1_i32 : i32
    %127 = tpu.concatenate %84, %115 in 1 : vector<8x128xf32>, vector<8x128xf32> -> vector<8x256xf32>
    %128 = arith.truncf %127 : vector<8x256xf32> to vector<8x256xbf16>
    %cst_65 = arith.constant dense<0.000000e+00> : vector<8x1024xf32>
    %129 = tpu.matmul %128, %29, %cst_65 {dimension_numbers = #tpu.dot_dimension_numbers<[1], [0], [0], [1], [0, 0, 1, 1], [], []>} : vector<8x256xbf16>, vector<256x1024xbf16>, vector<8x1024xf32> -> vector<8x1024xf32>
    %130 = arith.index_cast %c1_i32 : i32 to index
    %c0_66 = arith.constant 0 : index
    %c0_67 = arith.constant 0 : index
    %131 = vector.load %arg12[%130, %c0_66, %c0_67] : memref<8x8x512xbf16, #tpu.memory_space<vmem>>, vector<1x8x512xbf16>
    %132 = vector.shape_cast %131 : vector<1x8x512xbf16> to vector<8x512xbf16>
    %133 = vector.extract_strided_slice %129 {offsets = [0, 0], sizes = [8, 512], strides = [1, 1]} : vector<8x1024xf32> to vector<8x512xf32>
    %134 = arith.extf %132 : vector<8x512xbf16> to vector<8x512xf32>
    %135 = arith.addf %134, %133 : vector<8x512xf32>
    %136 = arith.index_cast %126 : i32 to index
    %c0_68 = arith.constant 0 : index
    %c0_69 = arith.constant 0 : index
    %137 = vector.load %arg13[%136, %c0_68, %c0_69] : memref<8x8x512xbf16, #tpu.memory_space<vmem>>, vector<1x8x512xbf16>
    %138 = vector.shape_cast %137 : vector<1x8x512xbf16> to vector<8x512xbf16>
    %139 = vector.extract_strided_slice %129 {offsets = [0, 512], sizes = [8, 512], strides = [1, 1]} : vector<8x1024xf32> to vector<8x512xf32>
    %140 = arith.extf %138 : vector<8x512xbf16> to vector<8x512xf32>
    %141 = arith.addf %140, %139 : vector<8x512xf32>
    %142 = vector.extract_strided_slice %135 {offsets = [0, 0], sizes = [8, 128], strides = [1, 1]} : vector<8x512xf32> to vector<8x128xf32>
    %cst_70 = arith.constant 5.000000e-01 : f32
    %143 = vector.broadcast %cst_70 : f32 to vector<8x128xf32>
    %144 = arith.mulf %143, %142 : vector<8x128xf32>
    %145 = math.tanh %144 : vector<8x128xf32>
    %cst_71 = arith.constant 5.000000e-01 : f32
    %146 = vector.broadcast %cst_71 : f32 to vector<8x128xf32>
    %147 = arith.mulf %146, %145 : vector<8x128xf32>
    %cst_72 = arith.constant 5.000000e-01 : f32
    %148 = vector.broadcast %cst_72 : f32 to vector<8x128xf32>
    %149 = arith.addf %147, %148 : vector<8x128xf32>
    %150 = vector.extract_strided_slice %135 {offsets = [0, 128], sizes = [8, 128], strides = [1, 1]} : vector<8x512xf32> to vector<8x128xf32>
    %cst_73 = arith.constant 5.000000e-01 : f32
    %151 = vector.broadcast %cst_73 : f32 to vector<8x128xf32>
    %152 = arith.mulf %151, %150 : vector<8x128xf32>
    %153 = math.tanh %152 : vector<8x128xf32>
    %cst_74 = arith.constant 5.000000e-01 : f32
    %154 = vector.broadcast %cst_74 : f32 to vector<8x128xf32>
    %155 = arith.mulf %154, %153 : vector<8x128xf32>
    %cst_75 = arith.constant 5.000000e-01 : f32
    %156 = vector.broadcast %cst_75 : f32 to vector<8x128xf32>
    %157 = arith.addf %155, %156 : vector<8x128xf32>
    %158 = vector.extract_strided_slice %135 {offsets = [0, 256], sizes = [8, 128], strides = [1, 1]} : vector<8x512xf32> to vector<8x128xf32>
    %159 = math.tanh %158 : vector<8x128xf32>
    %160 = vector.extract_strided_slice %135 {offsets = [0, 384], sizes = [8, 128], strides = [1, 1]} : vector<8x512xf32> to vector<8x128xf32>
    %cst_76 = arith.constant 5.000000e-01 : f32
    %161 = vector.broadcast %cst_76 : f32 to vector<8x128xf32>
    %162 = arith.mulf %161, %160 : vector<8x128xf32>
    %163 = math.tanh %162 : vector<8x128xf32>
    %cst_77 = arith.constant 5.000000e-01 : f32
    %164 = vector.broadcast %cst_77 : f32 to vector<8x128xf32>
    %165 = arith.mulf %164, %163 : vector<8x128xf32>
    %cst_78 = arith.constant 5.000000e-01 : f32
    %166 = vector.broadcast %cst_78 : f32 to vector<8x128xf32>
    %167 = arith.addf %165, %166 : vector<8x128xf32>
    %168 = arith.mulf %157, %82 : vector<8x128xf32>
    %169 = arith.mulf %149, %159 : vector<8x128xf32>
    %170 = arith.addf %168, %169 : vector<8x128xf32>
    %171 = math.tanh %170 : vector<8x128xf32>
    %172 = arith.mulf %167, %171 : vector<8x128xf32>
    %173 = vector.extract_strided_slice %141 {offsets = [0, 0], sizes = [8, 128], strides = [1, 1]} : vector<8x512xf32> to vector<8x128xf32>
    %cst_79 = arith.constant 5.000000e-01 : f32
    %174 = vector.broadcast %cst_79 : f32 to vector<8x128xf32>
    %175 = arith.mulf %174, %173 : vector<8x128xf32>
    %176 = math.tanh %175 : vector<8x128xf32>
    %cst_80 = arith.constant 5.000000e-01 : f32
    %177 = vector.broadcast %cst_80 : f32 to vector<8x128xf32>
    %178 = arith.mulf %177, %176 : vector<8x128xf32>
    %cst_81 = arith.constant 5.000000e-01 : f32
    %179 = vector.broadcast %cst_81 : f32 to vector<8x128xf32>
    %180 = arith.addf %178, %179 : vector<8x128xf32>
    %181 = vector.extract_strided_slice %141 {offsets = [0, 128], sizes = [8, 128], strides = [1, 1]} : vector<8x512xf32> to vector<8x128xf32>
    %cst_82 = arith.constant 5.000000e-01 : f32
    %182 = vector.broadcast %cst_82 : f32 to vector<8x128xf32>
    %183 = arith.mulf %182, %181 : vector<8x128xf32>
    %184 = math.tanh %183 : vector<8x128xf32>
    %cst_83 = arith.constant 5.000000e-01 : f32
    %185 = vector.broadcast %cst_83 : f32 to vector<8x128xf32>
    %186 = arith.mulf %185, %184 : vector<8x128xf32>
    %cst_84 = arith.constant 5.000000e-01 : f32
    %187 = vector.broadcast %cst_84 : f32 to vector<8x128xf32>
    %188 = arith.addf %186, %187 : vector<8x128xf32>
    %189 = vector.extract_strided_slice %141 {offsets = [0, 256], sizes = [8, 128], strides = [1, 1]} : vector<8x512xf32> to vector<8x128xf32>
    %190 = math.tanh %189 : vector<8x128xf32>
    %191 = vector.extract_strided_slice %141 {offsets = [0, 384], sizes = [8, 128], strides = [1, 1]} : vector<8x512xf32> to vector<8x128xf32>
    %cst_85 = arith.constant 5.000000e-01 : f32
    %192 = vector.broadcast %cst_85 : f32 to vector<8x128xf32>
    %193 = arith.mulf %192, %191 : vector<8x128xf32>
    %194 = math.tanh %193 : vector<8x128xf32>
    %cst_86 = arith.constant 5.000000e-01 : f32
    %195 = vector.broadcast %cst_86 : f32 to vector<8x128xf32>
    %196 = arith.mulf %195, %194 : vector<8x128xf32>
    %cst_87 = arith.constant 5.000000e-01 : f32
    %197 = vector.broadcast %cst_87 : f32 to vector<8x128xf32>
    %198 = arith.addf %196, %197 : vector<8x128xf32>
    %199 = arith.mulf %188, %113 : vector<8x128xf32>
    %200 = arith.mulf %180, %190 : vector<8x128xf32>
    %201 = arith.addf %199, %200 : vector<8x128xf32>
    %202 = math.tanh %201 : vector<8x128xf32>
    %203 = arith.mulf %198, %202 : vector<8x128xf32>
    %204 = arith.truncf %172 : vector<8x128xf32> to vector<8x128xbf16>
    %205 = arith.index_cast %c1_i32 : i32 to index
    %c0_88 = arith.constant 0 : index
    %c0_89 = arith.constant 0 : index
    %206 = vector.load %arg14[%205, %c0_88, %c0_89] : memref<8x8x128xbf16, #tpu.memory_space<vmem>>, vector<1x8x128xbf16>
    %207 = vector.shape_cast %206 : vector<1x8x128xbf16> to vector<8x128xbf16>
    %208 = vector.shape_cast %204 : vector<8x128xbf16> to vector<1x8x128xbf16>
    tpu.vector_store %arg14[%205, %c0_88, %c0_89], %208 {strides = array<i32>} : memref<8x8x128xbf16, #tpu.memory_space<vmem>>, vector<1x8x128xbf16>,
    %209 = arith.truncf %203 : vector<8x128xf32> to vector<8x128xbf16>
    %210 = arith.index_cast %126 : i32 to index
    %c0_90 = arith.constant 0 : index
    %c0_91 = arith.constant 0 : index
    %211 = vector.load %arg15[%210, %c0_90, %c0_91] : memref<8x8x128xbf16, #tpu.memory_space<vmem>>, vector<1x8x128xbf16>
    %212 = vector.shape_cast %211 : vector<1x8x128xbf16> to vector<8x128xbf16>
    %213 = vector.shape_cast %209 : vector<8x128xbf16> to vector<1x8x128xbf16>
    tpu.vector_store %arg15[%210, %c0_90, %c0_91], %213 {strides = array<i32>} : memref<8x8x128xbf16, #tpu.memory_space<vmem>>, vector<1x8x128xbf16>,
    %c2_i32 = arith.constant 2 : i32
    %c7_i32_92 = arith.constant 7 : i32
    %214 = arith.subi %c7_i32_92, %c2_i32 : i32
    %215 = tpu.concatenate %172, %203 in 1 : vector<8x128xf32>, vector<8x128xf32> -> vector<8x256xf32>
    %216 = arith.truncf %215 : vector<8x256xf32> to vector<8x256xbf16>
    %cst_93 = arith.constant dense<0.000000e+00> : vector<8x1024xf32>
    %217 = tpu.matmul %216, %29, %cst_93 {dimension_numbers = #tpu.dot_dimension_numbers<[1], [0], [0], [1], [0, 0, 1, 1], [], []>} : vector<8x256xbf16>, vector<256x1024xbf16>, vector<8x1024xf32> -> vector<8x1024xf32>
    %218 = arith.index_cast %c2_i32 : i32 to index
    %c0_94 = arith.constant 0 : index
    %c0_95 = arith.constant 0 : index
    %219 = vector.load %arg12[%218, %c0_94, %c0_95] : memref<8x8x512xbf16, #tpu.memory_space<vmem>>, vector<1x8x512xbf16>
    %220 = vector.shape_cast %219 : vector<1x8x512xbf16> to vector<8x512xbf16>
    %221 = vector.extract_strided_slice %217 {offsets = [0, 0], sizes = [8, 512], strides = [1, 1]} : vector<8x1024xf32> to vector<8x512xf32>
    %222 = arith.extf %220 : vector<8x512xbf16> to vector<8x512xf32>
    %223 = arith.addf %222, %221 : vector<8x512xf32>
    %224 = arith.index_cast %214 : i32 to index
    %c0_96 = arith.constant 0 : index
    %c0_97 = arith.constant 0 : index
    %225 = vector.load %arg13[%224, %c0_96, %c0_97] : memref<8x8x512xbf16, #tpu.memory_space<vmem>>, vector<1x8x512xbf16>
    %226 = vector.shape_cast %225 : vector<1x8x512xbf16> to vector<8x512xbf16>
    %227 = vector.extract_strided_slice %217 {offsets = [0, 512], sizes = [8, 512], strides = [1, 1]} : vector<8x1024xf32> to vector<8x512xf32>
    %228 = arith.extf %226 : vector<8x512xbf16> to vector<8x512xf32>
    %229 = arith.addf %228, %227 : vector<8x512xf32>
    %230 = vector.extract_strided_slice %223 {offsets = [0, 0], sizes = [8, 128], strides = [1, 1]} : vector<8x512xf32> to vector<8x128xf32>
    %cst_98 = arith.constant 5.000000e-01 : f32
    %231 = vector.broadcast %cst_98 : f32 to vector<8x128xf32>
    %232 = arith.mulf %231, %230 : vector<8x128xf32>
    %233 = math.tanh %232 : vector<8x128xf32>
    %cst_99 = arith.constant 5.000000e-01 : f32
    %234 = vector.broadcast %cst_99 : f32 to vector<8x128xf32>
    %235 = arith.mulf %234, %233 : vector<8x128xf32>
    %cst_100 = arith.constant 5.000000e-01 : f32
    %236 = vector.broadcast %cst_100 : f32 to vector<8x128xf32>
    %237 = arith.addf %235, %236 : vector<8x128xf32>
    %238 = vector.extract_strided_slice %223 {offsets = [0, 128], sizes = [8, 128], strides = [1, 1]} : vector<8x512xf32> to vector<8x128xf32>
    %cst_101 = arith.constant 5.000000e-01 : f32
    %239 = vector.broadcast %cst_101 : f32 to vector<8x128xf32>
    %240 = arith.mulf %239, %238 : vector<8x128xf32>
    %241 = math.tanh %240 : vector<8x128xf32>
    %cst_102 = arith.constant 5.000000e-01 : f32
    %242 = vector.broadcast %cst_102 : f32 to vector<8x128xf32>
    %243 = arith.mulf %242, %241 : vector<8x128xf32>
    %cst_103 = arith.constant 5.000000e-01 : f32
    %244 = vector.broadcast %cst_103 : f32 to vector<8x128xf32>
    %245 = arith.addf %243, %244 : vector<8x128xf32>
    %246 = vector.extract_strided_slice %223 {offsets = [0, 256], sizes = [8, 128], strides = [1, 1]} : vector<8x512xf32> to vector<8x128xf32>
    %247 = math.tanh %246 : vector<8x128xf32>
    %248 = vector.extract_strided_slice %223 {offsets = [0, 384], sizes = [8, 128], strides = [1, 1]} : vector<8x512xf32> to vector<8x128xf32>
    %cst_104 = arith.constant 5.000000e-01 : f32
    %249 = vector.broadcast %cst_104 : f32 to vector<8x128xf32>
    %250 = arith.mulf %249, %248 : vector<8x128xf32>
    %251 = math.tanh %250 : vector<8x128xf32>
    %cst_105 = arith.constant 5.000000e-01 : f32
    %252 = vector.broadcast %cst_105 : f32 to vector<8x128xf32>
    %253 = arith.mulf %252, %251 : vector<8x128xf32>
    %cst_106 = arith.constant 5.000000e-01 : f32
    %254 = vector.broadcast %cst_106 : f32 to vector<8x128xf32>
    %255 = arith.addf %253, %254 : vector<8x128xf32>
    %256 = arith.mulf %245, %170 : vector<8x128xf32>
    %257 = arith.mulf %237, %247 : vector<8x128xf32>
    %258 = arith.addf %256, %257 : vector<8x128xf32>
    %259 = math.tanh %258 : vector<8x128xf32>
    %260 = arith.mulf %255, %259 : vector<8x128xf32>
    %261 = vector.extract_strided_slice %229 {offsets = [0, 0], sizes = [8, 128], strides = [1, 1]} : vector<8x512xf32> to vector<8x128xf32>
    %cst_107 = arith.constant 5.000000e-01 : f32
    %262 = vector.broadcast %cst_107 : f32 to vector<8x128xf32>
    %263 = arith.mulf %262, %261 : vector<8x128xf32>
    %264 = math.tanh %263 : vector<8x128xf32>
    %cst_108 = arith.constant 5.000000e-01 : f32
    %265 = vector.broadcast %cst_108 : f32 to vector<8x128xf32>
    %266 = arith.mulf %265, %264 : vector<8x128xf32>
    %cst_109 = arith.constant 5.000000e-01 : f32
    %267 = vector.broadcast %cst_109 : f32 to vector<8x128xf32>
    %268 = arith.addf %266, %267 : vector<8x128xf32>
    %269 = vector.extract_strided_slice %229 {offsets = [0, 128], sizes = [8, 128], strides = [1, 1]} : vector<8x512xf32> to vector<8x128xf32>
    %cst_110 = arith.constant 5.000000e-01 : f32
    %270 = vector.broadcast %cst_110 : f32 to vector<8x128xf32>
    %271 = arith.mulf %270, %269 : vector<8x128xf32>
    %272 = math.tanh %271 : vector<8x128xf32>
    %cst_111 = arith.constant 5.000000e-01 : f32
    %273 = vector.broadcast %cst_111 : f32 to vector<8x128xf32>
    %274 = arith.mulf %273, %272 : vector<8x128xf32>
    %cst_112 = arith.constant 5.000000e-01 : f32
    %275 = vector.broadcast %cst_112 : f32 to vector<8x128xf32>
    %276 = arith.addf %274, %275 : vector<8x128xf32>
    %277 = vector.extract_strided_slice %229 {offsets = [0, 256], sizes = [8, 128], strides = [1, 1]} : vector<8x512xf32> to vector<8x128xf32>
    %278 = math.tanh %277 : vector<8x128xf32>
    %279 = vector.extract_strided_slice %229 {offsets = [0, 384], sizes = [8, 128], strides = [1, 1]} : vector<8x512xf32> to vector<8x128xf32>
    %cst_113 = arith.constant 5.000000e-01 : f32
    %280 = vector.broadcast %cst_113 : f32 to vector<8x128xf32>
    %281 = arith.mulf %280, %279 : vector<8x128xf32>
    %282 = math.tanh %281 : vector<8x128xf32>
    %cst_114 = arith.constant 5.000000e-01 : f32
    %283 = vector.broadcast %cst_114 : f32 to vector<8x128xf32>
    %284 = arith.mulf %283, %282 : vector<8x128xf32>
    %cst_115 = arith.constant 5.000000e-01 : f32
    %285 = vector.broadcast %cst_115 : f32 to vector<8x128xf32>
    %286 = arith.addf %284, %285 : vector<8x128xf32>
    %287 = arith.mulf %276, %201 : vector<8x128xf32>
    %288 = arith.mulf %268, %278 : vector<8x128xf32>
    %289 = arith.addf %287, %288 : vector<8x128xf32>
    %290 = math.tanh %289 : vector<8x128xf32>
    %291 = arith.mulf %286, %290 : vector<8x128xf32>
    %292 = arith.truncf %260 : vector<8x128xf32> to vector<8x128xbf16>
    %293 = arith.index_cast %c2_i32 : i32 to index
    %c0_116 = arith.constant 0 : index
    %c0_117 = arith.constant 0 : index
    %294 = vector.load %arg14[%293, %c0_116, %c0_117] : memref<8x8x128xbf16, #tpu.memory_space<vmem>>, vector<1x8x128xbf16>
    %295 = vector.shape_cast %294 : vector<1x8x128xbf16> to vector<8x128xbf16>
    %296 = vector.shape_cast %292 : vector<8x128xbf16> to vector<1x8x128xbf16>
    tpu.vector_store %arg14[%293, %c0_116, %c0_117], %296 {strides = array<i32>} : memref<8x8x128xbf16, #tpu.memory_space<vmem>>, vector<1x8x128xbf16>,
    %297 = arith.truncf %291 : vector<8x128xf32> to vector<8x128xbf16>
    %298 = arith.index_cast %214 : i32 to index
    %c0_118 = arith.constant 0 : index
    %c0_119 = arith.constant 0 : index
    %299 = vector.load %arg15[%298, %c0_118, %c0_119] : memref<8x8x128xbf16, #tpu.memory_space<vmem>>, vector<1x8x128xbf16>
    %300 = vector.shape_cast %299 : vector<1x8x128xbf16> to vector<8x128xbf16>
    %301 = vector.shape_cast %297 : vector<8x128xbf16> to vector<1x8x128xbf16>
    tpu.vector_store %arg15[%298, %c0_118, %c0_119], %301 {strides = array<i32>} : memref<8x8x128xbf16, #tpu.memory_space<vmem>>, vector<1x8x128xbf16>,
    %c3_i32 = arith.constant 3 : i32
    %c7_i32_120 = arith.constant 7 : i32
    %302 = arith.subi %c7_i32_120, %c3_i32 : i32
    %303 = tpu.concatenate %260, %291 in 1 : vector<8x128xf32>, vector<8x128xf32> -> vector<8x256xf32>
    %304 = arith.truncf %303 : vector<8x256xf32> to vector<8x256xbf16>
    %cst_121 = arith.constant dense<0.000000e+00> : vector<8x1024xf32>
    %305 = tpu.matmul %304, %29, %cst_121 {dimension_numbers = #tpu.dot_dimension_numbers<[1], [0], [0], [1], [0, 0, 1, 1], [], []>} : vector<8x256xbf16>, vector<256x1024xbf16>, vector<8x1024xf32> -> vector<8x1024xf32>
    %306 = arith.index_cast %c3_i32 : i32 to index
    %c0_122 = arith.constant 0 : index
    %c0_123 = arith.constant 0 : index
    %307 = vector.load %arg12[%306, %c0_122, %c0_123] : memref<8x8x512xbf16, #tpu.memory_space<vmem>>, vector<1x8x512xbf16>
    %308 = vector.shape_cast %307 : vector<1x8x512xbf16> to vector<8x512xbf16>
    %309 = vector.extract_strided_slice %305 {offsets = [0, 0], sizes = [8, 512], strides = [1, 1]} : vector<8x1024xf32> to vector<8x512xf32>
    %310 = arith.extf %308 : vector<8x512xbf16> to vector<8x512xf32>
    %311 = arith.addf %310, %309 : vector<8x512xf32>
    %312 = arith.index_cast %302 : i32 to index
    %c0_124 = arith.constant 0 : index
    %c0_125 = arith.constant 0 : index
    %313 = vector.load %arg13[%312, %c0_124, %c0_125] : memref<8x8x512xbf16, #tpu.memory_space<vmem>>, vector<1x8x512xbf16>
    %314 = vector.shape_cast %313 : vector<1x8x512xbf16> to vector<8x512xbf16>
    %315 = vector.extract_strided_slice %305 {offsets = [0, 512], sizes = [8, 512], strides = [1, 1]} : vector<8x1024xf32> to vector<8x512xf32>
    %316 = arith.extf %314 : vector<8x512xbf16> to vector<8x512xf32>
    %317 = arith.addf %316, %315 : vector<8x512xf32>
    %318 = vector.extract_strided_slice %311 {offsets = [0, 0], sizes = [8, 128], strides = [1, 1]} : vector<8x512xf32> to vector<8x128xf32>
    %cst_126 = arith.constant 5.000000e-01 : f32
    %319 = vector.broadcast %cst_126 : f32 to vector<8x128xf32>
    %320 = arith.mulf %319, %318 : vector<8x128xf32>
    %321 = math.tanh %320 : vector<8x128xf32>
    %cst_127 = arith.constant 5.000000e-01 : f32
    %322 = vector.broadcast %cst_127 : f32 to vector<8x128xf32>
    %323 = arith.mulf %322, %321 : vector<8x128xf32>
    %cst_128 = arith.constant 5.000000e-01 : f32
    %324 = vector.broadcast %cst_128 : f32 to vector<8x128xf32>
    %325 = arith.addf %323, %324 : vector<8x128xf32>
    %326 = vector.extract_strided_slice %311 {offsets = [0, 128], sizes = [8, 128], strides = [1, 1]} : vector<8x512xf32> to vector<8x128xf32>
    %cst_129 = arith.constant 5.000000e-01 : f32
    %327 = vector.broadcast %cst_129 : f32 to vector<8x128xf32>
    %328 = arith.mulf %327, %326 : vector<8x128xf32>
    %329 = math.tanh %328 : vector<8x128xf32>
    %cst_130 = arith.constant 5.000000e-01 : f32
    %330 = vector.broadcast %cst_130 : f32 to vector<8x128xf32>
    %331 = arith.mulf %330, %329 : vector<8x128xf32>
    %cst_131 = arith.constant 5.000000e-01 : f32
    %332 = vector.broadcast %cst_131 : f32 to vector<8x128xf32>
    %333 = arith.addf %331, %332 : vector<8x128xf32>
    %334 = vector.extract_strided_slice %311 {offsets = [0, 256], sizes = [8, 128], strides = [1, 1]} : vector<8x512xf32> to vector<8x128xf32>
    %335 = math.tanh %334 : vector<8x128xf32>
    %336 = vector.extract_strided_slice %311 {offsets = [0, 384], sizes = [8, 128], strides = [1, 1]} : vector<8x512xf32> to vector<8x128xf32>
    %cst_132 = arith.constant 5.000000e-01 : f32
    %337 = vector.broadcast %cst_132 : f32 to vector<8x128xf32>
    %338 = arith.mulf %337, %336 : vector<8x128xf32>
    %339 = math.tanh %338 : vector<8x128xf32>
    %cst_133 = arith.constant 5.000000e-01 : f32
    %340 = vector.broadcast %cst_133 : f32 to vector<8x128xf32>
    %341 = arith.mulf %340, %339 : vector<8x128xf32>
    %cst_134 = arith.constant 5.000000e-01 : f32
    %342 = vector.broadcast %cst_134 : f32 to vector<8x128xf32>
    %343 = arith.addf %341, %342 : vector<8x128xf32>
    %344 = arith.mulf %333, %258 : vector<8x128xf32>
    %345 = arith.mulf %325, %335 : vector<8x128xf32>
    %346 = arith.addf %344, %345 : vector<8x128xf32>
    %347 = math.tanh %346 : vector<8x128xf32>
    %348 = arith.mulf %343, %347 : vector<8x128xf32>
    %349 = vector.extract_strided_slice %317 {offsets = [0, 0], sizes = [8, 128], strides = [1, 1]} : vector<8x512xf32> to vector<8x128xf32>
    %cst_135 = arith.constant 5.000000e-01 : f32
    %350 = vector.broadcast %cst_135 : f32 to vector<8x128xf32>
    %351 = arith.mulf %350, %349 : vector<8x128xf32>
    %352 = math.tanh %351 : vector<8x128xf32>
    %cst_136 = arith.constant 5.000000e-01 : f32
    %353 = vector.broadcast %cst_136 : f32 to vector<8x128xf32>
    %354 = arith.mulf %353, %352 : vector<8x128xf32>
    %cst_137 = arith.constant 5.000000e-01 : f32
    %355 = vector.broadcast %cst_137 : f32 to vector<8x128xf32>
    %356 = arith.addf %354, %355 : vector<8x128xf32>
    %357 = vector.extract_strided_slice %317 {offsets = [0, 128], sizes = [8, 128], strides = [1, 1]} : vector<8x512xf32> to vector<8x128xf32>
    %cst_138 = arith.constant 5.000000e-01 : f32
    %358 = vector.broadcast %cst_138 : f32 to vector<8x128xf32>
    %359 = arith.mulf %358, %357 : vector<8x128xf32>
    %360 = math.tanh %359 : vector<8x128xf32>
    %cst_139 = arith.constant 5.000000e-01 : f32
    %361 = vector.broadcast %cst_139 : f32 to vector<8x128xf32>
    %362 = arith.mulf %361, %360 : vector<8x128xf32>
    %cst_140 = arith.constant 5.000000e-01 : f32
    %363 = vector.broadcast %cst_140 : f32 to vector<8x128xf32>
    %364 = arith.addf %362, %363 : vector<8x128xf32>
    %365 = vector.extract_strided_slice %317 {offsets = [0, 256], sizes = [8, 128], strides = [1, 1]} : vector<8x512xf32> to vector<8x128xf32>
    %366 = math.tanh %365 : vector<8x128xf32>
    %367 = vector.extract_strided_slice %317 {offsets = [0, 384], sizes = [8, 128], strides = [1, 1]} : vector<8x512xf32> to vector<8x128xf32>
    %cst_141 = arith.constant 5.000000e-01 : f32
    %368 = vector.broadcast %cst_141 : f32 to vector<8x128xf32>
    %369 = arith.mulf %368, %367 : vector<8x128xf32>
    %370 = math.tanh %369 : vector<8x128xf32>
    %cst_142 = arith.constant 5.000000e-01 : f32
    %371 = vector.broadcast %cst_142 : f32 to vector<8x128xf32>
    %372 = arith.mulf %371, %370 : vector<8x128xf32>
    %cst_143 = arith.constant 5.000000e-01 : f32
    %373 = vector.broadcast %cst_143 : f32 to vector<8x128xf32>
    %374 = arith.addf %372, %373 : vector<8x128xf32>
    %375 = arith.mulf %364, %289 : vector<8x128xf32>
    %376 = arith.mulf %356, %366 : vector<8x128xf32>
    %377 = arith.addf %375, %376 : vector<8x128xf32>
    %378 = math.tanh %377 : vector<8x128xf32>
    %379 = arith.mulf %374, %378 : vector<8x128xf32>
    %380 = arith.truncf %348 : vector<8x128xf32> to vector<8x128xbf16>
    %381 = arith.index_cast %c3_i32 : i32 to index
    %c0_144 = arith.constant 0 : index
    %c0_145 = arith.constant 0 : index
    %382 = vector.load %arg14[%381, %c0_144, %c0_145] : memref<8x8x128xbf16, #tpu.memory_space<vmem>>, vector<1x8x128xbf16>
    %383 = vector.shape_cast %382 : vector<1x8x128xbf16> to vector<8x128xbf16>
    %384 = vector.shape_cast %380 : vector<8x128xbf16> to vector<1x8x128xbf16>
    tpu.vector_store %arg14[%381, %c0_144, %c0_145], %384 {strides = array<i32>} : memref<8x8x128xbf16, #tpu.memory_space<vmem>>, vector<1x8x128xbf16>,
    %385 = arith.truncf %379 : vector<8x128xf32> to vector<8x128xbf16>
    %386 = arith.index_cast %302 : i32 to index
    %c0_146 = arith.constant 0 : index
    %c0_147 = arith.constant 0 : index
    %387 = vector.load %arg15[%386, %c0_146, %c0_147] : memref<8x8x128xbf16, #tpu.memory_space<vmem>>, vector<1x8x128xbf16>
    %388 = vector.shape_cast %387 : vector<1x8x128xbf16> to vector<8x128xbf16>
    %389 = vector.shape_cast %385 : vector<8x128xbf16> to vector<1x8x128xbf16>
    tpu.vector_store %arg15[%386, %c0_146, %c0_147], %389 {strides = array<i32>} : memref<8x8x128xbf16, #tpu.memory_space<vmem>>, vector<1x8x128xbf16>,
    %c4_i32 = arith.constant 4 : i32
    %c7_i32_148 = arith.constant 7 : i32
    %390 = arith.subi %c7_i32_148, %c4_i32 : i32
    %391 = tpu.concatenate %348, %379 in 1 : vector<8x128xf32>, vector<8x128xf32> -> vector<8x256xf32>
    %392 = arith.truncf %391 : vector<8x256xf32> to vector<8x256xbf16>
    %cst_149 = arith.constant dense<0.000000e+00> : vector<8x1024xf32>
    %393 = tpu.matmul %392, %29, %cst_149 {dimension_numbers = #tpu.dot_dimension_numbers<[1], [0], [0], [1], [0, 0, 1, 1], [], []>} : vector<8x256xbf16>, vector<256x1024xbf16>, vector<8x1024xf32> -> vector<8x1024xf32>
    %394 = arith.index_cast %c4_i32 : i32 to index
    %c0_150 = arith.constant 0 : index
    %c0_151 = arith.constant 0 : index
    %395 = vector.load %arg12[%394, %c0_150, %c0_151] : memref<8x8x512xbf16, #tpu.memory_space<vmem>>, vector<1x8x512xbf16>
    %396 = vector.shape_cast %395 : vector<1x8x512xbf16> to vector<8x512xbf16>
    %397 = vector.extract_strided_slice %393 {offsets = [0, 0], sizes = [8, 512], strides = [1, 1]} : vector<8x1024xf32> to vector<8x512xf32>
    %398 = arith.extf %396 : vector<8x512xbf16> to vector<8x512xf32>
    %399 = arith.addf %398, %397 : vector<8x512xf32>
    %400 = arith.index_cast %390 : i32 to index
    %c0_152 = arith.constant 0 : index
    %c0_153 = arith.constant 0 : index
    %401 = vector.load %arg13[%400, %c0_152, %c0_153] : memref<8x8x512xbf16, #tpu.memory_space<vmem>>, vector<1x8x512xbf16>
    %402 = vector.shape_cast %401 : vector<1x8x512xbf16> to vector<8x512xbf16>
    %403 = vector.extract_strided_slice %393 {offsets = [0, 512], sizes = [8, 512], strides = [1, 1]} : vector<8x1024xf32> to vector<8x512xf32>
    %404 = arith.extf %402 : vector<8x512xbf16> to vector<8x512xf32>
    %405 = arith.addf %404, %403 : vector<8x512xf32>
    %406 = vector.extract_strided_slice %399 {offsets = [0, 0], sizes = [8, 128], strides = [1, 1]} : vector<8x512xf32> to vector<8x128xf32>
    %cst_154 = arith.constant 5.000000e-01 : f32
    %407 = vector.broadcast %cst_154 : f32 to vector<8x128xf32>
    %408 = arith.mulf %407, %406 : vector<8x128xf32>
    %409 = math.tanh %408 : vector<8x128xf32>
    %cst_155 = arith.constant 5.000000e-01 : f32
    %410 = vector.broadcast %cst_155 : f32 to vector<8x128xf32>
    %411 = arith.mulf %410, %409 : vector<8x128xf32>
    %cst_156 = arith.constant 5.000000e-01 : f32
    %412 = vector.broadcast %cst_156 : f32 to vector<8x128xf32>
    %413 = arith.addf %411, %412 : vector<8x128xf32>
    %414 = vector.extract_strided_slice %399 {offsets = [0, 128], sizes = [8, 128], strides = [1, 1]} : vector<8x512xf32> to vector<8x128xf32>
    %cst_157 = arith.constant 5.000000e-01 : f32
    %415 = vector.broadcast %cst_157 : f32 to vector<8x128xf32>
    %416 = arith.mulf %415, %414 : vector<8x128xf32>
    %417 = math.tanh %416 : vector<8x128xf32>
    %cst_158 = arith.constant 5.000000e-01 : f32
    %418 = vector.broadcast %cst_158 : f32 to vector<8x128xf32>
    %419 = arith.mulf %418, %417 : vector<8x128xf32>
    %cst_159 = arith.constant 5.000000e-01 : f32
    %420 = vector.broadcast %cst_159 : f32 to vector<8x128xf32>
    %421 = arith.addf %419, %420 : vector<8x128xf32>
    %422 = vector.extract_strided_slice %399 {offsets = [0, 256], sizes = [8, 128], strides = [1, 1]} : vector<8x512xf32> to vector<8x128xf32>
    %423 = math.tanh %422 : vector<8x128xf32>
    %424 = vector.extract_strided_slice %399 {offsets = [0, 384], sizes = [8, 128], strides = [1, 1]} : vector<8x512xf32> to vector<8x128xf32>
    %cst_160 = arith.constant 5.000000e-01 : f32
    %425 = vector.broadcast %cst_160 : f32 to vector<8x128xf32>
    %426 = arith.mulf %425, %424 : vector<8x128xf32>
    %427 = math.tanh %426 : vector<8x128xf32>
    %cst_161 = arith.constant 5.000000e-01 : f32
    %428 = vector.broadcast %cst_161 : f32 to vector<8x128xf32>
    %429 = arith.mulf %428, %427 : vector<8x128xf32>
    %cst_162 = arith.constant 5.000000e-01 : f32
    %430 = vector.broadcast %cst_162 : f32 to vector<8x128xf32>
    %431 = arith.addf %429, %430 : vector<8x128xf32>
    %432 = arith.mulf %421, %346 : vector<8x128xf32>
    %433 = arith.mulf %413, %423 : vector<8x128xf32>
    %434 = arith.addf %432, %433 : vector<8x128xf32>
    %435 = math.tanh %434 : vector<8x128xf32>
    %436 = arith.mulf %431, %435 : vector<8x128xf32>
    %437 = vector.extract_strided_slice %405 {offsets = [0, 0], sizes = [8, 128], strides = [1, 1]} : vector<8x512xf32> to vector<8x128xf32>
    %cst_163 = arith.constant 5.000000e-01 : f32
    %438 = vector.broadcast %cst_163 : f32 to vector<8x128xf32>
    %439 = arith.mulf %438, %437 : vector<8x128xf32>
    %440 = math.tanh %439 : vector<8x128xf32>
    %cst_164 = arith.constant 5.000000e-01 : f32
    %441 = vector.broadcast %cst_164 : f32 to vector<8x128xf32>
    %442 = arith.mulf %441, %440 : vector<8x128xf32>
    %cst_165 = arith.constant 5.000000e-01 : f32
    %443 = vector.broadcast %cst_165 : f32 to vector<8x128xf32>
    %444 = arith.addf %442, %443 : vector<8x128xf32>
    %445 = vector.extract_strided_slice %405 {offsets = [0, 128], sizes = [8, 128], strides = [1, 1]} : vector<8x512xf32> to vector<8x128xf32>
    %cst_166 = arith.constant 5.000000e-01 : f32
    %446 = vector.broadcast %cst_166 : f32 to vector<8x128xf32>
    %447 = arith.mulf %446, %445 : vector<8x128xf32>
    %448 = math.tanh %447 : vector<8x128xf32>
    %cst_167 = arith.constant 5.000000e-01 : f32
    %449 = vector.broadcast %cst_167 : f32 to vector<8x128xf32>
    %450 = arith.mulf %449, %448 : vector<8x128xf32>
    %cst_168 = arith.constant 5.000000e-01 : f32
    %451 = vector.broadcast %cst_168 : f32 to vector<8x128xf32>
    %452 = arith.addf %450, %451 : vector<8x128xf32>
    %453 = vector.extract_strided_slice %405 {offsets = [0, 256], sizes = [8, 128], strides = [1, 1]} : vector<8x512xf32> to vector<8x128xf32>
    %454 = math.tanh %453 : vector<8x128xf32>
    %455 = vector.extract_strided_slice %405 {offsets = [0, 384], sizes = [8, 128], strides = [1, 1]} : vector<8x512xf32> to vector<8x128xf32>
    %cst_169 = arith.constant 5.000000e-01 : f32
    %456 = vector.broadcast %cst_169 : f32 to vector<8x128xf32>
    %457 = arith.mulf %456, %455 : vector<8x128xf32>
    %458 = math.tanh %457 : vector<8x128xf32>
    %cst_170 = arith.constant 5.000000e-01 : f32
    %459 = vector.broadcast %cst_170 : f32 to vector<8x128xf32>
    %460 = arith.mulf %459, %458 : vector<8x128xf32>
    %cst_171 = arith.constant 5.000000e-01 : f32
    %461 = vector.broadcast %cst_171 : f32 to vector<8x128xf32>
    %462 = arith.addf %460, %461 : vector<8x128xf32>
    %463 = arith.mulf %452, %377 : vector<8x128xf32>
    %464 = arith.mulf %444, %454 : vector<8x128xf32>
    %465 = arith.addf %463, %464 : vector<8x128xf32>
    %466 = math.tanh %465 : vector<8x128xf32>
    %467 = arith.mulf %462, %466 : vector<8x128xf32>
    %468 = arith.truncf %436 : vector<8x128xf32> to vector<8x128xbf16>
    %469 = arith.index_cast %c4_i32 : i32 to index
    %c0_172 = arith.constant 0 : index
    %c0_173 = arith.constant 0 : index
    %470 = vector.load %arg14[%469, %c0_172, %c0_173] : memref<8x8x128xbf16, #tpu.memory_space<vmem>>, vector<1x8x128xbf16>
    %471 = vector.shape_cast %470 : vector<1x8x128xbf16> to vector<8x128xbf16>
    %472 = vector.shape_cast %468 : vector<8x128xbf16> to vector<1x8x128xbf16>
    tpu.vector_store %arg14[%469, %c0_172, %c0_173], %472 {strides = array<i32>} : memref<8x8x128xbf16, #tpu.memory_space<vmem>>, vector<1x8x128xbf16>,
    %473 = arith.truncf %467 : vector<8x128xf32> to vector<8x128xbf16>
    %474 = arith.index_cast %390 : i32 to index
    %c0_174 = arith.constant 0 : index
    %c0_175 = arith.constant 0 : index
    %475 = vector.load %arg15[%474, %c0_174, %c0_175] : memref<8x8x128xbf16, #tpu.memory_space<vmem>>, vector<1x8x128xbf16>
    %476 = vector.shape_cast %475 : vector<1x8x128xbf16> to vector<8x128xbf16>
    %477 = vector.shape_cast %473 : vector<8x128xbf16> to vector<1x8x128xbf16>
    tpu.vector_store %arg15[%474, %c0_174, %c0_175], %477 {strides = array<i32>} : memref<8x8x128xbf16, #tpu.memory_space<vmem>>, vector<1x8x128xbf16>,
    %c5_i32 = arith.constant 5 : i32
    %c7_i32_176 = arith.constant 7 : i32
    %478 = arith.subi %c7_i32_176, %c5_i32 : i32
    %479 = tpu.concatenate %436, %467 in 1 : vector<8x128xf32>, vector<8x128xf32> -> vector<8x256xf32>
    %480 = arith.truncf %479 : vector<8x256xf32> to vector<8x256xbf16>
    %cst_177 = arith.constant dense<0.000000e+00> : vector<8x1024xf32>
    %481 = tpu.matmul %480, %29, %cst_177 {dimension_numbers = #tpu.dot_dimension_numbers<[1], [0], [0], [1], [0, 0, 1, 1], [], []>} : vector<8x256xbf16>, vector<256x1024xbf16>, vector<8x1024xf32> -> vector<8x1024xf32>
    %482 = arith.index_cast %c5_i32 : i32 to index
    %c0_178 = arith.constant 0 : index
    %c0_179 = arith.constant 0 : index
    %483 = vector.load %arg12[%482, %c0_178, %c0_179] : memref<8x8x512xbf16, #tpu.memory_space<vmem>>, vector<1x8x512xbf16>
    %484 = vector.shape_cast %483 : vector<1x8x512xbf16> to vector<8x512xbf16>
    %485 = vector.extract_strided_slice %481 {offsets = [0, 0], sizes = [8, 512], strides = [1, 1]} : vector<8x1024xf32> to vector<8x512xf32>
    %486 = arith.extf %484 : vector<8x512xbf16> to vector<8x512xf32>
    %487 = arith.addf %486, %485 : vector<8x512xf32>
    %488 = arith.index_cast %478 : i32 to index
    %c0_180 = arith.constant 0 : index
    %c0_181 = arith.constant 0 : index
    %489 = vector.load %arg13[%488, %c0_180, %c0_181] : memref<8x8x512xbf16, #tpu.memory_space<vmem>>, vector<1x8x512xbf16>
    %490 = vector.shape_cast %489 : vector<1x8x512xbf16> to vector<8x512xbf16>
    %491 = vector.extract_strided_slice %481 {offsets = [0, 512], sizes = [8, 512], strides = [1, 1]} : vector<8x1024xf32> to vector<8x512xf32>
    %492 = arith.extf %490 : vector<8x512xbf16> to vector<8x512xf32>
    %493 = arith.addf %492, %491 : vector<8x512xf32>
    %494 = vector.extract_strided_slice %487 {offsets = [0, 0], sizes = [8, 128], strides = [1, 1]} : vector<8x512xf32> to vector<8x128xf32>
    %cst_182 = arith.constant 5.000000e-01 : f32
    %495 = vector.broadcast %cst_182 : f32 to vector<8x128xf32>
    %496 = arith.mulf %495, %494 : vector<8x128xf32>
    %497 = math.tanh %496 : vector<8x128xf32>
    %cst_183 = arith.constant 5.000000e-01 : f32
    %498 = vector.broadcast %cst_183 : f32 to vector<8x128xf32>
    %499 = arith.mulf %498, %497 : vector<8x128xf32>
    %cst_184 = arith.constant 5.000000e-01 : f32
    %500 = vector.broadcast %cst_184 : f32 to vector<8x128xf32>
    %501 = arith.addf %499, %500 : vector<8x128xf32>
    %502 = vector.extract_strided_slice %487 {offsets = [0, 128], sizes = [8, 128], strides = [1, 1]} : vector<8x512xf32> to vector<8x128xf32>
    %cst_185 = arith.constant 5.000000e-01 : f32
    %503 = vector.broadcast %cst_185 : f32 to vector<8x128xf32>
    %504 = arith.mulf %503, %502 : vector<8x128xf32>
    %505 = math.tanh %504 : vector<8x128xf32>
    %cst_186 = arith.constant 5.000000e-01 : f32
    %506 = vector.broadcast %cst_186 : f32 to vector<8x128xf32>
    %507 = arith.mulf %506, %505 : vector<8x128xf32>
    %cst_187 = arith.constant 5.000000e-01 : f32
    %508 = vector.broadcast %cst_187 : f32 to vector<8x128xf32>
    %509 = arith.addf %507, %508 : vector<8x128xf32>
    %510 = vector.extract_strided_slice %487 {offsets = [0, 256], sizes = [8, 128], strides = [1, 1]} : vector<8x512xf32> to vector<8x128xf32>
    %511 = math.tanh %510 : vector<8x128xf32>
    %512 = vector.extract_strided_slice %487 {offsets = [0, 384], sizes = [8, 128], strides = [1, 1]} : vector<8x512xf32> to vector<8x128xf32>
    %cst_188 = arith.constant 5.000000e-01 : f32
    %513 = vector.broadcast %cst_188 : f32 to vector<8x128xf32>
    %514 = arith.mulf %513, %512 : vector<8x128xf32>
    %515 = math.tanh %514 : vector<8x128xf32>
    %cst_189 = arith.constant 5.000000e-01 : f32
    %516 = vector.broadcast %cst_189 : f32 to vector<8x128xf32>
    %517 = arith.mulf %516, %515 : vector<8x128xf32>
    %cst_190 = arith.constant 5.000000e-01 : f32
    %518 = vector.broadcast %cst_190 : f32 to vector<8x128xf32>
    %519 = arith.addf %517, %518 : vector<8x128xf32>
    %520 = arith.mulf %509, %434 : vector<8x128xf32>
    %521 = arith.mulf %501, %511 : vector<8x128xf32>
    %522 = arith.addf %520, %521 : vector<8x128xf32>
    %523 = math.tanh %522 : vector<8x128xf32>
    %524 = arith.mulf %519, %523 : vector<8x128xf32>
    %525 = vector.extract_strided_slice %493 {offsets = [0, 0], sizes = [8, 128], strides = [1, 1]} : vector<8x512xf32> to vector<8x128xf32>
    %cst_191 = arith.constant 5.000000e-01 : f32
    %526 = vector.broadcast %cst_191 : f32 to vector<8x128xf32>
    %527 = arith.mulf %526, %525 : vector<8x128xf32>
    %528 = math.tanh %527 : vector<8x128xf32>
    %cst_192 = arith.constant 5.000000e-01 : f32
    %529 = vector.broadcast %cst_192 : f32 to vector<8x128xf32>
    %530 = arith.mulf %529, %528 : vector<8x128xf32>
    %cst_193 = arith.constant 5.000000e-01 : f32
    %531 = vector.broadcast %cst_193 : f32 to vector<8x128xf32>
    %532 = arith.addf %530, %531 : vector<8x128xf32>
    %533 = vector.extract_strided_slice %493 {offsets = [0, 128], sizes = [8, 128], strides = [1, 1]} : vector<8x512xf32> to vector<8x128xf32>
    %cst_194 = arith.constant 5.000000e-01 : f32
    %534 = vector.broadcast %cst_194 : f32 to vector<8x128xf32>
    %535 = arith.mulf %534, %533 : vector<8x128xf32>
    %536 = math.tanh %535 : vector<8x128xf32>
    %cst_195 = arith.constant 5.000000e-01 : f32
    %537 = vector.broadcast %cst_195 : f32 to vector<8x128xf32>
    %538 = arith.mulf %537, %536 : vector<8x128xf32>
    %cst_196 = arith.constant 5.000000e-01 : f32
    %539 = vector.broadcast %cst_196 : f32 to vector<8x128xf32>
    %540 = arith.addf %538, %539 : vector<8x128xf32>
    %541 = vector.extract_strided_slice %493 {offsets = [0, 256], sizes = [8, 128], strides = [1, 1]} : vector<8x512xf32> to vector<8x128xf32>
    %542 = math.tanh %541 : vector<8x128xf32>
    %543 = vector.extract_strided_slice %493 {offsets = [0, 384], sizes = [8, 128], strides = [1, 1]} : vector<8x512xf32> to vector<8x128xf32>
    %cst_197 = arith.constant 5.000000e-01 : f32
    %544 = vector.broadcast %cst_197 : f32 to vector<8x128xf32>
    %545 = arith.mulf %544, %543 : vector<8x128xf32>
    %546 = math.tanh %545 : vector<8x128xf32>
    %cst_198 = arith.constant 5.000000e-01 : f32
    %547 = vector.broadcast %cst_198 : f32 to vector<8x128xf32>
    %548 = arith.mulf %547, %546 : vector<8x128xf32>
    %cst_199 = arith.constant 5.000000e-01 : f32
    %549 = vector.broadcast %cst_199 : f32 to vector<8x128xf32>
    %550 = arith.addf %548, %549 : vector<8x128xf32>
    %551 = arith.mulf %540, %465 : vector<8x128xf32>
    %552 = arith.mulf %532, %542 : vector<8x128xf32>
    %553 = arith.addf %551, %552 : vector<8x128xf32>
    %554 = math.tanh %553 : vector<8x128xf32>
    %555 = arith.mulf %550, %554 : vector<8x128xf32>
    %556 = arith.truncf %524 : vector<8x128xf32> to vector<8x128xbf16>
    %557 = arith.index_cast %c5_i32 : i32 to index
    %c0_200 = arith.constant 0 : index
    %c0_201 = arith.constant 0 : index
    %558 = vector.load %arg14[%557, %c0_200, %c0_201] : memref<8x8x128xbf16, #tpu.memory_space<vmem>>, vector<1x8x128xbf16>
    %559 = vector.shape_cast %558 : vector<1x8x128xbf16> to vector<8x128xbf16>
    %560 = vector.shape_cast %556 : vector<8x128xbf16> to vector<1x8x128xbf16>
    tpu.vector_store %arg14[%557, %c0_200, %c0_201], %560 {strides = array<i32>} : memref<8x8x128xbf16, #tpu.memory_space<vmem>>, vector<1x8x128xbf16>,
    %561 = arith.truncf %555 : vector<8x128xf32> to vector<8x128xbf16>
    %562 = arith.index_cast %478 : i32 to index
    %c0_202 = arith.constant 0 : index
    %c0_203 = arith.constant 0 : index
    %563 = vector.load %arg15[%562, %c0_202, %c0_203] : memref<8x8x128xbf16, #tpu.memory_space<vmem>>, vector<1x8x128xbf16>
    %564 = vector.shape_cast %563 : vector<1x8x128xbf16> to vector<8x128xbf16>
    %565 = vector.shape_cast %561 : vector<8x128xbf16> to vector<1x8x128xbf16>
    tpu.vector_store %arg15[%562, %c0_202, %c0_203], %565 {strides = array<i32>} : memref<8x8x128xbf16, #tpu.memory_space<vmem>>, vector<1x8x128xbf16>,
    %c6_i32 = arith.constant 6 : i32
    %c7_i32_204 = arith.constant 7 : i32
    %566 = arith.subi %c7_i32_204, %c6_i32 : i32
    %567 = tpu.concatenate %524, %555 in 1 : vector<8x128xf32>, vector<8x128xf32> -> vector<8x256xf32>
    %568 = arith.truncf %567 : vector<8x256xf32> to vector<8x256xbf16>
    %cst_205 = arith.constant dense<0.000000e+00> : vector<8x1024xf32>
    %569 = tpu.matmul %568, %29, %cst_205 {dimension_numbers = #tpu.dot_dimension_numbers<[1], [0], [0], [1], [0, 0, 1, 1], [], []>} : vector<8x256xbf16>, vector<256x1024xbf16>, vector<8x1024xf32> -> vector<8x1024xf32>
    %570 = arith.index_cast %c6_i32 : i32 to index
    %c0_206 = arith.constant 0 : index
    %c0_207 = arith.constant 0 : index
    %571 = vector.load %arg12[%570, %c0_206, %c0_207] : memref<8x8x512xbf16, #tpu.memory_space<vmem>>, vector<1x8x512xbf16>
    %572 = vector.shape_cast %571 : vector<1x8x512xbf16> to vector<8x512xbf16>
    %573 = vector.extract_strided_slice %569 {offsets = [0, 0], sizes = [8, 512], strides = [1, 1]} : vector<8x1024xf32> to vector<8x512xf32>
    %574 = arith.extf %572 : vector<8x512xbf16> to vector<8x512xf32>
    %575 = arith.addf %574, %573 : vector<8x512xf32>
    %576 = arith.index_cast %566 : i32 to index
    %c0_208 = arith.constant 0 : index
    %c0_209 = arith.constant 0 : index
    %577 = vector.load %arg13[%576, %c0_208, %c0_209] : memref<8x8x512xbf16, #tpu.memory_space<vmem>>, vector<1x8x512xbf16>
    %578 = vector.shape_cast %577 : vector<1x8x512xbf16> to vector<8x512xbf16>
    %579 = vector.extract_strided_slice %569 {offsets = [0, 512], sizes = [8, 512], strides = [1, 1]} : vector<8x1024xf32> to vector<8x512xf32>
    %580 = arith.extf %578 : vector<8x512xbf16> to vector<8x512xf32>
    %581 = arith.addf %580, %579 : vector<8x512xf32>
    %582 = vector.extract_strided_slice %575 {offsets = [0, 0], sizes = [8, 128], strides = [1, 1]} : vector<8x512xf32> to vector<8x128xf32>
    %cst_210 = arith.constant 5.000000e-01 : f32
    %583 = vector.broadcast %cst_210 : f32 to vector<8x128xf32>
    %584 = arith.mulf %583, %582 : vector<8x128xf32>
    %585 = math.tanh %584 : vector<8x128xf32>
    %cst_211 = arith.constant 5.000000e-01 : f32
    %586 = vector.broadcast %cst_211 : f32 to vector<8x128xf32>
    %587 = arith.mulf %586, %585 : vector<8x128xf32>
    %cst_212 = arith.constant 5.000000e-01 : f32
    %588 = vector.broadcast %cst_212 : f32 to vector<8x128xf32>
    %589 = arith.addf %587, %588 : vector<8x128xf32>
    %590 = vector.extract_strided_slice %575 {offsets = [0, 128], sizes = [8, 128], strides = [1, 1]} : vector<8x512xf32> to vector<8x128xf32>
    %cst_213 = arith.constant 5.000000e-01 : f32
    %591 = vector.broadcast %cst_213 : f32 to vector<8x128xf32>
    %592 = arith.mulf %591, %590 : vector<8x128xf32>
    %593 = math.tanh %592 : vector<8x128xf32>
    %cst_214 = arith.constant 5.000000e-01 : f32
    %594 = vector.broadcast %cst_214 : f32 to vector<8x128xf32>
    %595 = arith.mulf %594, %593 : vector<8x128xf32>
    %cst_215 = arith.constant 5.000000e-01 : f32
    %596 = vector.broadcast %cst_215 : f32 to vector<8x128xf32>
    %597 = arith.addf %595, %596 : vector<8x128xf32>
    %598 = vector.extract_strided_slice %575 {offsets = [0, 256], sizes = [8, 128], strides = [1, 1]} : vector<8x512xf32> to vector<8x128xf32>
    %599 = math.tanh %598 : vector<8x128xf32>
    %600 = vector.extract_strided_slice %575 {offsets = [0, 384], sizes = [8, 128], strides = [1, 1]} : vector<8x512xf32> to vector<8x128xf32>
    %cst_216 = arith.constant 5.000000e-01 : f32
    %601 = vector.broadcast %cst_216 : f32 to vector<8x128xf32>
    %602 = arith.mulf %601, %600 : vector<8x128xf32>
    %603 = math.tanh %602 : vector<8x128xf32>
    %cst_217 = arith.constant 5.000000e-01 : f32
    %604 = vector.broadcast %cst_217 : f32 to vector<8x128xf32>
    %605 = arith.mulf %604, %603 : vector<8x128xf32>
    %cst_218 = arith.constant 5.000000e-01 : f32
    %606 = vector.broadcast %cst_218 : f32 to vector<8x128xf32>
    %607 = arith.addf %605, %606 : vector<8x128xf32>
    %608 = arith.mulf %597, %522 : vector<8x128xf32>
    %609 = arith.mulf %589, %599 : vector<8x128xf32>
    %610 = arith.addf %608, %609 : vector<8x128xf32>
    %611 = math.tanh %610 : vector<8x128xf32>
    %612 = arith.mulf %607, %611 : vector<8x128xf32>
    %613 = vector.extract_strided_slice %581 {offsets = [0, 0], sizes = [8, 128], strides = [1, 1]} : vector<8x512xf32> to vector<8x128xf32>
    %cst_219 = arith.constant 5.000000e-01 : f32
    %614 = vector.broadcast %cst_219 : f32 to vector<8x128xf32>
    %615 = arith.mulf %614, %613 : vector<8x128xf32>
    %616 = math.tanh %615 : vector<8x128xf32>
    %cst_220 = arith.constant 5.000000e-01 : f32
    %617 = vector.broadcast %cst_220 : f32 to vector<8x128xf32>
    %618 = arith.mulf %617, %616 : vector<8x128xf32>
    %cst_221 = arith.constant 5.000000e-01 : f32
    %619 = vector.broadcast %cst_221 : f32 to vector<8x128xf32>
    %620 = arith.addf %618, %619 : vector<8x128xf32>
    %621 = vector.extract_strided_slice %581 {offsets = [0, 128], sizes = [8, 128], strides = [1, 1]} : vector<8x512xf32> to vector<8x128xf32>
    %cst_222 = arith.constant 5.000000e-01 : f32
    %622 = vector.broadcast %cst_222 : f32 to vector<8x128xf32>
    %623 = arith.mulf %622, %621 : vector<8x128xf32>
    %624 = math.tanh %623 : vector<8x128xf32>
    %cst_223 = arith.constant 5.000000e-01 : f32
    %625 = vector.broadcast %cst_223 : f32 to vector<8x128xf32>
    %626 = arith.mulf %625, %624 : vector<8x128xf32>
    %cst_224 = arith.constant 5.000000e-01 : f32
    %627 = vector.broadcast %cst_224 : f32 to vector<8x128xf32>
    %628 = arith.addf %626, %627 : vector<8x128xf32>
    %629 = vector.extract_strided_slice %581 {offsets = [0, 256], sizes = [8, 128], strides = [1, 1]} : vector<8x512xf32> to vector<8x128xf32>
    %630 = math.tanh %629 : vector<8x128xf32>
    %631 = vector.extract_strided_slice %581 {offsets = [0, 384], sizes = [8, 128], strides = [1, 1]} : vector<8x512xf32> to vector<8x128xf32>
    %cst_225 = arith.constant 5.000000e-01 : f32
    %632 = vector.broadcast %cst_225 : f32 to vector<8x128xf32>
    %633 = arith.mulf %632, %631 : vector<8x128xf32>
    %634 = math.tanh %633 : vector<8x128xf32>
    %cst_226 = arith.constant 5.000000e-01 : f32
    %635 = vector.broadcast %cst_226 : f32 to vector<8x128xf32>
    %636 = arith.mulf %635, %634 : vector<8x128xf32>
    %cst_227 = arith.constant 5.000000e-01 : f32
    %637 = vector.broadcast %cst_227 : f32 to vector<8x128xf32>
    %638 = arith.addf %636, %637 : vector<8x128xf32>
    %639 = arith.mulf %628, %553 : vector<8x128xf32>
    %640 = arith.mulf %620, %630 : vector<8x128xf32>
    %641 = arith.addf %639, %640 : vector<8x128xf32>
    %642 = math.tanh %641 : vector<8x128xf32>
    %643 = arith.mulf %638, %642 : vector<8x128xf32>
    %644 = arith.truncf %612 : vector<8x128xf32> to vector<8x128xbf16>
    %645 = arith.index_cast %c6_i32 : i32 to index
    %c0_228 = arith.constant 0 : index
    %c0_229 = arith.constant 0 : index
    %646 = vector.load %arg14[%645, %c0_228, %c0_229] : memref<8x8x128xbf16, #tpu.memory_space<vmem>>, vector<1x8x128xbf16>
    %647 = vector.shape_cast %646 : vector<1x8x128xbf16> to vector<8x128xbf16>
    %648 = vector.shape_cast %644 : vector<8x128xbf16> to vector<1x8x128xbf16>
    tpu.vector_store %arg14[%645, %c0_228, %c0_229], %648 {strides = array<i32>} : memref<8x8x128xbf16, #tpu.memory_space<vmem>>, vector<1x8x128xbf16>,
    %649 = arith.truncf %643 : vector<8x128xf32> to vector<8x128xbf16>
    %650 = arith.index_cast %566 : i32 to index
    %c0_230 = arith.constant 0 : index
    %c0_231 = arith.constant 0 : index
    %651 = vector.load %arg15[%650, %c0_230, %c0_231] : memref<8x8x128xbf16, #tpu.memory_space<vmem>>, vector<1x8x128xbf16>
    %652 = vector.shape_cast %651 : vector<1x8x128xbf16> to vector<8x128xbf16>
    %653 = vector.shape_cast %649 : vector<8x128xbf16> to vector<1x8x128xbf16>
    tpu.vector_store %arg15[%650, %c0_230, %c0_231], %653 {strides = array<i32>} : memref<8x8x128xbf16, #tpu.memory_space<vmem>>, vector<1x8x128xbf16>,
    %c7_i32_232 = arith.constant 7 : i32
    %c7_i32_233 = arith.constant 7 : i32
    %654 = arith.subi %c7_i32_233, %c7_i32_232 : i32
    %655 = tpu.concatenate %612, %643 in 1 : vector<8x128xf32>, vector<8x128xf32> -> vector<8x256xf32>
    %656 = arith.truncf %655 : vector<8x256xf32> to vector<8x256xbf16>
    %cst_234 = arith.constant dense<0.000000e+00> : vector<8x1024xf32>
    %657 = tpu.matmul %656, %29, %cst_234 {dimension_numbers = #tpu.dot_dimension_numbers<[1], [0], [0], [1], [0, 0, 1, 1], [], []>} : vector<8x256xbf16>, vector<256x1024xbf16>, vector<8x1024xf32> -> vector<8x1024xf32>
    %658 = arith.index_cast %c7_i32_232 : i32 to index
    %c0_235 = arith.constant 0 : index
    %c0_236 = arith.constant 0 : index
    %659 = vector.load %arg12[%658, %c0_235, %c0_236] : memref<8x8x512xbf16, #tpu.memory_space<vmem>>, vector<1x8x512xbf16>
    %660 = vector.shape_cast %659 : vector<1x8x512xbf16> to vector<8x512xbf16>
    %661 = vector.extract_strided_slice %657 {offsets = [0, 0], sizes = [8, 512], strides = [1, 1]} : vector<8x1024xf32> to vector<8x512xf32>
    %662 = arith.extf %660 : vector<8x512xbf16> to vector<8x512xf32>
    %663 = arith.addf %662, %661 : vector<8x512xf32>
    %664 = arith.index_cast %654 : i32 to index
    %c0_237 = arith.constant 0 : index
    %c0_238 = arith.constant 0 : index
    %665 = vector.load %arg13[%664, %c0_237, %c0_238] : memref<8x8x512xbf16, #tpu.memory_space<vmem>>, vector<1x8x512xbf16>
    %666 = vector.shape_cast %665 : vector<1x8x512xbf16> to vector<8x512xbf16>
    %667 = vector.extract_strided_slice %657 {offsets = [0, 512], sizes = [8, 512], strides = [1, 1]} : vector<8x1024xf32> to vector<8x512xf32>
    %668 = arith.extf %666 : vector<8x512xbf16> to vector<8x512xf32>
    %669 = arith.addf %668, %667 : vector<8x512xf32>
    %670 = vector.extract_strided_slice %663 {offsets = [0, 0], sizes = [8, 128], strides = [1, 1]} : vector<8x512xf32> to vector<8x128xf32>
    %cst_239 = arith.constant 5.000000e-01 : f32
    %671 = vector.broadcast %cst_239 : f32 to vector<8x128xf32>
    %672 = arith.mulf %671, %670 : vector<8x128xf32>
    %673 = math.tanh %672 : vector<8x128xf32>
    %cst_240 = arith.constant 5.000000e-01 : f32
    %674 = vector.broadcast %cst_240 : f32 to vector<8x128xf32>
    %675 = arith.mulf %674, %673 : vector<8x128xf32>
    %cst_241 = arith.constant 5.000000e-01 : f32
    %676 = vector.broadcast %cst_241 : f32 to vector<8x128xf32>
    %677 = arith.addf %675, %676 : vector<8x128xf32>
    %678 = vector.extract_strided_slice %663 {offsets = [0, 128], sizes = [8, 128], strides = [1, 1]} : vector<8x512xf32> to vector<8x128xf32>
    %cst_242 = arith.constant 5.000000e-01 : f32
    %679 = vector.broadcast %cst_242 : f32 to vector<8x128xf32>
    %680 = arith.mulf %679, %678 : vector<8x128xf32>
    %681 = math.tanh %680 : vector<8x128xf32>
    %cst_243 = arith.constant 5.000000e-01 : f32
    %682 = vector.broadcast %cst_243 : f32 to vector<8x128xf32>
    %683 = arith.mulf %682, %681 : vector<8x128xf32>
    %cst_244 = arith.constant 5.000000e-01 : f32
    %684 = vector.broadcast %cst_244 : f32 to vector<8x128xf32>
    %685 = arith.addf %683, %684 : vector<8x128xf32>
    %686 = vector.extract_strided_slice %663 {offsets = [0, 256], sizes = [8, 128], strides = [1, 1]} : vector<8x512xf32> to vector<8x128xf32>
    %687 = math.tanh %686 : vector<8x128xf32>
    %688 = vector.extract_strided_slice %663 {offsets = [0, 384], sizes = [8, 128], strides = [1, 1]} : vector<8x512xf32> to vector<8x128xf32>
    %cst_245 = arith.constant 5.000000e-01 : f32
    %689 = vector.broadcast %cst_245 : f32 to vector<8x128xf32>
    %690 = arith.mulf %689, %688 : vector<8x128xf32>
    %691 = math.tanh %690 : vector<8x128xf32>
    %cst_246 = arith.constant 5.000000e-01 : f32
    %692 = vector.broadcast %cst_246 : f32 to vector<8x128xf32>
    %693 = arith.mulf %692, %691 : vector<8x128xf32>
    %cst_247 = arith.constant 5.000000e-01 : f32
    %694 = vector.broadcast %cst_247 : f32 to vector<8x128xf32>
    %695 = arith.addf %693, %694 : vector<8x128xf32>
    %696 = arith.mulf %685, %610 : vector<8x128xf32>
    %697 = arith.mulf %677, %687 : vector<8x128xf32>
    %698 = arith.addf %696, %697 : vector<8x128xf32>
    %699 = math.tanh %698 : vector<8x128xf32>
    %700 = arith.mulf %695, %699 : vector<8x128xf32>
    %701 = vector.extract_strided_slice %669 {offsets = [0, 0], sizes = [8, 128], strides = [1, 1]} : vector<8x512xf32> to vector<8x128xf32>
    %cst_248 = arith.constant 5.000000e-01 : f32
    %702 = vector.broadcast %cst_248 : f32 to vector<8x128xf32>
    %703 = arith.mulf %702, %701 : vector<8x128xf32>
    %704 = math.tanh %703 : vector<8x128xf32>
    %cst_249 = arith.constant 5.000000e-01 : f32
    %705 = vector.broadcast %cst_249 : f32 to vector<8x128xf32>
    %706 = arith.mulf %705, %704 : vector<8x128xf32>
    %cst_250 = arith.constant 5.000000e-01 : f32
    %707 = vector.broadcast %cst_250 : f32 to vector<8x128xf32>
    %708 = arith.addf %706, %707 : vector<8x128xf32>
    %709 = vector.extract_strided_slice %669 {offsets = [0, 128], sizes = [8, 128], strides = [1, 1]} : vector<8x512xf32> to vector<8x128xf32>
    %cst_251 = arith.constant 5.000000e-01 : f32
    %710 = vector.broadcast %cst_251 : f32 to vector<8x128xf32>
    %711 = arith.mulf %710, %709 : vector<8x128xf32>
    %712 = math.tanh %711 : vector<8x128xf32>
    %cst_252 = arith.constant 5.000000e-01 : f32
    %713 = vector.broadcast %cst_252 : f32 to vector<8x128xf32>
    %714 = arith.mulf %713, %712 : vector<8x128xf32>
    %cst_253 = arith.constant 5.000000e-01 : f32
    %715 = vector.broadcast %cst_253 : f32 to vector<8x128xf32>
    %716 = arith.addf %714, %715 : vector<8x128xf32>
    %717 = vector.extract_strided_slice %669 {offsets = [0, 256], sizes = [8, 128], strides = [1, 1]} : vector<8x512xf32> to vector<8x128xf32>
    %718 = math.tanh %717 : vector<8x128xf32>
    %719 = vector.extract_strided_slice %669 {offsets = [0, 384], sizes = [8, 128], strides = [1, 1]} : vector<8x512xf32> to vector<8x128xf32>
    %cst_254 = arith.constant 5.000000e-01 : f32
    %720 = vector.broadcast %cst_254 : f32 to vector<8x128xf32>
    %721 = arith.mulf %720, %719 : vector<8x128xf32>
    %722 = math.tanh %721 : vector<8x128xf32>
    %cst_255 = arith.constant 5.000000e-01 : f32
    %723 = vector.broadcast %cst_255 : f32 to vector<8x128xf32>
    %724 = arith.mulf %723, %722 : vector<8x128xf32>
    %cst_256 = arith.constant 5.000000e-01 : f32
    %725 = vector.broadcast %cst_256 : f32 to vector<8x128xf32>
    %726 = arith.addf %724, %725 : vector<8x128xf32>
    %727 = arith.mulf %716, %641 : vector<8x128xf32>
    %728 = arith.mulf %708, %718 : vector<8x128xf32>
    %729 = arith.addf %727, %728 : vector<8x128xf32>
    %730 = math.tanh %729 : vector<8x128xf32>
    %731 = arith.mulf %726, %730 : vector<8x128xf32>
    %732 = arith.truncf %700 : vector<8x128xf32> to vector<8x128xbf16>
    %733 = arith.index_cast %c7_i32_232 : i32 to index
    %c0_257 = arith.constant 0 : index
    %c0_258 = arith.constant 0 : index
    %734 = vector.load %arg14[%733, %c0_257, %c0_258] : memref<8x8x128xbf16, #tpu.memory_space<vmem>>, vector<1x8x128xbf16>
    %735 = vector.shape_cast %734 : vector<1x8x128xbf16> to vector<8x128xbf16>
    %736 = vector.shape_cast %732 : vector<8x128xbf16> to vector<1x8x128xbf16>
    tpu.vector_store %arg14[%733, %c0_257, %c0_258], %736 {strides = array<i32>} : memref<8x8x128xbf16, #tpu.memory_space<vmem>>, vector<1x8x128xbf16>,
    %737 = arith.truncf %731 : vector<8x128xf32> to vector<8x128xbf16>
    %738 = arith.index_cast %654 : i32 to index
    %c0_259 = arith.constant 0 : index
    %c0_260 = arith.constant 0 : index
    %739 = vector.load %arg15[%738, %c0_259, %c0_260] : memref<8x8x128xbf16, #tpu.memory_space<vmem>>, vector<1x8x128xbf16>
    %740 = vector.shape_cast %739 : vector<1x8x128xbf16> to vector<8x128xbf16>
    %741 = vector.shape_cast %737 : vector<8x128xbf16> to vector<1x8x128xbf16>
    tpu.vector_store %arg15[%738, %c0_259, %c0_260], %741 {strides = array<i32>} : memref<8x8x128xbf16, #tpu.memory_space<vmem>>, vector<1x8x128xbf16>,
    %c8_i32 = arith.constant 8 : i32
    %c0_261 = arith.constant 0 : index
    %c0_262 = arith.constant 0 : index
    %c0_263 = arith.constant 0 : index
    %742 = vector.load %arg16[%c0_261, %c0_262, %c0_263] : memref<4x8x128xf32, #tpu.memory_space<vmem>>, vector<1x8x128xf32>
    %743 = vector.shape_cast %742 : vector<1x8x128xf32> to vector<8x128xf32>
    %744 = vector.shape_cast %700 : vector<8x128xf32> to vector<1x8x128xf32>
    tpu.vector_store %arg16[%c0_261, %c0_262, %c0_263], %744 {strides = array<i32>} : memref<4x8x128xf32, #tpu.memory_space<vmem>>, vector<1x8x128xf32>,
    %c1_264 = arith.constant 1 : index
    %c0_265 = arith.constant 0 : index
    %c0_266 = arith.constant 0 : index
    %745 = vector.load %arg16[%c1_264, %c0_265, %c0_266] : memref<4x8x128xf32, #tpu.memory_space<vmem>>, vector<1x8x128xf32>
    %746 = vector.shape_cast %745 : vector<1x8x128xf32> to vector<8x128xf32>
    %747 = vector.shape_cast %698 : vector<8x128xf32> to vector<1x8x128xf32>
    tpu.vector_store %arg16[%c1_264, %c0_265, %c0_266], %747 {strides = array<i32>} : memref<4x8x128xf32, #tpu.memory_space<vmem>>, vector<1x8x128xf32>,
    %c2_267 = arith.constant 2 : index
    %c0_268 = arith.constant 0 : index
    %c0_269 = arith.constant 0 : index
    %748 = vector.load %arg16[%c2_267, %c0_268, %c0_269] : memref<4x8x128xf32, #tpu.memory_space<vmem>>, vector<1x8x128xf32>
    %749 = vector.shape_cast %748 : vector<1x8x128xf32> to vector<8x128xf32>
    %750 = vector.shape_cast %731 : vector<8x128xf32> to vector<1x8x128xf32>
    tpu.vector_store %arg16[%c2_267, %c0_268, %c0_269], %750 {strides = array<i32>} : memref<4x8x128xf32, #tpu.memory_space<vmem>>, vector<1x8x128xf32>,
    %c3_270 = arith.constant 3 : index
    %c0_271 = arith.constant 0 : index
    %c0_272 = arith.constant 0 : index
    %751 = vector.load %arg16[%c3_270, %c0_271, %c0_272] : memref<4x8x128xf32, #tpu.memory_space<vmem>>, vector<1x8x128xf32>
    %752 = vector.shape_cast %751 : vector<1x8x128xf32> to vector<8x128xf32>
    %753 = vector.shape_cast %729 : vector<8x128xf32> to vector<1x8x128xf32>
    tpu.vector_store %arg16[%c3_270, %c0_271, %c0_272], %753 {strides = array<i32>} : memref<4x8x128xf32, #tpu.memory_space<vmem>>, vector<1x8x128xf32>,
    %c0_273 = arith.constant 0 : index
    %c0_274 = arith.constant 0 : index
    %c0_275 = arith.constant 0 : index
    %754 = vector.load %arg14[%c0_273, %c0_274, %c0_275] : memref<8x8x128xbf16, #tpu.memory_space<vmem>>, vector<8x8x128xbf16>
    %755 = vector.shape_cast %754 : vector<8x8x128xbf16> to vector<64x128xbf16>
    %c0_276 = arith.constant 0 : index
    %c0_277 = arith.constant 0 : index
    %c0_278 = arith.constant 0 : index
    %756 = vector.load %arg15[%c0_276, %c0_277, %c0_278] : memref<8x8x128xbf16, #tpu.memory_space<vmem>>, vector<8x8x128xbf16>
    %757 = vector.shape_cast %756 : vector<8x8x128xbf16> to vector<64x128xbf16>
    %c0_279 = arith.constant 0 : index
    %c0_280 = arith.constant 0 : index
    %758 = vector.load %arg7[%c0_279, %c0_280] : memref<128x128xbf16, #tpu.memory_space<vmem>>, vector<128x128xbf16>
    %cst_281 = arith.constant dense<0.000000e+00> : vector<64x128xf32>
    %759 = tpu.matmul %755, %758, %cst_281 {dimension_numbers = #tpu.dot_dimension_numbers<[1], [0], [0], [1], [0, 0, 1, 1], [], []>} : vector<64x128xbf16>, vector<128x128xbf16>, vector<64x128xf32> -> vector<64x128xf32>
    %c0_282 = arith.constant 0 : index
    %c0_283 = arith.constant 0 : index
    %760 = vector.load %arg9[%c0_282, %c0_283] : memref<1x128xf32, #tpu.memory_space<vmem>>, vector<1x128xf32>
    %761 = vector.broadcast %760 : vector<1x128xf32> to vector<64x128xf32>
    %762 = arith.addf %759, %761 : vector<64x128xf32>
    %c0_284 = arith.constant 0 : index
    %c0_285 = arith.constant 0 : index
    %763 = vector.load %arg8[%c0_284, %c0_285] : memref<128x128xbf16, #tpu.memory_space<vmem>>, vector<128x128xbf16>
    %cst_286 = arith.constant dense<0.000000e+00> : vector<64x128xf32>
    %764 = tpu.matmul %757, %763, %cst_286 {dimension_numbers = #tpu.dot_dimension_numbers<[1], [0], [0], [1], [0, 0, 1, 1], [], []>} : vector<64x128xbf16>, vector<128x128xbf16>, vector<64x128xf32> -> vector<64x128xf32>
    %765 = vector.shape_cast %762 : vector<64x128xf32> to vector<8x8x128xf32>
    %c0_287 = arith.constant 0 : index
    %c0_288 = arith.constant 0 : index
    %c0_289 = arith.constant 0 : index
    %766 = vector.load %arg10[%c0_287, %c0_288, %c0_289] : memref<8x8x128xf32, #tpu.memory_space<vmem>>, vector<8x8x128xf32>
    tpu.vector_store %arg10[%c0_287, %c0_288, %c0_289], %765 {strides = array<i32>} : memref<8x8x128xf32, #tpu.memory_space<vmem>>, vector<8x8x128xf32>,
    %767 = vector.shape_cast %764 : vector<64x128xf32> to vector<8x8x128xf32>
    %c0_290 = arith.constant 0 : index
    %c0_291 = arith.constant 0 : index
    %c0_292 = arith.constant 0 : index
    %768 = vector.load %arg11[%c0_290, %c0_291, %c0_292] : memref<8x8x128xf32, #tpu.memory_space<vmem>>, vector<8x8x128xf32>
    tpu.vector_store %arg11[%c0_290, %c0_291, %c0_292], %767 {strides = array<i32>} : memref<8x8x128xf32, #tpu.memory_space<vmem>>, vector<8x8x128xf32>,
    return
  }
  func.func @transform_0(%arg0: i32, %arg1: i32) -> (i32, i32, i32) {
    %c0_i32 = arith.constant 0 : i32
    %c0_i32_0 = arith.constant 0 : i32
    return %arg1, %arg0, %c0_i32 : i32, i32, i32
  }
  func.func @transform_1(%arg0: i32, %arg1: i32) -> (i32, i32, i32) {
    %c0_i32 = arith.constant 0 : i32
    %0 = arith.subi %c0_i32, %arg1 : i32
    %c0_i32_0 = arith.constant 0 : i32
    %c0_i32_1 = arith.constant 0 : i32
    return %0, %arg0, %c0_i32_0 : i32, i32, i32
  }
  func.func @transform_2(%arg0: i32, %arg1: i32) -> (i32, i32, i32) {
    %c0_i32 = arith.constant 0 : i32
    %c0_i32_0 = arith.constant 0 : i32
    %c0_i32_1 = arith.constant 0 : i32
    %c0_i32_2 = arith.constant 0 : i32
    return %c0_i32, %c0_i32_0, %c0_i32_1 : i32, i32, i32
  }
  func.func @transform_3(%arg0: i32, %arg1: i32) -> (i32, i32, i32) {
    %c0_i32 = arith.constant 0 : i32
    %c0_i32_0 = arith.constant 0 : i32
    %c0_i32_1 = arith.constant 0 : i32
    %c0_i32_2 = arith.constant 0 : i32
    return %c0_i32, %c0_i32_0, %c0_i32_1 : i32, i32, i32
  }
  func.func @transform_4(%arg0: i32, %arg1: i32) -> (i32, i32) {
    %c0_i32 = arith.constant 0 : i32
    %c0_i32_0 = arith.constant 0 : i32
    %c0_i32_1 = arith.constant 0 : i32
    return %c0_i32, %c0_i32_0 : i32, i32
  }
  func.func @transform_5(%arg0: i32, %arg1: i32) -> (i32, i32) {
    %c0_i32 = arith.constant 0 : i32
    %c0_i32_0 = arith.constant 0 : i32
    %c0_i32_1 = arith.constant 0 : i32
    return %c0_i32, %c0_i32_0 : i32, i32
  }
  func.func @transform_6(%arg0: i32, %arg1: i32) -> (i32, i32) {
    %c0_i32 = arith.constant 0 : i32
    %c0_i32_0 = arith.constant 0 : i32
    %c0_i32_1 = arith.constant 0 : i32
    return %c0_i32, %c0_i32_0 : i32, i32
  }
  func.func @transform_7(%arg0: i32, %arg1: i32) -> (i32, i32) {
    %c0_i32 = arith.constant 0 : i32
    %c0_i32_0 = arith.constant 0 : i32
    %c0_i32_1 = arith.constant 0 : i32
    return %c0_i32, %c0_i32_0 : i32, i32
  }
  func.func @transform_8(%arg0: i32, %arg1: i32) -> (i32, i32, i32) {
    %c0_i32 = arith.constant 0 : i32
    %c0_i32_0 = arith.constant 0 : i32
    return %arg1, %arg0, %c0_i32 : i32, i32, i32
  }
  func.func @transform_9(%arg0: i32, %arg1: i32) -> (i32, i32, i32) {
    %c0_i32 = arith.constant 0 : i32
    %0 = arith.subi %c0_i32, %arg1 : i32
    %c0_i32_0 = arith.constant 0 : i32
    %c0_i32_1 = arith.constant 0 : i32
    return %0, %arg0, %c0_i32_0 : i32, i32, i32
  }
}

</mosaic_0001>

<bundles_post_ra>
// kernel: bidirectional_lstm.1
= control target key start
LH: loop header
LB: loop body
LE: loop exit
PB: predicated region body
PF: predicated region fallthrough
CT: control target
= control target key end

     0   :  { %vm134_vm0 = vcmask 130048   ;;  %s7608_s2 = inlined_call_operand.vmem [shape: bf16[2,16,512], index: 2, kind: input, shape index: {}]   ;;  %s7609_s0 = inlined_call_operand.vmem [shape: f32[8,8,16], index: 0, kind: input, shape index: {}, may-alias: {0,1}]   ;;  %s7610_s4 = inlined_call_operand.vmem [shape: bf16[256,1024], index: 4, kind: input, shape index: {}]   ;;  %s7611_s1 = inlined_call_operand.vmem [shape: f32[8,8,16], index: 1, kind: input, shape index: {}, may-alias: {0,1}]   ;;  %s7612_s3 = inlined_call_operand.vmem [shape: f32[2,1,512], index: 3, kind: input, shape index: {}]   ;;  %s7613_s5 = inlined_call_operand.vmem [shape: bf16[128,128], index: 5, kind: input, shape index: {}]   ;;  %s7614_s7 = inlined_call_operand.vmem [shape: f32[1,128], index: 7, kind: input, shape index: {}]   ;;  %s7615_s6 = inlined_call_operand.vmem [shape: bf16[128,128], index: 6, kind: input, shape index: {}]   ;;  %s7616_s8 = inlined_call_operand.vmem [shape: f32[8,8,128], index: 8, kind: output, shape index: {0}]   ;;  %s7617_s9 = inlined_call_operand.vmem [shape: f32[8,8,128], index: 9, kind: output, shape index: {1}]  }
   0x1   :  { %v3752_v0 = vld [vmem:[%s7608_s2] sm:$0xf]  ;;  %v4429_v1 = vld [vmem:[%s7608_s2 + $0xc] sm:$0xf0]  ;;  %v4427_v2 = vld [vmem:[%s7608_s2 + $0x4] sm:$0xf] }
   0x2   :  { %v3753_v3 = vor.u32 %v4429_v1, %v3752_v0  ;;  %v3754_v4 = vld [vmem:[%s7608_s2 + $0x10] sm:$0xf0]  ;;  %v76_v5 = vld [vmem:[%s7609_s0] sm:$0xff]  ;;  %v77_v6 = vld [vmem:[%s7609_s0 + $0x8] sm:$0xff] }
   0x3   :  { %v3757_v7 = vor.u32 %v4427_v2, %v3754_v4  ;;  %v4820_v8 = vpack.c.bf16 %v77_v6, %v76_v5  ;;  %v78_v9 = vld [vmem:[%s7609_s0 + $0x10] sm:$0xff]  ;;  %v79_v10 = vld [vmem:[%s7609_s0 + $0x18] sm:$0xff]  ;;  %v3789_v11 = vld [vmem:[%s7608_s2 + $0x20] sm:$0xf] }
   0x4   :  { %154 = vmatpush.bf16.msra.mxu0 %v3753_v3  ;;  %4587 = vmatpush.bf16.msra.mxu2 %v3753_v3  ;;  %v4831_v12 = vpack.c.bf16 %v79_v10, %v78_v9  ;;  %v4433_v13 = vld [vmem:[%s7608_s2 + $0x2c] sm:$0xf0]  ;;  %v4431_v14 = vld [vmem:[%s7608_s2 + $0x24] sm:$0xf]  ;;  %v3791_v15 = vld [vmem:[%s7608_s2 + $0x30] sm:$0xf0] }
   0x5   :  { %183 = vmatpush.bf16.msra.mxu1 %v3757_v7  ;;  %4588 = vmatpush.bf16.msra.mxu3 %v3757_v7  ;;  %v3790_v16 = vor.u32 %v4433_v13, %v3789_v11  ;;  %v3794_v17 = vor.u32 %v4431_v14, %v3791_v15  ;;  %v4045_v18 = vld [vmem:[%s7610_s4 + $0x1c0] sm:$0xf]  ;;  %v3760_v32 = vld [vmem:[%s7608_s2 + $0x8] sm:$0xf]  ;;  %v4430_v33 = vld [vmem:[%s7608_s2 + $0x14] sm:$0xf0] }
   0x6   :  { %v4495_v19 = vld [vmem:[%s7610_s4 + $0x1dc] sm:$0xf0]  ;;  %v4428_v34 = vld [vmem:[%s7608_s2 + $0xc] sm:$0xf]  ;;  %v3761_v37 = vor.u32 %v4430_v33, %v3760_v32  ;;  %v3762_v38 = vld [vmem:[%s7608_s2 + $0x18] sm:$0xf0] }
   0x7   :  { %3766 = vmatmul.msk.bf16.vlgmr.msra.gmra.mxu0 %vm134_vm0, %v4820_v8  ;;  %3767 = vmatmul.msk.bf16.vlgmr.msra.gmra.mxu2 %vm134_vm0, %v4831_v12  ;;  %v4301_v20 = vld [vmem:[%s7610_s4 + $0x3c0] sm:$0xf]  ;;  %v4859_v21 = vor.u32 %v4495_v19, %v4045_v18  ;;  %v3765_v39 = vor.u32 %v4428_v34, %v3762_v38  ;;  %v81_v42 = vld [vmem:[%s7609_s0 + $0x28] sm:$0xff]  ;;  %v82_v6 = vld [vmem:[%s7609_s0 + $0x30] sm:$0xff] }
   0x8   :  { %3770 = vmatmul.msk.bf16.vlgmr.msra.gmra.mxu1 %vm134_vm0, %v4820_v8  ;;  %3771 = vmatmul.msk.bf16.vlgmr.msra.gmra.mxu3 %vm134_vm0, %v4831_v12  ;;  %v4559_v22 = vld [vmem:[%s7610_s4 + $0x3dc] sm:$0xf0]  ;;  %v89_v44 = vld [vmem:[%s7611_s1 + $0x8] sm:$0xff]  ;;  %v83_v7 = vld [vmem:[%s7609_s0 + $0x38] sm:$0xff] }
   0x9   :  { %318 = vmatpush.bf16.msrb.mxu0 %v3790_v16  ;;  %347 = vmatpush.bf16.msrb.mxu1 %v3794_v17  ;;  %7870 = vst [vmem:[#allocation7_spill] sm:$0xff] %v4859_v21  ;;  %v4013_v23 = vld [vmem:[%s7610_s4 + $0x180] sm:$0xf]  ;;  %v4870_v25 = vor.u32 %v4559_v22, %v4301_v20  ;;  %v90_v9 = vld [vmem:[%s7611_s1 + $0x10] sm:$0xff]  ;;  %v91_v10 = vld [vmem:[%s7611_s1 + $0x18] sm:$0xff]  ;;  %v5022_v14 = vpack.c.bf16 %v83_v7, %v82_v6 }
   0xa   :  { %v4487_v24 = vld [vmem:[%s7610_s4 + $0x19c] sm:$0xf0]  ;;  %212 = vmatpush.bf16.msrb.mxu2 %v3761_v37  ;;  %241 = vmatpush.bf16.msrb.mxu3 %v3765_v39  ;;  %v5024_v15 = vpack.c.bf16 %v91_v10, %v90_v9  ;;  %v4488_v32 = vld [vmem:[%s7610_s4 + $0x1a4] sm:$0xf0] }
   0xb   :  { %7871 = vst [vmem:[#allocation8_spill] sm:$0xff] %v4870_v25  ;;  %v4269_v26 = vld [vmem:[%s7610_s4 + $0x380] sm:$0xf]  ;;  %v4879_v28 = vor.u32 %v4487_v24, %v4013_v23  ;;  %v4053_v23 = vld [vmem:[%s7610_s4 + $0x1c8] sm:$0xf] }
   0xc   :  { %v4551_v27 = vld [vmem:[%s7610_s4 + $0x39c] sm:$0xf0]  ;;  %v4496_v24 = vld [vmem:[%s7610_s4 + $0x1e4] sm:$0xf0] }
   0xd   :  { %1268 = vmatpush.bf16.msra.mxu0 %v4859_v21  ;;  %7872 = vst [vmem:[#allocation9_spill] sm:$0xff] %v4879_v28  ;;  %v3981_v29 = vld [vmem:[%s7610_s4 + $0x140] sm:$0xf]  ;;  %1281 = vmatpush.bf16.msra.mxu1 %v4870_v25  ;;  %v4888_v31 = vor.u32 %v4551_v27, %v4269_v26  ;;  %v4309_v26 = vld [vmem:[%s7610_s4 + $0x3c8] sm:$0xf]  ;;  %v5061_v27 = vor.u32 %v4496_v24, %v4053_v23 }
   0xe   :  { %v4479_v30 = vld [vmem:[%s7610_s4 + $0x15c] sm:$0xf0]  ;;  %v4277_v34 = vld [vmem:[%s7610_s4 + $0x388] sm:$0xf] }
   0xf   :  { %7873 = vst [vmem:[#allocation10_spill] sm:$0xff] %v4888_v31  ;;  %v4237_v35 = vld [vmem:[%s7610_s4 + $0x340] sm:$0xf]  ;;  %v4912_v41 = vor.u32 %v4479_v30, %v3981_v29  ;;  %v4560_v29 = vld [vmem:[%s7610_s4 + $0x3e4] sm:$0xf0] }
  0x10   :  { %v4543_v36 = vld [vmem:[%s7610_s4 + $0x35c] sm:$0xf0]  ;;  %7886 = vst [vmem:[#allocation23_spill] sm:$0xff] %v5061_v27  ;;  %v4021_v30 = vld [vmem:[%s7610_s4 + $0x188] sm:$0xf]  ;;  %v5074_v33 = vor.u32 %v4560_v29, %v4309_v26  ;;  %v94_v29 = vld [vmem:[%s7611_s1 + $0x30] sm:$0xff] }
  0x11   :  { %v80_v40 = vld [vmem:[%s7609_s0 + $0x20] sm:$0xff]  ;;  %1269 = vmatpush.bf16.msra.mxu0 %v4879_v28  ;;  %7874 = vst [vmem:[#allocation11_spill] sm:$0xff] %v4912_v41  ;;  %1282 = vmatpush.bf16.msra.mxu1 %v4888_v31  ;;  %v4924_v45 = vor.u32 %v4543_v36, %v4237_v35  ;;  %v4552_v35 = vld [vmem:[%s7610_s4 + $0x3a4] sm:$0xf0]  ;;  %v5083_v36 = vor.u32 %v4488_v32, %v4021_v30  ;;  %v95_v30 = vld [vmem:[%s7611_s1 + $0x38] sm:$0xff] }
  0x12   :  { %v88_v43 = vld [vmem:[%s7611_s1] sm:$0xff]  ;;  %v4926_v46 = vpack.c.bf16 %v81_v42, %v80_v40  ;;  %7887 = vst [vmem:[#allocation24_spill] sm:$0xff] %v5074_v33  ;;  %v5086_v37 = vor.u32 %v4552_v35, %v4277_v34  ;;  %v3989_v38 = vld [vmem:[%s7610_s4 + $0x148] sm:$0xf] }
  0x13   :  { %7875 = vst [vmem:[#allocation12_spill] sm:$0xff] %v4924_v45  ;;  %v4928_v47 = vpack.c.bf16 %v89_v44, %v88_v43  ;;  %v3949_v48 = vld [vmem:[%s7610_s4 + $0x100] sm:$0xf]  ;;  %v4480_v39 = vld [vmem:[%s7610_s4 + $0x164] sm:$0xf0] }
  0x14   :  { %v4471_v49 = vld [vmem:[%s7610_s4 + $0x11c] sm:$0xf0]  ;;  %7888 = vst [vmem:[#allocation25_spill] sm:$0xff] %v5083_v36  ;;  %v4245_v40 = vld [vmem:[%s7610_s4 + $0x348] sm:$0xf]  ;;  %v5101_v43 = vor.u32 %v4480_v39, %v3989_v38  ;;  %v5215_v39 = vpack.c.bf16 %v95_v30, %v94_v29 }
  0x15   :  { %1270 = vmatpush.bf16.msra.mxu0 %v4912_v41  ;;  %1283 = vmatpush.bf16.msra.mxu1 %v4924_v45  ;;  %v4205_v50 = vld [vmem:[%s7610_s4 + $0x300] sm:$0xf]  ;;  %v4948_v52 = vor.u32 %v4471_v49, %v3949_v48  ;;  %7889 = vst [vmem:[#allocation26_spill] sm:$0xff] %v5086_v37  ;;  %v4544_v42 = vld [vmem:[%s7610_s4 + $0x364] sm:$0xf0] }
  0x16   :  { %v4535_v51 = vld [vmem:[%s7610_s4 + $0x31c] sm:$0xf0]  ;;  %7890 = vst [vmem:[#allocation27_spill] sm:$0xff] %v5101_v43  ;;  %v5104_v44 = vor.u32 %v4544_v42, %v4245_v40  ;;  %v3957_v48 = vld [vmem:[%s7610_s4 + $0x108] sm:$0xf] }
  0x17   :  { %3768 = vmatmul.msk.bf16.gmra.mxu2 %vm134_vm0, %v4926_v46  ;;  %3803 = vmatmul.msk.bf16.vlgmr.msrb.gmra.mxu0 %vm134_vm0, %v4928_v47  ;;  %7876 = vst [vmem:[#allocation13_spill] sm:$0xff] %v4948_v52  ;;  %v4950_v53 = vor.u32 %v4535_v51, %v4205_v50  ;;  %v3917_v54 = vld [vmem:[%s7610_s4 + $0xc0] sm:$0xf]  ;;  %v4472_v49 = vld [vmem:[%s7610_s4 + $0x124] sm:$0xf0] }
  0x18   :  { %3772 = vmatmul.msk.bf16.gmra.mxu3 %vm134_vm0, %v4926_v46  ;;  %3807 = vmatmul.msk.bf16.vlgmr.msrb.gmra.mxu1 %vm134_vm0, %v4928_v47  ;;  %v4463_v55 = vld [vmem:[%s7610_s4 + $0xdc] sm:$0xf0]  ;;  %7891 = vst [vmem:[#allocation28_spill] sm:$0xff] %v5104_v44  ;;  %v93_v51 = vld [vmem:[%s7611_s1 + $0x28] sm:$0xff] }
  0x19   :  { %7877 = vst [vmem:[#allocation14_spill] sm:$0xff] %v4950_v53  ;;  %v4173_v56 = vld [vmem:[%s7610_s4 + $0x2c0] sm:$0xf]  ;;  %1271 = vmatpush.bf16.msra.mxu0 %v4948_v52  ;;  %1284 = vmatpush.bf16.msra.mxu1 %v4950_v53  ;;  %v4967_v57 = vor.u32 %v4463_v55, %v3917_v54  ;;  %v5119_v54 = vor.u32 %v4472_v49, %v3957_v48  ;;  %v4213_v55 = vld [vmem:[%s7610_s4 + $0x308] sm:$0xf] }
  0x1a   :  { %v4527_v58 = vld [vmem:[%s7610_s4 + $0x2dc] sm:$0xf0]  ;;  %v4520_v9 = vld [vmem:[%s7610_s4 + $0x2a4] sm:$0xf0]  ;;  %v4434_v48 = vld [vmem:[%s7608_s2 + $0x34] sm:$0xf0] }
  0x1b   :  { %7878 = vst [vmem:[#allocation15_spill] sm:$0xff] %v4967_v57  ;;  %v3885_v59 = vld [vmem:[%s7610_s4 + $0x80] sm:$0xf]  ;;  %v4975_v60 = vor.u32 %v4527_v58, %v4173_v56  ;;  %v4536_v56 = vld [vmem:[%s7610_s4 + $0x324] sm:$0xf0] }
  0x1c   :  { %v4455_v61 = vld [vmem:[%s7610_s4 + $0x9c] sm:$0xf0]  ;;  %7892 = vst [vmem:[#allocation29_spill] sm:$0xff] %v5119_v54  ;;  %v3861_v10 = vld [vmem:[%s7610_s4 + $0x48] sm:$0xf] }
  0x1d   :  { %7879 = vst [vmem:[#allocation16_spill] sm:$0xff] %v4975_v60  ;;  %v4141_v62 = vld [vmem:[%s7610_s4 + $0x280] sm:$0xf]  ;;  %1272 = vmatpush.bf16.msra.mxu0 %v4967_v57  ;;  %1285 = vmatpush.bf16.msra.mxu1 %v4975_v60  ;;  %v4988_v0 = vor.u32 %v4455_v61, %v3885_v59  ;;  %v5130_v59 = vor.u32 %v4536_v56, %v4213_v55  ;;  %v3925_v61 = vld [vmem:[%s7610_s4 + $0xc8] sm:$0xf]  ;;  %v7618_v55 = vmov 0.0|0.0  }
  0x1e   :  { %v4519_v63 = vld [vmem:[%s7610_s4 + $0x29c] sm:$0xf0]  ;;  %v4512_v23 = vld [vmem:[%s7610_s4 + $0x264] sm:$0xf0]  ;;  %v4432_v49 = vld [vmem:[%s7608_s2 + $0x2c] sm:$0xf] }
  0x1f   :  { %7880 = vst [vmem:[#allocation17_spill] sm:$0xff] %v4988_v0  ;;  %v4990_v1 = vor.u32 %v4519_v63, %v4141_v62  ;;  %v3853_v2 = vld [vmem:[%s7610_s4 + $0x40] sm:$0xf]  ;;  %v4464_v62 = vld [vmem:[%s7610_s4 + $0xe4] sm:$0xf0] }
  0x20   :  { %v4447_v3 = vld [vmem:[%s7610_s4 + $0x5c] sm:$0xf0]  ;;  %7893 = vst [vmem:[#allocation30_spill] sm:$0xff] %v5130_v59  ;;  %v4181_v63 = vld [vmem:[%s7610_s4 + $0x2c8] sm:$0xf] }
  0x21   :  { %7881 = vst [vmem:[#allocation18_spill] sm:$0xff] %v4990_v1  ;;  %v4109_v4 = vld [vmem:[%s7610_s4 + $0x240] sm:$0xf]  ;;  %1273 = vmatpush.bf16.msra.mxu0 %v4988_v0  ;;  %1286 = vmatpush.bf16.msra.mxu1 %v4990_v1  ;;  %v5018_v11 = vor.u32 %v4447_v3, %v3853_v2  ;;  %v5146_v2 = vor.u32 %v4464_v62, %v3925_v61  ;;  %v4528_v3 = vld [vmem:[%s7610_s4 + $0x2e4] sm:$0xf0] }
  0x22   :  { %v4511_v5 = vld [vmem:[%s7610_s4 + $0x25c] sm:$0xf0]  ;;  %v5162_v6 = vor.u32 %v4528_v3, %v4181_v63  ;;  %v3829_v24 = vld [vmem:[%s7610_s4 + $0x8] sm:$0xf]  ;;  %v4491_v56 = vld [vmem:[%s7610_s4 + $0x1c4] sm:$0xf] }
  0x23   :  { %7882 = vst [vmem:[#allocation19_spill] sm:$0xff] %v5018_v11  ;;  %v5020_v13 = vor.u32 %v4511_v5, %v4109_v4  ;;  %v3821_v16 = vld [vmem:[%s7610_s4] sm:$0xf]  ;;  %v3893_v4 = vld [vmem:[%s7610_s4 + $0x88] sm:$0xf] }
  0x24   :  { %v4439_v17 = vld [vmem:[%s7610_s4 + $0x1c] sm:$0xf0]  ;;  %7894 = vst [vmem:[#allocation31_spill] sm:$0xff] %v5146_v2  ;;  %v4456_v5 = vld [vmem:[%s7610_s4 + $0xa4] sm:$0xf0] }
  0x25   :  { %7883 = vst [vmem:[#allocation20_spill] sm:$0xff] %v5020_v13  ;;  %1274 = vmatpush.bf16.msra.mxu0 %v5018_v11  ;;  %1287 = vmatpush.bf16.msra.mxu1 %v5020_v13  ;;  %v4077_v18 = vld [vmem:[%s7610_s4 + $0x200] sm:$0xf]  ;;  %v5044_v20 = vor.u32 %v4439_v17, %v3821_v16  ;;  %v5165_v7 = vor.u32 %v4456_v5, %v3893_v4  ;;  %v4448_v16 = vld [vmem:[%s7610_s4 + $0x64] sm:$0xf0] }
  0x26   :  { %v4503_v19 = vld [vmem:[%s7610_s4 + $0x21c] sm:$0xf0]  ;;  %7895 = vst [vmem:[#allocation32_spill] sm:$0xff] %v5162_v6  ;;  %v4440_v26 = vld [vmem:[%s7610_s4 + $0x24] sm:$0xf0] }
  0x27   :  { %3769 = vmatmul.msk.bf16.gmra.mxu2 %vm134_vm0, %v5022_v14  ;;  %3804 = vmatmul.msk.bf16.gmra.mxu0 %vm134_vm0, %v5024_v15  ;;  %7884 = vst [vmem:[#allocation21_spill] sm:$0xff] %v5044_v20  ;;  %v5046_v22 = vor.u32 %v4503_v19, %v4077_v18  ;;  %v92_v50 = vld [vmem:[%s7611_s1 + $0x20] sm:$0xff]  ;;  %v5183_v18 = vor.u32 %v4448_v16, %v3861_v10  ;;  %v4117_v19 = vld [vmem:[%s7610_s4 + $0x248] sm:$0xf]  ;;  %v4061_v3 = vld [vmem:[%s7610_s4 + $0x1d0] sm:$0xf] }
  0x28   :  { %3773 = vmatmul.msk.bf16.gmra.mxu3 %vm134_vm0, %v5022_v14  ;;  %3808 = vmatmul.msk.bf16.gmra.mxu1 %vm134_vm0, %v5024_v15  ;;  %v5127_v58 = vpack.c.bf16 %v93_v51, %v92_v50  ;;  %7896 = vst [vmem:[#allocation33_spill] sm:$0xff] %v5165_v7  ;;  %v5204_v32 = vor.u32 %v4512_v23, %v4117_v19  ;;  %v4085_v35 = vld [vmem:[%s7610_s4 + $0x208] sm:$0xf]  ;;  %v4047_v61 = vld [vmem:[%s7610_s4 + $0x1e0] sm:$0xf0] }
  0x29   :  { %7885 = vst [vmem:[#allocation22_spill] sm:$0xff] %v5046_v22  ;;  %1275 = vmatpush.bf16.msra.mxu0 %v5044_v20  ;;  %1288 = vmatpush.bf16.msra.mxu1 %v5046_v22  ;;  %v5207_v34 = vor.u32 %v4440_v26, %v3829_v24  ;;  %v4504_v38 = vld [vmem:[%s7610_s4 + $0x224] sm:$0xf0]  ;;  %v4555_v62 = vld [vmem:[%s7610_s4 + $0x3c4] sm:$0xf]  ;;  %v5257_v63 = vor.u32 %v4491_v56, %v4047_v61 }
  0x2a   :  { %7898 = vst [vmem:[#allocation35_spill] sm:$0xff] %v5183_v18  ;;  %v5218_v40 = vor.u32 %v4504_v38, %v4085_v35  ;;  %v3797_v42 = vld [vmem:[%s7608_s2 + $0x28] sm:$0xf]  ;;  %v4497_v4 = vld [vmem:[%s7610_s4 + $0x1ec] sm:$0xf0] }
  0x2b   :  { %7899 = vst [vmem:[#allocation36_spill] sm:$0xff] %v5204_v32  ;;  %v3798_v50 = vor.u32 %v4434_v48, %v3797_v42  ;;  %v4561_v10 = vld [vmem:[%s7610_s4 + $0x3ec] sm:$0xf0]  ;;  %v4483_v16 = vld [vmem:[%s7610_s4 + $0x184] sm:$0xf] }
  0x2c   :  { %7900 = vst [vmem:[#allocation37_spill] sm:$0xff] %v5207_v34  ;;  %v4015_v23 = vld [vmem:[%s7610_s4 + $0x1a0] sm:$0xf0]  ;;  %v4029_v35 = vld [vmem:[%s7610_s4 + $0x190] sm:$0xf] }
  0x2d   :  { %1320 = vmatpush.bf16.msrb.mxu0 %v5061_v27  ;;  %1333 = vmatpush.bf16.msrb.mxu1 %v5074_v33  ;;  %7901 = vst [vmem:[#allocation38_spill] sm:$0xff] %v5218_v40  ;;  %v4547_v24 = vld [vmem:[%s7610_s4 + $0x384] sm:$0xf]  ;;  %v5295_v29 = vor.u32 %v4483_v16, %v4015_v23  ;;  %v4489_v38 = vld [vmem:[%s7610_s4 + $0x1ac] sm:$0xf0] }
  0x2e   :  { %376 = vmatpush.bf16.msra.mxu2 %v3798_v50  ;;  %7902 = vst [vmem:[#allocation39_spill] sm:$0xff] %v5257_v63  ;;  %v4271_v26 = vld [vmem:[%s7610_s4 + $0x3a0] sm:$0xf0]  ;;  %v4285_v42 = vld [vmem:[%s7610_s4 + $0x390] sm:$0xf]  ;;  %v5309_v48 = vor.u32 %v4489_v38, %v4029_v35 }
  0x2f   :  { %7906 = vst [vmem:[#allocation43_spill] sm:$0xff] %v5295_v29  ;;  %v5297_v30 = vor.u32 %v4547_v24, %v4271_v26  ;;  %v4539_v56 = vld [vmem:[%s7610_s4 + $0x344] sm:$0xf]  ;;  %v4545_v16 = vld [vmem:[%s7610_s4 + $0x36c] sm:$0xf0] }
  0x30   :  { %7908 = vst [vmem:[#allocation45_spill] sm:$0xff] %v5309_v48  ;;  %v4467_v24 = vld [vmem:[%s7610_s4 + $0x104] sm:$0xf] }
  0x31   :  { %1321 = vmatpush.bf16.msrb.mxu0 %v5083_v36  ;;  %1334 = vmatpush.bf16.msrb.mxu1 %v5086_v37  ;;  %7907 = vst [vmem:[#allocation44_spill] sm:$0xff] %v5297_v30  ;;  %v3951_v26 = vld [vmem:[%s7610_s4 + $0x120] sm:$0xf0] }
  0x32   :  { %v4531_v35 = vld [vmem:[%s7610_s4 + $0x304] sm:$0xf]  ;;  %v5368_v38 = vor.u32 %v4467_v24, %v3951_v26 }
  0x33   :  { %v4175_v26 = vld [vmem:[%s7610_s4 + $0x2e0] sm:$0xf0] }
  0x34   :  { %7914 = vst [vmem:[#allocation51_spill] sm:$0xff] %v5368_v38 }
  0x35   :  { %1322 = vmatpush.bf16.msrb.mxu0 %v5101_v43  ;;  %1335 = vmatpush.bf16.msrb.mxu1 %v5104_v44 }
  0x37   :  { %3774 = vmatmul.msk.bf16.vlgmr.msrb.gmra.mxu2 %vm134_vm0, %v4820_v8  ;;  %3805 = vmatmul.msk.bf16.gmra.mxu0 %vm134_vm0, %v5127_v58 }
  0x38   :  { %3778 = vmatmul.msk.bf16.vlgmr.msrb.gmra.mxu3 %vm134_vm0, %v4820_v8  ;;  %3809 = vmatmul.msk.bf16.gmra.mxu1 %vm134_vm0, %v5127_v58  ;;  %v4149_v8 = vld [vmem:[%s7610_s4 + $0x288] sm:$0xf] }
  0x39   :  { %1323 = vmatpush.bf16.msrb.mxu0 %v5119_v54  ;;  %1336 = vmatpush.bf16.msrb.mxu1 %v5130_v59  ;;  %v5180_v17 = vor.u32 %v4520_v9, %v4149_v8  ;;  %v5270_v8 = vor.u32 %v4497_v4, %v4061_v3  ;;  %v4317_v9 = vld [vmem:[%s7610_s4 + $0x3d0] sm:$0xf] }
  0x3a   :  { %1294 = vmatpush.bf16.msrb.mxu2 %v5257_v63  ;;  %v5282_v19 = vor.u32 %v4561_v10, %v4317_v9  ;;  %v4481_v3 = vld [vmem:[%s7610_s4 + $0x16c] sm:$0xf0] }
  0x3b   :  { %7897 = vst [vmem:[#allocation34_spill] sm:$0xff] %v5180_v17  ;;  %v4253_v10 = vld [vmem:[%s7610_s4 + $0x350] sm:$0xf] }
  0x3c   :  { %7904 = vst [vmem:[#allocation41_spill] sm:$0xff] %v5270_v8  ;;  %v5351_v23 = vor.u32 %v4545_v16, %v4253_v10  ;;  %v3919_v10 = vld [vmem:[%s7610_s4 + $0xe0] sm:$0xf0] }
  0x3d   :  { %1324 = vmatpush.bf16.msrb.mxu0 %v5146_v2  ;;  %1337 = vmatpush.bf16.msrb.mxu1 %v5162_v6  ;;  %7905 = vst [vmem:[#allocation42_spill] sm:$0xff] %v5282_v19  ;;  %v4523_v16 = vld [vmem:[%s7610_s4 + $0x2c4] sm:$0xf] }
  0x3e   :  { %1295 = vmatpush.bf16.msrb.mxu2 %v5295_v29  ;;  %7913 = vst [vmem:[#allocation50_spill] sm:$0xff] %v5351_v23 }
  0x41   :  { %1325 = vmatpush.bf16.msrb.mxu0 %v5165_v7  ;;  %1338 = vmatpush.bf16.msrb.mxu1 %v5180_v17 }
  0x45   :  { %1326 = vmatpush.bf16.msrb.mxu0 %v5183_v18  ;;  %1339 = vmatpush.bf16.msrb.mxu1 %v5204_v32 }
  0x47   :  { %3775 = vmatmul.msk.bf16.gmra.mxu2 %vm134_vm0, %v4831_v12  ;;  %3806 = vmatmul.msk.bf16.gmra.mxu0 %vm134_vm0, %v5215_v39 }
  0x48   :  { %3779 = vmatmul.msk.bf16.gmra.mxu3 %vm134_vm0, %v4831_v12  ;;  %3810 = vmatmul.msk.bf16.gmra.mxu1 %vm134_vm0, %v5215_v39  ;;  %v3799_v12 = vld [vmem:[%s7608_s2 + $0x38] sm:$0xf0] }
  0x49   :  { %1327 = vmatpush.bf16.msrb.mxu0 %v5207_v34  ;;  %1340 = vmatpush.bf16.msrb.mxu1 %v5218_v40  ;;  %v3802_v51 = vor.u32 %v4432_v49, %v3799_v12  ;;  %v4553_v49 = vld [vmem:[%s7610_s4 + $0x3ac] sm:$0xf0]  ;;  %v4475_v12 = vld [vmem:[%s7610_s4 + $0x144] sm:$0xf] }
  0x4a   :  { %v5314_v50 = vor.u32 %v4553_v49, %v4285_v42  ;;  %v4207_v42 = vld [vmem:[%s7610_s4 + $0x320] sm:$0xf0]  ;;  %v3965_v49 = vld [vmem:[%s7610_s4 + $0x110] sm:$0xf] }
  0x4b   :  { %405 = vmatpush.bf16.msra.mxu3 %v3802_v51  ;;  %v3983_v51 = vld [vmem:[%s7610_s4 + $0x160] sm:$0xf0] }
  0x4c   :  { %7909 = vst [vmem:[#allocation46_spill] sm:$0xff] %v5314_v50  ;;  %v5329_v61 = vor.u32 %v4475_v12, %v3983_v51  ;;  %v4473_v12 = vld [vmem:[%s7610_s4 + $0x12c] sm:$0xf0] }
  0x4d   :  { %v5383_v51 = vor.u32 %v4473_v12, %v3965_v49  ;;  %v5417_v49 = vor.u32 %v4523_v16, %v4175_v26  ;;  %v3887_v16 = vld [vmem:[%s7610_s4 + $0xa0] sm:$0xf0] }
  0x4e   :  { %7910 = vst [vmem:[#allocation47_spill] sm:$0xff] %v5329_v61  ;;  %1296 = vmatpush.bf16.msrb.mxu2 %v5329_v61  ;;  %v4515_v26 = vld [vmem:[%s7610_s4 + $0x284] sm:$0xf] }
  0x4f   :  { %7916 = vst [vmem:[#allocation53_spill] sm:$0xff] %v5383_v51 }
  0x50   :  { %7919 = vst [vmem:[#allocation56_spill] sm:$0xff] %v5417_v49 }
  0x52   :  { %1297 = vmatpush.bf16.msrb.mxu2 %v5368_v38  ;;  %v3895_v38 = vld [vmem:[%s7610_s4 + $0xa8] sm:$0xf0] }
  0x57   :  { %3776 = vmatmul.msk.bf16.gmra.mxu2 %vm134_vm0, %v4926_v46  ;;  %1276 = vmatmul.bf16.vlgmr.msra.gmra.mxu0 %v7618_v55 }
  0x58   :  { %3780 = vmatmul.msk.bf16.gmra.mxu3 %vm134_vm0, %v4926_v46  ;;  %1289 = vmatmul.bf16.vlgmr.msra.gmra.mxu1 %v7618_v55  ;;  %v4303_v46 = vld [vmem:[%s7610_s4 + $0x3e0] sm:$0xf0] }
  0x59   :  { %v5268_v5 = vor.u32 %v4555_v62, %v4303_v46  ;;  %1372 = vmatpush.bf16.msra.mxu0 %v5270_v8  ;;  %1385 = vmatpush.bf16.msra.mxu1 %v5282_v19  ;;  %v4239_v62 = vld [vmem:[%s7610_s4 + $0x360] sm:$0xf0]  ;;  %v3997_v46 = vld [vmem:[%s7610_s4 + $0x150] sm:$0xf] }
  0x5a   :  { %v5340_v4 = vor.u32 %v4539_v56, %v4239_v62  ;;  %v5342_v9 = vor.u32 %v4481_v3, %v3997_v46  ;;  %v4221_v56 = vld [vmem:[%s7610_s4 + $0x310] sm:$0xf]  ;;  %v4459_v3 = vld [vmem:[%s7610_s4 + $0xc4] sm:$0xf] }
  0x5b   :  { %7903 = vst [vmem:[#allocation40_spill] sm:$0xff] %v5268_v5  ;;  %1307 = vmatpush.bf16.msrb.mxu3 %v5268_v5  ;;  %v4537_v62 = vld [vmem:[%s7610_s4 + $0x32c] sm:$0xf0]  ;;  %v5404_v24 = vor.u32 %v4459_v3, %v3919_v10  ;;  %v4451_v10 = vld [vmem:[%s7610_s4 + $0x84] sm:$0xf] }
  0x5c   :  { %7911 = vst [vmem:[#allocation48_spill] sm:$0xff] %v5340_v4  ;;  %v5393_v46 = vor.u32 %v4537_v62, %v4221_v56  ;;  %v4189_v56 = vld [vmem:[%s7610_s4 + $0x2d0] sm:$0xf] }
  0x5d   :  { %1373 = vmatpush.bf16.msra.mxu0 %v5309_v48  ;;  %1386 = vmatpush.bf16.msra.mxu1 %v5314_v50  ;;  %7912 = vst [vmem:[#allocation49_spill] sm:$0xff] %v5342_v9  ;;  %v4529_v62 = vld [vmem:[%s7610_s4 + $0x2ec] sm:$0xf0]  ;;  %v4484_v48 = vld [vmem:[%s7610_s4 + $0x18c] sm:$0xf] }
  0x5e   :  { %7917 = vst [vmem:[#allocation54_spill] sm:$0xff] %v5393_v46  ;;  %1298 = vmatpush.bf16.msrb.mxu2 %v5404_v24  ;;  %v5429_v3 = vor.u32 %v4529_v62, %v4189_v56  ;;  %v3901_v56 = vld [vmem:[%s7610_s4 + $0x90] sm:$0xf] }
  0x5f   :  { %1308 = vmatpush.bf16.msrb.mxu3 %v5297_v30  ;;  %7918 = vst [vmem:[#allocation55_spill] sm:$0xff] %v5404_v24  ;;  %v4457_v62 = vld [vmem:[%s7610_s4 + $0xac] sm:$0xf0] }
  0x60   :  { %7921 = vst [vmem:[#allocation58_spill] sm:$0xff] %v5429_v3  ;;  %v4513_v19 = vld [vmem:[%s7610_s4 + $0x26c] sm:$0xf0] }
  0x61   :  { %1374 = vmatpush.bf16.msra.mxu0 %v5342_v9  ;;  %1387 = vmatpush.bf16.msra.mxu1 %v5351_v23 }
  0x63   :  { %1309 = vmatpush.bf16.msrb.mxu3 %v5340_v4 }
  0x65   :  { %1375 = vmatpush.bf16.msra.mxu0 %v5383_v51  ;;  %1388 = vmatpush.bf16.msra.mxu1 %v5393_v46  ;;  %v4521_v46 = vld [vmem:[%s7610_s4 + $0x2ac] sm:$0xf0]  ;;  %v4556_v51 = vld [vmem:[%s7610_s4 + $0x3cc] sm:$0xf] }
  0x67   :  { %3777 = vmatmul.msk.bf16.gmra.mxu2 %vm134_vm0, %v5022_v14  ;;  %1328 = vmatmul.bf16.vlgmr.msrb.gmra.mxu0 %v7618_v55 }
  0x68   :  { %3781 = vmatmul.msk.bf16.gmra.mxu3 %vm134_vm0, %v5022_v14  ;;  %1341 = vmatmul.bf16.vlgmr.msrb.gmra.mxu1 %v7618_v55  ;;  %v5381_v14 = vor.u32 %v4531_v35, %v4207_v42  ;;  %v3933_v35 = vld [vmem:[%s7610_s4 + $0xd0] sm:$0xf] }
  0x69   :  { %v4465_v42 = vld [vmem:[%s7610_s4 + $0xec] sm:$0xf0]  ;;  %1389 = vmatpush.bf16.msra.mxu1 %v5429_v3  ;;  %v4111_v3 = vld [vmem:[%s7610_s4 + $0x260] sm:$0xf0] }
  0x6a   :  { %7915 = vst [vmem:[#allocation52_spill] sm:$0xff] %v5381_v14  ;;  %1310 = vmatpush.bf16.msrb.mxu3 %v5381_v14  ;;  %v5419_v12 = vor.u32 %v4465_v42, %v3933_v35  ;;  %v5440_v35 = vor.u32 %v4451_v10, %v3887_v16  ;;  %v4143_v42 = vld [vmem:[%s7610_s4 + $0x2a0] sm:$0xf0]  ;;  %v5455_v10 = vor.u32 %v4457_v62, %v3901_v56  ;;  %v4157_v16 = vld [vmem:[%s7610_s4 + $0x290] sm:$0xf] }
  0x6b   :  { %v5453_v55 = vor.u32 %v4515_v26, %v4143_v42  ;;  %v5465_v23 = vor.u32 %v4521_v46, %v4157_v16  ;;  %v4443_v26 = vld [vmem:[%s7610_s4 + $0x44] sm:$0xf]  ;;  %v3869_v46 = vld [vmem:[%s7610_s4 + $0x50] sm:$0xf] }
  0x6c   :  { %7920 = vst [vmem:[#allocation57_spill] sm:$0xff] %v5419_v12  ;;  %1376 = vmatpush.bf16.msra.mxu0 %v5419_v12  ;;  %1299 = vmatpush.bf16.msrb.mxu2 %v5440_v35  ;;  %v3855_v42 = vld [vmem:[%s7610_s4 + $0x60] sm:$0xf0]  ;;  %v4449_v16 = vld [vmem:[%s7610_s4 + $0x6c] sm:$0xf0] }
  0x6d   :  { %7922 = vst [vmem:[#allocation59_spill] sm:$0xff] %v5440_v35  ;;  %v4507_v56 = vld [vmem:[%s7610_s4 + $0x244] sm:$0xf]  ;;  %v5476_v62 = vor.u32 %v4443_v26, %v3855_v42  ;;  %v5491_v26 = vor.u32 %v4449_v16, %v3869_v46  ;;  %v4125_v42 = vld [vmem:[%s7610_s4 + $0x250] sm:$0xf]  ;;  %1390 = vmatpush.bf16.msra.mxu1 %v5465_v23 }
  0x6e   :  { %1311 = vmatpush.bf16.msrb.mxu3 %v5417_v49  ;;  %7923 = vst [vmem:[#allocation60_spill] sm:$0xff] %v5453_v55  ;;  %v5489_v50 = vor.u32 %v4507_v56, %v4111_v3  ;;  %v5501_v12 = vor.u32 %v4513_v19, %v4125_v42  ;;  %v4435_v3 = vld [vmem:[%s7610_s4 + $0x4] sm:$0xf]  ;;  %v3837_v42 = vld [vmem:[%s7610_s4 + $0x10] sm:$0xf] }
  0x6f   :  { %7924 = vst [vmem:[#allocation61_spill] sm:$0xff] %v5455_v10  ;;  %v3823_v56 = vld [vmem:[%s7610_s4 + $0x20] sm:$0xf0]  ;;  %v3959_v35 = vld [vmem:[%s7610_s4 + $0x128] sm:$0xf0] }
  0x70   :  { %7925 = vst [vmem:[#allocation62_spill] sm:$0xff] %v5465_v23  ;;  %1377 = vmatpush.bf16.msra.mxu0 %v5455_v10  ;;  %1300 = vmatpush.bf16.msrb.mxu2 %v5476_v62  ;;  %v5513_v46 = vor.u32 %v4435_v3, %v3823_v56  ;;  %v4499_v19 = vld [vmem:[%s7610_s4 + $0x204] sm:$0xf]  ;;  %v4093_v3 = vld [vmem:[%s7610_s4 + $0x210] sm:$0xf] }
  0x71   :  { %7926 = vst [vmem:[#allocation63_spill] sm:$0xff] %v5476_v62  ;;  %v4079_v16 = vld [vmem:[%s7610_s4 + $0x220] sm:$0xf0]  ;;  %v4505_v56 = vld [vmem:[%s7610_s4 + $0x22c] sm:$0xf0]  ;;  %1391 = vmatpush.bf16.msra.mxu1 %v5501_v12 }
  0x72   :  { %1312 = vmatpush.bf16.msrb.mxu3 %v5453_v55  ;;  %7927 = vst [vmem:[#allocation64_spill] sm:$0xff] %v5489_v50  ;;  %v5526_v23 = vor.u32 %v4499_v19, %v4079_v16  ;;  %v5541_v19 = vor.u32 %v4505_v56, %v4093_v3  ;;  %v4492_v16 = vld [vmem:[%s7610_s4 + $0x1cc] sm:$0xf]  ;;  %v4498_v3 = vld [vmem:[%s7610_s4 + $0x1f4] sm:$0xf0] }
  0x73   :  { %7928 = vst [vmem:[#allocation65_spill] sm:$0xff] %v5491_v26  ;;  %v4468_v55 = vld [vmem:[%s7610_s4 + $0x10c] sm:$0xf] }
  0x74   :  { %7929 = vst [vmem:[#allocation66_spill] sm:$0xff] %v5501_v12  ;;  %1378 = vmatpush.bf16.msra.mxu0 %v5491_v26  ;;  %1301 = vmatpush.bf16.msrb.mxu2 %v5513_v46  ;;  %v4055_v26 = vld [vmem:[%s7610_s4 + $0x1e8] sm:$0xf0] }
  0x75   :  { %7930 = vst [vmem:[#allocation67_spill] sm:$0xff] %v5513_v46  ;;  %v5552_v9 = vor.u32 %v4492_v16, %v4055_v26  ;;  %v4325_v26 = vld [vmem:[%s7610_s4 + $0x3d8] sm:$0xf]  ;;  %1392 = vmatpush.bf16.msra.mxu1 %v5541_v19  ;;  %v4476_v46 = vld [vmem:[%s7610_s4 + $0x14c] sm:$0xf] }
  0x76   :  { %1313 = vmatpush.bf16.msrb.mxu3 %v5489_v50  ;;  %7931 = vst [vmem:[#allocation68_spill] sm:$0xff] %v5526_v23  ;;  %v4562_v16 = vld [vmem:[%s7610_s4 + $0x3f4] sm:$0xf0] }
  0x77   :  { %3811 = vmatmul.msk.bf16.vlgmr.msra.gmra.mxu2 %vm134_vm0, %v4928_v47  ;;  %7933 = vst [vmem:[#allocation70_spill] sm:$0xff] %v5541_v19  ;;  %v5605_v19 = vld [vmem:[%s7612_s3] sm:$0xf] }
  0x78   :  { %3815 = vmatmul.msk.bf16.vlgmr.msra.gmra.mxu3 %vm134_vm0, %v4928_v47  ;;  %v4441_v47 = vld [vmem:[%s7610_s4 + $0x2c] sm:$0xf0]  ;;  %7934 = vst [vmem:[#allocation71_spill] sm:$0xff] %v5552_v9  ;;  %1346 = vmatpush.bf16.msra.mxu2 %v5552_v9  ;;  %v5649_v50 = vperm.slane %v5605_v19, 0  ;;  %v5652_v62 = vperm.slane %v5605_v19, 1 }
  0x79   :  { %v5539_v10 = vor.u32 %v4441_v47, %v3837_v42  ;;  %v4311_v42 = vld [vmem:[%s7610_s4 + $0x3e8] sm:$0xf0]  ;;  %v4069_v47 = vld [vmem:[%s7610_s4 + $0x1d8] sm:$0xf] }
  0x7a   :  { %v5563_v56 = vor.u32 %v4556_v51, %v4311_v42  ;;  %v5565_v12 = vor.u32 %v4498_v3, %v4069_v47  ;;  %1314 = vmatpush.bf16.msrb.mxu3 %v5526_v23  ;;  %v5578_v51 = vor.u32 %v4562_v16, %v4325_v26  ;;  %v4023_v42 = vld [vmem:[%s7610_s4 + $0x1a8] sm:$0xf0]  ;;  %v4037_v26 = vld [vmem:[%s7610_s4 + $0x198] sm:$0xf] }
  0x7b   :  { %7932 = vst [vmem:[#allocation69_spill] sm:$0xff] %v5539_v10  ;;  %1379 = vmatpush.bf16.msra.mxu0 %v5539_v10  ;;  %v4548_v47 = vld [vmem:[%s7610_s4 + $0x38c] sm:$0xf]  ;;  %v5591_v8 = vor.u32 %v4484_v48, %v4023_v42  ;;  %v4490_v16 = vld [vmem:[%s7610_s4 + $0x1b4] sm:$0xf0] }
  0x7c   :  { %7935 = vst [vmem:[#allocation72_spill] sm:$0xff] %v5563_v56  ;;  %v4279_v3 = vld [vmem:[%s7610_s4 + $0x3a8] sm:$0xf0]  ;;  %v4293_v10 = vld [vmem:[%s7610_s4 + $0x398] sm:$0xf]  ;;  %v5611_v42 = vor.u32 %v4490_v16, %v4037_v26  ;;  %1437 = vmatpush.bf16.msrb.mxu1 %v5578_v51 }
  0x7d   :  { %7936 = vst [vmem:[#allocation73_spill] sm:$0xff] %v5565_v12  ;;  %v5609_v48 = vor.u32 %v4548_v47, %v4279_v3  ;;  %v4554_v23 = vld [vmem:[%s7610_s4 + $0x3b4] sm:$0xf0]  ;;  %v4540_v47 = vld [vmem:[%s7610_s4 + $0x34c] sm:$0xf]  ;;  %v7942_v3 = vmov 0.0|0.0   ;;  %1347 = vmatpush.bf16.msra.mxu2 %v5591_v8 }
  0x7e   :  { %7937 = vst [vmem:[#allocation74_spill] sm:$0xff] %v5578_v51  ;;  %1359 = vmatpush.bf16.msra.mxu3 %v5563_v56  ;;  %v5617_v9 = vor.u32 %v4554_v23, %v4293_v10  ;;  %1380 = vmatmul.bf16.vlgmr.msra.gmra.mxu0 %v7942_v3  ;;  %v4247_v26 = vld [vmem:[%s7610_s4 + $0x368] sm:$0xf0]  ;;  %v4005_v23 = vld [vmem:[%s7610_s4 + $0x158] sm:$0xf] }
  0x7f   :  { %7938 = vst [vmem:[#allocation75_spill] sm:$0xff] %v5591_v8  ;;  %1424 = vmatpush.bf16.msrb.mxu0 %v5565_v12  ;;  %v3991_v12 = vld [vmem:[%s7610_s4 + $0x168] sm:$0xf0]  ;;  %v4482_v10 = vld [vmem:[%s7610_s4 + $0x174] sm:$0xf0]  ;;  %1393 = vmatmul.bf16.vlgmr.msra.gmra.mxu1 %v7942_v3 }
  0x80   :  { %7939 = vst [vmem:[#allocation76_spill] sm:$0xff] %v5609_v48  ;;  %v5640_v16 = vor.u32 %v4476_v46, %v3991_v12  ;;  %v4261_v51 = vld [vmem:[%s7610_s4 + $0x358] sm:$0xf]  ;;  %v5656_v12 = vor.u32 %v4540_v47, %v4247_v26  ;;  %1438 = vmatpush.bf16.msrb.mxu1 %v5617_v9  ;;  %v5659_v8 = vor.u32 %v4482_v10, %v4005_v23  ;;  %v4215_v23 = vld [vmem:[%s7610_s4 + $0x328] sm:$0xf0] }
  0x81   :  { %7940 = vst [vmem:[#allocation77_spill] sm:$0xff] %v5611_v42  ;;  %v4546_v56 = vld [vmem:[%s7610_s4 + $0x374] sm:$0xf0] }
  0x82   :  { %7941 = vst [vmem:[#allocation78_spill] sm:$0xff] %v5617_v9  ;;  %1360 = vmatpush.bf16.msra.mxu3 %v5609_v48  ;;  %v4532_v48 = vld [vmem:[%s7610_s4 + $0x30c] sm:$0xf]  ;;  %v3973_v10 = vld [vmem:[%s7610_s4 + $0x118] sm:$0xf]  ;;  %1348 = vmatpush.bf16.msra.mxu2 %v5640_v16 }
  0x83   :  { %7943 = vst [vmem:[#allocation79_spill] sm:$0xff] %v5640_v16  ;;  %1425 = vmatpush.bf16.msrb.mxu0 %v5611_v42  ;;  %v5671_v42 = vor.u32 %v4546_v56, %v4261_v51  ;;  %v4474_v9 = vld [vmem:[%s7610_s4 + $0x134] sm:$0xf0]  ;;  %v5695_v24 = vor.u32 %v4532_v48, %v4215_v23  ;;  %v3927_v16 = vld [vmem:[%s7610_s4 + $0xe8] sm:$0xf0] }
  0x84   :  { %7944 = vst [vmem:[#allocation80_spill] sm:$0xff] %v5656_v12  ;;  %v156_v46 = vpop.f32.mrf.mxu0  ;;  %v4229_v56 = vld [vmem:[%s7610_s4 + $0x318] sm:$0xf] }
  0x85   :  { %7945 = vst [vmem:[#allocation81_spill] sm:$0xff] %v5659_v8  ;;  %v157_v47 = vadd.f32 %v156_v46, %v5649_v50  ;;  %v185_v26 = vpop.f32.mrf.mxu1  ;;  %v5684_v46 = vor.u32 %v4468_v55, %v3959_v35  ;;  %v4538_v51 = vld [vmem:[%s7610_s4 + $0x334] sm:$0xf0]  ;;  %v5702_v55 = vor.u32 %v4474_v9, %v3973_v10  ;;  %v4460_v35 = vld [vmem:[%s7610_s4 + $0xcc] sm:$0xf]  ;;  %1439 = vmatpush.bf16.msrb.mxu1 %v5671_v42 }
  0x86   :  { %7946 = vst [vmem:[#allocation82_spill] sm:$0xff] %v5671_v42  ;;  %v186_v49 = vadd.f32 %v185_v26, %v5652_v62  ;;  %1361 = vmatpush.bf16.msra.mxu3 %v5656_v12  ;;  %v5714_v48 = vor.u32 %v4538_v51, %v4229_v56  ;;  %v3941_v9 = vld [vmem:[%s7610_s4 + $0xd8] sm:$0xf]  ;;  %v5726_v10 = vor.u32 %v4460_v35, %v3927_v16  ;;  %v5738_v12 = vld [vmem:[%s7612_s3 + $0x4] sm:$0xf] }
  0x87   :  { %7947 = vst [vmem:[#allocation83_spill] sm:$0xff] %v5684_v46  ;;  %3812 = vmatmul.msk.bf16.gmra.mxu2 %vm134_vm0, %v5024_v15  ;;  %1426 = vmatpush.bf16.msrb.mxu0 %v5659_v8  ;;  %v4197_v56 = vld [vmem:[%s7610_s4 + $0x2d8] sm:$0xf]  ;;  %v5782_v61 = vperm.slane %v5738_v12, 0 }
  0x88   :  { %7948 = vst [vmem:[#allocation84_spill] sm:$0xff] %v5695_v24  ;;  %v5697_v26 = vpack.c.bf16 %v186_v49, %v157_v47  ;;  %3816 = vmatmul.msk.bf16.gmra.mxu3 %vm134_vm0, %v5024_v15  ;;  %v4524_v49 = vld [vmem:[%s7610_s4 + $0x2cc] sm:$0xf]  ;;  %v4466_v47 = vld [vmem:[%s7610_s4 + $0xf4] sm:$0xf0]  ;;  %1349 = vmatpush.bf16.msra.mxu2 %v5684_v46 }
  0x89   :  { %7949 = vst [vmem:[#allocation85_spill] sm:$0xff] %v5702_v55  ;;  %v4183_v15 = vld [vmem:[%s7610_s4 + $0x2e8] sm:$0xf0]  ;;  %v4530_v51 = vld [vmem:[%s7610_s4 + $0x2f4] sm:$0xf0]  ;;  %v5745_v14 = vor.u32 %v4466_v47, %v3941_v9  ;;  %1440 = vmatpush.bf16.msrb.mxu1 %v5714_v48 }
  0x8a   :  { %7950 = vst [vmem:[#allocation86_spill] sm:$0xff] %v5714_v48  ;;  %v161_v23 = vpop.f32.mrf.mxu2  ;;  %1362 = vmatpush.bf16.msra.mxu3 %v5695_v24  ;;  %v5741_v16 = vor.u32 %v4524_v49, %v4183_v15  ;;  %v4516_v49 = vld [vmem:[%s7610_s4 + $0x28c] sm:$0xf]  ;;  %v3909_v47 = vld [vmem:[%s7610_s4 + $0x98] sm:$0xf] }
  0x8b   :  { %7951 = vst [vmem:[#allocation87_spill] sm:$0xff] %v5726_v10  ;;  %v162_v42 = vadd.f32 %v161_v23, %v5649_v50  ;;  %v190_v8 = vpop.f32.mrf.mxu3  ;;  %1427 = vmatpush.bf16.msrb.mxu0 %v5702_v55  ;;  %v4452_v23 = vld [vmem:[%s7610_s4 + $0x8c] sm:$0xf]  ;;  %v5758_v55 = vor.u32 %v4530_v51, %v4197_v56  ;;  %v4458_v24 = vld [vmem:[%s7610_s4 + $0xb4] sm:$0xf0] }
  0x8c   :  { %7952 = vst [vmem:[#allocation88_spill] sm:$0xff] %v5741_v16  ;;  %v191_v35 = vadd.f32 %v190_v8, %v5652_v62  ;;  %v158_v46 = vpop.f32.mrf.mxu0  ;;  %v4151_v9 = vld [vmem:[%s7610_s4 + $0x2a8] sm:$0xf0]  ;;  %1350 = vmatpush.bf16.msra.mxu2 %v5726_v10  ;;  %v5773_v56 = vor.u32 %v4452_v23, %v3895_v38  ;;  %v4165_v51 = vld [vmem:[%s7610_s4 + $0x298] sm:$0xf]  ;;  %v5790_v38 = vor.u32 %v4458_v24, %v3909_v47 }
  0x8d   :  { %7953 = vst [vmem:[#allocation89_spill] sm:$0xff] %v5745_v14  ;;  %v159_v15 = vadd.f32 %v158_v46, %v5649_v50  ;;  %v187_v8 = vpop.f32.mrf.mxu1  ;;  %v4522_v48 = vld [vmem:[%s7610_s4 + $0x2b4] sm:$0xf0]  ;;  %v4444_v23 = vld [vmem:[%s7610_s4 + $0x4c] sm:$0xf]  ;;  %1441 = vmatpush.bf16.msrb.mxu1 %v5758_v55 }
  0x8e   :  { %7954 = vst [vmem:[#allocation90_spill] sm:$0xff] %v5758_v55  ;;  %v5769_v4 = vpack.c.bf16 %v191_v35, %v162_v42  ;;  %v188_v46 = vadd.f32 %v187_v8, %v5652_v62  ;;  %1363 = vmatpush.bf16.msra.mxu3 %v5741_v16  ;;  %v5785_v42 = vor.u32 %v4516_v49, %v4151_v9  ;;  %v3863_v8 = vld [vmem:[%s7610_s4 + $0x68] sm:$0xf0]  ;;  %v4450_v9 = vld [vmem:[%s7610_s4 + $0x74] sm:$0xf0] }
  0x8f   :  { %7956 = vst [vmem:[#allocation92_spill] sm:$0xff] %v5773_v56  ;;  %1428 = vmatpush.bf16.msrb.mxu0 %v5745_v14  ;;  %v5802_v49 = vor.u32 %v4522_v48, %v4165_v51  ;;  %v4119_v24 = vld [vmem:[%s7610_s4 + $0x268] sm:$0xf0]  ;;  %v5817_v48 = vor.u32 %v4444_v23, %v3863_v8  ;;  %v4133_v51 = vld [vmem:[%s7610_s4 + $0x258] sm:$0xf] }
  0x90   :  { %7955 = vst [vmem:[#allocation91_spill] sm:$0xff] %v5769_v4  ;;  %v5787_v35 = vpack.c.bf16 %v188_v46, %v159_v15  ;;  %v4508_v4 = vld [vmem:[%s7610_s4 + $0x24c] sm:$0xf]  ;;  %v3877_v15 = vld [vmem:[%s7610_s4 + $0x58] sm:$0xf]  ;;  %v5814_v46 = vperm.slane %v5738_v12, 1  ;;  %1351 = vmatpush.bf16.msra.mxu2 %v5773_v56 }
  0x91   :  { %7957 = vst [vmem:[#allocation93_spill] sm:$0xff] %v5785_v42  ;;  %v5827_v16 = vor.u32 %v4508_v4, %v4119_v24  ;;  %v5831_v23 = vor.u32 %v4450_v9, %v3877_v15  ;;  %v4436_v8 = vld [vmem:[%s7610_s4 + $0xc] sm:$0xf]  ;;  %1442 = vmatpush.bf16.msrb.mxu1 %v5802_v49  ;;  %v3845_v9 = vld [vmem:[%s7610_s4 + $0x18] sm:$0xf] }
  0x92   :  { %7958 = vst [vmem:[#allocation94_spill] sm:$0xff] %v5787_v35  ;;  %v163_v47 = vpop.f32.mrf.mxu2  ;;  %v4514_v35 = vld [vmem:[%s7610_s4 + $0x274] sm:$0xf0]  ;;  %1364 = vmatpush.bf16.msra.mxu3 %v5785_v42  ;;  %v4500_v4 = vld [vmem:[%s7610_s4 + $0x20c] sm:$0xf] }
  0x93   :  { %7959 = vst [vmem:[#allocation95_spill] sm:$0xff] %v5790_v38  ;;  %v164_v55 = vadd.f32 %v163_v47, %v5649_v50  ;;  %v192_v14 = vpop.f32.mrf.mxu3  ;;  %1429 = vmatpush.bf16.msrb.mxu0 %v5790_v38  ;;  %v3831_v47 = vld [vmem:[%s7610_s4 + $0x28] sm:$0xf0]  ;;  %v5844_v38 = vor.u32 %v4514_v35, %v4133_v51  ;;  %v4442_v42 = vld [vmem:[%s7610_s4 + $0x34] sm:$0xf0] }
  0x94   :  { %7960 = vst [vmem:[#allocation96_spill] sm:$0xff] %v5802_v49  ;;  %v193_v10 = vadd.f32 %v192_v14, %v5652_v62  ;;  %v320_v56 = vpop.f32.mrf.mxu0  ;;  %v4087_v15 = vld [vmem:[%s7610_s4 + $0x228] sm:$0xf0]  ;;  %1352 = vmatpush.bf16.msra.mxu2 %v5817_v48  ;;  %v5859_v35 = vor.u32 %v4436_v8, %v3831_v47  ;;  %v4101_v51 = vld [vmem:[%s7610_s4 + $0x218] sm:$0xf]  ;;  %v5877_v8 = vor.u32 %v4442_v42, %v3845_v9 }
  0x95   :  { %7961 = vst [vmem:[#allocation97_spill] sm:$0xff] %v5817_v48  ;;  %v321_v24 = vadd.f32 %v320_v56, %v5782_v61  ;;  %v349_v14 = vpop.f32.mrf.mxu1  ;;  %v4506_v49 = vld [vmem:[%s7610_s4 + $0x234] sm:$0xf0]  ;;  %1443 = vmatpush.bf16.msrb.mxu1 %v5844_v38 }
  0x96   :  { %7962 = vst [vmem:[#allocation98_spill] sm:$0xff] %v5827_v16  ;;  %v5855_v30 = vpack.c.bf16 %v193_v10, %v164_v55  ;;  %v350_v56 = vadd.f32 %v349_v14, %v5814_v46  ;;  %1365 = vmatpush.bf16.msra.mxu3 %v5827_v16  ;;  %v5870_v55 = vor.u32 %v4500_v4, %v4087_v15 }
  0x97   :  { %7963 = vst [vmem:[#allocation99_spill] sm:$0xff] %v5844_v38  ;;  %3813 = vmatmul.msk.bf16.gmra.mxu2 %vm134_vm0, %v5127_v58  ;;  %1430 = vmatpush.bf16.msrb.mxu0 %v5831_v23  ;;  %v5880_v47 = vor.u32 %v4506_v49, %v4101_v51 }
  0x98   :  { %7964 = vst [vmem:[#allocation100_spill] sm:$0xff] %v5855_v30  ;;  %v5872_v10 = vpack.c.bf16 %v350_v56, %v321_v24  ;;  %3817 = vmatmul.msk.bf16.gmra.mxu3 %vm134_vm0, %v5127_v58  ;;  %1353 = vmatpush.bf16.msra.mxu2 %v5859_v35 }
  0x99   :  { %7965 = vst [vmem:[#allocation101_spill] sm:$0xff] %v5859_v35  ;;  %1444 = vmatpush.bf16.msrb.mxu1 %v5880_v47 }
  0x9a   :  { %7966 = vst [vmem:[#allocation102_spill] sm:$0xff] %v5870_v55  ;;  %v166_v14 = vpop.f32.mrf.mxu2  ;;  %1366 = vmatpush.bf16.msra.mxu3 %v5870_v55 }
  0x9b   :  { %7967 = vst [vmem:[#allocation103_spill] sm:$0xff] %v5872_v10  ;;  %v167_v30 = vadd.f32 %v166_v14, %v5649_v50  ;;  %v195_v4 = vpop.f32.mrf.mxu3  ;;  %1431 = vmatpush.bf16.msrb.mxu0 %v5877_v8 }
  0x9c   :  { %7968 = vst [vmem:[#allocation104_spill] sm:$0xff] %v5877_v8  ;;  %v196_v24 = vadd.f32 %v195_v4, %v5652_v62  ;;  %v322_v15 = vpop.f32.mrf.mxu0  ;;  %1445 = vmatmul.bf16.vlgmr.msrb.gmra.mxu1 %v7942_v3 }
  0x9d   :  { %7969 = vst [vmem:[#allocation105_spill] sm:$0xff] %v5880_v47  ;;  %v323_v58 = vadd.f32 %v322_v15, %v5782_v61  ;;  %v351_v42 = vpop.f32.mrf.mxu1  ;;  %1551 = vmatpush.bf16.msra.mxu1 %v4870_v25 }
  0x9e   :  { %v5890_v49 = vpack.c.bf16 %v196_v24, %v167_v30  ;;  %v352_v9 = vadd.f32 %v351_v42, %v5814_v46  ;;  %1432 = vmatmul.bf16.vlgmr.msrb.gmra.mxu0 %v7942_v3 }
  0x9f   :  { %1538 = vmatpush.bf16.msra.mxu0 %v4859_v21 }
  0xa0   :  { %7970 = vst [vmem:[#allocation106_spill] sm:$0xff] %v5890_v49  ;;  %v5895_v56 = vpack.c.bf16 %v352_v9, %v323_v58 }
  0xa1   :  { %1552 = vmatpush.bf16.msra.mxu1 %v4888_v31 }
  0xa2   :  { %7971 = vst [vmem:[#allocation107_spill] sm:$0xff] %v5895_v56  ;;  %v168_v51 = vpop.f32.mrf.mxu2 }
  0xa3   :  { %1539 = vmatpush.bf16.msra.mxu0 %v4879_v28  ;;  %v169_v14 = vadd.f32 %v168_v51, %v5649_v50  ;;  %v197_v4 = vpop.f32.mrf.mxu3 }
  0xa4   :  { %v198_v30 = vadd.f32 %v197_v4, %v5652_v62  ;;  %v325_v24 = vpop.f32.mrf.mxu0 }
  0xa5   :  { %v326_v15 = vadd.f32 %v325_v24, %v5782_v61  ;;  %v354_v42 = vpop.f32.mrf.mxu1  ;;  %1553 = vmatpush.bf16.msra.mxu1 %v4924_v45 }
  0xa6   :  { %v5904_v58 = vpack.c.bf16 %v198_v30, %v169_v14  ;;  %v355_v9 = vadd.f32 %v354_v42, %v5814_v46 }
  0xa7   :  { %1540 = vmatpush.bf16.msra.mxu0 %v4912_v41  ;;  %3814 = vmatmul.msk.bf16.gmra.mxu2 %vm134_vm0, %v5215_v39 }
  0xa8   :  { %7972 = vst [vmem:[#allocation108_spill] sm:$0xff] %v5904_v58  ;;  %v5910_v10 = vpack.c.bf16 %v355_v9, %v326_v15  ;;  %3818 = vmatmul.msk.bf16.gmra.mxu3 %vm134_vm0, %v5215_v39 }
  0xa9   :  { %1554 = vmatpush.bf16.msra.mxu1 %v4950_v53 }
  0xaa   :  { %7973 = vst [vmem:[#allocation109_spill] sm:$0xff] %v5910_v10  ;;  %v171_v51 = vpop.f32.mrf.mxu2 }
  0xab   :  { %1541 = vmatpush.bf16.msra.mxu0 %v4948_v52  ;;  %v172_v14 = vadd.f32 %v171_v51, %v5649_v50  ;;  %v200_v4 = vpop.f32.mrf.mxu3  ;;  %v4493_v51 = vld [vmem:[%s7610_s4 + $0x1d4] sm:$0xf] }
  0xac   :  { %v201_v30 = vadd.f32 %v200_v4, %v5652_v62  ;;  %v327_v24 = vpop.f32.mrf.mxu0  ;;  %v4063_v4 = vld [vmem:[%s7610_s4 + $0x1f0] sm:$0xf0] }
  0xad   :  { %v328_v42 = vadd.f32 %v327_v24, %v5782_v61  ;;  %v356_v56 = vpop.f32.mrf.mxu1  ;;  %1555 = vmatpush.bf16.msra.mxu1 %v4975_v60  ;;  %v5942_v10 = vor.u32 %v4493_v51, %v4063_v4  ;;  %v4485_v60 = vld [vmem:[%s7610_s4 + $0x194] sm:$0xf]  ;;  %v5966_v4 = vperm.slane %v5605_v19, 2 }
  0xae   :  { %v5920_v15 = vpack.c.bf16 %v201_v30, %v172_v14  ;;  %v357_v39 = vadd.f32 %v356_v56, %v5814_v46  ;;  %v4557_v14 = vld [vmem:[%s7610_s4 + $0x3d4] sm:$0xf] }
  0xaf   :  { %1542 = vmatpush.bf16.msra.mxu0 %v4967_v57  ;;  %v4319_v56 = vld [vmem:[%s7610_s4 + $0x3f0] sm:$0xf0] }
  0xb0   :  { %7974 = vst [vmem:[#allocation110_spill] sm:$0xff] %v5920_v15  ;;  %v5924_v9 = vpack.c.bf16 %v357_v39, %v328_v42  ;;  %v5945_v49 = vor.u32 %v4557_v14, %v4319_v56  ;;  %v4287_v51 = vld [vmem:[%s7610_s4 + $0x3b0] sm:$0xf0] }
  0xb1   :  { %1556 = vmatpush.bf16.msra.mxu1 %v4990_v1  ;;  %v4031_v1 = vld [vmem:[%s7610_s4 + $0x1b0] sm:$0xf0] }
  0xb2   :  { %7975 = vst [vmem:[#allocation111_spill] sm:$0xff] %v5924_v9  ;;  %v173_v24 = vpop.f32.mrf.mxu2  ;;  %v5975_v14 = vor.u32 %v4485_v60, %v4031_v1  ;;  %v4541_v60 = vld [vmem:[%s7610_s4 + $0x354] sm:$0xf] }
  0xb3   :  { %1543 = vmatpush.bf16.msra.mxu0 %v4988_v0  ;;  %v174_v30 = vadd.f32 %v173_v24, %v5649_v50  ;;  %v202_v42 = vpop.f32.mrf.mxu3  ;;  %v4255_v1 = vld [vmem:[%s7610_s4 + $0x370] sm:$0xf0]  ;;  %v3879_v0 = vld [vmem:[%s7610_s4 + $0x78] sm:$0xf0] }
  0xb4   :  { %v203_v39 = vadd.f32 %v202_v42, %v5652_v62  ;;  %v330_v15 = vpop.f32.mrf.mxu0 }
  0xb5   :  { %v331_v58 = vadd.f32 %v330_v15, %v5782_v61  ;;  %v359_v9 = vpop.f32.mrf.mxu1  ;;  %v4549_v15 = vld [vmem:[%s7610_s4 + $0x394] sm:$0xf]  ;;  %1557 = vmatpush.bf16.msra.mxu1 %v5020_v13  ;;  %v6003_v13 = vor.u32 %v4541_v60, %v4255_v1 }
  0xb6   :  { %v5954_v50 = vpack.c.bf16 %v203_v39, %v174_v30  ;;  %v360_v62 = vadd.f32 %v359_v9, %v5814_v46  ;;  %v5973_v9 = vperm.slane %v5605_v19, 3  ;;  %v5978_v56 = vor.u32 %v4549_v15, %v4287_v51  ;;  %v4477_v30 = vld [vmem:[%s7610_s4 + $0x154] sm:$0xf] }
  0xb7   :  { %1544 = vmatpush.bf16.msra.mxu0 %v5018_v11  ;;  %1302 = vmatmul.bf16.vlgmr.msrb.gmra.mxu2 %v7942_v3  ;;  %v4223_v60 = vld [vmem:[%s7610_s4 + $0x330] sm:$0xf0] }
  0xb8   :  { %7976 = vst [vmem:[#allocation112_spill] sm:$0xff] %v5954_v50  ;;  %v5968_v24 = vpack.c.bf16 %v360_v62, %v331_v58  ;;  %1315 = vmatmul.bf16.vlgmr.msrb.gmra.mxu3 %v7942_v3  ;;  %1398 = vmatpush.bf16.msrb.mxu2 %v5942_v10  ;;  %v3999_v58 = vld [vmem:[%s7610_s4 + $0x170] sm:$0xf0] }
  0xb9   :  { %1411 = vmatpush.bf16.msrb.mxu3 %v5945_v49  ;;  %1558 = vmatpush.bf16.msra.mxu1 %v5046_v22  ;;  %v5999_v51 = vor.u32 %v4477_v30, %v3999_v58  ;;  %v4533_v58 = vld [vmem:[%s7610_s4 + $0x314] sm:$0xf] }
  0xba   :  { %7977 = vst [vmem:[#allocation113_spill] sm:$0xff] %v5968_v24  ;;  %v214_v42 = vpop.f32.mrf.mxu2 }
  0xbb   :  { %1545 = vmatpush.bf16.msra.mxu0 %v5044_v20  ;;  %v215_v19 = vadd.f32 %v214_v42, %v5966_v4  ;;  %v243_v39 = vpop.f32.mrf.mxu3  ;;  %v4469_v42 = vld [vmem:[%s7610_s4 + $0x114] sm:$0xf] }
  0xbc   :  { %v244_v62 = vadd.f32 %v243_v39, %v5973_v9  ;;  %1399 = vmatpush.bf16.msrb.mxu2 %v5975_v14  ;;  %v332_v15 = vpop.f32.mrf.mxu0  ;;  %v3967_v39 = vld [vmem:[%s7610_s4 + $0x130] sm:$0xf0] }
  0xbd   :  { %1603 = vmatpush.bf16.msrb.mxu1 %v5074_v33  ;;  %1412 = vmatpush.bf16.msrb.mxu3 %v5978_v56  ;;  %v333_v50 = vadd.f32 %v332_v15, %v5782_v61  ;;  %v361_v24 = vpop.f32.mrf.mxu1  ;;  %v3935_v15 = vld [vmem:[%s7610_s4 + $0xf0] sm:$0xf0] }
  0xbe   :  { %v6011_v33 = vpack.c.bf16 %v244_v62, %v215_v19  ;;  %v362_v30 = vadd.f32 %v361_v24, %v5814_v46  ;;  %v6025_v19 = vor.u32 %v4469_v42, %v3967_v39  ;;  %v6028_v24 = vor.u32 %v4533_v58, %v4223_v60  ;;  %v4461_v62 = vld [vmem:[%s7610_s4 + $0xd4] sm:$0xf] }
  0xbf   :  { %1590 = vmatpush.bf16.msrb.mxu0 %v5061_v27  ;;  %v4191_v42 = vld [vmem:[%s7610_s4 + $0x2f0] sm:$0xf0]  ;;  %v4462_v27 = vld [vmem:[%s7610_s4 + $0xdc] sm:$0xf] }
  0xc0   :  { %v6022_v1 = vpack.c.bf16 %v362_v30, %v333_v50  ;;  %1400 = vmatpush.bf16.msrb.mxu2 %v5999_v51  ;;  %7979 = vst [vmem:[#allocation115_spill] sm:$0xff] %v6028_v24  ;;  %v4525_v50 = vld [vmem:[%s7610_s4 + $0x2d4] sm:$0xf]  ;;  %v1480_v11 = vunpack.c.l.bf16 %v6011_v33 }
  0xc1   :  { %1604 = vmatpush.bf16.msrb.mxu1 %v5086_v37  ;;  %1413 = vmatpush.bf16.msrb.mxu3 %v6003_v13  ;;  %v6051_v45 = vor.u32 %v4525_v50, %v4191_v42  ;;  %v4159_v50 = vld [vmem:[%s7610_s4 + $0x2b0] sm:$0xf0] }
  0xc2   :  { %7978 = vst [vmem:[#allocation114_spill] sm:$0xff] %v6022_v1  ;;  %v216_v22 = vpop.f32.mrf.mxu2  ;;  %v6047_v1 = vor.u32 %v4461_v62, %v3935_v15  ;;  %v4517_v15 = vld [vmem:[%s7610_s4 + $0x294] sm:$0xf] }
  0xc3   :  { %1591 = vmatpush.bf16.msrb.mxu0 %v5083_v36  ;;  %v217_v39 = vadd.f32 %v216_v22, %v5966_v4  ;;  %v245_v30 = vpop.f32.mrf.mxu3  ;;  %7980 = vst [vmem:[#allocation116_spill] sm:$0xff] %v6051_v45  ;;  %v4453_v22 = vld [vmem:[%s7610_s4 + $0x94] sm:$0xf] }
  0xc4   :  { %v246_v58 = vadd.f32 %v245_v30, %v5973_v9  ;;  %1401 = vmatpush.bf16.msrb.mxu2 %v6025_v19  ;;  %v335_v60 = vpop.f32.mrf.mxu0  ;;  %v3903_v30 = vld [vmem:[%s7610_s4 + $0xb0] sm:$0xf0] }
  0xc5   :  { %1605 = vmatpush.bf16.msrb.mxu1 %v5104_v44  ;;  %1414 = vmatpush.bf16.msrb.mxu3 %v6028_v24  ;;  %v336_v37 = vadd.f32 %v335_v60, %v5782_v61  ;;  %v364_v53 = vpop.f32.mrf.mxu1  ;;  %v3871_v60 = vld [vmem:[%s7610_s4 + $0x70] sm:$0xf0] }
  0xc6   :  { %v6059_v44 = vpack.c.bf16 %v246_v58, %v217_v39  ;;  %v365_v62 = vadd.f32 %v364_v53, %v5814_v46  ;;  %v6075_v53 = vor.u32 %v4453_v22, %v3903_v30  ;;  %v6078_v39 = vor.u32 %v4517_v15, %v4159_v50  ;;  %v4445_v58 = vld [vmem:[%s7610_s4 + $0x54] sm:$0xf] }
  0xc7   :  { %1592 = vmatpush.bf16.msrb.mxu0 %v5101_v43  ;;  %1354 = vmatmul.bf16.vlgmr.msra.gmra.mxu2 %v7942_v3  ;;  %v4127_v22 = vld [vmem:[%s7610_s4 + $0x270] sm:$0xf0]  ;;  %v4007_v43 = vld [vmem:[%s7610_s4 + $0x178] sm:$0xf0] }
  0xc8   :  { %7981 = vst [vmem:[#allocation117_spill] sm:$0xff] %v6059_v44  ;;  %v6071_v42 = vpack.c.bf16 %v365_v62, %v336_v37  ;;  %1367 = vmatmul.bf16.vlgmr.msra.gmra.mxu3 %v7942_v3  ;;  %1402 = vmatpush.bf16.msrb.mxu2 %v6047_v1  ;;  %v4509_v62 = vld [vmem:[%s7610_s4 + $0x254] sm:$0xf]  ;;  %v6099_v44 = vor.u32 %v4445_v58, %v3871_v60 }
  0xc9   :  { %1606 = vmatpush.bf16.msrb.mxu1 %v5130_v59  ;;  %1415 = vmatpush.bf16.msrb.mxu3 %v6051_v45  ;;  %7983 = vst [vmem:[#allocation119_spill] sm:$0xff] %v6078_v39  ;;  %v6104_v31 = vor.u32 %v4509_v62, %v4127_v22  ;;  %v4095_v60 = vld [vmem:[%s7610_s4 + $0x230] sm:$0xf0]  ;;  %v4494_v62 = vld [vmem:[%s7610_s4 + $0x1dc] sm:$0xf] }
  0xca   :  { %7982 = vst [vmem:[#allocation118_spill] sm:$0xff] %v6071_v42  ;;  %v219_v37 = vpop.f32.mrf.mxu2  ;;  %v4071_v22 = vld [vmem:[%s7610_s4 + $0x1f8] sm:$0xf0] }
  0xcb   :  { %1593 = vmatpush.bf16.msrb.mxu0 %v5119_v54  ;;  %v220_v30 = vadd.f32 %v219_v37, %v5966_v4  ;;  %v248_v15 = vpop.f32.mrf.mxu3  ;;  %7984 = vst [vmem:[#allocation120_spill] sm:$0xff] %v6104_v31  ;;  %v4437_v37 = vld [vmem:[%s7610_s4 + $0x14] sm:$0xf]  ;;  %v6140_v25 = vor.u32 %v4494_v62, %v4071_v22  ;;  %v4486_v54 = vld [vmem:[%s7610_s4 + $0x19c] sm:$0xf]  ;;  %v1478_v22 = vunpack.c.l.bf16 %v5697_v26 }
  0xcc   :  { %v249_v50 = vadd.f32 %v248_v15, %v5973_v9  ;;  %1403 = vmatpush.bf16.msrb.mxu2 %v6075_v53  ;;  %v6097_v42 = vpop.f32.mrf.mxu0  ;;  %v3839_v15 = vld [vmem:[%s7610_s4 + $0x30] sm:$0xf0] }
  0xcd   :  { %1607 = vmatpush.bf16.msrb.mxu1 %v5162_v6  ;;  %1416 = vmatpush.bf16.msrb.mxu3 %v6078_v39  ;;  %v6102_v59 = vpop.f32.mrf.mxu1  ;;  %v4501_v6 = vld [vmem:[%s7610_s4 + $0x214] sm:$0xf] }
  0xce   :  { %v6115_v58 = vpack.c.bf16 %v249_v50, %v220_v30  ;;  %v4327_v30 = vld [vmem:[%s7610_s4 + $0x3f8] sm:$0xf0]  ;;  %v6135_v50 = vor.u32 %v4437_v37, %v3839_v15 }
  0xcf   :  { %1594 = vmatpush.bf16.msrb.mxu0 %v5146_v2  ;;  %v4558_v2 = vld [vmem:[%s7610_s4 + $0x3dc] sm:$0xf] }
  0xd0   :  { %7985 = vst [vmem:[#allocation121_spill] sm:$0xff] %v6115_v58  ;;  %1404 = vmatpush.bf16.msrb.mxu2 %v6099_v44  ;;  %v6138_v58 = vor.u32 %v4501_v6, %v4095_v60  ;;  %v6142_v47 = vor.u32 %v4558_v2, %v4327_v30  ;;  %v4550_v6 = vld [vmem:[%s7610_s4 + $0x39c] sm:$0xf] }
  0xd1   :  { %1608 = vmatpush.bf16.msrb.mxu1 %v5180_v17  ;;  %1417 = vmatpush.bf16.msrb.mxu3 %v6104_v31  ;;  %v4039_v17 = vld [vmem:[%s7610_s4 + $0x1b8] sm:$0xf0] }
  0xd2   :  { %7986 = vst [vmem:[#allocation122_spill] sm:$0xff] %v6138_v58  ;;  %v4295_v2 = vld [vmem:[%s7610_s4 + $0x3b8] sm:$0xf0]  ;;  %v6164_v30 = vor.u32 %v4486_v54, %v4039_v17 }
  0xd3   :  { %1595 = vmatpush.bf16.msrb.mxu0 %v5165_v7  ;;  %v221_v7 = vpop.f32.mrf.mxu2  ;;  %7987 = vst [vmem:[#allocation123_spill] sm:$0xff] %v6142_v47  ;;  %v250_v15 = vpop.f32.mrf.mxu3  ;;  %v4542_v54 = vld [vmem:[%s7610_s4 + $0x35c] sm:$0xf] }
  0xd4   :  { %v222_v37 = vadd.f32 %v221_v7, %v5966_v4  ;;  %v251_v60 = vadd.f32 %v250_v15, %v5973_v9  ;;  %1405 = vmatpush.bf16.msrb.mxu2 %v6135_v50  ;;  %v1277_v62 = vpop.f32.mrf.mxu0  ;;  %v4478_v15 = vld [vmem:[%s7610_s4 + $0x15c] sm:$0xf] }
  0xd5   :  { %1609 = vmatpush.bf16.msrb.mxu1 %v5204_v32  ;;  %1418 = vmatpush.bf16.msrb.mxu3 %v6138_v58  ;;  %v1290_v7 = vpop.f32.mrf.mxu1  ;;  %v6169_v32 = vor.u32 %v4550_v6, %v4295_v2  ;;  %v4263_v17 = vld [vmem:[%s7610_s4 + $0x378] sm:$0xf0]  ;;  %v6188_v6 = vor.u32 %v4478_v15, %v4007_v43 }
  0xd6   :  { %v1291_v38 = vadd.f32 %v1290_v7, %v1277_v62  ;;  %v4470_v62 = vld [vmem:[%s7610_s4 + $0x11c] sm:$0xf] }
  0xd7   :  { %1596 = vmatpush.bf16.msrb.mxu0 %v5183_v18  ;;  %v6166_v18 = vpack.c.bf16 %v251_v60, %v222_v37  ;;  %7989 = vst [vmem:[#allocation125_spill] sm:$0xff] %v6169_v32  ;;  %1406 = vmatmul.bf16.vlgmr.msrb.gmra.mxu2 %v7942_v3  ;;  %v6191_v60 = vor.u32 %v4542_v54, %v4263_v17  ;;  %v3975_v7 = vld [vmem:[%s7610_s4 + $0x138] sm:$0xf0] }
  0xd8   :  { %1450 = vmatpush.bf16.msra.mxu2 %v6140_v25  ;;  %v1482_v37 = vadd.f32 %v1478_v22, %v1291_v38  ;;  %1419 = vmatmul.bf16.vlgmr.msrb.gmra.mxu3 %v7942_v3  ;;  %v4534_v43 = vld [vmem:[%s7610_s4 + $0x31c] sm:$0xf] }
  0xd9   :  { %7988 = vst [vmem:[#allocation124_spill] sm:$0xff] %v6166_v18  ;;  %1463 = vmatpush.bf16.msra.mxu3 %v6142_v47  ;;  %1610 = vmatpush.bf16.msrb.mxu1 %v5218_v40  ;;  %v4231_v15 = vld [vmem:[%s7610_s4 + $0x338] sm:$0xf0] }
  0xda   :  { %7990 = vst [vmem:[#allocation126_spill] sm:$0xff] %v6191_v60  ;;  %v1497_v54 = vmul.f32 0.5, %v1482_v37  ;;  %v3943_v37 = vld [vmem:[%s7610_s4 + $0xf8] sm:$0xf0] }
  0xdb   :  { %1597 = vmatpush.bf16.msrb.mxu0 %v5207_v34  ;;  %v224_v2 = vpop.f32.mrf.mxu2  ;;  %v253_v22 = vpop.f32.mrf.mxu3  ;;  %v6208_v34 = vor.u32 %v4470_v62, %v3975_v7  ;;  %v6228_v62 = vor.u32 %v4462_v27, %v3943_v37  ;;  %v4518_v27 = vld [vmem:[%s7610_s4 + $0x29c] sm:$0xf] }
  0xdc   :  { %1451 = vmatpush.bf16.msra.mxu2 %v6164_v30  ;;  %v225_v38 = vadd.f32 %v224_v2, %v5966_v4  ;;  %v254_v17 = vadd.f32 %v253_v22, %v5973_v9  ;;  %v1279_v18 = vpop.f32.mrf.mxu0  ;;  %v6213_v2 = vor.u32 %v4534_v43, %v4231_v15  ;;  %4591 = vtanh.f32 %v1497_v54  ;;  %v4454_v22 = vld [vmem:[%s7610_s4 + $0x9c] sm:$0xf] }
  0xdd   :  { %1464 = vmatpush.bf16.msra.mxu3 %v6169_v32  ;;  %v1292_v40 = vpop.f32.mrf.mxu1  ;;  %v4526_v18 = vld [vmem:[%s7610_s4 + $0x2dc] sm:$0xf] }
  0xde   :  { %v6210_v36 = vpack.c.bf16 %v254_v17, %v225_v38  ;;  %7992 = vst [vmem:[#allocation128_spill] sm:$0xff] %v6213_v2  ;;  %v4199_v40 = vld [vmem:[%s7610_s4 + $0x2f8] sm:$0xf0] }
  0xdf   :  { %v6231_v38 = vor.u32 %v4526_v18, %v4199_v40  ;;  %v3911_v43 = vld [vmem:[%s7610_s4 + $0xb8] sm:$0xf0] }
  0xe0   :  { %1452 = vmatpush.bf16.msra.mxu2 %v6188_v6  ;;  %7991 = vst [vmem:[#allocation127_spill] sm:$0xff] %v6210_v36  ;;  %v4167_v17 = vld [vmem:[%s7610_s4 + $0x2b8] sm:$0xf0]  ;;  %v6248_v36 = vor.u32 %v4454_v22, %v3911_v43 }
  0xe1   :  { %1465 = vmatpush.bf16.msra.mxu3 %v6191_v60  ;;  %7993 = vst [vmem:[#allocation129_spill] sm:$0xff] %v6231_v38  ;;  %v6254_v60 = vor.u32 %v4518_v27, %v4167_v17  ;;  %v4510_v22 = vld [vmem:[%s7610_s4 + $0x25c] sm:$0xf] }
  0xe2   :  { %v4592_v20 = vpop.eup %4591  ;;  %v4135_v43 = vld [vmem:[%s7610_s4 + $0x278] sm:$0xf0] }
  0xe3   :  { %v226_v7 = vpop.f32.mrf.mxu2  ;;  %v255_v54 = vpop.f32.mrf.mxu3  ;;  %7995 = vst [vmem:[#allocation131_spill] sm:$0xff] %v6254_v60 }
  0xe4   :  { %1453 = vmatpush.bf16.msra.mxu2 %v6208_v34  ;;  %v227_v15 = vadd.f32 %v226_v7, %v5966_v4  ;;  %v256_v37 = vadd.f32 %v255_v54, %v5973_v9  ;;  %v1329_v18 = vpop.f32.mrf.mxu0  ;;  %v4446_v54 = vld [vmem:[%s7610_s4 + $0x5c] sm:$0xf] }
  0xe5   :  { %1466 = vmatpush.bf16.msra.mxu3 %v6213_v2  ;;  %v1342_v40 = vpop.f32.mrf.mxu1  ;;  %v6269_v27 = vor.u32 %v4446_v54, %v3879_v0  ;;  %v4502_v0 = vld [vmem:[%s7610_s4 + $0x21c] sm:$0xf] }
  0xe6   :  { %v6250_v2 = vpack.c.bf16 %v256_v37, %v227_v15  ;;  %v1343_v7 = vadd.f32 %v1342_v40, %v1329_v18  ;;  %v1499_v37 = vmul.f32 0.5, %v4592_v20  ;;  %v6272_v18 = vor.u32 %v4510_v22, %v4135_v43  ;;  %v4438_v40 = vld [vmem:[%s7610_s4 + $0x1c] sm:$0xf] }
  0xe8   :  { %1454 = vmatpush.bf16.msra.mxu2 %v6228_v62  ;;  %7994 = vst [vmem:[#allocation130_spill] sm:$0xff] %v6250_v2  ;;  %v1484_v15 = vadd.f32 %v1480_v11, %v1343_v7  ;;  %v3847_v2 = vld [vmem:[%s7610_s4 + $0x38] sm:$0xf0]  ;;  %v1500_v43 = vadd.f32 0.5, %v1499_v37 }
  0xe9   :  { %1467 = vmatpush.bf16.msra.mxu3 %v6231_v38  ;;  %7996 = vst [vmem:[#allocation132_spill] sm:$0xff] %v6272_v18  ;;  %v4103_v7 = vld [vmem:[%s7610_s4 + $0x238] sm:$0xf0] }
  0xea   :  { %4593 = vtanh.f32 %v1484_v15  ;;  %v6289_v15 = vor.u32 %v4438_v40, %v3847_v2  ;;  %v6310_v40 = vperm.slane %v5738_v12, 2 }
  0xeb   :  { %v229_v17 = vpop.f32.mrf.mxu2  ;;  %v258_v20 = vpop.f32.mrf.mxu3 }
  0xec   :  { %1455 = vmatpush.bf16.msra.mxu2 %v6248_v36  ;;  %v230_v11 = vadd.f32 %v229_v17, %v5966_v4  ;;  %v259_v54 = vadd.f32 %v258_v20, %v5973_v9  ;;  %v1331_v22 = vpop.f32.mrf.mxu0  ;;  %7997 = vst [vmem:[#allocation133_spill] sm:$0xff] %v6289_v15  ;;  %v6294_v17 = vor.u32 %v4502_v0, %v4103_v7  ;;  %v8002_v7 = vld [vmem:[#allocation47_spill] sm:$0xff] }
  0xed   :  { %1468 = vmatpush.bf16.msra.mxu3 %v6254_v60  ;;  %v1344_v60 = vpop.f32.mrf.mxu1  ;;  %v8003_v22 = vld [vmem:[#allocation48_spill] sm:$0xff] }
  0xee   :  { %v6291_v38 = vpack.c.bf16 %v259_v54, %v230_v11  ;;  %7999 = vst [vmem:[#allocation135_spill] sm:$0xff] %v6294_v17  ;;  %v8001_v11 = vld [vmem:[#allocation44_spill] sm:$0xff] }
  0xf0   :  { %1456 = vmatpush.bf16.msra.mxu2 %v6269_v27  ;;  %7998 = vst [vmem:[#allocation134_spill] sm:$0xff] %v6291_v38  ;;  %v4594_v32 = vpop.eup %4593  ;;  %v8008_v38 = vld [vmem:[#allocation56_spill] sm:$0xff] }
  0xf1   :  { %1469 = vmatpush.bf16.msra.mxu3 %v6272_v18  ;;  %v6296_v57 = vmul.f32 %v4594_v32, %v1500_v43  ;;  %v8013_v18 = vld [vmem:[#allocation64_spill] sm:$0xff] }
  0xf3   :  { %v231_v20 = vpop.f32.mrf.mxu2  ;;  %v260_v37 = vpop.f32.mrf.mxu3 }
  0xf4   :  { %1457 = vmatpush.bf16.msra.mxu2 %v6289_v15  ;;  %v232_v2 = vadd.f32 %v231_v20, %v5966_v4  ;;  %v261_v60 = vadd.f32 %v260_v37, %v5973_v9  ;;  %v6314_v4 = vperm.slane %v5738_v12, 3  ;;  %v8005_v20 = vld [vmem:[#allocation51_spill] sm:$0xff] }
  0xf5   :  { %1470 = vmatpush.bf16.msra.mxu3 %v6294_v17 }
  0xf6   :  { %v6306_v32 = vpack.c.bf16 %v261_v60, %v232_v2  ;;  %v8006_v2 = vld [vmem:[#allocation52_spill] sm:$0xff]  ;;  %v8007_v60 = vld [vmem:[#allocation55_spill] sm:$0xff] }
  0xf7   :  { %1458 = vmatmul.bf16.vlgmr.msra.gmra.mxu2 %v7942_v3 }
  0xf8   :  { %1564 = vmatpush.bf16.msrb.mxu2 %v5257_v63  ;;  %1471 = vmatmul.bf16.vlgmr.msra.gmra.mxu3 %v7942_v3  ;;  %8000 = vst [vmem:[#allocation136_spill] sm:$0xff] %v6306_v32 }
  0xf9   :  { %1577 = vmatpush.bf16.msrb.mxu3 %v5268_v5  ;;  %v8012_v5 = vld [vmem:[#allocation63_spill] sm:$0xff] }
  0xfb   :  { %v378_v0 = vpop.f32.mrf.mxu2  ;;  %v407_v54 = vpop.f32.mrf.mxu3 }
  0xfc   :  { %1565 = vmatpush.bf16.msrb.mxu2 %v5295_v29  ;;  %v379_v9 = vadd.f32 %v378_v0, %v6310_v40  ;;  %v408_v3 = vadd.f32 %v407_v54, %v6314_v4  ;;  %v1394_v54 = vpop.f32.mrf.mxu1 }
  0xfd   :  { %1578 = vmatpush.bf16.msrb.mxu3 %v8001_v11 }
  0xfe   :  { %v6320_v43 = vpack.c.bf16 %v408_v3, %v379_v9  ;;  %v8010_v9 = vld [vmem:[#allocation59_spill] sm:$0xff] }
 0x100   :  { %1566 = vmatpush.bf16.msrb.mxu2 %v8002_v7  ;;  %8004 = vst [vmem:[#allocation137_spill] sm:$0xff] %v6320_v43  ;;  %v8011_v43 = vld [vmem:[#allocation60_spill] sm:$0xff] }
 0x101   :  { %1579 = vmatpush.bf16.msrb.mxu3 %v8003_v22  ;;  %v1381_v22 = vpop.f32.mrf.mxu0 }
 0x102   :  { %v1395_v3 = vadd.f32 %v1394_v54, %v1381_v22  ;;  %v8017_v22 = vld [vmem:[#allocation68_spill] sm:$0xff] }
 0x103   :  { %v380_v37 = vpop.f32.mrf.mxu2  ;;  %v409_v32 = vpop.f32.mrf.mxu3  ;;  %v8018_v54 = vld [vmem:[#allocation72_spill] sm:$0xff] }
 0x104   :  { %1567 = vmatpush.bf16.msrb.mxu2 %v8005_v20  ;;  %v381_v12 = vadd.f32 %v380_v37, %v6310_v40  ;;  %v410_v0 = vadd.f32 %v409_v32, %v6314_v4 }
 0x105   :  { %1580 = vmatpush.bf16.msrb.mxu3 %v8006_v2 }
 0x106   :  { %v6328_v11 = vpack.c.bf16 %v410_v0, %v381_v12  ;;  %v1396_v0 = vpop.f32.mrf.mxu1 }
 0x107   :  { %v8023_v0 = vld [vmem:[#allocation80_spill] sm:$0xff] }
 0x108   :  { %1568 = vmatpush.bf16.msrb.mxu2 %v8007_v60  ;;  %8009 = vst [vmem:[#allocation138_spill] sm:$0xff] %v6328_v11  ;;  %v8015_v11 = vld [vmem:[#allocation67_spill] sm:$0xff] }
 0x109   :  { %1581 = vmatpush.bf16.msrb.mxu3 %v8008_v38  ;;  %v1383_v12 = vpop.f32.mrf.mxu0  ;;  %v8019_v60 = vld [vmem:[#allocation75_spill] sm:$0xff] }
 0x10a   :  { %v8022_v12 = vld [vmem:[#allocation79_spill] sm:$0xff] }
 0x10b   :  { %v383_v2 = vpop.f32.mrf.mxu2  ;;  %v412_v37 = vpop.f32.mrf.mxu3 }
 0x10c   :  { %1569 = vmatpush.bf16.msrb.mxu2 %v8010_v9  ;;  %v384_v17 = vadd.f32 %v383_v2, %v6310_v40  ;;  %v413_v38 = vadd.f32 %v412_v37, %v6314_v4  ;;  %v8016_v9 = vld [vmem:[#allocation71_spill] sm:$0xff] }
 0x10d   :  { %1582 = vmatpush.bf16.msrb.mxu3 %v8011_v43 }
 0x10e   :  { %v6336_v32 = vpack.c.bf16 %v413_v38, %v384_v17  ;;  %v8020_v38 = vld [vmem:[#allocation76_spill] sm:$0xff] }
 0x110   :  { %1570 = vmatpush.bf16.msrb.mxu2 %v8012_v5  ;;  %8014 = vst [vmem:[#allocation139_spill] sm:$0xff] %v6336_v32 }
 0x111   :  { %1583 = vmatpush.bf16.msrb.mxu3 %v8013_v18  ;;  %v8024_v18 = vld [vmem:[#allocation83_spill] sm:$0xff] }
 0x113   :  { %v385_v43 = vpop.f32.mrf.mxu2  ;;  %v414_v5 = vpop.f32.mrf.mxu3 }
 0x114   :  { %1571 = vmatpush.bf16.msrb.mxu2 %v8015_v11  ;;  %v386_v2 = vadd.f32 %v385_v43, %v6310_v40  ;;  %v415_v37 = vadd.f32 %v414_v5, %v6314_v4 }
 0x115   :  { %1584 = vmatpush.bf16.msrb.mxu3 %v8017_v22 }
 0x116   :  { %v6346_v17 = vpack.c.bf16 %v415_v37, %v386_v2  ;;  %v8027_v37 = vld [vmem:[#allocation87_spill] sm:$0xff] }
 0x118   :  { %1616 = vmatpush.bf16.msra.mxu2 %v8016_v9  ;;  %8021 = vst [vmem:[#allocation140_spill] sm:$0xff] %v6346_v17  ;;  %v338_v17 = vadd.f32 %v6097_v42, %v5782_v61 }
 0x119   :  { %1629 = vmatpush.bf16.msra.mxu3 %v8018_v54  ;;  %v1446_v5 = vpop.f32.mrf.mxu1 }
 0x11b   :  { %v388_v32 = vpop.f32.mrf.mxu2  ;;  %v417_v54 = vpop.f32.mrf.mxu3 }
 0x11c   :  { %1617 = vmatpush.bf16.msra.mxu2 %v8019_v60  ;;  %v389_v22 = vadd.f32 %v388_v32, %v6310_v40  ;;  %v418_v43 = vadd.f32 %v417_v54, %v6314_v4  ;;  %v1433_v9 = vpop.f32.mrf.mxu0  ;;  %v8025_v60 = vld [vmem:[#allocation84_spill] sm:$0xff]  ;;  %v367_v32 = vadd.f32 %v6102_v59, %v5814_v46 }
 0x11d   :  { %1630 = vmatpush.bf16.msra.mxu3 %v8020_v38  ;;  %v1447_v2 = vadd.f32 %v1446_v5, %v1433_v9 }
 0x11e   :  { %v6354_v11 = vpack.c.bf16 %v418_v43, %v389_v22  ;;  %v8030_v43 = vld [vmem:[#allocation93_spill] sm:$0xff] }
 0x120   :  { %1618 = vmatpush.bf16.msra.mxu2 %v8022_v12  ;;  %8026 = vst [vmem:[#allocation141_spill] sm:$0xff] %v6354_v11  ;;  %v8029_v12 = vld [vmem:[#allocation92_spill] sm:$0xff] }
 0x121   :  { %1631 = vmatpush.bf16.msra.mxu3 %v8023_v0  ;;  %v8028_v0 = vld [vmem:[#allocation88_spill] sm:$0xff]  ;;  %v1448_v5 = vpop.f32.mrf.mxu1 }
 0x123   :  { %v390_v38 = vpop.f32.mrf.mxu2 }
 0x124   :  { %1619 = vmatpush.bf16.msra.mxu2 %v8024_v18  ;;  %v391_v54 = vadd.f32 %v390_v38, %v6310_v40  ;;  %v419_v18 = vpop.f32.mrf.mxu3  ;;  %v1435_v22 = vpop.f32.mrf.mxu0 }
 0x125   :  { %1632 = vmatpush.bf16.msra.mxu3 %v8025_v60  ;;  %v6364_v60 = vpack.c.bf16 %v367_v32, %v338_v17  ;;  %v420_v9 = vadd.f32 %v419_v18, %v6314_v4 }
 0x127   :  { %v6368_v61 = vpack.c.bf16 %v420_v9, %v391_v54  ;;  %v1489_v59 = vunpack.c.l.bf16 %v6364_v60 }
 0x128   :  { %1620 = vmatpush.bf16.msra.mxu2 %v8027_v37 }
 0x129   :  { %1633 = vmatpush.bf16.msra.mxu3 %v8028_v0  ;;  %8031 = vst [vmem:[#allocation142_spill] sm:$0xff] %v6368_v61  ;;  %v1493_v17 = vadd.f32 %v1489_v59, %v1395_v3 }
 0x12b   :  { %v393_v46 = vpop.f32.mrf.mxu2  ;;  %v1515_v54 = vmul.f32 0.5, %v1493_v17 }
 0x12c   :  { %1621 = vmatpush.bf16.msra.mxu2 %v8029_v12  ;;  %v394_v42 = vadd.f32 %v393_v46, %v6310_v40  ;;  %v422_v38 = vpop.f32.mrf.mxu3 }
 0x12d   :  { %1634 = vmatpush.bf16.msra.mxu3 %v8030_v43  ;;  %v423_v18 = vadd.f32 %v422_v38, %v6314_v4  ;;  %4595 = vtanh.f32 %v1515_v54 }
 0x12f   :  { %v6377_v32 = vpack.c.bf16 %v423_v18, %v394_v42  ;;  %v1479_v42 = vunpack.c.h.bf16 %v5697_v26 }
 0x130   :  { %1622 = vmatpush.bf16.msra.mxu2 %v5817_v48 }
 0x131   :  { %1635 = vmatpush.bf16.msra.mxu3 %v5827_v16  ;;  %8032 = vst [vmem:[#allocation143_spill] sm:$0xff] %v6377_v32 }
 0x133   :  { %v395_v9 = vpop.f32.mrf.mxu2  ;;  %v4596_v16 = vpop.eup %4595 }
 0x134   :  { %1623 = vmatpush.bf16.msra.mxu2 %v5859_v35  ;;  %v396_v22 = vadd.f32 %v395_v9, %v6310_v40  ;;  %v424_v5 = vpop.f32.mrf.mxu3  ;;  %v1517_v17 = vmul.f32 0.5, %v4596_v16 }
 0x135   :  { %1636 = vmatpush.bf16.msra.mxu3 %v5870_v55  ;;  %v425_v11 = vadd.f32 %v424_v5, %v6314_v4 }
 0x136   :  { %v1518_v40 = vadd.f32 0.5, %v1517_v17 }
 0x137   :  { %v6381_v61 = vpack.c.bf16 %v425_v11, %v396_v22 }
 0x139   :  { %v1491_v46 = vunpack.c.l.bf16 %v6381_v61 }
 0x13b   :  { %v1495_v3 = vadd.f32 %v1491_v46, %v1447_v2  ;;  %v1303_v59 = vpop.f32.mrf.mxu2 }
 0x13c   :  { %v1316_v38 = vpop.f32.mrf.mxu3 }
 0x13d   :  { %4597 = vtanh.f32 %v1495_v3  ;;  %v1317_v55 = vadd.f32 %v1316_v38, %v1303_v59  ;;  %v1481_v3 = vunpack.c.h.bf16 %v6011_v33 }
 0x13f   :  { %v1483_v18 = vadd.f32 %v1479_v42, %v1317_v55 }
 0x141   :  { %v1501_v32 = vmul.f32 0.5, %v1483_v18 }
 0x143   :  { %v4598_v9 = vpop.eup %4597  ;;  %4599 = vtanh.f32 %v1501_v32  ;;  %v1305_v54 = vpop.f32.mrf.mxu2 }
 0x144   :  { %v6385_v4 = vmul.f32 %v4598_v9, %v1518_v40  ;;  %v1318_v11 = vpop.f32.mrf.mxu3 }
 0x149   :  { %v4600_v22 = vpop.eup %4599 }
 0x14a   :  { %v1503_v5 = vmul.f32 0.5, %v4600_v22  ;;  %v8033_v22 = vld [vmem:[#allocation41_spill] sm:$0xff] }
 0x14b   :  { %v1355_v43 = vpop.f32.mrf.mxu2 }
 0x14c   :  { %v1504_v2 = vadd.f32 0.5, %v1503_v5  ;;  %v1368_v46 = vpop.f32.mrf.mxu3 }
 0x14d   :  { %v1369_v0 = vadd.f32 %v1368_v46, %v1355_v43 }
 0x14e   :  { %v1510_v59 = vmul.f32 0.0, %v1504_v2 }
 0x14f   :  { %v1485_v26 = vadd.f32 %v1481_v3, %v1369_v0  ;;  %v1490_v0 = vunpack.c.h.bf16 %v6364_v60  ;;  %v8034_v3 = vld [vmem:[#allocation45_spill] sm:$0xff] }
 0x150   :  { %v6389_v16 = vadd.f32 %v6296_v57, %v1510_v59  ;;  %v8035_v60 = vld [vmem:[#allocation49_spill] sm:$0xff] }
 0x151   :  { %v1506_v55 = vmul.f32 0.5, %v1485_v26  ;;  %v8036_v59 = vld [vmem:[#allocation53_spill] sm:$0xff] }
 0x153   :  { %4601 = vtanh.f32 %v1506_v55  ;;  %v1357_v32 = vpop.f32.mrf.mxu2  ;;  %v8037_v55 = vld [vmem:[#allocation57_spill] sm:$0xff] }
 0x154   :  { %v1370_v38 = vpop.f32.mrf.mxu3  ;;  %4603 = vtanh.f32 %v6389_v16 }
 0x155   :  { %v8038_v38 = vld [vmem:[#allocation61_spill] sm:$0xff] }
 0x159   :  { %v4602_v42 = vpop.eup %4601 }
 0x15a   :  { %v1508_v17 = vmul.f32 0.5, %v4602_v42  ;;  %v4604_v54 = vpop.eup %4603 }
 0x15b   :  { %v1407_v18 = vpop.f32.mrf.mxu2 }
 0x15c   :  { %v1509_v40 = vadd.f32 0.5, %v1508_v17  ;;  %v1420_v9 = vpop.f32.mrf.mxu3 }
 0x15d   :  { %v1421_v11 = vadd.f32 %v1420_v9, %v1407_v18  ;;  %v1492_v9 = vunpack.c.h.bf16 %v6381_v61 }
 0x15e   :  { %v1514_v43 = vmul.f32 %v4604_v54, %v1509_v40  ;;  %v8039_v54 = vld [vmem:[#allocation65_spill] sm:$0xff] }
 0x15f   :  { %v1494_v57 = vadd.f32 %v1490_v0, %v1421_v11 }
 0x160   :  { %v6392_v33 = vpack.c.bf16 %v1514_v43, %v1514_v43 }
 0x161   :  { %v1519_v46 = vmul.f32 0.5, %v1494_v57  ;;  %v8040_v57 = vld [vmem:[#allocation69_spill] sm:$0xff] }
 0x162   :  { %1534 = vst [vmem:[#allocation4] sm:$0xf] %v6392_v33  ;;  %1546 = vmatmul.bf16.vlgmr.msra.gmra.mxu0 %v6392_v33  ;;  %1572 = vmatmul.bf16.vlgmr.msrb.gmra.mxu2 %v6392_v33 }
 0x163   :  { %1642 = vmatpush.bf16.msra.mxu0 %v8033_v22  ;;  %1668 = vmatpush.bf16.msrb.mxu2 %v5942_v10  ;;  %v1409_v5 = vpop.f32.mrf.mxu2  ;;  %4605 = vtanh.f32 %v1519_v46 }
 0x164   :  { %v1422_v2 = vpop.f32.mrf.mxu3 }
 0x165   :  { %v8041_v2 = vld [vmem:[#allocation73_spill] sm:$0xff] }
 0x167   :  { %1643 = vmatpush.bf16.msra.mxu0 %v8034_v3  ;;  %1669 = vmatpush.bf16.msrb.mxu2 %v5975_v14 }
 0x169   :  { %v4606_v26 = vpop.eup %4605 }
 0x16a   :  { %v1521_v32 = vmul.f32 0.5, %v4606_v26  ;;  %v8042_v26 = vld [vmem:[#allocation77_spill] sm:$0xff] }
 0x16b   :  { %1644 = vmatpush.bf16.msra.mxu0 %v8035_v60  ;;  %1670 = vmatpush.bf16.msrb.mxu2 %v5999_v51 }
 0x16c   :  { %v1522_v42 = vadd.f32 0.5, %v1521_v32 }
 0x16e   :  { %v1528_v43 = vmul.f32 0.0, %v1522_v42  ;;  %v8043_v42 = vld [vmem:[#allocation81_spill] sm:$0xff] }
 0x16f   :  { %1645 = vmatpush.bf16.msra.mxu0 %v8036_v59  ;;  %1671 = vmatpush.bf16.msrb.mxu2 %v6025_v19 }
 0x170   :  { %v6418_v5 = vadd.f32 %v6385_v4, %v1528_v43 }
 0x172   :  { %1598 = vmatmul.bf16.vlgmr.msrb.gmra.mxu0 %v6392_v33  ;;  %1624 = vmatmul.bf16.vlgmr.msra.gmra.mxu2 %v6392_v33 }
 0x173   :  { %1646 = vmatpush.bf16.msra.mxu0 %v8037_v55  ;;  %1672 = vmatpush.bf16.msrb.mxu2 %v6047_v1 }
 0x177   :  { %1647 = vmatpush.bf16.msra.mxu0 %v8038_v38  ;;  %1673 = vmatpush.bf16.msrb.mxu2 %v6075_v53 }
 0x17a   :  { %v1459_v17 = vpop.f32.mrf.mxu2 }
 0x17b   :  { %v1472_v18 = vpop.f32.mrf.mxu3  ;;  %1648 = vmatpush.bf16.msra.mxu0 %v8039_v54  ;;  %1674 = vmatpush.bf16.msrb.mxu2 %v6099_v44 }
 0x17c   :  { %v1473_v40 = vadd.f32 %v1472_v18, %v1459_v17 }
 0x17e   :  { %v1496_v11 = vadd.f32 %v1492_v9, %v1473_v40  ;;  %v8044_v9 = vld [vmem:[#allocation85_spill] sm:$0xff] }
 0x17f   :  { %1649 = vmatpush.bf16.msra.mxu0 %v8040_v57  ;;  %1675 = vmatpush.bf16.msrb.mxu2 %v6135_v50 }
 0x180   :  { %v1524_v0 = vmul.f32 0.5, %v1496_v11  ;;  %v8045_v11 = vld [vmem:[#allocation42_spill] sm:$0xff] }
 0x182   :  { %4607 = vtanh.f32 %v1524_v0  ;;  %v1461_v61 = vpop.f32.mrf.mxu2  ;;  %1650 = vmatmul.bf16.vlgmr.msra.gmra.mxu0 %v6392_v33  ;;  %1676 = vmatmul.bf16.vlgmr.msrb.gmra.mxu2 %v6392_v33  ;;  %v8046_v0 = vld [vmem:[#allocation89_spill] sm:$0xff] }
 0x183   :  { %1694 = vmatpush.bf16.msrb.mxu0 %v8041_v2  ;;  %1720 = vmatpush.bf16.msra.mxu2 %v6140_v25  ;;  %v1474_v46 = vpop.f32.mrf.mxu3  ;;  %4609 = vtanh.f32 %v6418_v5  ;;  %v8047_v61 = vld [vmem:[#allocation46_spill] sm:$0xff] }
 0x184   :  { %v8048_v46 = vld [vmem:[#allocation95_spill] sm:$0xff] }
 0x187   :  { %1695 = vmatpush.bf16.msrb.mxu0 %v8042_v26  ;;  %1721 = vmatpush.bf16.msra.mxu2 %v6164_v30 }
 0x188   :  { %v4608_v32 = vpop.eup %4607 }
 0x189   :  { %v1526_v4 = vmul.f32 0.5, %v4608_v32  ;;  %v4610_v18 = vpop.eup %4609  ;;  %v8049_v32 = vld [vmem:[#allocation50_spill] sm:$0xff] }
 0x18b   :  { %1696 = vmatpush.bf16.msrb.mxu0 %v8043_v42  ;;  %1722 = vmatpush.bf16.msra.mxu2 %v6188_v6  ;;  %v1527_v17 = vadd.f32 0.5, %v1526_v4  ;;  %v8050_v4 = vld [vmem:[#allocation54_spill] sm:$0xff] }
 0x18d   :  { %v1532_v40 = vmul.f32 %v4610_v18, %v1527_v17  ;;  %v8051_v17 = vld [vmem:[#allocation58_spill] sm:$0xff] }
 0x18e   :  { %v8052_v18 = vld [vmem:[#allocation62_spill] sm:$0xff] }
 0x18f   :  { %1697 = vmatpush.bf16.msrb.mxu0 %v8044_v9  ;;  %1723 = vmatpush.bf16.msra.mxu2 %v6208_v34  ;;  %v6431_v43 = vpack.c.bf16 %v1532_v40, %v1532_v40  ;;  %v8053_v40 = vld [vmem:[#allocation66_spill] sm:$0xff] }
 0x191   :  { %1537 = vst [vmem:[#allocation5 + $0x1c] sm:$0xf] %v6431_v43  ;;  %1559 = vmatmul.bf16.vlgmr.msra.gmra.mxu1 %v6431_v43  ;;  %1585 = vmatmul.bf16.vlgmr.msrb.gmra.mxu3 %v6431_v43 }
 0x192   :  { %1655 = vmatpush.bf16.msra.mxu1 %v8045_v11  ;;  %1681 = vmatpush.bf16.msrb.mxu3 %v5945_v49 }
 0x193   :  { %1698 = vmatpush.bf16.msrb.mxu0 %v8046_v0  ;;  %1724 = vmatpush.bf16.msra.mxu2 %v6228_v62 }
 0x196   :  { %1656 = vmatpush.bf16.msra.mxu1 %v8047_v61  ;;  %1682 = vmatpush.bf16.msrb.mxu3 %v5978_v56 }
 0x197   :  { %1699 = vmatpush.bf16.msrb.mxu0 %v8048_v46  ;;  %1725 = vmatpush.bf16.msra.mxu2 %v6248_v36 }
 0x19a   :  { %1657 = vmatpush.bf16.msra.mxu1 %v8049_v32  ;;  %1683 = vmatpush.bf16.msrb.mxu3 %v6003_v13 }
 0x19b   :  { %1700 = vmatpush.bf16.msrb.mxu0 %v5831_v23  ;;  %1726 = vmatpush.bf16.msra.mxu2 %v6269_v27 }
 0x19e   :  { %1658 = vmatpush.bf16.msra.mxu1 %v8050_v4  ;;  %1684 = vmatpush.bf16.msrb.mxu3 %v6028_v24 }
 0x19f   :  { %1701 = vmatpush.bf16.msrb.mxu0 %v5877_v8  ;;  %1727 = vmatpush.bf16.msra.mxu2 %v6289_v15 }
 0x1a1   :  { %1611 = vmatmul.bf16.vlgmr.msrb.gmra.mxu1 %v6431_v43  ;;  %1637 = vmatmul.bf16.vlgmr.msra.gmra.mxu3 %v6431_v43 }
 0x1a2   :  { %1659 = vmatpush.bf16.msra.mxu1 %v8051_v17  ;;  %1685 = vmatpush.bf16.msrb.mxu3 %v6051_v45 }
 0x1a3   :  { %1810 = vmatpush.bf16.msra.mxu0 %v4859_v21  ;;  %1836 = vmatpush.bf16.msrb.mxu2 %v5257_v63 }
 0x1a4   :  { %1702 = vmatmul.bf16.vlgmr.msrb.gmra.mxu0 %v6392_v33  ;;  %1728 = vmatmul.bf16.vlgmr.msra.gmra.mxu2 %v6392_v33  ;;  %v8054_v33 = vld [vmem:[#allocation70_spill] sm:$0xff] }
 0x1a6   :  { %1660 = vmatpush.bf16.msra.mxu1 %v8052_v18  ;;  %1686 = vmatpush.bf16.msrb.mxu3 %v6078_v39  ;;  %v8056_v39 = vld [vmem:[#allocation15_spill] sm:$0xff] }
 0x1a7   :  { %1811 = vmatpush.bf16.msra.mxu0 %v4879_v28  ;;  %1837 = vmatpush.bf16.msrb.mxu2 %v5295_v29  ;;  %v8055_v29 = vld [vmem:[#allocation74_spill] sm:$0xff] }
 0x1aa   :  { %1661 = vmatpush.bf16.msra.mxu1 %v8053_v40  ;;  %1687 = vmatpush.bf16.msrb.mxu3 %v6104_v31  ;;  %v8058_v31 = vld [vmem:[#allocation78_spill] sm:$0xff]  ;;  %v8067_v40 = vld [vmem:[#allocation128_spill] sm:$0xff] }
 0x1ab   :  { %1812 = vmatpush.bf16.msra.mxu0 %v4912_v41  ;;  %1838 = vmatpush.bf16.msrb.mxu2 %v8002_v7  ;;  %v8057_v41 = vld [vmem:[#allocation55_spill] sm:$0xff]  ;;  %v8068_v7 = vld [vmem:[#allocation21_spill] sm:$0xff] }
 0x1ae   :  { %1662 = vmatpush.bf16.msra.mxu1 %v8054_v33  ;;  %1688 = vmatpush.bf16.msrb.mxu3 %v6138_v58  ;;  %v8061_v33 = vld [vmem:[#allocation59_spill] sm:$0xff]  ;;  %v8062_v58 = vld [vmem:[#allocation82_spill] sm:$0xff] }
 0x1af   :  { %1813 = vmatpush.bf16.msra.mxu0 %v4948_v52  ;;  %1839 = vmatpush.bf16.msrb.mxu2 %v8005_v20  ;;  %v8059_v52 = vld [vmem:[#allocation125_spill] sm:$0xff] }
 0x1b0   :  { %v8060_v20 = vld [vmem:[#allocation17_spill] sm:$0xff] }
 0x1b1   :  { %1663 = vmatmul.bf16.vlgmr.msra.gmra.mxu1 %v6431_v43  ;;  %1689 = vmatmul.bf16.vlgmr.msrb.gmra.mxu3 %v6431_v43 }
 0x1b2   :  { %1707 = vmatpush.bf16.msrb.mxu1 %v8055_v29  ;;  %1733 = vmatpush.bf16.msra.mxu3 %v6142_v47  ;;  %v8063_v29 = vld [vmem:[#allocation126_spill] sm:$0xff]  ;;  %v8064_v47 = vld [vmem:[#allocation19_spill] sm:$0xff] }
 0x1b3   :  { %1814 = vmatpush.bf16.msra.mxu0 %v8056_v39  ;;  %1840 = vmatpush.bf16.msrb.mxu2 %v8057_v41  ;;  %v8065_v39 = vld [vmem:[#allocation63_spill] sm:$0xff]  ;;  %v8066_v41 = vld [vmem:[#allocation86_spill] sm:$0xff] }
 0x1b6   :  { %1708 = vmatpush.bf16.msrb.mxu1 %v8058_v31  ;;  %1734 = vmatpush.bf16.msra.mxu3 %v8059_v52  ;;  %v8069_v31 = vld [vmem:[#allocation67_spill] sm:$0xff] }
 0x1b7   :  { %1815 = vmatpush.bf16.msra.mxu0 %v8060_v20  ;;  %1841 = vmatpush.bf16.msrb.mxu2 %v8061_v33  ;;  %v8070_v52 = vld [vmem:[#allocation23_spill] sm:$0xff]  ;;  %v8072_v33 = vld [vmem:[#allocation90_spill] sm:$0xff] }
 0x1b8   :  { %v8071_v20 = vld [vmem:[#allocation71_spill] sm:$0xff] }
 0x1ba   :  { %1709 = vmatpush.bf16.msrb.mxu1 %v8062_v58  ;;  %1735 = vmatpush.bf16.msra.mxu3 %v8063_v29  ;;  %v8073_v58 = vld [vmem:[#allocation129_spill] sm:$0xff] }
 0x1bb   :  { %1816 = vmatpush.bf16.msra.mxu0 %v8064_v47  ;;  %1842 = vmatpush.bf16.msrb.mxu2 %v8065_v39  ;;  %v8074_v29 = vld [vmem:[#allocation25_spill] sm:$0xff]  ;;  %v8075_v47 = vld [vmem:[#allocation75_spill] sm:$0xff]  ;;  %v8076_v39 = vld [vmem:[#allocation96_spill] sm:$0xff] }
 0x1be   :  { %1710 = vmatpush.bf16.msrb.mxu1 %v8066_v41  ;;  %1736 = vmatpush.bf16.msra.mxu3 %v8067_v40  ;;  %v8077_v41 = vld [vmem:[#allocation131_spill] sm:$0xff] }
 0x1bf   :  { %1817 = vmatpush.bf16.msra.mxu0 %v8068_v7  ;;  %1843 = vmatpush.bf16.msrb.mxu2 %v8069_v31  ;;  %v8078_v40 = vld [vmem:[#allocation27_spill] sm:$0xff] }
 0x1c0   :  { %v8079_v7 = vld [vmem:[#allocation79_spill] sm:$0xff] }
 0x1c1   :  { %v8080_v31 = vld [vmem:[#allocation99_spill] sm:$0xff] }
 0x1c2   :  { %1711 = vmatpush.bf16.msrb.mxu1 %v8072_v33  ;;  %1737 = vmatpush.bf16.msra.mxu3 %v8073_v58  ;;  %v8083_v33 = vld [vmem:[#allocation83_spill] sm:$0xff]  ;;  %v8084_v58 = vld [vmem:[#allocation105_spill] sm:$0xff] }
 0x1c3   :  { %1862 = vmatpush.bf16.msrb.mxu0 %v8070_v52  ;;  %1888 = vmatpush.bf16.msra.mxu2 %v8071_v20  ;;  %v8081_v52 = vld [vmem:[#allocation132_spill] sm:$0xff]  ;;  %v8082_v20 = vld [vmem:[#allocation29_spill] sm:$0xff] }
 0x1c6   :  { %1712 = vmatpush.bf16.msrb.mxu1 %v8076_v39  ;;  %1738 = vmatpush.bf16.msra.mxu3 %v8077_v41  ;;  %v8087_v39 = vld [vmem:[#allocation40_spill] sm:$0xff]  ;;  %v8088_v41 = vld [vmem:[#allocation31_spill] sm:$0xff] }
 0x1c7   :  { %1863 = vmatpush.bf16.msrb.mxu0 %v8074_v29  ;;  %1889 = vmatpush.bf16.msra.mxu2 %v8075_v47  ;;  %v8085_v29 = vld [vmem:[#allocation135_spill] sm:$0xff]  ;;  %v8086_v47 = vld [vmem:[#allocation8_spill] sm:$0xff] }
 0x1ca   :  { %1713 = vmatpush.bf16.msrb.mxu1 %v8080_v31  ;;  %1739 = vmatpush.bf16.msra.mxu3 %v8081_v52  ;;  %v8089_v52 = vld [vmem:[#allocation10_spill] sm:$0xff]  ;;  %v8110_v31 = vld [vmem:[#allocation28_spill] sm:$0xff] }
 0x1cb   :  { %1864 = vmatpush.bf16.msrb.mxu0 %v8078_v40  ;;  %1890 = vmatpush.bf16.msra.mxu2 %v8079_v7  ;;  %v8114_v7 = vld [vmem:[#allocation32_spill] sm:$0xff] }
 0x1cc   :  { %v8118_v40 = vld [vmem:[#allocation36_spill] sm:$0xff] }
 0x1ce   :  { %1714 = vmatpush.bf16.msrb.mxu1 %v8084_v58  ;;  %1740 = vmatpush.bf16.msra.mxu3 %v8085_v29  ;;  %v8092_v29 = vld [vmem:[#allocation12_spill] sm:$0xff] }
 0x1cf   :  { %1865 = vmatpush.bf16.msrb.mxu0 %v8082_v20  ;;  %1891 = vmatpush.bf16.msra.mxu2 %v8083_v33  ;;  %v8090_v20 = vld [vmem:[#allocation44_spill] sm:$0xff]  ;;  %v8091_v33 = vld [vmem:[#allocation33_spill] sm:$0xff] }
 0x1d1   :  { %1715 = vmatmul.bf16.vlgmr.msrb.gmra.mxu1 %v6431_v43  ;;  %1741 = vmatmul.bf16.vlgmr.msra.gmra.mxu3 %v6431_v43  ;;  %v8097_v43 = vld [vmem:[#allocation37_spill] sm:$0xff] }
 0x1d2   :  { %1823 = vmatpush.bf16.msra.mxu1 %v8086_v47  ;;  %1849 = vmatpush.bf16.msrb.mxu3 %v8087_v39  ;;  %v8093_v47 = vld [vmem:[#allocation48_spill] sm:$0xff]  ;;  %v8094_v39 = vld [vmem:[#allocation35_spill] sm:$0xff] }
 0x1d3   :  { %1866 = vmatpush.bf16.msrb.mxu0 %v8088_v41  ;;  %1892 = vmatpush.bf16.msra.mxu2 %v8027_v37  ;;  %v8095_v37 = vld [vmem:[#allocation14_spill] sm:$0xff]  ;;  %v8096_v41 = vld [vmem:[#allocation52_spill] sm:$0xff] }
 0x1d6   :  { %1824 = vmatpush.bf16.msra.mxu1 %v8089_v52  ;;  %1850 = vmatpush.bf16.msrb.mxu3 %v8090_v20  ;;  %v8098_v20 = vld [vmem:[#allocation16_spill] sm:$0xff]  ;;  %v8104_v52 = vld [vmem:[#allocation22_spill] sm:$0xff] }
 0x1d7   :  { %1867 = vmatpush.bf16.msrb.mxu0 %v8091_v33  ;;  %1893 = vmatpush.bf16.msra.mxu2 %v8029_v12  ;;  %v8099_v33 = vld [vmem:[#allocation56_spill] sm:$0xff]  ;;  %v8100_v12 = vld [vmem:[#allocation18_spill] sm:$0xff] }
 0x1da   :  { %1825 = vmatpush.bf16.msra.mxu1 %v8092_v29  ;;  %1851 = vmatpush.bf16.msrb.mxu3 %v8093_v47  ;;  %v8101_v29 = vld [vmem:[#allocation60_spill] sm:$0xff] }
 0x1db   :  { %1868 = vmatpush.bf16.msrb.mxu0 %v8094_v39  ;;  %1894 = vmatpush.bf16.msra.mxu2 %v5817_v48  ;;  %v8102_v39 = vld [vmem:[#allocation20_spill] sm:$0xff] }
 0x1dc   :  { %v8103_v48 = vld [vmem:[#allocation64_spill] sm:$0xff] }
 0x1de   :  { %1826 = vmatpush.bf16.msra.mxu1 %v8095_v37  ;;  %1852 = vmatpush.bf16.msrb.mxu3 %v8096_v41  ;;  %v8105_v41 = vld [vmem:[#allocation68_spill] sm:$0xff] }
 0x1df   :  { %1869 = vmatpush.bf16.msrb.mxu0 %v8097_v43  ;;  %1895 = vmatpush.bf16.msra.mxu2 %v5859_v35  ;;  %v1547_v47 = vpop.f32.mrf.mxu0  ;;  %v8106_v35 = vld [vmem:[#allocation24_spill] sm:$0xff] }
 0x1e2   :  { %1827 = vmatpush.bf16.msra.mxu1 %v8098_v20  ;;  %1853 = vmatpush.bf16.msrb.mxu3 %v8099_v33  ;;  %v8107_v20 = vld [vmem:[#allocation72_spill] sm:$0xff]  ;;  %v8108_v33 = vld [vmem:[#allocation26_spill] sm:$0xff] }
 0x1e5   :  { %v1573_v37 = vpop.f32.mrf.mxu2 }
 0x1e6   :  { %1828 = vmatpush.bf16.msra.mxu1 %v8100_v12  ;;  %1854 = vmatpush.bf16.msrb.mxu3 %v8101_v29  ;;  %v8109_v12 = vld [vmem:[#allocation76_spill] sm:$0xff] }
 0x1e7   :  { %v1549_v43 = vpop.f32.mrf.mxu0 }
 0x1ea   :  { %1829 = vmatpush.bf16.msra.mxu1 %v8102_v39  ;;  %1855 = vmatpush.bf16.msrb.mxu3 %v8103_v48  ;;  %v8111_v39 = vld [vmem:[#allocation80_spill] sm:$0xff]  ;;  %v8112_v48 = vld [vmem:[#allocation30_spill] sm:$0xff] }
 0x1ed   :  { %v1575_v29 = vpop.f32.mrf.mxu2 }
 0x1ee   :  { %1830 = vmatpush.bf16.msra.mxu1 %v8104_v52  ;;  %1856 = vmatpush.bf16.msrb.mxu3 %v8105_v41  ;;  %v8113_v52 = vld [vmem:[#allocation84_spill] sm:$0xff] }
 0x1ef   :  { %v1599_v58 = vpop.f32.mrf.mxu0 }
 0x1f2   :  { %1875 = vmatpush.bf16.msrb.mxu1 %v8106_v35  ;;  %1901 = vmatpush.bf16.msra.mxu3 %v8107_v20  ;;  %v8115_v35 = vld [vmem:[#allocation88_spill] sm:$0xff]  ;;  %v8116_v20 = vld [vmem:[#allocation34_spill] sm:$0xff] }
 0x1f5   :  { %v1625_v41 = vpop.f32.mrf.mxu2 }
 0x1f6   :  { %1876 = vmatpush.bf16.msrb.mxu1 %v8108_v33  ;;  %1902 = vmatpush.bf16.msra.mxu3 %v8109_v12  ;;  %v8117_v33 = vld [vmem:[#allocation93_spill] sm:$0xff] }
 0x1f7   :  { %v1601_v43 = vpop.f32.mrf.mxu0 }
 0x1fa   :  { %1877 = vmatpush.bf16.msrb.mxu1 %v8110_v31  ;;  %1903 = vmatpush.bf16.msra.mxu3 %v8111_v39  ;;  %v8119_v31 = vld [vmem:[#allocation98_spill] sm:$0xff] }
 0x1fb   :  { %v8120_v39 = vld [vmem:[#allocation38_spill] sm:$0xff] }
 0x1fd   :  { %v1627_v29 = vpop.f32.mrf.mxu2 }
 0x1fe   :  { %1878 = vmatpush.bf16.msrb.mxu1 %v8112_v48  ;;  %1904 = vmatpush.bf16.msra.mxu3 %v8113_v52  ;;  %v8121_v48 = vld [vmem:[#allocation102_spill] sm:$0xff] }
 0x1ff   :  { %v1651_v12 = vpop.f32.mrf.mxu0 }
 0x202   :  { %1879 = vmatpush.bf16.msrb.mxu1 %v8114_v7  ;;  %1905 = vmatpush.bf16.msra.mxu3 %v8115_v35  ;;  %v8122_v35 = vld [vmem:[#allocation94_spill] sm:$0xff] }
 0x203   :  { %v1749_v45 = vunpack.c.l.bf16 %v8122_v35  ;;  %v1750_v29 = vunpack.c.h.bf16 %v8122_v35 }
 0x205   :  { %v1677_v52 = vpop.f32.mrf.mxu2 }
 0x206   :  { %1880 = vmatpush.bf16.msrb.mxu1 %v8116_v20  ;;  %1906 = vmatpush.bf16.msra.mxu3 %v8117_v33 }
 0x207   :  { %v1653_v43 = vpop.f32.mrf.mxu0 }
 0x208   :  { %v8123_v43 = vld [vmem:[#allocation117_spill] sm:$0xff] }
 0x209   :  { %v1751_v8 = vunpack.c.l.bf16 %v8123_v43 }
 0x20a   :  { %1881 = vmatpush.bf16.msrb.mxu1 %v8118_v40  ;;  %1907 = vmatpush.bf16.msra.mxu3 %v8119_v31 }
 0x20d   :  { %v1679_v28 = vpop.f32.mrf.mxu2 }
 0x20e   :  { %1882 = vmatpush.bf16.msrb.mxu1 %v8120_v39  ;;  %1908 = vmatpush.bf16.msra.mxu3 %v8121_v48  ;;  %v1560_v18 = vpop.f32.mrf.mxu1 }
 0x20f   :  { %v1561_v7 = vadd.f32 %v1560_v18, %v1547_v47 }
 0x211   :  { %v1753_v20 = vadd.f32 %v1749_v45, %v1561_v7 }
 0x213   :  { %v1768_v63 = vmul.f32 0.5, %v1753_v20  ;;  %v1752_v20 = vunpack.c.h.bf16 %v8123_v43 }
 0x214   :  { %v1586_v17 = vpop.f32.mrf.mxu3 }
 0x215   :  { %v1587_v33 = vadd.f32 %v1586_v17, %v1573_v37  ;;  %4611 = vtanh.f32 %v1768_v63 }
 0x216   :  { %v1562_v40 = vpop.f32.mrf.mxu1 }
 0x217   :  { %v1754_v21 = vadd.f32 %v1750_v29, %v1587_v33 }
 0x219   :  { %v1772_v31 = vmul.f32 0.5, %v1754_v21 }
 0x21b   :  { %4613 = vtanh.f32 %v1772_v31  ;;  %v4612_v47 = vpop.eup %4611 }
 0x21c   :  { %v1588_v39 = vpop.f32.mrf.mxu3  ;;  %v1770_v7 = vmul.f32 0.5, %v4612_v47  ;;  %v8124_v47 = vld [vmem:[#allocation118_spill] sm:$0xff] }
 0x21e   :  { %v1612_v48 = vpop.f32.mrf.mxu1  ;;  %v1771_v39 = vadd.f32 0.5, %v1770_v7 }
 0x21f   :  { %v1613_v15 = vadd.f32 %v1612_v48, %v1599_v58 }
 0x221   :  { %v1703_v28 = vpop.f32.mrf.mxu0  ;;  %v4614_v18 = vpop.eup %4613  ;;  %v1755_v24 = vadd.f32 %v1751_v8, %v1613_v15 }
 0x222   :  { %v1774_v45 = vmul.f32 0.5, %v4614_v18  ;;  %v1760_v18 = vunpack.c.l.bf16 %v8124_v47 }
 0x223   :  { %4615 = vtanh.f32 %v1755_v24 }
 0x224   :  { %v1638_v37 = vpop.f32.mrf.mxu3  ;;  %v1775_v17 = vadd.f32 0.5, %v1774_v45 }
 0x225   :  { %v1639_v35 = vadd.f32 %v1638_v37, %v1625_v41 }
 0x226   :  { %v1614_v63 = vpop.f32.mrf.mxu1  ;;  %v1781_v33 = vmul.f32 %v1775_v17, %v6389_v16 }
 0x227   :  { %v1729_v21 = vpop.f32.mrf.mxu2  ;;  %v1756_v31 = vadd.f32 %v1752_v20, %v1639_v35 }
 0x229   :  { %v1705_v40 = vpop.f32.mrf.mxu0  ;;  %v4616_v48 = vpop.eup %4615  ;;  %v1777_v58 = vmul.f32 0.5, %v1756_v31 }
 0x22a   :  { %v1782_v29 = vmul.f32 %v4616_v48, %v1771_v39 }
 0x22b   :  { %4617 = vtanh.f32 %v1777_v58 }
 0x22c   :  { %v6553_v8 = vadd.f32 %v1782_v29, %v1781_v33  ;;  %v1640_v24 = vpop.f32.mrf.mxu3 }
 0x22e   :  { %4619 = vtanh.f32 %v6553_v8  ;;  %v1664_v15 = vpop.f32.mrf.mxu1 }
 0x22f   :  { %v1731_v41 = vpop.f32.mrf.mxu2  ;;  %v1665_v43 = vadd.f32 %v1664_v15, %v1651_v12  ;;  %v1761_v12 = vunpack.c.h.bf16 %v8124_v47 }
 0x230   :  { %v8125_v41 = vld [vmem:[#allocation143_spill] sm:$0xff] }
 0x231   :  { %v4618_v45 = vpop.eup %4617  ;;  %v1764_v37 = vadd.f32 %v1760_v18, %v1665_v43  ;;  %v1762_v15 = vunpack.c.l.bf16 %v8125_v41 }
 0x232   :  { %v1779_v7 = vmul.f32 0.5, %v4618_v45 }
 0x234   :  { %v4620_v35 = vpop.eup %4619  ;;  %v1780_v20 = vadd.f32 0.5, %v1779_v7  ;;  %v1690_v63 = vpop.f32.mrf.mxu3 }
 0x235   :  { %v1691_v39 = vadd.f32 %v1690_v63, %v1677_v52  ;;  %v1786_v52 = vmul.f32 0.5, %v1764_v37 }
 0x236   :  { %v1785_v31 = vmul.f32 %v4620_v35, %v1780_v20  ;;  %v1666_v16 = vpop.f32.mrf.mxu1  ;;  %v1763_v35 = vunpack.c.h.bf16 %v8125_v41  ;;  %v8126_v41 = vld [vmem:[#allocation115_spill] sm:$0xff] }
 0x237   :  { %v1765_v48 = vadd.f32 %v1761_v12, %v1691_v39 }
 0x238   :  { %v6557_v17 = vpack.c.bf16 %v1785_v31, %v1785_v31 }
 0x239   :  { %v1790_v58 = vmul.f32 0.5, %v1765_v48 }
 0x23a   :  { %1806 = vst [vmem:[#allocation4 + $0x4] sm:$0xf] %v6557_v17  ;;  %1818 = vmatmul.bf16.vlgmr.msra.gmra.mxu0 %v6557_v17  ;;  %1844 = vmatmul.bf16.vlgmr.msrb.gmra.mxu2 %v6557_v17 }
 0x23b   :  { %1914 = vmatpush.bf16.msra.mxu0 %v8033_v22  ;;  %1940 = vmatpush.bf16.msrb.mxu2 %v5942_v10  ;;  %4621 = vtanh.f32 %v1790_v58 }
 0x23c   :  { %v1692_v40 = vpop.f32.mrf.mxu3  ;;  %4623 = vtanh.f32 %v1786_v52 }
 0x23f   :  { %1915 = vmatpush.bf16.msra.mxu0 %v8034_v3  ;;  %1941 = vmatpush.bf16.msrb.mxu2 %v5975_v14 }
 0x241   :  { %v4622_v29 = vpop.eup %4621 }
 0x242   :  { %v4624_v43 = vpop.eup %4623  ;;  %v1792_v18 = vmul.f32 0.5, %v4622_v29 }
 0x243   :  { %1916 = vmatpush.bf16.msra.mxu0 %v8035_v60  ;;  %1942 = vmatpush.bf16.msrb.mxu2 %v5999_v51  ;;  %v1788_v45 = vmul.f32 0.5, %v4624_v43  ;;  %v8128_v43 = vld [vmem:[#allocation133_spill] sm:$0xff] }
 0x244   :  { %v1793_v20 = vadd.f32 0.5, %v1792_v18  ;;  %v8130_v18 = vld [vmem:[#allocation39_spill] sm:$0xff] }
 0x245   :  { %v1789_v31 = vadd.f32 0.5, %v1788_v45  ;;  %v8131_v45 = vld [vmem:[#allocation58_spill] sm:$0xff] }
 0x246   :  { %v1799_v12 = vmul.f32 %v1793_v20, %v6418_v5  ;;  %v8135_v20 = vld [vmem:[#allocation62_spill] sm:$0xff] }
 0x247   :  { %1917 = vmatpush.bf16.msra.mxu0 %v8036_v59  ;;  %1943 = vmatpush.bf16.msrb.mxu2 %v6025_v19 }
 0x24a   :  { %1870 = vmatmul.bf16.vlgmr.msrb.gmra.mxu0 %v6557_v17  ;;  %1896 = vmatmul.bf16.vlgmr.msra.gmra.mxu2 %v6557_v17 }
 0x24b   :  { %1918 = vmatpush.bf16.msra.mxu0 %v8037_v55  ;;  %1944 = vmatpush.bf16.msrb.mxu2 %v6047_v1 }
 0x24e   :  { %v1716_v33 = vpop.f32.mrf.mxu1 }
 0x24f   :  { %v1717_v24 = vadd.f32 %v1716_v33, %v1703_v28  ;;  %1919 = vmatpush.bf16.msra.mxu0 %v8038_v38  ;;  %1945 = vmatpush.bf16.msrb.mxu2 %v6075_v53 }
 0x251   :  { %v1766_v47 = vadd.f32 %v1762_v15, %v1717_v24  ;;  %v8127_v15 = vld [vmem:[#allocation104_spill] sm:$0xff] }
 0x253   :  { %4625 = vtanh.f32 %v1766_v47  ;;  %1920 = vmatpush.bf16.msra.mxu0 %v8039_v54  ;;  %1946 = vmatpush.bf16.msrb.mxu2 %v6099_v44  ;;  %v8129_v47 = vld [vmem:[#allocation7_spill] sm:$0xff] }
 0x254   :  { %v1742_v37 = vpop.f32.mrf.mxu3 }
 0x255   :  { %v1743_v7 = vadd.f32 %v1742_v37, %v1729_v21  ;;  %v8132_v37 = vld [vmem:[#allocation116_spill] sm:$0xff] }
 0x256   :  { %v1718_v63 = vpop.f32.mrf.mxu1 }
 0x257   :  { %v1767_v28 = vadd.f32 %v1763_v35, %v1743_v7  ;;  %1921 = vmatpush.bf16.msra.mxu0 %v8040_v57  ;;  %1947 = vmatpush.bf16.msrb.mxu2 %v6135_v50  ;;  %v8133_v7 = vld [vmem:[#allocation9_spill] sm:$0xff]  ;;  %v8134_v35 = vld [vmem:[#allocation43_spill] sm:$0xff] }
 0x258   :  { %v8136_v63 = vld [vmem:[#allocation119_spill] sm:$0xff] }
 0x259   :  { %v4626_v16 = vpop.eup %4625  ;;  %v1795_v39 = vmul.f32 0.5, %v1767_v28  ;;  %v8137_v28 = vld [vmem:[#allocation11_spill] sm:$0xff] }
 0x25a   :  { %v1800_v40 = vmul.f32 %v4626_v16, %v1789_v31  ;;  %1922 = vmatmul.bf16.vlgmr.msra.gmra.mxu0 %v6557_v17  ;;  %1948 = vmatmul.bf16.vlgmr.msrb.gmra.mxu2 %v6557_v17  ;;  %v8138_v31 = vld [vmem:[#allocation47_spill] sm:$0xff]  ;;  %v8139_v16 = vld [vmem:[#allocation66_spill] sm:$0xff] }
 0x25b   :  { %4627 = vtanh.f32 %v1795_v39  ;;  %1966 = vmatpush.bf16.msrb.mxu0 %v8041_v2  ;;  %1992 = vmatpush.bf16.msra.mxu2 %v6140_v25  ;;  %v8140_v39 = vld [vmem:[#allocation120_spill] sm:$0xff] }
 0x25c   :  { %v6586_v21 = vadd.f32 %v1800_v40, %v1799_v12  ;;  %v1744_v48 = vpop.f32.mrf.mxu3  ;;  %v8141_v12 = vld [vmem:[#allocation13_spill] sm:$0xff]  ;;  %v8142_v40 = vld [vmem:[#allocation51_spill] sm:$0xff] }
 0x25d   :  { %v8144_v48 = vld [vmem:[#allocation122_spill] sm:$0xff] }
 0x25e   :  { %4629 = vtanh.f32 %v6586_v21 }
 0x25f   :  { %1967 = vmatpush.bf16.msrb.mxu0 %v8042_v26  ;;  %1993 = vmatpush.bf16.msra.mxu2 %v6164_v30 }
 0x261   :  { %v4628_v5 = vpop.eup %4627 }
 0x262   :  { %v1797_v58 = vmul.f32 0.5, %v4628_v5  ;;  %v8145_v5 = vld [vmem:[#allocation74_spill] sm:$0xff] }
 0x263   :  { %1968 = vmatpush.bf16.msrb.mxu0 %v8043_v42  ;;  %1994 = vmatpush.bf16.msra.mxu2 %v6188_v6 }
 0x264   :  { %v4630_v52 = vpop.eup %4629  ;;  %v1798_v33 = vadd.f32 0.5, %v1797_v58  ;;  %v8146_v58 = vld [vmem:[#allocation123_spill] sm:$0xff] }
 0x266   :  { %v1803_v29 = vmul.f32 %v4630_v52, %v1798_v33  ;;  %v8147_v52 = vld [vmem:[#allocation15_spill] sm:$0xff] }
 0x267   :  { %1969 = vmatpush.bf16.msrb.mxu0 %v8044_v9  ;;  %1995 = vmatpush.bf16.msra.mxu2 %v6208_v34  ;;  %v8148_v33 = vld [vmem:[#allocation55_spill] sm:$0xff] }
 0x268   :  { %v6597_v24 = vpack.c.bf16 %v1803_v29, %v1803_v29  ;;  %v8149_v29 = vld [vmem:[#allocation78_spill] sm:$0xff] }
 0x26a   :  { %1809 = vst [vmem:[#allocation5 + $0x18] sm:$0xf] %v6597_v24  ;;  %1831 = vmatmul.bf16.vlgmr.msra.gmra.mxu1 %v6597_v24  ;;  %1857 = vmatmul.bf16.vlgmr.msrb.gmra.mxu3 %v6597_v24 }
 0x26b   :  { %1927 = vmatpush.bf16.msra.mxu1 %v8045_v11  ;;  %1953 = vmatpush.bf16.msrb.mxu3 %v5945_v49 }
 0x26c   :  { %1970 = vmatpush.bf16.msrb.mxu0 %v8046_v0  ;;  %1996 = vmatpush.bf16.msra.mxu2 %v6228_v62 }
 0x26f   :  { %1928 = vmatpush.bf16.msra.mxu1 %v8047_v61  ;;  %1954 = vmatpush.bf16.msrb.mxu3 %v5978_v56 }
 0x270   :  { %1971 = vmatpush.bf16.msrb.mxu0 %v8048_v46  ;;  %1997 = vmatpush.bf16.msra.mxu2 %v6248_v36 }
 0x273   :  { %1929 = vmatpush.bf16.msra.mxu1 %v8049_v32  ;;  %1955 = vmatpush.bf16.msrb.mxu3 %v6003_v13 }
 0x274   :  { %1972 = vmatpush.bf16.msrb.mxu0 %v5831_v23  ;;  %1998 = vmatpush.bf16.msra.mxu2 %v6269_v27 }
 0x277   :  { %1930 = vmatpush.bf16.msra.mxu1 %v8050_v4  ;;  %1956 = vmatpush.bf16.msrb.mxu3 %v8126_v41 }
 0x278   :  { %1973 = vmatpush.bf16.msrb.mxu0 %v8127_v15  ;;  %1999 = vmatpush.bf16.msra.mxu2 %v8128_v43 }
 0x27a   :  { %1883 = vmatmul.bf16.vlgmr.msrb.gmra.mxu1 %v6597_v24  ;;  %1909 = vmatmul.bf16.vlgmr.msra.gmra.mxu3 %v6597_v24 }
 0x27b   :  { %1931 = vmatpush.bf16.msra.mxu1 %v8131_v45  ;;  %1957 = vmatpush.bf16.msrb.mxu3 %v8132_v37 }
 0x27c   :  { %2082 = vmatpush.bf16.msra.mxu0 %v8129_v47  ;;  %2108 = vmatpush.bf16.msrb.mxu2 %v8130_v18 }
 0x27d   :  { %1974 = vmatmul.bf16.vlgmr.msrb.gmra.mxu0 %v6557_v17  ;;  %2000 = vmatmul.bf16.vlgmr.msra.gmra.mxu2 %v6557_v17  ;;  %v8143_v17 = vld [vmem:[#allocation70_spill] sm:$0xff] }
 0x27f   :  { %1932 = vmatpush.bf16.msra.mxu1 %v8135_v20  ;;  %1958 = vmatpush.bf16.msrb.mxu3 %v8136_v63  ;;  %v8209_v63 = vld [vmem:[#allocation32_spill] sm:$0xff] }
 0x280   :  { %2083 = vmatpush.bf16.msra.mxu0 %v8133_v7  ;;  %2109 = vmatpush.bf16.msrb.mxu2 %v8134_v35  ;;  %v8213_v20 = vld [vmem:[#allocation36_spill] sm:$0xff] }
 0x283   :  { %1933 = vmatpush.bf16.msra.mxu1 %v8139_v16  ;;  %1959 = vmatpush.bf16.msrb.mxu3 %v8140_v39  ;;  %v8158_v39 = vld [vmem:[#allocation128_spill] sm:$0xff]  ;;  %v8159_v16 = vld [vmem:[#allocation21_spill] sm:$0xff] }
 0x284   :  { %2084 = vmatpush.bf16.msra.mxu0 %v8137_v28  ;;  %2110 = vmatpush.bf16.msrb.mxu2 %v8138_v31  ;;  %v8205_v28 = vld [vmem:[#allocation28_spill] sm:$0xff] }
 0x287   :  { %1934 = vmatpush.bf16.msra.mxu1 %v8143_v17  ;;  %1960 = vmatpush.bf16.msrb.mxu3 %v8144_v48  ;;  %v8152_v17 = vld [vmem:[#allocation59_spill] sm:$0xff]  ;;  %v8153_v48 = vld [vmem:[#allocation82_spill] sm:$0xff] }
 0x288   :  { %2085 = vmatpush.bf16.msra.mxu0 %v8141_v12  ;;  %2111 = vmatpush.bf16.msrb.mxu2 %v8142_v40  ;;  %v8150_v12 = vld [vmem:[#allocation125_spill] sm:$0xff] }
 0x289   :  { %v8151_v40 = vld [vmem:[#allocation17_spill] sm:$0xff] }
 0x28a   :  { %1935 = vmatmul.bf16.vlgmr.msra.gmra.mxu1 %v6597_v24  ;;  %1961 = vmatmul.bf16.vlgmr.msrb.gmra.mxu3 %v6597_v24 }
 0x28b   :  { %1979 = vmatpush.bf16.msrb.mxu1 %v8145_v5  ;;  %2005 = vmatpush.bf16.msra.mxu3 %v8146_v58  ;;  %v8154_v5 = vld [vmem:[#allocation126_spill] sm:$0xff]  ;;  %v8155_v58 = vld [vmem:[#allocation19_spill] sm:$0xff] }
 0x28c   :  { %2086 = vmatpush.bf16.msra.mxu0 %v8147_v52  ;;  %2112 = vmatpush.bf16.msrb.mxu2 %v8148_v33  ;;  %v8156_v52 = vld [vmem:[#allocation63_spill] sm:$0xff]  ;;  %v8157_v33 = vld [vmem:[#allocation86_spill] sm:$0xff] }
 0x28f   :  { %1980 = vmatpush.bf16.msrb.mxu1 %v8149_v29  ;;  %2006 = vmatpush.bf16.msra.mxu3 %v8150_v12  ;;  %v8160_v29 = vld [vmem:[#allocation67_spill] sm:$0xff] }
 0x290   :  { %2087 = vmatpush.bf16.msra.mxu0 %v8151_v40  ;;  %2113 = vmatpush.bf16.msrb.mxu2 %v8152_v17  ;;  %v8161_v12 = vld [vmem:[#allocation23_spill] sm:$0xff]  ;;  %v8163_v17 = vld [vmem:[#allocation90_spill] sm:$0xff] }
 0x291   :  { %v8162_v40 = vld [vmem:[#allocation71_spill] sm:$0xff] }
 0x293   :  { %1981 = vmatpush.bf16.msrb.mxu1 %v8153_v48  ;;  %2007 = vmatpush.bf16.msra.mxu3 %v8154_v5  ;;  %v8164_v48 = vld [vmem:[#allocation129_spill] sm:$0xff] }
 0x294   :  { %2088 = vmatpush.bf16.msra.mxu0 %v8155_v58  ;;  %2114 = vmatpush.bf16.msrb.mxu2 %v8156_v52  ;;  %v8165_v5 = vld [vmem:[#allocation25_spill] sm:$0xff]  ;;  %v8166_v58 = vld [vmem:[#allocation75_spill] sm:$0xff]  ;;  %v8167_v52 = vld [vmem:[#allocation96_spill] sm:$0xff] }
 0x297   :  { %1982 = vmatpush.bf16.msrb.mxu1 %v8157_v33  ;;  %2008 = vmatpush.bf16.msra.mxu3 %v8158_v39  ;;  %v8168_v33 = vld [vmem:[#allocation131_spill] sm:$0xff] }
 0x298   :  { %2089 = vmatpush.bf16.msra.mxu0 %v8159_v16  ;;  %2115 = vmatpush.bf16.msrb.mxu2 %v8160_v29  ;;  %v8169_v39 = vld [vmem:[#allocation27_spill] sm:$0xff] }
 0x299   :  { %v8170_v16 = vld [vmem:[#allocation79_spill] sm:$0xff] }
 0x29a   :  { %v8171_v29 = vld [vmem:[#allocation99_spill] sm:$0xff] }
 0x29b   :  { %1983 = vmatpush.bf16.msrb.mxu1 %v8163_v17  ;;  %2009 = vmatpush.bf16.msra.mxu3 %v8164_v48  ;;  %v8174_v17 = vld [vmem:[#allocation83_spill] sm:$0xff]  ;;  %v8175_v48 = vld [vmem:[#allocation105_spill] sm:$0xff] }
 0x29c   :  { %2134 = vmatpush.bf16.msrb.mxu0 %v8161_v12  ;;  %2160 = vmatpush.bf16.msra.mxu2 %v8162_v40  ;;  %v8172_v12 = vld [vmem:[#allocation132_spill] sm:$0xff]  ;;  %v8173_v40 = vld [vmem:[#allocation29_spill] sm:$0xff] }
 0x29f   :  { %1984 = vmatpush.bf16.msrb.mxu1 %v8167_v52  ;;  %2010 = vmatpush.bf16.msra.mxu3 %v8168_v33  ;;  %v8178_v52 = vld [vmem:[#allocation40_spill] sm:$0xff]  ;;  %v8179_v33 = vld [vmem:[#allocation31_spill] sm:$0xff] }
 0x2a0   :  { %2135 = vmatpush.bf16.msrb.mxu0 %v8165_v5  ;;  %2161 = vmatpush.bf16.msra.mxu2 %v8166_v58  ;;  %v8176_v5 = vld [vmem:[#allocation135_spill] sm:$0xff]  ;;  %v8177_v58 = vld [vmem:[#allocation8_spill] sm:$0xff] }
 0x2a3   :  { %1985 = vmatpush.bf16.msrb.mxu1 %v8171_v29  ;;  %2011 = vmatpush.bf16.msra.mxu3 %v8172_v12  ;;  %v8181_v12 = vld [vmem:[#allocation10_spill] sm:$0xff]  ;;  %v8190_v29 = vld [vmem:[#allocation52_spill] sm:$0xff] }
 0x2a4   :  { %2136 = vmatpush.bf16.msrb.mxu0 %v8169_v39  ;;  %2162 = vmatpush.bf16.msra.mxu2 %v8170_v16  ;;  %v8180_v39 = vld [vmem:[#allocation87_spill] sm:$0xff]  ;;  %v8199_v16 = vld [vmem:[#allocation22_spill] sm:$0xff] }
 0x2a7   :  { %1986 = vmatpush.bf16.msrb.mxu1 %v8175_v48  ;;  %2012 = vmatpush.bf16.msra.mxu3 %v8176_v5  ;;  %v8184_v48 = vld [vmem:[#allocation92_spill] sm:$0xff] }
 0x2a8   :  { %2137 = vmatpush.bf16.msrb.mxu0 %v8173_v40  ;;  %2163 = vmatpush.bf16.msra.mxu2 %v8174_v17  ;;  %v8182_v40 = vld [vmem:[#allocation44_spill] sm:$0xff]  ;;  %v8183_v17 = vld [vmem:[#allocation33_spill] sm:$0xff] }
 0x2a9   :  { %v8185_v5 = vld [vmem:[#allocation12_spill] sm:$0xff] }
 0x2aa   :  { %1987 = vmatmul.bf16.vlgmr.msrb.gmra.mxu1 %v6597_v24  ;;  %2013 = vmatmul.bf16.vlgmr.msra.gmra.mxu3 %v6597_v24  ;;  %v8191_v24 = vld [vmem:[#allocation37_spill] sm:$0xff] }
 0x2ab   :  { %2095 = vmatpush.bf16.msra.mxu1 %v8177_v58  ;;  %2121 = vmatpush.bf16.msrb.mxu3 %v8178_v52  ;;  %v8186_v58 = vld [vmem:[#allocation48_spill] sm:$0xff]  ;;  %v8187_v52 = vld [vmem:[#allocation35_spill] sm:$0xff] }
 0x2ac   :  { %2138 = vmatpush.bf16.msrb.mxu0 %v8179_v33  ;;  %2164 = vmatpush.bf16.msra.mxu2 %v8180_v39  ;;  %v8188_v33 = vld [vmem:[#allocation97_spill] sm:$0xff]  ;;  %v8189_v39 = vld [vmem:[#allocation14_spill] sm:$0xff] }
 0x2af   :  { %2096 = vmatpush.bf16.msra.mxu1 %v8181_v12  ;;  %2122 = vmatpush.bf16.msrb.mxu3 %v8182_v40  ;;  %v8192_v12 = vld [vmem:[#allocation101_spill] sm:$0xff]  ;;  %v8193_v40 = vld [vmem:[#allocation16_spill] sm:$0xff] }
 0x2b0   :  { %2139 = vmatpush.bf16.msrb.mxu0 %v8183_v17  ;;  %2165 = vmatpush.bf16.msra.mxu2 %v8184_v48  ;;  %v8194_v17 = vld [vmem:[#allocation56_spill] sm:$0xff]  ;;  %v8195_v48 = vld [vmem:[#allocation18_spill] sm:$0xff] }
 0x2b3   :  { %2097 = vmatpush.bf16.msra.mxu1 %v8185_v5  ;;  %2123 = vmatpush.bf16.msrb.mxu3 %v8186_v58  ;;  %v8196_v5 = vld [vmem:[#allocation60_spill] sm:$0xff] }
 0x2b4   :  { %2140 = vmatpush.bf16.msrb.mxu0 %v8187_v52  ;;  %2166 = vmatpush.bf16.msra.mxu2 %v8188_v33  ;;  %v8197_v52 = vld [vmem:[#allocation20_spill] sm:$0xff] }
 0x2b5   :  { %v8198_v33 = vld [vmem:[#allocation64_spill] sm:$0xff] }
 0x2b7   :  { %2098 = vmatpush.bf16.msra.mxu1 %v8189_v39  ;;  %2124 = vmatpush.bf16.msrb.mxu3 %v8190_v29  ;;  %v1819_v58 = vpop.f32.mrf.mxu0  ;;  %v8200_v29 = vld [vmem:[#allocation68_spill] sm:$0xff] }
 0x2b8   :  { %2141 = vmatpush.bf16.msrb.mxu0 %v8191_v24  ;;  %2167 = vmatpush.bf16.msra.mxu2 %v8192_v12  ;;  %v8201_v12 = vld [vmem:[#allocation24_spill] sm:$0xff] }
 0x2bb   :  { %2099 = vmatpush.bf16.msra.mxu1 %v8193_v40  ;;  %2125 = vmatpush.bf16.msrb.mxu3 %v8194_v17  ;;  %v8202_v40 = vld [vmem:[#allocation72_spill] sm:$0xff]  ;;  %v8203_v17 = vld [vmem:[#allocation26_spill] sm:$0xff] }
 0x2bd   :  { %v1845_v39 = vpop.f32.mrf.mxu2 }
 0x2bf   :  { %2100 = vmatpush.bf16.msra.mxu1 %v8195_v48  ;;  %2126 = vmatpush.bf16.msrb.mxu3 %v8196_v5  ;;  %v1821_v24 = vpop.f32.mrf.mxu0  ;;  %v8204_v48 = vld [vmem:[#allocation76_spill] sm:$0xff] }
 0x2c3   :  { %2101 = vmatpush.bf16.msra.mxu1 %v8197_v52  ;;  %2127 = vmatpush.bf16.msrb.mxu3 %v8198_v33  ;;  %v8206_v52 = vld [vmem:[#allocation80_spill] sm:$0xff]  ;;  %v8207_v33 = vld [vmem:[#allocation30_spill] sm:$0xff] }
 0x2c5   :  { %v1847_v5 = vpop.f32.mrf.mxu2 }
 0x2c7   :  { %2102 = vmatpush.bf16.msra.mxu1 %v8199_v16  ;;  %2128 = vmatpush.bf16.msrb.mxu3 %v8200_v29  ;;  %v1871_v31 = vpop.f32.mrf.mxu0  ;;  %v8208_v16 = vld [vmem:[#allocation84_spill] sm:$0xff] }
 0x2cb   :  { %2147 = vmatpush.bf16.msrb.mxu1 %v8201_v12  ;;  %2173 = vmatpush.bf16.msra.mxu3 %v8202_v40  ;;  %v8210_v12 = vld [vmem:[#allocation88_spill] sm:$0xff]  ;;  %v8211_v40 = vld [vmem:[#allocation34_spill] sm:$0xff] }
 0x2cd   :  { %v1897_v29 = vpop.f32.mrf.mxu2 }
 0x2cf   :  { %2148 = vmatpush.bf16.msrb.mxu1 %v8203_v17  ;;  %2174 = vmatpush.bf16.msra.mxu3 %v8204_v48  ;;  %v1873_v24 = vpop.f32.mrf.mxu0  ;;  %v8212_v17 = vld [vmem:[#allocation93_spill] sm:$0xff] }
 0x2d3   :  { %2149 = vmatpush.bf16.msrb.mxu1 %v8205_v28  ;;  %2175 = vmatpush.bf16.msra.mxu3 %v8206_v52  ;;  %v8214_v28 = vld [vmem:[#allocation98_spill] sm:$0xff] }
 0x2d4   :  { %v8215_v52 = vld [vmem:[#allocation38_spill] sm:$0xff] }
 0x2d5   :  { %v1899_v5 = vpop.f32.mrf.mxu2 }
 0x2d7   :  { %2150 = vmatpush.bf16.msrb.mxu1 %v8207_v33  ;;  %2176 = vmatpush.bf16.msra.mxu3 %v8208_v16  ;;  %v1923_v48 = vpop.f32.mrf.mxu0  ;;  %v8216_v33 = vld [vmem:[#allocation102_spill] sm:$0xff] }
 0x2db   :  { %2151 = vmatpush.bf16.msrb.mxu1 %v8209_v63  ;;  %2177 = vmatpush.bf16.msra.mxu3 %v8210_v12  ;;  %v8217_v12 = vld [vmem:[#allocation91_spill] sm:$0xff] }
 0x2dc   :  { %v2021_v37 = vunpack.c.l.bf16 %v8217_v12  ;;  %v2022_v5 = vunpack.c.h.bf16 %v8217_v12 }
 0x2dd   :  { %v1949_v16 = vpop.f32.mrf.mxu2 }
 0x2df   :  { %2152 = vmatpush.bf16.msrb.mxu1 %v8211_v40  ;;  %2178 = vmatpush.bf16.msra.mxu3 %v8212_v17  ;;  %v1925_v24 = vpop.f32.mrf.mxu0 }
 0x2e0   :  { %v8218_v24 = vld [vmem:[#allocation121_spill] sm:$0xff] }
 0x2e1   :  { %v2023_v15 = vunpack.c.l.bf16 %v8218_v24 }
 0x2e3   :  { %2153 = vmatpush.bf16.msrb.mxu1 %v8213_v20  ;;  %2179 = vmatpush.bf16.msra.mxu3 %v8214_v28 }
 0x2e5   :  { %v1951_v7 = vpop.f32.mrf.mxu2 }
 0x2e7   :  { %2154 = vmatpush.bf16.msrb.mxu1 %v8215_v52  ;;  %2180 = vmatpush.bf16.msra.mxu3 %v8216_v33  ;;  %v1832_v35 = vpop.f32.mrf.mxu1 }
 0x2e8   :  { %v1833_v63 = vadd.f32 %v1832_v35, %v1819_v58 }
 0x2ea   :  { %v2025_v40 = vadd.f32 %v2021_v37, %v1833_v63 }
 0x2ec   :  { %v2040_v18 = vmul.f32 0.5, %v2025_v40 }
 0x2ed   :  { %v1858_v45 = vpop.f32.mrf.mxu3 }
 0x2ee   :  { %v1859_v17 = vadd.f32 %v1858_v45, %v1845_v39  ;;  %4631 = vtanh.f32 %v2040_v18 }
 0x2ef   :  { %v1834_v20 = vpop.f32.mrf.mxu1 }
 0x2f0   :  { %v2026_v47 = vadd.f32 %v2022_v5, %v1859_v17  ;;  %v2024_v20 = vunpack.c.h.bf16 %v8218_v24 }
 0x2f2   :  { %v2044_v28 = vmul.f32 0.5, %v2026_v47 }
 0x2f4   :  { %4633 = vtanh.f32 %v2044_v28  ;;  %v4632_v35 = vpop.eup %4631 }
 0x2f5   :  { %v1860_v52 = vpop.f32.mrf.mxu3  ;;  %v2042_v45 = vmul.f32 0.5, %v4632_v35  ;;  %v8219_v35 = vld [vmem:[#allocation114_spill] sm:$0xff] }
 0x2f7   :  { %v1884_v33 = vpop.f32.mrf.mxu1  ;;  %v2043_v40 = vadd.f32 0.5, %v2042_v45 }
 0x2f8   :  { %v1885_v43 = vadd.f32 %v1884_v33, %v1871_v31 }
 0x2fa   :  { %v1975_v7 = vpop.f32.mrf.mxu0  ;;  %v4634_v58 = vpop.eup %4633  ;;  %v2027_v41 = vadd.f32 %v2023_v15, %v1885_v43 }
 0x2fb   :  { %v2046_v37 = vmul.f32 0.5, %v4634_v58  ;;  %v2032_v58 = vunpack.c.l.bf16 %v8219_v35 }
 0x2fc   :  { %4635 = vtanh.f32 %v2027_v41 }
 0x2fd   :  { %v1910_v63 = vpop.f32.mrf.mxu3  ;;  %v2047_v12 = vadd.f32 0.5, %v2046_v37 }
 0x2fe   :  { %v1911_v39 = vadd.f32 %v1910_v63, %v1897_v29 }
 0x2ff   :  { %v1886_v18 = vpop.f32.mrf.mxu1  ;;  %v2053_v33 = vmul.f32 %v2047_v12, %v6553_v8 }
 0x300   :  { %v2001_v47 = vpop.f32.mrf.mxu2  ;;  %v2028_v28 = vadd.f32 %v2024_v20, %v1911_v39 }
 0x302   :  { %v1977_v17 = vpop.f32.mrf.mxu0  ;;  %v4636_v31 = vpop.eup %4635  ;;  %v2049_v52 = vmul.f32 0.5, %v2028_v28 }
 0x303   :  { %v2054_v5 = vmul.f32 %v4636_v31, %v2043_v40 }
 0x304   :  { %4637 = vtanh.f32 %v2049_v52 }
 0x305   :  { %v6719_v15 = vadd.f32 %v2054_v5, %v2053_v33  ;;  %v1912_v41 = vpop.f32.mrf.mxu3 }
 0x307   :  { %4639 = vtanh.f32 %v6719_v15  ;;  %v1936_v29 = vpop.f32.mrf.mxu1 }
 0x308   :  { %v2003_v43 = vpop.f32.mrf.mxu2  ;;  %v1937_v24 = vadd.f32 %v1936_v29, %v1923_v48  ;;  %v2033_v48 = vunpack.c.h.bf16 %v8219_v35 }
 0x309   :  { %v8220_v43 = vld [vmem:[#allocation142_spill] sm:$0xff] }
 0x30a   :  { %v4638_v37 = vpop.eup %4637  ;;  %v2036_v63 = vadd.f32 %v2032_v58, %v1937_v24  ;;  %v2034_v29 = vunpack.c.l.bf16 %v8220_v43 }
 0x30b   :  { %v2051_v45 = vmul.f32 0.5, %v4638_v37 }
 0x30d   :  { %v4640_v39 = vpop.eup %4639  ;;  %v2052_v20 = vadd.f32 0.5, %v2051_v45  ;;  %v1962_v18 = vpop.f32.mrf.mxu3 }
 0x30e   :  { %v1963_v40 = vadd.f32 %v1962_v18, %v1949_v16  ;;  %v2058_v16 = vmul.f32 0.5, %v2036_v63 }
 0x30f   :  { %v2057_v28 = vmul.f32 %v4640_v39, %v2052_v20  ;;  %v1938_v8 = vpop.f32.mrf.mxu1  ;;  %v2035_v39 = vunpack.c.h.bf16 %v8220_v43  ;;  %v8221_v43 = vld [vmem:[#allocation115_spill] sm:$0xff] }
 0x310   :  { %v2037_v31 = vadd.f32 %v2033_v48, %v1963_v40 }
 0x311   :  { %v6723_v12 = vpack.c.bf16 %v2057_v28, %v2057_v28 }
 0x312   :  { %v2062_v52 = vmul.f32 0.5, %v2037_v31 }
 0x313   :  { %2078 = vst [vmem:[#allocation4 + $0x8] sm:$0xf] %v6723_v12  ;;  %2090 = vmatmul.bf16.vlgmr.msra.gmra.mxu0 %v6723_v12  ;;  %2116 = vmatmul.bf16.vlgmr.msrb.gmra.mxu2 %v6723_v12 }
 0x314   :  { %2186 = vmatpush.bf16.msra.mxu0 %v8033_v22  ;;  %2212 = vmatpush.bf16.msrb.mxu2 %v5942_v10  ;;  %4641 = vtanh.f32 %v2062_v52 }
 0x315   :  { %v1964_v17 = vpop.f32.mrf.mxu3  ;;  %4643 = vtanh.f32 %v2058_v16 }
 0x318   :  { %2187 = vmatpush.bf16.msra.mxu0 %v8034_v3  ;;  %2213 = vmatpush.bf16.msrb.mxu2 %v5975_v14 }
 0x31a   :  { %v4642_v5 = vpop.eup %4641 }
 0x31b   :  { %v4644_v24 = vpop.eup %4643  ;;  %v2064_v58 = vmul.f32 0.5, %v4642_v5 }
 0x31c   :  { %2188 = vmatpush.bf16.msra.mxu0 %v8035_v60  ;;  %2214 = vmatpush.bf16.msrb.mxu2 %v5999_v51  ;;  %v2060_v37 = vmul.f32 0.5, %v4644_v24  ;;  %v8223_v24 = vld [vmem:[#allocation133_spill] sm:$0xff] }
 0x31d   :  { %v2065_v20 = vadd.f32 0.5, %v2064_v58  ;;  %v8225_v58 = vld [vmem:[#allocation39_spill] sm:$0xff] }
 0x31e   :  { %v2061_v28 = vadd.f32 0.5, %v2060_v37  ;;  %v8226_v37 = vld [vmem:[#allocation58_spill] sm:$0xff] }
 0x31f   :  { %v2071_v48 = vmul.f32 %v2065_v20, %v6586_v21  ;;  %v8230_v20 = vld [vmem:[#allocation62_spill] sm:$0xff] }
 0x320   :  { %2189 = vmatpush.bf16.msra.mxu0 %v8036_v59  ;;  %2215 = vmatpush.bf16.msrb.mxu2 %v6025_v19 }
 0x323   :  { %2142 = vmatmul.bf16.vlgmr.msrb.gmra.mxu0 %v6723_v12  ;;  %2168 = vmatmul.bf16.vlgmr.msra.gmra.mxu2 %v6723_v12 }
 0x324   :  { %2190 = vmatpush.bf16.msra.mxu0 %v8037_v55  ;;  %2216 = vmatpush.bf16.msrb.mxu2 %v6047_v1 }
 0x327   :  { %v1988_v33 = vpop.f32.mrf.mxu1 }
 0x328   :  { %v1989_v41 = vadd.f32 %v1988_v33, %v1975_v7  ;;  %2191 = vmatpush.bf16.msra.mxu0 %v8038_v38  ;;  %2217 = vmatpush.bf16.msrb.mxu2 %v6075_v53 }
 0x32a   :  { %v2038_v35 = vadd.f32 %v2034_v29, %v1989_v41  ;;  %v8222_v29 = vld [vmem:[#allocation104_spill] sm:$0xff] }
 0x32c   :  { %4645 = vtanh.f32 %v2038_v35  ;;  %2192 = vmatpush.bf16.msra.mxu0 %v8039_v54  ;;  %2218 = vmatpush.bf16.msrb.mxu2 %v6099_v44  ;;  %v8224_v35 = vld [vmem:[#allocation7_spill] sm:$0xff] }
 0x32d   :  { %v2014_v63 = vpop.f32.mrf.mxu3 }
 0x32e   :  { %v2015_v45 = vadd.f32 %v2014_v63, %v2001_v47  ;;  %v8227_v63 = vld [vmem:[#allocation116_spill] sm:$0xff] }
 0x32f   :  { %v1990_v18 = vpop.f32.mrf.mxu1 }
 0x330   :  { %v2039_v7 = vadd.f32 %v2035_v39, %v2015_v45  ;;  %2193 = vmatpush.bf16.msra.mxu0 %v8040_v57  ;;  %2219 = vmatpush.bf16.msrb.mxu2 %v6135_v50  ;;  %v8228_v45 = vld [vmem:[#allocation9_spill] sm:$0xff]  ;;  %v8229_v39 = vld [vmem:[#allocation43_spill] sm:$0xff] }
 0x331   :  { %v8231_v18 = vld [vmem:[#allocation119_spill] sm:$0xff] }
 0x332   :  { %v4646_v8 = vpop.eup %4645  ;;  %v2067_v40 = vmul.f32 0.5, %v2039_v7  ;;  %v8232_v7 = vld [vmem:[#allocation11_spill] sm:$0xff] }
 0x333   :  { %v2072_v17 = vmul.f32 %v4646_v8, %v2061_v28  ;;  %2194 = vmatmul.bf16.vlgmr.msra.gmra.mxu0 %v6723_v12  ;;  %2220 = vmatmul.bf16.vlgmr.msrb.gmra.mxu2 %v6723_v12  ;;  %v8233_v28 = vld [vmem:[#allocation47_spill] sm:$0xff]  ;;  %v8234_v8 = vld [vmem:[#allocation66_spill] sm:$0xff] }
 0x334   :  { %4647 = vtanh.f32 %v2067_v40  ;;  %2238 = vmatpush.bf16.msrb.mxu0 %v8041_v2  ;;  %2264 = vmatpush.bf16.msra.mxu2 %v6140_v25  ;;  %v8235_v40 = vld [vmem:[#allocation120_spill] sm:$0xff] }
 0x335   :  { %v6752_v47 = vadd.f32 %v2072_v17, %v2071_v48  ;;  %v2016_v31 = vpop.f32.mrf.mxu3  ;;  %v8236_v48 = vld [vmem:[#allocation13_spill] sm:$0xff]  ;;  %v8237_v17 = vld [vmem:[#allocation51_spill] sm:$0xff] }
 0x336   :  { %v8239_v31 = vld [vmem:[#allocation122_spill] sm:$0xff] }
 0x337   :  { %4649 = vtanh.f32 %v6752_v47 }
 0x338   :  { %2239 = vmatpush.bf16.msrb.mxu0 %v8042_v26  ;;  %2265 = vmatpush.bf16.msra.mxu2 %v6164_v30 }
 0x33a   :  { %v4648_v21 = vpop.eup %4647 }
 0x33b   :  { %v2069_v52 = vmul.f32 0.5, %v4648_v21  ;;  %v8240_v21 = vld [vmem:[#allocation74_spill] sm:$0xff] }
 0x33c   :  { %2240 = vmatpush.bf16.msrb.mxu0 %v8043_v42  ;;  %2266 = vmatpush.bf16.msra.mxu2 %v6188_v6 }
 0x33d   :  { %v4650_v16 = vpop.eup %4649  ;;  %v2070_v33 = vadd.f32 0.5, %v2069_v52  ;;  %v8241_v52 = vld [vmem:[#allocation123_spill] sm:$0xff] }
 0x33f   :  { %v2075_v5 = vmul.f32 %v4650_v16, %v2070_v33  ;;  %v8242_v16 = vld [vmem:[#allocation15_spill] sm:$0xff] }
 0x340   :  { %2241 = vmatpush.bf16.msrb.mxu0 %v8044_v9  ;;  %2267 = vmatpush.bf16.msra.mxu2 %v6208_v34  ;;  %v8243_v33 = vld [vmem:[#allocation55_spill] sm:$0xff] }
 0x341   :  { %v6763_v41 = vpack.c.bf16 %v2075_v5, %v2075_v5  ;;  %v8244_v5 = vld [vmem:[#allocation78_spill] sm:$0xff] }
 0x343   :  { %2081 = vst [vmem:[#allocation5 + $0x14] sm:$0xf] %v6763_v41  ;;  %2103 = vmatmul.bf16.vlgmr.msra.gmra.mxu1 %v6763_v41  ;;  %2129 = vmatmul.bf16.vlgmr.msrb.gmra.mxu3 %v6763_v41 }
 0x344   :  { %2199 = vmatpush.bf16.msra.mxu1 %v8045_v11  ;;  %2225 = vmatpush.bf16.msrb.mxu3 %v5945_v49 }
 0x345   :  { %2242 = vmatpush.bf16.msrb.mxu0 %v8046_v0  ;;  %2268 = vmatpush.bf16.msra.mxu2 %v6228_v62 }
 0x348   :  { %2200 = vmatpush.bf16.msra.mxu1 %v8047_v61  ;;  %2226 = vmatpush.bf16.msrb.mxu3 %v5978_v56 }
 0x349   :  { %2243 = vmatpush.bf16.msrb.mxu0 %v8048_v46  ;;  %2269 = vmatpush.bf16.msra.mxu2 %v6248_v36 }
 0x34c   :  { %2201 = vmatpush.bf16.msra.mxu1 %v8049_v32  ;;  %2227 = vmatpush.bf16.msrb.mxu3 %v6003_v13 }
 0x34d   :  { %2244 = vmatpush.bf16.msrb.mxu0 %v5831_v23  ;;  %2270 = vmatpush.bf16.msra.mxu2 %v6269_v27 }
 0x350   :  { %2202 = vmatpush.bf16.msra.mxu1 %v8050_v4  ;;  %2228 = vmatpush.bf16.msrb.mxu3 %v8221_v43 }
 0x351   :  { %2245 = vmatpush.bf16.msrb.mxu0 %v8222_v29  ;;  %2271 = vmatpush.bf16.msra.mxu2 %v8223_v24 }
 0x353   :  { %2155 = vmatmul.bf16.vlgmr.msrb.gmra.mxu1 %v6763_v41  ;;  %2181 = vmatmul.bf16.vlgmr.msra.gmra.mxu3 %v6763_v41 }
 0x354   :  { %2203 = vmatpush.bf16.msra.mxu1 %v8226_v37  ;;  %2229 = vmatpush.bf16.msrb.mxu3 %v8227_v63 }
 0x355   :  { %2354 = vmatpush.bf16.msra.mxu0 %v8224_v35  ;;  %2380 = vmatpush.bf16.msrb.mxu2 %v8225_v58 }
 0x356   :  { %2246 = vmatmul.bf16.vlgmr.msrb.gmra.mxu0 %v6723_v12  ;;  %2272 = vmatmul.bf16.vlgmr.msra.gmra.mxu2 %v6723_v12  ;;  %v8238_v12 = vld [vmem:[#allocation70_spill] sm:$0xff] }
 0x358   :  { %2204 = vmatpush.bf16.msra.mxu1 %v8230_v20  ;;  %2230 = vmatpush.bf16.msrb.mxu3 %v8231_v18  ;;  %v8304_v18 = vld [vmem:[#allocation32_spill] sm:$0xff] }
 0x359   :  { %2355 = vmatpush.bf16.msra.mxu0 %v8228_v45  ;;  %2381 = vmatpush.bf16.msrb.mxu2 %v8229_v39  ;;  %v8308_v20 = vld [vmem:[#allocation36_spill] sm:$0xff] }
 0x35c   :  { %2205 = vmatpush.bf16.msra.mxu1 %v8234_v8  ;;  %2231 = vmatpush.bf16.msrb.mxu3 %v8235_v40  ;;  %v8253_v40 = vld [vmem:[#allocation128_spill] sm:$0xff]  ;;  %v8254_v8 = vld [vmem:[#allocation21_spill] sm:$0xff] }
 0x35d   :  { %2356 = vmatpush.bf16.msra.mxu0 %v8232_v7  ;;  %2382 = vmatpush.bf16.msrb.mxu2 %v8233_v28  ;;  %v8300_v7 = vld [vmem:[#allocation28_spill] sm:$0xff] }
 0x360   :  { %2206 = vmatpush.bf16.msra.mxu1 %v8238_v12  ;;  %2232 = vmatpush.bf16.msrb.mxu3 %v8239_v31  ;;  %v8247_v12 = vld [vmem:[#allocation59_spill] sm:$0xff]  ;;  %v8248_v31 = vld [vmem:[#allocation82_spill] sm:$0xff] }
 0x361   :  { %2357 = vmatpush.bf16.msra.mxu0 %v8236_v48  ;;  %2383 = vmatpush.bf16.msrb.mxu2 %v8237_v17  ;;  %v8245_v48 = vld [vmem:[#allocation125_spill] sm:$0xff] }
 0x362   :  { %v8246_v17 = vld [vmem:[#allocation17_spill] sm:$0xff] }
 0x363   :  { %2207 = vmatmul.bf16.vlgmr.msra.gmra.mxu1 %v6763_v41  ;;  %2233 = vmatmul.bf16.vlgmr.msrb.gmra.mxu3 %v6763_v41 }
 0x364   :  { %2251 = vmatpush.bf16.msrb.mxu1 %v8240_v21  ;;  %2277 = vmatpush.bf16.msra.mxu3 %v8241_v52  ;;  %v8249_v21 = vld [vmem:[#allocation126_spill] sm:$0xff]  ;;  %v8250_v52 = vld [vmem:[#allocation19_spill] sm:$0xff] }
 0x365   :  { %2358 = vmatpush.bf16.msra.mxu0 %v8242_v16  ;;  %2384 = vmatpush.bf16.msrb.mxu2 %v8243_v33  ;;  %v8251_v16 = vld [vmem:[#allocation63_spill] sm:$0xff]  ;;  %v8252_v33 = vld [vmem:[#allocation86_spill] sm:$0xff] }
 0x368   :  { %2252 = vmatpush.bf16.msrb.mxu1 %v8244_v5  ;;  %2278 = vmatpush.bf16.msra.mxu3 %v8245_v48  ;;  %v8255_v5 = vld [vmem:[#allocation67_spill] sm:$0xff] }
 0x369   :  { %2359 = vmatpush.bf16.msra.mxu0 %v8246_v17  ;;  %2385 = vmatpush.bf16.msrb.mxu2 %v8247_v12  ;;  %v8256_v48 = vld [vmem:[#allocation23_spill] sm:$0xff]  ;;  %v8258_v12 = vld [vmem:[#allocation90_spill] sm:$0xff] }
 0x36a   :  { %v8257_v17 = vld [vmem:[#allocation71_spill] sm:$0xff] }
 0x36c   :  { %2253 = vmatpush.bf16.msrb.mxu1 %v8248_v31  ;;  %2279 = vmatpush.bf16.msra.mxu3 %v8249_v21  ;;  %v8259_v31 = vld [vmem:[#allocation129_spill] sm:$0xff] }
 0x36d   :  { %2360 = vmatpush.bf16.msra.mxu0 %v8250_v52  ;;  %2386 = vmatpush.bf16.msrb.mxu2 %v8251_v16  ;;  %v8260_v21 = vld [vmem:[#allocation25_spill] sm:$0xff]  ;;  %v8261_v52 = vld [vmem:[#allocation75_spill] sm:$0xff]  ;;  %v8262_v16 = vld [vmem:[#allocation96_spill] sm:$0xff] }
 0x370   :  { %2254 = vmatpush.bf16.msrb.mxu1 %v8252_v33  ;;  %2280 = vmatpush.bf16.msra.mxu3 %v8253_v40  ;;  %v8263_v33 = vld [vmem:[#allocation131_spill] sm:$0xff] }
 0x371   :  { %2361 = vmatpush.bf16.msra.mxu0 %v8254_v8  ;;  %2387 = vmatpush.bf16.msrb.mxu2 %v8255_v5  ;;  %v8264_v40 = vld [vmem:[#allocation27_spill] sm:$0xff] }
 0x372   :  { %v8265_v8 = vld [vmem:[#allocation79_spill] sm:$0xff] }
 0x373   :  { %v8266_v5 = vld [vmem:[#allocation99_spill] sm:$0xff] }
 0x374   :  { %2255 = vmatpush.bf16.msrb.mxu1 %v8258_v12  ;;  %2281 = vmatpush.bf16.msra.mxu3 %v8259_v31  ;;  %v8269_v12 = vld [vmem:[#allocation83_spill] sm:$0xff]  ;;  %v8270_v31 = vld [vmem:[#allocation105_spill] sm:$0xff] }
 0x375   :  { %2406 = vmatpush.bf16.msrb.mxu0 %v8256_v48  ;;  %2432 = vmatpush.bf16.msra.mxu2 %v8257_v17  ;;  %v8267_v48 = vld [vmem:[#allocation132_spill] sm:$0xff]  ;;  %v8268_v17 = vld [vmem:[#allocation29_spill] sm:$0xff] }
 0x378   :  { %2256 = vmatpush.bf16.msrb.mxu1 %v8262_v16  ;;  %2282 = vmatpush.bf16.msra.mxu3 %v8263_v33  ;;  %v8273_v16 = vld [vmem:[#allocation40_spill] sm:$0xff]  ;;  %v8274_v33 = vld [vmem:[#allocation31_spill] sm:$0xff] }
 0x379   :  { %2407 = vmatpush.bf16.msrb.mxu0 %v8260_v21  ;;  %2433 = vmatpush.bf16.msra.mxu2 %v8261_v52  ;;  %v8271_v21 = vld [vmem:[#allocation135_spill] sm:$0xff]  ;;  %v8272_v52 = vld [vmem:[#allocation8_spill] sm:$0xff] }
 0x37c   :  { %2257 = vmatpush.bf16.msrb.mxu1 %v8266_v5  ;;  %2283 = vmatpush.bf16.msra.mxu3 %v8267_v48  ;;  %v8276_v48 = vld [vmem:[#allocation10_spill] sm:$0xff]  ;;  %v8285_v5 = vld [vmem:[#allocation52_spill] sm:$0xff] }
 0x37d   :  { %2408 = vmatpush.bf16.msrb.mxu0 %v8264_v40  ;;  %2434 = vmatpush.bf16.msra.mxu2 %v8265_v8  ;;  %v8275_v40 = vld [vmem:[#allocation87_spill] sm:$0xff]  ;;  %v8294_v8 = vld [vmem:[#allocation22_spill] sm:$0xff] }
 0x380   :  { %2258 = vmatpush.bf16.msrb.mxu1 %v8270_v31  ;;  %2284 = vmatpush.bf16.msra.mxu3 %v8271_v21  ;;  %v8279_v31 = vld [vmem:[#allocation92_spill] sm:$0xff] }
 0x381   :  { %2409 = vmatpush.bf16.msrb.mxu0 %v8268_v17  ;;  %2435 = vmatpush.bf16.msra.mxu2 %v8269_v12  ;;  %v8277_v17 = vld [vmem:[#allocation44_spill] sm:$0xff]  ;;  %v8278_v12 = vld [vmem:[#allocation33_spill] sm:$0xff] }
 0x382   :  { %v8280_v21 = vld [vmem:[#allocation12_spill] sm:$0xff] }
 0x383   :  { %2259 = vmatmul.bf16.vlgmr.msrb.gmra.mxu1 %v6763_v41  ;;  %2285 = vmatmul.bf16.vlgmr.msra.gmra.mxu3 %v6763_v41  ;;  %v8286_v41 = vld [vmem:[#allocation37_spill] sm:$0xff] }
 0x384   :  { %2367 = vmatpush.bf16.msra.mxu1 %v8272_v52  ;;  %2393 = vmatpush.bf16.msrb.mxu3 %v8273_v16  ;;  %v8281_v52 = vld [vmem:[#allocation48_spill] sm:$0xff]  ;;  %v8282_v16 = vld [vmem:[#allocation35_spill] sm:$0xff] }
 0x385   :  { %2410 = vmatpush.bf16.msrb.mxu0 %v8274_v33  ;;  %2436 = vmatpush.bf16.msra.mxu2 %v8275_v40  ;;  %v8283_v33 = vld [vmem:[#allocation97_spill] sm:$0xff]  ;;  %v8284_v40 = vld [vmem:[#allocation14_spill] sm:$0xff] }
 0x388   :  { %2368 = vmatpush.bf16.msra.mxu1 %v8276_v48  ;;  %2394 = vmatpush.bf16.msrb.mxu3 %v8277_v17  ;;  %v8287_v48 = vld [vmem:[#allocation101_spill] sm:$0xff]  ;;  %v8288_v17 = vld [vmem:[#allocation16_spill] sm:$0xff] }
 0x389   :  { %2411 = vmatpush.bf16.msrb.mxu0 %v8278_v12  ;;  %2437 = vmatpush.bf16.msra.mxu2 %v8279_v31  ;;  %v8289_v12 = vld [vmem:[#allocation56_spill] sm:$0xff]  ;;  %v8290_v31 = vld [vmem:[#allocation18_spill] sm:$0xff] }
 0x38c   :  { %2369 = vmatpush.bf16.msra.mxu1 %v8280_v21  ;;  %2395 = vmatpush.bf16.msrb.mxu3 %v8281_v52  ;;  %v8291_v21 = vld [vmem:[#allocation60_spill] sm:$0xff] }
 0x38d   :  { %2412 = vmatpush.bf16.msrb.mxu0 %v8282_v16  ;;  %2438 = vmatpush.bf16.msra.mxu2 %v8283_v33  ;;  %v8292_v16 = vld [vmem:[#allocation20_spill] sm:$0xff] }
 0x38e   :  { %v8293_v33 = vld [vmem:[#allocation64_spill] sm:$0xff] }
 0x390   :  { %2370 = vmatpush.bf16.msra.mxu1 %v8284_v40  ;;  %2396 = vmatpush.bf16.msrb.mxu3 %v8285_v5  ;;  %v2091_v52 = vpop.f32.mrf.mxu0  ;;  %v8295_v5 = vld [vmem:[#allocation68_spill] sm:$0xff] }
 0x391   :  { %2413 = vmatpush.bf16.msrb.mxu0 %v8286_v41  ;;  %2439 = vmatpush.bf16.msra.mxu2 %v8287_v48  ;;  %v8296_v48 = vld [vmem:[#allocation24_spill] sm:$0xff] }
 0x394   :  { %2371 = vmatpush.bf16.msra.mxu1 %v8288_v17  ;;  %2397 = vmatpush.bf16.msrb.mxu3 %v8289_v12  ;;  %v8297_v17 = vld [vmem:[#allocation72_spill] sm:$0xff]  ;;  %v8298_v12 = vld [vmem:[#allocation26_spill] sm:$0xff] }
 0x396   :  { %v2117_v40 = vpop.f32.mrf.mxu2 }
 0x398   :  { %2372 = vmatpush.bf16.msra.mxu1 %v8290_v31  ;;  %2398 = vmatpush.bf16.msrb.mxu3 %v8291_v21  ;;  %v2093_v41 = vpop.f32.mrf.mxu0  ;;  %v8299_v31 = vld [vmem:[#allocation76_spill] sm:$0xff] }
 0x39c   :  { %2373 = vmatpush.bf16.msra.mxu1 %v8292_v16  ;;  %2399 = vmatpush.bf16.msrb.mxu3 %v8293_v33  ;;  %v8301_v16 = vld [vmem:[#allocation80_spill] sm:$0xff]  ;;  %v8302_v33 = vld [vmem:[#allocation30_spill] sm:$0xff] }
 0x39e   :  { %v2119_v21 = vpop.f32.mrf.mxu2 }
 0x3a0   :  { %2374 = vmatpush.bf16.msra.mxu1 %v8294_v8  ;;  %2400 = vmatpush.bf16.msrb.mxu3 %v8295_v5  ;;  %v2143_v28 = vpop.f32.mrf.mxu0  ;;  %v8303_v8 = vld [vmem:[#allocation84_spill] sm:$0xff] }
 0x3a4   :  { %2419 = vmatpush.bf16.msrb.mxu1 %v8296_v48  ;;  %2445 = vmatpush.bf16.msra.mxu3 %v8297_v17  ;;  %v8305_v48 = vld [vmem:[#allocation88_spill] sm:$0xff]  ;;  %v8306_v17 = vld [vmem:[#allocation34_spill] sm:$0xff] }
 0x3a6   :  { %v2169_v5 = vpop.f32.mrf.mxu2 }
 0x3a8   :  { %2420 = vmatpush.bf16.msrb.mxu1 %v8298_v12  ;;  %2446 = vmatpush.bf16.msra.mxu3 %v8299_v31  ;;  %v2145_v41 = vpop.f32.mrf.mxu0  ;;  %v8307_v12 = vld [vmem:[#allocation93_spill] sm:$0xff] }
 0x3ac   :  { %2421 = vmatpush.bf16.msrb.mxu1 %v8300_v7  ;;  %2447 = vmatpush.bf16.msra.mxu3 %v8301_v16  ;;  %v8309_v7 = vld [vmem:[#allocation98_spill] sm:$0xff] }
 0x3ad   :  { %v8310_v16 = vld [vmem:[#allocation38_spill] sm:$0xff] }
 0x3ae   :  { %v2171_v21 = vpop.f32.mrf.mxu2 }
 0x3b0   :  { %2422 = vmatpush.bf16.msrb.mxu1 %v8302_v33  ;;  %2448 = vmatpush.bf16.msra.mxu3 %v8303_v8  ;;  %v2195_v31 = vpop.f32.mrf.mxu0  ;;  %v8311_v33 = vld [vmem:[#allocation102_spill] sm:$0xff] }
 0x3b4   :  { %2423 = vmatpush.bf16.msrb.mxu1 %v8304_v18  ;;  %2449 = vmatpush.bf16.msra.mxu3 %v8305_v48  ;;  %v8312_v48 = vld [vmem:[#allocation100_spill] sm:$0xff] }
 0x3b5   :  { %v2293_v63 = vunpack.c.l.bf16 %v8312_v48  ;;  %v2294_v21 = vunpack.c.h.bf16 %v8312_v48 }
 0x3b6   :  { %v2221_v8 = vpop.f32.mrf.mxu2 }
 0x3b8   :  { %2424 = vmatpush.bf16.msrb.mxu1 %v8306_v17  ;;  %2450 = vmatpush.bf16.msra.mxu3 %v8307_v12  ;;  %v2197_v41 = vpop.f32.mrf.mxu0 }
 0x3b9   :  { %v8313_v41 = vld [vmem:[#allocation124_spill] sm:$0xff] }
 0x3ba   :  { %v2295_v29 = vunpack.c.l.bf16 %v8313_v41 }
 0x3bc   :  { %2425 = vmatpush.bf16.msrb.mxu1 %v8308_v20  ;;  %2451 = vmatpush.bf16.msra.mxu3 %v8309_v7 }
 0x3be   :  { %v2223_v45 = vpop.f32.mrf.mxu2 }
 0x3c0   :  { %2426 = vmatpush.bf16.msrb.mxu1 %v8310_v16  ;;  %2452 = vmatpush.bf16.msra.mxu3 %v8311_v33  ;;  %v2104_v39 = vpop.f32.mrf.mxu1 }
 0x3c1   :  { %v2105_v18 = vadd.f32 %v2104_v39, %v2091_v52 }
 0x3c3   :  { %v2297_v17 = vadd.f32 %v2293_v63, %v2105_v18 }
 0x3c5   :  { %v2312_v58 = vmul.f32 0.5, %v2297_v17 }
 0x3c6   :  { %v2130_v37 = vpop.f32.mrf.mxu3 }
 0x3c7   :  { %v2131_v12 = vadd.f32 %v2130_v37, %v2117_v40  ;;  %4651 = vtanh.f32 %v2312_v58 }
 0x3c8   :  { %v2106_v20 = vpop.f32.mrf.mxu1 }
 0x3c9   :  { %v2298_v35 = vadd.f32 %v2294_v21, %v2131_v12  ;;  %v2296_v20 = vunpack.c.h.bf16 %v8313_v41 }
 0x3cb   :  { %v2316_v7 = vmul.f32 0.5, %v2298_v35 }
 0x3cd   :  { %4653 = vtanh.f32 %v2316_v7  ;;  %v4652_v39 = vpop.eup %4651 }
 0x3ce   :  { %v2132_v16 = vpop.f32.mrf.mxu3  ;;  %v2314_v37 = vmul.f32 0.5, %v4652_v39  ;;  %v8314_v39 = vld [vmem:[#allocation113_spill] sm:$0xff] }
 0x3d0   :  { %v2156_v33 = vpop.f32.mrf.mxu1  ;;  %v2315_v17 = vadd.f32 0.5, %v2314_v37 }
 0x3d1   :  { %v2157_v24 = vadd.f32 %v2156_v33, %v2143_v28 }
 0x3d3   :  { %v2247_v45 = vpop.f32.mrf.mxu0  ;;  %v4654_v52 = vpop.eup %4653  ;;  %v2299_v43 = vadd.f32 %v2295_v29, %v2157_v24 }
 0x3d4   :  { %v2318_v63 = vmul.f32 0.5, %v4654_v52  ;;  %v2304_v52 = vunpack.c.l.bf16 %v8314_v39 }
 0x3d5   :  { %4655 = vtanh.f32 %v2299_v43 }
 0x3d6   :  { %v2182_v18 = vpop.f32.mrf.mxu3  ;;  %v2319_v48 = vadd.f32 0.5, %v2318_v63 }
 0x3d7   :  { %v2183_v40 = vadd.f32 %v2182_v18, %v2169_v5 }
 0x3d8   :  { %v2158_v58 = vpop.f32.mrf.mxu1  ;;  %v2325_v33 = vmul.f32 %v2319_v48, %v6719_v15 }
 0x3d9   :  { %v2273_v35 = vpop.f32.mrf.mxu2  ;;  %v2300_v7 = vadd.f32 %v2296_v20, %v2183_v40 }
 0x3db   :  { %v2249_v12 = vpop.f32.mrf.mxu0  ;;  %v4656_v28 = vpop.eup %4655  ;;  %v2321_v16 = vmul.f32 0.5, %v2300_v7 }
 0x3dc   :  { %v2326_v21 = vmul.f32 %v4656_v28, %v2315_v17 }
 0x3dd   :  { %4657 = vtanh.f32 %v2321_v16 }
 0x3de   :  { %v6885_v29 = vadd.f32 %v2326_v21, %v2325_v33  ;;  %v2184_v43 = vpop.f32.mrf.mxu3 }
 0x3e0   :  { %4659 = vtanh.f32 %v6885_v29  ;;  %v2208_v5 = vpop.f32.mrf.mxu1 }
 0x3e1   :  { %v2275_v24 = vpop.f32.mrf.mxu2  ;;  %v2209_v41 = vadd.f32 %v2208_v5, %v2195_v31  ;;  %v2305_v31 = vunpack.c.h.bf16 %v8314_v39 }
 0x3e2   :  { %v8315_v24 = vld [vmem:[#allocation141_spill] sm:$0xff] }
 0x3e3   :  { %v4658_v63 = vpop.eup %4657  ;;  %v2308_v18 = vadd.f32 %v2304_v52, %v2209_v41  ;;  %v2306_v5 = vunpack.c.l.bf16 %v8315_v24 }
 0x3e4   :  { %v2323_v37 = vmul.f32 0.5, %v4658_v63 }
 0x3e6   :  { %v4660_v40 = vpop.eup %4659  ;;  %v2324_v20 = vadd.f32 0.5, %v2323_v37  ;;  %v2234_v58 = vpop.f32.mrf.mxu3 }
 0x3e7   :  { %v2235_v17 = vadd.f32 %v2234_v58, %v2221_v8  ;;  %v2330_v8 = vmul.f32 0.5, %v2308_v18 }
 0x3e8   :  { %v2329_v7 = vmul.f32 %v4660_v40, %v2324_v20  ;;  %v2210_v15 = vpop.f32.mrf.mxu1  ;;  %v2307_v40 = vunpack.c.h.bf16 %v8315_v24  ;;  %v8316_v24 = vld [vmem:[#allocation115_spill] sm:$0xff] }
 0x3e9   :  { %v2309_v28 = vadd.f32 %v2305_v31, %v2235_v17 }
 0x3ea   :  { %v6889_v48 = vpack.c.bf16 %v2329_v7, %v2329_v7 }
 0x3eb   :  { %v2334_v16 = vmul.f32 0.5, %v2309_v28 }
 0x3ec   :  { %2350 = vst [vmem:[#allocation4 + $0xc] sm:$0xf] %v6889_v48  ;;  %2362 = vmatmul.bf16.vlgmr.msra.gmra.mxu0 %v6889_v48  ;;  %2388 = vmatmul.bf16.vlgmr.msrb.gmra.mxu2 %v6889_v48 }
 0x3ed   :  { %2458 = vmatpush.bf16.msra.mxu0 %v8033_v22  ;;  %2484 = vmatpush.bf16.msrb.mxu2 %v5942_v10  ;;  %4661 = vtanh.f32 %v2334_v16 }
 0x3ee   :  { %v2236_v12 = vpop.f32.mrf.mxu3  ;;  %4663 = vtanh.f32 %v2330_v8 }
 0x3f1   :  { %2459 = vmatpush.bf16.msra.mxu0 %v8034_v3  ;;  %2485 = vmatpush.bf16.msrb.mxu2 %v5975_v14 }
 0x3f3   :  { %v4662_v21 = vpop.eup %4661 }
 0x3f4   :  { %v4664_v41 = vpop.eup %4663  ;;  %v2336_v52 = vmul.f32 0.5, %v4662_v21 }
 0x3f5   :  { %2460 = vmatpush.bf16.msra.mxu0 %v8035_v60  ;;  %2486 = vmatpush.bf16.msrb.mxu2 %v5999_v51  ;;  %v2332_v63 = vmul.f32 0.5, %v4664_v41  ;;  %v8318_v41 = vld [vmem:[#allocation133_spill] sm:$0xff] }
 0x3f6   :  { %v2337_v20 = vadd.f32 0.5, %v2336_v52  ;;  %v8320_v52 = vld [vmem:[#allocation39_spill] sm:$0xff] }
 0x3f7   :  { %v2333_v7 = vadd.f32 0.5, %v2332_v63  ;;  %v8321_v63 = vld [vmem:[#allocation58_spill] sm:$0xff] }
 0x3f8   :  { %v2343_v31 = vmul.f32 %v2337_v20, %v6752_v47  ;;  %v8325_v20 = vld [vmem:[#allocation62_spill] sm:$0xff] }
 0x3f9   :  { %2461 = vmatpush.bf16.msra.mxu0 %v8036_v59  ;;  %2487 = vmatpush.bf16.msrb.mxu2 %v6025_v19 }
 0x3fc   :  { %2414 = vmatmul.bf16.vlgmr.msrb.gmra.mxu0 %v6889_v48  ;;  %2440 = vmatmul.bf16.vlgmr.msra.gmra.mxu2 %v6889_v48 }
 0x3fd   :  { %2462 = vmatpush.bf16.msra.mxu0 %v8037_v55  ;;  %2488 = vmatpush.bf16.msrb.mxu2 %v6047_v1 }
 0x400   :  { %v2260_v33 = vpop.f32.mrf.mxu1 }
 0x401   :  { %v2261_v43 = vadd.f32 %v2260_v33, %v2247_v45  ;;  %2463 = vmatpush.bf16.msra.mxu0 %v8038_v38  ;;  %2489 = vmatpush.bf16.msrb.mxu2 %v6075_v53 }
 0x403   :  { %v2310_v39 = vadd.f32 %v2306_v5, %v2261_v43  ;;  %v8317_v5 = vld [vmem:[#allocation104_spill] sm:$0xff] }
 0x405   :  { %4665 = vtanh.f32 %v2310_v39  ;;  %2464 = vmatpush.bf16.msra.mxu0 %v8039_v54  ;;  %2490 = vmatpush.bf16.msrb.mxu2 %v6099_v44  ;;  %v8319_v39 = vld [vmem:[#allocation7_spill] sm:$0xff] }
 0x406   :  { %v2286_v18 = vpop.f32.mrf.mxu3 }
 0x407   :  { %v2287_v37 = vadd.f32 %v2286_v18, %v2273_v35  ;;  %v8322_v18 = vld [vmem:[#allocation116_spill] sm:$0xff] }
 0x408   :  { %v2262_v58 = vpop.f32.mrf.mxu1 }
 0x409   :  { %v2311_v45 = vadd.f32 %v2307_v40, %v2287_v37  ;;  %2465 = vmatpush.bf16.msra.mxu0 %v8040_v57  ;;  %2491 = vmatpush.bf16.msrb.mxu2 %v6135_v50  ;;  %v8323_v37 = vld [vmem:[#allocation9_spill] sm:$0xff]  ;;  %v8324_v40 = vld [vmem:[#allocation43_spill] sm:$0xff] }
 0x40a   :  { %v8326_v58 = vld [vmem:[#allocation119_spill] sm:$0xff] }
 0x40b   :  { %v4666_v15 = vpop.eup %4665  ;;  %v2339_v17 = vmul.f32 0.5, %v2311_v45  ;;  %v8327_v45 = vld [vmem:[#allocation11_spill] sm:$0xff] }
 0x40c   :  { %v2344_v12 = vmul.f32 %v4666_v15, %v2333_v7  ;;  %2466 = vmatmul.bf16.vlgmr.msra.gmra.mxu0 %v6889_v48  ;;  %2492 = vmatmul.bf16.vlgmr.msrb.gmra.mxu2 %v6889_v48  ;;  %v8328_v7 = vld [vmem:[#allocation47_spill] sm:$0xff]  ;;  %v8329_v15 = vld [vmem:[#allocation66_spill] sm:$0xff] }
 0x40d   :  { %4667 = vtanh.f32 %v2339_v17  ;;  %2510 = vmatpush.bf16.msrb.mxu0 %v8041_v2  ;;  %2536 = vmatpush.bf16.msra.mxu2 %v6140_v25  ;;  %v8330_v17 = vld [vmem:[#allocation120_spill] sm:$0xff] }
 0x40e   :  { %v6918_v35 = vadd.f32 %v2344_v12, %v2343_v31  ;;  %v2288_v28 = vpop.f32.mrf.mxu3  ;;  %v8331_v31 = vld [vmem:[#allocation13_spill] sm:$0xff]  ;;  %v8332_v12 = vld [vmem:[#allocation51_spill] sm:$0xff] }
 0x40f   :  { %v8334_v28 = vld [vmem:[#allocation122_spill] sm:$0xff] }
 0x410   :  { %4669 = vtanh.f32 %v6918_v35 }
 0x411   :  { %2511 = vmatpush.bf16.msrb.mxu0 %v8042_v26  ;;  %2537 = vmatpush.bf16.msra.mxu2 %v6164_v30 }
 0x413   :  { %v4668_v47 = vpop.eup %4667 }
 0x414   :  { %v2341_v16 = vmul.f32 0.5, %v4668_v47  ;;  %v8335_v47 = vld [vmem:[#allocation74_spill] sm:$0xff] }
 0x415   :  { %2512 = vmatpush.bf16.msrb.mxu0 %v8043_v42  ;;  %2538 = vmatpush.bf16.msra.mxu2 %v6188_v6 }
 0x416   :  { %v4670_v8 = vpop.eup %4669  ;;  %v2342_v33 = vadd.f32 0.5, %v2341_v16  ;;  %v8336_v16 = vld [vmem:[#allocation123_spill] sm:$0xff] }
 0x418   :  { %v2347_v21 = vmul.f32 %v4670_v8, %v2342_v33  ;;  %v8337_v8 = vld [vmem:[#allocation15_spill] sm:$0xff] }
 0x419   :  { %2513 = vmatpush.bf16.msrb.mxu0 %v8044_v9  ;;  %2539 = vmatpush.bf16.msra.mxu2 %v6208_v34  ;;  %v8338_v33 = vld [vmem:[#allocation55_spill] sm:$0xff] }
 0x41a   :  { %v6929_v43 = vpack.c.bf16 %v2347_v21, %v2347_v21  ;;  %v8339_v21 = vld [vmem:[#allocation78_spill] sm:$0xff] }
 0x41c   :  { %2353 = vst [vmem:[#allocation5 + $0x10] sm:$0xf] %v6929_v43  ;;  %2375 = vmatmul.bf16.vlgmr.msra.gmra.mxu1 %v6929_v43  ;;  %2401 = vmatmul.bf16.vlgmr.msrb.gmra.mxu3 %v6929_v43 }
 0x41d   :  { %2471 = vmatpush.bf16.msra.mxu1 %v8045_v11  ;;  %2497 = vmatpush.bf16.msrb.mxu3 %v5945_v49 }
 0x41e   :  { %2514 = vmatpush.bf16.msrb.mxu0 %v8046_v0  ;;  %2540 = vmatpush.bf16.msra.mxu2 %v6228_v62 }
 0x421   :  { %2472 = vmatpush.bf16.msra.mxu1 %v8047_v61  ;;  %2498 = vmatpush.bf16.msrb.mxu3 %v5978_v56 }
 0x422   :  { %2515 = vmatpush.bf16.msrb.mxu0 %v8048_v46  ;;  %2541 = vmatpush.bf16.msra.mxu2 %v6248_v36 }
 0x425   :  { %2473 = vmatpush.bf16.msra.mxu1 %v8049_v32  ;;  %2499 = vmatpush.bf16.msrb.mxu3 %v6003_v13 }
 0x426   :  { %2516 = vmatpush.bf16.msrb.mxu0 %v5831_v23  ;;  %2542 = vmatpush.bf16.msra.mxu2 %v6269_v27 }
 0x429   :  { %2474 = vmatpush.bf16.msra.mxu1 %v8050_v4  ;;  %2500 = vmatpush.bf16.msrb.mxu3 %v8316_v24 }
 0x42a   :  { %2517 = vmatpush.bf16.msrb.mxu0 %v8317_v5  ;;  %2543 = vmatpush.bf16.msra.mxu2 %v8318_v41 }
 0x42c   :  { %2427 = vmatmul.bf16.vlgmr.msrb.gmra.mxu1 %v6929_v43  ;;  %2453 = vmatmul.bf16.vlgmr.msra.gmra.mxu3 %v6929_v43 }
 0x42d   :  { %2475 = vmatpush.bf16.msra.mxu1 %v8321_v63  ;;  %2501 = vmatpush.bf16.msrb.mxu3 %v8322_v18 }
 0x42e   :  { %2626 = vmatpush.bf16.msra.mxu0 %v8319_v39  ;;  %2652 = vmatpush.bf16.msrb.mxu2 %v8320_v52 }
 0x42f   :  { %2518 = vmatmul.bf16.vlgmr.msrb.gmra.mxu0 %v6889_v48  ;;  %2544 = vmatmul.bf16.vlgmr.msra.gmra.mxu2 %v6889_v48  ;;  %v8333_v48 = vld [vmem:[#allocation70_spill] sm:$0xff] }
 0x431   :  { %2476 = vmatpush.bf16.msra.mxu1 %v8325_v20  ;;  %2502 = vmatpush.bf16.msrb.mxu3 %v8326_v58  ;;  %v8399_v58 = vld [vmem:[#allocation32_spill] sm:$0xff] }
 0x432   :  { %2627 = vmatpush.bf16.msra.mxu0 %v8323_v37  ;;  %2653 = vmatpush.bf16.msrb.mxu2 %v8324_v40  ;;  %v8403_v20 = vld [vmem:[#allocation36_spill] sm:$0xff] }
 0x435   :  { %2477 = vmatpush.bf16.msra.mxu1 %v8329_v15  ;;  %2503 = vmatpush.bf16.msrb.mxu3 %v8330_v17  ;;  %v8348_v17 = vld [vmem:[#allocation128_spill] sm:$0xff]  ;;  %v8349_v15 = vld [vmem:[#allocation21_spill] sm:$0xff] }
 0x436   :  { %2628 = vmatpush.bf16.msra.mxu0 %v8327_v45  ;;  %2654 = vmatpush.bf16.msrb.mxu2 %v8328_v7  ;;  %v8395_v45 = vld [vmem:[#allocation28_spill] sm:$0xff] }
 0x439   :  { %2478 = vmatpush.bf16.msra.mxu1 %v8333_v48  ;;  %2504 = vmatpush.bf16.msrb.mxu3 %v8334_v28  ;;  %v8342_v48 = vld [vmem:[#allocation59_spill] sm:$0xff]  ;;  %v8343_v28 = vld [vmem:[#allocation82_spill] sm:$0xff] }
 0x43a   :  { %2629 = vmatpush.bf16.msra.mxu0 %v8331_v31  ;;  %2655 = vmatpush.bf16.msrb.mxu2 %v8332_v12  ;;  %v8340_v31 = vld [vmem:[#allocation125_spill] sm:$0xff] }
 0x43b   :  { %v8341_v12 = vld [vmem:[#allocation17_spill] sm:$0xff] }
 0x43c   :  { %2479 = vmatmul.bf16.vlgmr.msra.gmra.mxu1 %v6929_v43  ;;  %2505 = vmatmul.bf16.vlgmr.msrb.gmra.mxu3 %v6929_v43 }
 0x43d   :  { %2523 = vmatpush.bf16.msrb.mxu1 %v8335_v47  ;;  %2549 = vmatpush.bf16.msra.mxu3 %v8336_v16  ;;  %v8344_v47 = vld [vmem:[#allocation126_spill] sm:$0xff]  ;;  %v8345_v16 = vld [vmem:[#allocation19_spill] sm:$0xff] }
 0x43e   :  { %2630 = vmatpush.bf16.msra.mxu0 %v8337_v8  ;;  %2656 = vmatpush.bf16.msrb.mxu2 %v8338_v33  ;;  %v8346_v8 = vld [vmem:[#allocation63_spill] sm:$0xff]  ;;  %v8347_v33 = vld [vmem:[#allocation86_spill] sm:$0xff] }
 0x441   :  { %2524 = vmatpush.bf16.msrb.mxu1 %v8339_v21  ;;  %2550 = vmatpush.bf16.msra.mxu3 %v8340_v31  ;;  %v8350_v21 = vld [vmem:[#allocation67_spill] sm:$0xff] }
 0x442   :  { %2631 = vmatpush.bf16.msra.mxu0 %v8341_v12  ;;  %2657 = vmatpush.bf16.msrb.mxu2 %v8342_v48  ;;  %v8351_v31 = vld [vmem:[#allocation23_spill] sm:$0xff]  ;;  %v8353_v48 = vld [vmem:[#allocation90_spill] sm:$0xff] }
 0x443   :  { %v8352_v12 = vld [vmem:[#allocation71_spill] sm:$0xff] }
 0x445   :  { %2525 = vmatpush.bf16.msrb.mxu1 %v8343_v28  ;;  %2551 = vmatpush.bf16.msra.mxu3 %v8344_v47  ;;  %v8354_v28 = vld [vmem:[#allocation129_spill] sm:$0xff] }
 0x446   :  { %2632 = vmatpush.bf16.msra.mxu0 %v8345_v16  ;;  %2658 = vmatpush.bf16.msrb.mxu2 %v8346_v8  ;;  %v8355_v47 = vld [vmem:[#allocation25_spill] sm:$0xff]  ;;  %v8356_v16 = vld [vmem:[#allocation75_spill] sm:$0xff]  ;;  %v8357_v8 = vld [vmem:[#allocation96_spill] sm:$0xff] }
 0x449   :  { %2526 = vmatpush.bf16.msrb.mxu1 %v8347_v33  ;;  %2552 = vmatpush.bf16.msra.mxu3 %v8348_v17  ;;  %v8358_v33 = vld [vmem:[#allocation131_spill] sm:$0xff] }
 0x44a   :  { %2633 = vmatpush.bf16.msra.mxu0 %v8349_v15  ;;  %2659 = vmatpush.bf16.msrb.mxu2 %v8350_v21  ;;  %v8359_v17 = vld [vmem:[#allocation27_spill] sm:$0xff] }
 0x44b   :  { %v8360_v15 = vld [vmem:[#allocation79_spill] sm:$0xff] }
 0x44c   :  { %v8361_v21 = vld [vmem:[#allocation99_spill] sm:$0xff] }
 0x44d   :  { %2527 = vmatpush.bf16.msrb.mxu1 %v8353_v48  ;;  %2553 = vmatpush.bf16.msra.mxu3 %v8354_v28  ;;  %v8364_v48 = vld [vmem:[#allocation83_spill] sm:$0xff]  ;;  %v8365_v28 = vld [vmem:[#allocation105_spill] sm:$0xff] }
 0x44e   :  { %2678 = vmatpush.bf16.msrb.mxu0 %v8351_v31  ;;  %2704 = vmatpush.bf16.msra.mxu2 %v8352_v12  ;;  %v8362_v31 = vld [vmem:[#allocation132_spill] sm:$0xff]  ;;  %v8363_v12 = vld [vmem:[#allocation29_spill] sm:$0xff] }
 0x451   :  { %2528 = vmatpush.bf16.msrb.mxu1 %v8357_v8  ;;  %2554 = vmatpush.bf16.msra.mxu3 %v8358_v33  ;;  %v8368_v8 = vld [vmem:[#allocation40_spill] sm:$0xff]  ;;  %v8369_v33 = vld [vmem:[#allocation31_spill] sm:$0xff] }
 0x452   :  { %2679 = vmatpush.bf16.msrb.mxu0 %v8355_v47  ;;  %2705 = vmatpush.bf16.msra.mxu2 %v8356_v16  ;;  %v8366_v47 = vld [vmem:[#allocation135_spill] sm:$0xff]  ;;  %v8367_v16 = vld [vmem:[#allocation8_spill] sm:$0xff] }
 0x455   :  { %2529 = vmatpush.bf16.msrb.mxu1 %v8361_v21  ;;  %2555 = vmatpush.bf16.msra.mxu3 %v8362_v31  ;;  %v8371_v31 = vld [vmem:[#allocation10_spill] sm:$0xff]  ;;  %v8380_v21 = vld [vmem:[#allocation52_spill] sm:$0xff] }
 0x456   :  { %2680 = vmatpush.bf16.msrb.mxu0 %v8359_v17  ;;  %2706 = vmatpush.bf16.msra.mxu2 %v8360_v15  ;;  %v8370_v17 = vld [vmem:[#allocation87_spill] sm:$0xff]  ;;  %v8389_v15 = vld [vmem:[#allocation22_spill] sm:$0xff] }
 0x459   :  { %2530 = vmatpush.bf16.msrb.mxu1 %v8365_v28  ;;  %2556 = vmatpush.bf16.msra.mxu3 %v8366_v47  ;;  %v8374_v28 = vld [vmem:[#allocation92_spill] sm:$0xff] }
 0x45a   :  { %2681 = vmatpush.bf16.msrb.mxu0 %v8363_v12  ;;  %2707 = vmatpush.bf16.msra.mxu2 %v8364_v48  ;;  %v8372_v12 = vld [vmem:[#allocation44_spill] sm:$0xff]  ;;  %v8373_v48 = vld [vmem:[#allocation33_spill] sm:$0xff] }
 0x45b   :  { %v8375_v47 = vld [vmem:[#allocation12_spill] sm:$0xff] }
 0x45c   :  { %2531 = vmatmul.bf16.vlgmr.msrb.gmra.mxu1 %v6929_v43  ;;  %2557 = vmatmul.bf16.vlgmr.msra.gmra.mxu3 %v6929_v43  ;;  %v8381_v43 = vld [vmem:[#allocation37_spill] sm:$0xff] }
 0x45d   :  { %2639 = vmatpush.bf16.msra.mxu1 %v8367_v16  ;;  %2665 = vmatpush.bf16.msrb.mxu3 %v8368_v8  ;;  %v8376_v16 = vld [vmem:[#allocation48_spill] sm:$0xff]  ;;  %v8377_v8 = vld [vmem:[#allocation35_spill] sm:$0xff] }
 0x45e   :  { %2682 = vmatpush.bf16.msrb.mxu0 %v8369_v33  ;;  %2708 = vmatpush.bf16.msra.mxu2 %v8370_v17  ;;  %v8378_v33 = vld [vmem:[#allocation97_spill] sm:$0xff]  ;;  %v8379_v17 = vld [vmem:[#allocation14_spill] sm:$0xff] }
 0x461   :  { %2640 = vmatpush.bf16.msra.mxu1 %v8371_v31  ;;  %2666 = vmatpush.bf16.msrb.mxu3 %v8372_v12  ;;  %v8382_v31 = vld [vmem:[#allocation101_spill] sm:$0xff]  ;;  %v8383_v12 = vld [vmem:[#allocation16_spill] sm:$0xff] }
 0x462   :  { %2683 = vmatpush.bf16.msrb.mxu0 %v8373_v48  ;;  %2709 = vmatpush.bf16.msra.mxu2 %v8374_v28  ;;  %v8384_v48 = vld [vmem:[#allocation56_spill] sm:$0xff]  ;;  %v8385_v28 = vld [vmem:[#allocation18_spill] sm:$0xff] }
 0x465   :  { %2641 = vmatpush.bf16.msra.mxu1 %v8375_v47  ;;  %2667 = vmatpush.bf16.msrb.mxu3 %v8376_v16  ;;  %v8386_v47 = vld [vmem:[#allocation60_spill] sm:$0xff] }
 0x466   :  { %2684 = vmatpush.bf16.msrb.mxu0 %v8377_v8  ;;  %2710 = vmatpush.bf16.msra.mxu2 %v8378_v33  ;;  %v8387_v8 = vld [vmem:[#allocation20_spill] sm:$0xff] }
 0x467   :  { %v8388_v33 = vld [vmem:[#allocation64_spill] sm:$0xff] }
 0x469   :  { %2642 = vmatpush.bf16.msra.mxu1 %v8379_v17  ;;  %2668 = vmatpush.bf16.msrb.mxu3 %v8380_v21  ;;  %v2363_v16 = vpop.f32.mrf.mxu0  ;;  %v8390_v21 = vld [vmem:[#allocation68_spill] sm:$0xff] }
 0x46a   :  { %2685 = vmatpush.bf16.msrb.mxu0 %v8381_v43  ;;  %2711 = vmatpush.bf16.msra.mxu2 %v8382_v31  ;;  %v8391_v31 = vld [vmem:[#allocation24_spill] sm:$0xff] }
 0x46d   :  { %2643 = vmatpush.bf16.msra.mxu1 %v8383_v12  ;;  %2669 = vmatpush.bf16.msrb.mxu3 %v8384_v48  ;;  %v8392_v12 = vld [vmem:[#allocation72_spill] sm:$0xff]  ;;  %v8393_v48 = vld [vmem:[#allocation26_spill] sm:$0xff] }
 0x46f   :  { %v2389_v17 = vpop.f32.mrf.mxu2 }
 0x471   :  { %2644 = vmatpush.bf16.msra.mxu1 %v8385_v28  ;;  %2670 = vmatpush.bf16.msrb.mxu3 %v8386_v47  ;;  %v2365_v43 = vpop.f32.mrf.mxu0  ;;  %v8394_v28 = vld [vmem:[#allocation76_spill] sm:$0xff] }
 0x475   :  { %2645 = vmatpush.bf16.msra.mxu1 %v8387_v8  ;;  %2671 = vmatpush.bf16.msrb.mxu3 %v8388_v33  ;;  %v8396_v8 = vld [vmem:[#allocation80_spill] sm:$0xff]  ;;  %v8397_v33 = vld [vmem:[#allocation30_spill] sm:$0xff] }
 0x477   :  { %v2391_v47 = vpop.f32.mrf.mxu2 }
 0x479   :  { %2646 = vmatpush.bf16.msra.mxu1 %v8389_v15  ;;  %2672 = vmatpush.bf16.msrb.mxu3 %v8390_v21  ;;  %v2415_v7 = vpop.f32.mrf.mxu0  ;;  %v8398_v15 = vld [vmem:[#allocation84_spill] sm:$0xff] }
 0x47d   :  { %2691 = vmatpush.bf16.msrb.mxu1 %v8391_v31  ;;  %2717 = vmatpush.bf16.msra.mxu3 %v8392_v12  ;;  %v8400_v31 = vld [vmem:[#allocation88_spill] sm:$0xff]  ;;  %v8401_v12 = vld [vmem:[#allocation34_spill] sm:$0xff] }
 0x47f   :  { %v2441_v21 = vpop.f32.mrf.mxu2 }
 0x481   :  { %2692 = vmatpush.bf16.msrb.mxu1 %v8393_v48  ;;  %2718 = vmatpush.bf16.msra.mxu3 %v8394_v28  ;;  %v2417_v43 = vpop.f32.mrf.mxu0  ;;  %v8402_v48 = vld [vmem:[#allocation93_spill] sm:$0xff] }
 0x485   :  { %2693 = vmatpush.bf16.msrb.mxu1 %v8395_v45  ;;  %2719 = vmatpush.bf16.msra.mxu3 %v8396_v8  ;;  %v8404_v45 = vld [vmem:[#allocation98_spill] sm:$0xff] }
 0x486   :  { %v8405_v8 = vld [vmem:[#allocation38_spill] sm:$0xff] }
 0x487   :  { %v2443_v47 = vpop.f32.mrf.mxu2 }
 0x489   :  { %2694 = vmatpush.bf16.msrb.mxu1 %v8397_v33  ;;  %2720 = vmatpush.bf16.msra.mxu3 %v8398_v15  ;;  %v2467_v28 = vpop.f32.mrf.mxu0  ;;  %v8406_v33 = vld [vmem:[#allocation102_spill] sm:$0xff] }
 0x48d   :  { %2695 = vmatpush.bf16.msrb.mxu1 %v8399_v58  ;;  %2721 = vmatpush.bf16.msra.mxu3 %v8400_v31  ;;  %v8407_v31 = vld [vmem:[#allocation106_spill] sm:$0xff] }
 0x48e   :  { %v2565_v18 = vunpack.c.l.bf16 %v8407_v31  ;;  %v2566_v47 = vunpack.c.h.bf16 %v8407_v31 }
 0x48f   :  { %v2493_v15 = vpop.f32.mrf.mxu2 }
 0x491   :  { %2696 = vmatpush.bf16.msrb.mxu1 %v8401_v12  ;;  %2722 = vmatpush.bf16.msra.mxu3 %v8402_v48  ;;  %v2469_v43 = vpop.f32.mrf.mxu0 }
 0x492   :  { %v8408_v43 = vld [vmem:[#allocation127_spill] sm:$0xff] }
 0x493   :  { %v2567_v5 = vunpack.c.l.bf16 %v8408_v43 }
 0x495   :  { %2697 = vmatpush.bf16.msrb.mxu1 %v8403_v20  ;;  %2723 = vmatpush.bf16.msra.mxu3 %v8404_v45 }
 0x497   :  { %v2495_v37 = vpop.f32.mrf.mxu2 }
 0x499   :  { %2698 = vmatpush.bf16.msrb.mxu1 %v8405_v8  ;;  %2724 = vmatpush.bf16.msra.mxu3 %v8406_v33  ;;  %v2376_v40 = vpop.f32.mrf.mxu1 }
 0x49a   :  { %v2377_v58 = vadd.f32 %v2376_v40, %v2363_v16 }
 0x49c   :  { %v2569_v12 = vadd.f32 %v2565_v18, %v2377_v58 }
 0x49e   :  { %v2584_v52 = vmul.f32 0.5, %v2569_v12 }
 0x49f   :  { %v2402_v63 = vpop.f32.mrf.mxu3 }
 0x4a0   :  { %v2403_v48 = vadd.f32 %v2402_v63, %v2389_v17  ;;  %4671 = vtanh.f32 %v2584_v52 }
 0x4a1   :  { %v2378_v20 = vpop.f32.mrf.mxu1 }
 0x4a2   :  { %v2570_v39 = vadd.f32 %v2566_v47, %v2403_v48  ;;  %v2568_v20 = vunpack.c.h.bf16 %v8408_v43 }
 0x4a4   :  { %v2588_v45 = vmul.f32 0.5, %v2570_v39 }
 0x4a6   :  { %4673 = vtanh.f32 %v2588_v45  ;;  %v4672_v40 = vpop.eup %4671 }
 0x4a7   :  { %v2404_v8 = vpop.f32.mrf.mxu3  ;;  %v2586_v63 = vmul.f32 0.5, %v4672_v40  ;;  %v8409_v40 = vld [vmem:[#allocation111_spill] sm:$0xff] }
 0x4a9   :  { %v2428_v33 = vpop.f32.mrf.mxu1  ;;  %v2587_v12 = vadd.f32 0.5, %v2586_v63 }
 0x4aa   :  { %v2429_v41 = vadd.f32 %v2428_v33, %v2415_v7 }
 0x4ac   :  { %v2519_v37 = vpop.f32.mrf.mxu0  ;;  %v4674_v16 = vpop.eup %4673  ;;  %v2571_v24 = vadd.f32 %v2567_v5, %v2429_v41 }
 0x4ad   :  { %v2590_v18 = vmul.f32 0.5, %v4674_v16  ;;  %v2576_v16 = vunpack.c.l.bf16 %v8409_v40 }
 0x4ae   :  { %4675 = vtanh.f32 %v2571_v24 }
 0x4af   :  { %v2454_v58 = vpop.f32.mrf.mxu3  ;;  %v2591_v31 = vadd.f32 0.5, %v2590_v18 }
 0x4b0   :  { %v2455_v17 = vadd.f32 %v2454_v58, %v2441_v21 }
 0x4b1   :  { %v2430_v52 = vpop.f32.mrf.mxu1  ;;  %v2597_v33 = vmul.f32 %v2591_v31, %v6885_v29 }
 0x4b2   :  { %v2545_v39 = vpop.f32.mrf.mxu2  ;;  %v2572_v45 = vadd.f32 %v2568_v20, %v2455_v17 }
 0x4b4   :  { %v2521_v48 = vpop.f32.mrf.mxu0  ;;  %v4676_v7 = vpop.eup %4675  ;;  %v2593_v8 = vmul.f32 0.5, %v2572_v45 }
 0x4b5   :  { %v2598_v47 = vmul.f32 %v4676_v7, %v2587_v12 }
 0x4b6   :  { %4677 = vtanh.f32 %v2593_v8 }
 0x4b7   :  { %v7051_v5 = vadd.f32 %v2598_v47, %v2597_v33  ;;  %v2456_v24 = vpop.f32.mrf.mxu3 }
 0x4b9   :  { %4679 = vtanh.f32 %v7051_v5  ;;  %v2480_v21 = vpop.f32.mrf.mxu1 }
 0x4ba   :  { %v2547_v41 = vpop.f32.mrf.mxu2  ;;  %v2481_v43 = vadd.f32 %v2480_v21, %v2467_v28  ;;  %v2577_v28 = vunpack.c.h.bf16 %v8409_v40 }
 0x4bb   :  { %v8410_v41 = vld [vmem:[#allocation140_spill] sm:$0xff] }
 0x4bc   :  { %v4678_v18 = vpop.eup %4677  ;;  %v2580_v58 = vadd.f32 %v2576_v16, %v2481_v43  ;;  %v2578_v21 = vunpack.c.l.bf16 %v8410_v41 }
 0x4bd   :  { %v2595_v63 = vmul.f32 0.5, %v4678_v18 }
 0x4bf   :  { %v4680_v17 = vpop.eup %4679  ;;  %v2596_v20 = vadd.f32 0.5, %v2595_v63  ;;  %v2506_v52 = vpop.f32.mrf.mxu3 }
 0x4c0   :  { %v2507_v12 = vadd.f32 %v2506_v52, %v2493_v15  ;;  %v2602_v15 = vmul.f32 0.5, %v2580_v58 }
 0x4c1   :  { %v2601_v45 = vmul.f32 %v4680_v17, %v2596_v20  ;;  %v2482_v29 = vpop.f32.mrf.mxu1  ;;  %v2579_v17 = vunpack.c.h.bf16 %v8410_v41  ;;  %v8411_v41 = vld [vmem:[#allocation115_spill] sm:$0xff] }
 0x4c2   :  { %v2581_v7 = vadd.f32 %v2577_v28, %v2507_v12 }
 0x4c3   :  { %v7055_v31 = vpack.c.bf16 %v2601_v45, %v2601_v45 }
 0x4c4   :  { %v2606_v8 = vmul.f32 0.5, %v2581_v7 }
 0x4c5   :  { %2622 = vst [vmem:[#allocation4 + $0x10] sm:$0xf] %v7055_v31  ;;  %2634 = vmatmul.bf16.vlgmr.msra.gmra.mxu0 %v7055_v31  ;;  %2660 = vmatmul.bf16.vlgmr.msrb.gmra.mxu2 %v7055_v31 }
 0x4c6   :  { %2730 = vmatpush.bf16.msra.mxu0 %v8033_v22  ;;  %2756 = vmatpush.bf16.msrb.mxu2 %v5942_v10  ;;  %4681 = vtanh.f32 %v2606_v8 }
 0x4c7   :  { %v2508_v48 = vpop.f32.mrf.mxu3  ;;  %4683 = vtanh.f32 %v2602_v15 }
 0x4ca   :  { %2731 = vmatpush.bf16.msra.mxu0 %v8034_v3  ;;  %2757 = vmatpush.bf16.msrb.mxu2 %v5975_v14 }
 0x4cc   :  { %v4682_v47 = vpop.eup %4681 }
 0x4cd   :  { %v4684_v43 = vpop.eup %4683  ;;  %v2608_v16 = vmul.f32 0.5, %v4682_v47 }
 0x4ce   :  { %2732 = vmatpush.bf16.msra.mxu0 %v8035_v60  ;;  %2758 = vmatpush.bf16.msrb.mxu2 %v5999_v51  ;;  %v2604_v18 = vmul.f32 0.5, %v4684_v43  ;;  %v8413_v43 = vld [vmem:[#allocation133_spill] sm:$0xff] }
 0x4cf   :  { %v2609_v20 = vadd.f32 0.5, %v2608_v16  ;;  %v8415_v16 = vld [vmem:[#allocation39_spill] sm:$0xff] }
 0x4d0   :  { %v2605_v45 = vadd.f32 0.5, %v2604_v18  ;;  %v8416_v18 = vld [vmem:[#allocation58_spill] sm:$0xff] }
 0x4d1   :  { %v2615_v28 = vmul.f32 %v2609_v20, %v6918_v35  ;;  %v8420_v20 = vld [vmem:[#allocation62_spill] sm:$0xff] }
 0x4d2   :  { %2733 = vmatpush.bf16.msra.mxu0 %v8036_v59  ;;  %2759 = vmatpush.bf16.msrb.mxu2 %v6025_v19 }
 0x4d5   :  { %2686 = vmatmul.bf16.vlgmr.msrb.gmra.mxu0 %v7055_v31  ;;  %2712 = vmatmul.bf16.vlgmr.msra.gmra.mxu2 %v7055_v31 }
 0x4d6   :  { %2734 = vmatpush.bf16.msra.mxu0 %v8037_v55  ;;  %2760 = vmatpush.bf16.msrb.mxu2 %v6047_v1 }
 0x4d9   :  { %v2532_v33 = vpop.f32.mrf.mxu1 }
 0x4da   :  { %v2533_v24 = vadd.f32 %v2532_v33, %v2519_v37  ;;  %2735 = vmatpush.bf16.msra.mxu0 %v8038_v38  ;;  %2761 = vmatpush.bf16.msrb.mxu2 %v6075_v53 }
 0x4dc   :  { %v2582_v40 = vadd.f32 %v2578_v21, %v2533_v24  ;;  %v8412_v21 = vld [vmem:[#allocation104_spill] sm:$0xff] }
 0x4de   :  { %4685 = vtanh.f32 %v2582_v40  ;;  %2736 = vmatpush.bf16.msra.mxu0 %v8039_v54  ;;  %2762 = vmatpush.bf16.msrb.mxu2 %v6099_v44  ;;  %v8414_v40 = vld [vmem:[#allocation7_spill] sm:$0xff] }
 0x4df   :  { %v2558_v58 = vpop.f32.mrf.mxu3 }
 0x4e0   :  { %v2559_v63 = vadd.f32 %v2558_v58, %v2545_v39  ;;  %v8417_v58 = vld [vmem:[#allocation116_spill] sm:$0xff] }
 0x4e1   :  { %v2534_v52 = vpop.f32.mrf.mxu1 }
 0x4e2   :  { %v2583_v37 = vadd.f32 %v2579_v17, %v2559_v63  ;;  %2737 = vmatpush.bf16.msra.mxu0 %v8040_v57  ;;  %2763 = vmatpush.bf16.msrb.mxu2 %v6135_v50  ;;  %v8418_v63 = vld [vmem:[#allocation9_spill] sm:$0xff]  ;;  %v8419_v17 = vld [vmem:[#allocation43_spill] sm:$0xff] }
 0x4e3   :  { %v8421_v52 = vld [vmem:[#allocation119_spill] sm:$0xff] }
 0x4e4   :  { %v4686_v29 = vpop.eup %4685  ;;  %v2611_v12 = vmul.f32 0.5, %v2583_v37  ;;  %v8422_v37 = vld [vmem:[#allocation11_spill] sm:$0xff] }
 0x4e5   :  { %v2616_v48 = vmul.f32 %v4686_v29, %v2605_v45  ;;  %2738 = vmatmul.bf16.vlgmr.msra.gmra.mxu0 %v7055_v31  ;;  %2764 = vmatmul.bf16.vlgmr.msrb.gmra.mxu2 %v7055_v31  ;;  %v8423_v45 = vld [vmem:[#allocation47_spill] sm:$0xff]  ;;  %v8424_v29 = vld [vmem:[#allocation66_spill] sm:$0xff] }
 0x4e6   :  { %4687 = vtanh.f32 %v2611_v12  ;;  %2782 = vmatpush.bf16.msrb.mxu0 %v8041_v2  ;;  %2808 = vmatpush.bf16.msra.mxu2 %v6140_v25  ;;  %v8425_v12 = vld [vmem:[#allocation120_spill] sm:$0xff] }
 0x4e7   :  { %v7084_v39 = vadd.f32 %v2616_v48, %v2615_v28  ;;  %v2560_v7 = vpop.f32.mrf.mxu3  ;;  %v8426_v28 = vld [vmem:[#allocation13_spill] sm:$0xff]  ;;  %v8427_v48 = vld [vmem:[#allocation51_spill] sm:$0xff] }
 0x4e8   :  { %v8429_v7 = vld [vmem:[#allocation122_spill] sm:$0xff] }
 0x4e9   :  { %4689 = vtanh.f32 %v7084_v39 }
 0x4ea   :  { %2783 = vmatpush.bf16.msrb.mxu0 %v8042_v26  ;;  %2809 = vmatpush.bf16.msra.mxu2 %v6164_v30 }
 0x4ec   :  { %v4688_v35 = vpop.eup %4687 }
 0x4ed   :  { %v2613_v8 = vmul.f32 0.5, %v4688_v35  ;;  %v8430_v35 = vld [vmem:[#allocation74_spill] sm:$0xff] }
 0x4ee   :  { %2784 = vmatpush.bf16.msrb.mxu0 %v8043_v42  ;;  %2810 = vmatpush.bf16.msra.mxu2 %v6188_v6 }
 0x4ef   :  { %v4690_v15 = vpop.eup %4689  ;;  %v2614_v33 = vadd.f32 0.5, %v2613_v8  ;;  %v8431_v8 = vld [vmem:[#allocation123_spill] sm:$0xff] }
 0x4f1   :  { %v2619_v47 = vmul.f32 %v4690_v15, %v2614_v33  ;;  %v8432_v15 = vld [vmem:[#allocation15_spill] sm:$0xff] }
 0x4f2   :  { %2785 = vmatpush.bf16.msrb.mxu0 %v8044_v9  ;;  %2811 = vmatpush.bf16.msra.mxu2 %v6208_v34  ;;  %v8433_v33 = vld [vmem:[#allocation55_spill] sm:$0xff] }
 0x4f3   :  { %v7095_v24 = vpack.c.bf16 %v2619_v47, %v2619_v47  ;;  %v8434_v47 = vld [vmem:[#allocation78_spill] sm:$0xff] }
 0x4f5   :  { %2625 = vst [vmem:[#allocation5 + $0xc] sm:$0xf] %v7095_v24  ;;  %2647 = vmatmul.bf16.vlgmr.msra.gmra.mxu1 %v7095_v24  ;;  %2673 = vmatmul.bf16.vlgmr.msrb.gmra.mxu3 %v7095_v24 }
 0x4f6   :  { %2743 = vmatpush.bf16.msra.mxu1 %v8045_v11  ;;  %2769 = vmatpush.bf16.msrb.mxu3 %v5945_v49 }
 0x4f7   :  { %2786 = vmatpush.bf16.msrb.mxu0 %v8046_v0  ;;  %2812 = vmatpush.bf16.msra.mxu2 %v6228_v62 }
 0x4fa   :  { %2744 = vmatpush.bf16.msra.mxu1 %v8047_v61  ;;  %2770 = vmatpush.bf16.msrb.mxu3 %v5978_v56 }
 0x4fb   :  { %2787 = vmatpush.bf16.msrb.mxu0 %v8048_v46  ;;  %2813 = vmatpush.bf16.msra.mxu2 %v6248_v36 }
 0x4fe   :  { %2745 = vmatpush.bf16.msra.mxu1 %v8049_v32  ;;  %2771 = vmatpush.bf16.msrb.mxu3 %v6003_v13 }
 0x4ff   :  { %2788 = vmatpush.bf16.msrb.mxu0 %v5831_v23  ;;  %2814 = vmatpush.bf16.msra.mxu2 %v6269_v27 }
 0x502   :  { %2746 = vmatpush.bf16.msra.mxu1 %v8050_v4  ;;  %2772 = vmatpush.bf16.msrb.mxu3 %v8411_v41 }
 0x503   :  { %2789 = vmatpush.bf16.msrb.mxu0 %v8412_v21  ;;  %2815 = vmatpush.bf16.msra.mxu2 %v8413_v43 }
 0x505   :  { %2699 = vmatmul.bf16.vlgmr.msrb.gmra.mxu1 %v7095_v24  ;;  %2725 = vmatmul.bf16.vlgmr.msra.gmra.mxu3 %v7095_v24 }
 0x506   :  { %2747 = vmatpush.bf16.msra.mxu1 %v8416_v18  ;;  %2773 = vmatpush.bf16.msrb.mxu3 %v8417_v58 }
 0x507   :  { %2898 = vmatpush.bf16.msra.mxu0 %v8414_v40  ;;  %2924 = vmatpush.bf16.msrb.mxu2 %v8415_v16 }
 0x508   :  { %2790 = vmatmul.bf16.vlgmr.msrb.gmra.mxu0 %v7055_v31  ;;  %2816 = vmatmul.bf16.vlgmr.msra.gmra.mxu2 %v7055_v31  ;;  %v8428_v31 = vld [vmem:[#allocation70_spill] sm:$0xff] }
 0x50a   :  { %2748 = vmatpush.bf16.msra.mxu1 %v8420_v20  ;;  %2774 = vmatpush.bf16.msrb.mxu3 %v8421_v52  ;;  %v8494_v52 = vld [vmem:[#allocation32_spill] sm:$0xff] }
 0x50b   :  { %2899 = vmatpush.bf16.msra.mxu0 %v8418_v63  ;;  %2925 = vmatpush.bf16.msrb.mxu2 %v8419_v17  ;;  %v8498_v20 = vld [vmem:[#allocation36_spill] sm:$0xff] }
 0x50e   :  { %2749 = vmatpush.bf16.msra.mxu1 %v8424_v29  ;;  %2775 = vmatpush.bf16.msrb.mxu3 %v8425_v12  ;;  %v8443_v12 = vld [vmem:[#allocation128_spill] sm:$0xff]  ;;  %v8444_v29 = vld [vmem:[#allocation21_spill] sm:$0xff] }
 0x50f   :  { %2900 = vmatpush.bf16.msra.mxu0 %v8422_v37  ;;  %2926 = vmatpush.bf16.msrb.mxu2 %v8423_v45  ;;  %v8490_v37 = vld [vmem:[#allocation28_spill] sm:$0xff] }
 0x512   :  { %2750 = vmatpush.bf16.msra.mxu1 %v8428_v31  ;;  %2776 = vmatpush.bf16.msrb.mxu3 %v8429_v7  ;;  %v8437_v31 = vld [vmem:[#allocation59_spill] sm:$0xff]  ;;  %v8438_v7 = vld [vmem:[#allocation82_spill] sm:$0xff] }
 0x513   :  { %2901 = vmatpush.bf16.msra.mxu0 %v8426_v28  ;;  %2927 = vmatpush.bf16.msrb.mxu2 %v8427_v48  ;;  %v8435_v28 = vld [vmem:[#allocation125_spill] sm:$0xff] }
 0x514   :  { %v8436_v48 = vld [vmem:[#allocation17_spill] sm:$0xff] }
 0x515   :  { %2751 = vmatmul.bf16.vlgmr.msra.gmra.mxu1 %v7095_v24  ;;  %2777 = vmatmul.bf16.vlgmr.msrb.gmra.mxu3 %v7095_v24 }
 0x516   :  { %2795 = vmatpush.bf16.msrb.mxu1 %v8430_v35  ;;  %2821 = vmatpush.bf16.msra.mxu3 %v8431_v8  ;;  %v8439_v35 = vld [vmem:[#allocation126_spill] sm:$0xff]  ;;  %v8440_v8 = vld [vmem:[#allocation19_spill] sm:$0xff] }
 0x517   :  { %2902 = vmatpush.bf16.msra.mxu0 %v8432_v15  ;;  %2928 = vmatpush.bf16.msrb.mxu2 %v8433_v33  ;;  %v8441_v15 = vld [vmem:[#allocation63_spill] sm:$0xff]  ;;  %v8442_v33 = vld [vmem:[#allocation86_spill] sm:$0xff] }
 0x51a   :  { %2796 = vmatpush.bf16.msrb.mxu1 %v8434_v47  ;;  %2822 = vmatpush.bf16.msra.mxu3 %v8435_v28  ;;  %v8445_v47 = vld [vmem:[#allocation67_spill] sm:$0xff] }
 0x51b   :  { %2903 = vmatpush.bf16.msra.mxu0 %v8436_v48  ;;  %2929 = vmatpush.bf16.msrb.mxu2 %v8437_v31  ;;  %v8446_v28 = vld [vmem:[#allocation23_spill] sm:$0xff]  ;;  %v8448_v31 = vld [vmem:[#allocation90_spill] sm:$0xff] }
 0x51c   :  { %v8447_v48 = vld [vmem:[#allocation71_spill] sm:$0xff] }
 0x51e   :  { %2797 = vmatpush.bf16.msrb.mxu1 %v8438_v7  ;;  %2823 = vmatpush.bf16.msra.mxu3 %v8439_v35  ;;  %v8449_v7 = vld [vmem:[#allocation129_spill] sm:$0xff] }
 0x51f   :  { %2904 = vmatpush.bf16.msra.mxu0 %v8440_v8  ;;  %2930 = vmatpush.bf16.msrb.mxu2 %v8441_v15  ;;  %v8450_v35 = vld [vmem:[#allocation25_spill] sm:$0xff]  ;;  %v8451_v8 = vld [vmem:[#allocation75_spill] sm:$0xff]  ;;  %v8452_v15 = vld [vmem:[#allocation96_spill] sm:$0xff] }
 0x522   :  { %2798 = vmatpush.bf16.msrb.mxu1 %v8442_v33  ;;  %2824 = vmatpush.bf16.msra.mxu3 %v8443_v12  ;;  %v8453_v33 = vld [vmem:[#allocation131_spill] sm:$0xff] }
 0x523   :  { %2905 = vmatpush.bf16.msra.mxu0 %v8444_v29  ;;  %2931 = vmatpush.bf16.msrb.mxu2 %v8445_v47  ;;  %v8454_v12 = vld [vmem:[#allocation27_spill] sm:$0xff] }
 0x524   :  { %v8455_v29 = vld [vmem:[#allocation79_spill] sm:$0xff] }
 0x525   :  { %v8456_v47 = vld [vmem:[#allocation99_spill] sm:$0xff] }
 0x526   :  { %2799 = vmatpush.bf16.msrb.mxu1 %v8448_v31  ;;  %2825 = vmatpush.bf16.msra.mxu3 %v8449_v7  ;;  %v8459_v31 = vld [vmem:[#allocation83_spill] sm:$0xff]  ;;  %v8460_v7 = vld [vmem:[#allocation105_spill] sm:$0xff] }
 0x527   :  { %2950 = vmatpush.bf16.msrb.mxu0 %v8446_v28  ;;  %2976 = vmatpush.bf16.msra.mxu2 %v8447_v48  ;;  %v8457_v28 = vld [vmem:[#allocation132_spill] sm:$0xff]  ;;  %v8458_v48 = vld [vmem:[#allocation29_spill] sm:$0xff] }
 0x52a   :  { %2800 = vmatpush.bf16.msrb.mxu1 %v8452_v15  ;;  %2826 = vmatpush.bf16.msra.mxu3 %v8453_v33  ;;  %v8463_v15 = vld [vmem:[#allocation40_spill] sm:$0xff]  ;;  %v8464_v33 = vld [vmem:[#allocation31_spill] sm:$0xff] }
 0x52b   :  { %2951 = vmatpush.bf16.msrb.mxu0 %v8450_v35  ;;  %2977 = vmatpush.bf16.msra.mxu2 %v8451_v8  ;;  %v8461_v35 = vld [vmem:[#allocation135_spill] sm:$0xff]  ;;  %v8462_v8 = vld [vmem:[#allocation8_spill] sm:$0xff] }
 0x52e   :  { %2801 = vmatpush.bf16.msrb.mxu1 %v8456_v47  ;;  %2827 = vmatpush.bf16.msra.mxu3 %v8457_v28  ;;  %v8466_v28 = vld [vmem:[#allocation10_spill] sm:$0xff]  ;;  %v8475_v47 = vld [vmem:[#allocation52_spill] sm:$0xff] }
 0x52f   :  { %2952 = vmatpush.bf16.msrb.mxu0 %v8454_v12  ;;  %2978 = vmatpush.bf16.msra.mxu2 %v8455_v29  ;;  %v8465_v12 = vld [vmem:[#allocation87_spill] sm:$0xff]  ;;  %v8484_v29 = vld [vmem:[#allocation22_spill] sm:$0xff] }
 0x532   :  { %2802 = vmatpush.bf16.msrb.mxu1 %v8460_v7  ;;  %2828 = vmatpush.bf16.msra.mxu3 %v8461_v35  ;;  %v8469_v7 = vld [vmem:[#allocation92_spill] sm:$0xff] }
 0x533   :  { %2953 = vmatpush.bf16.msrb.mxu0 %v8458_v48  ;;  %2979 = vmatpush.bf16.msra.mxu2 %v8459_v31  ;;  %v8467_v48 = vld [vmem:[#allocation44_spill] sm:$0xff]  ;;  %v8468_v31 = vld [vmem:[#allocation33_spill] sm:$0xff] }
 0x534   :  { %v8470_v35 = vld [vmem:[#allocation12_spill] sm:$0xff] }
 0x535   :  { %2803 = vmatmul.bf16.vlgmr.msrb.gmra.mxu1 %v7095_v24  ;;  %2829 = vmatmul.bf16.vlgmr.msra.gmra.mxu3 %v7095_v24  ;;  %v8476_v24 = vld [vmem:[#allocation37_spill] sm:$0xff] }
 0x536   :  { %2911 = vmatpush.bf16.msra.mxu1 %v8462_v8  ;;  %2937 = vmatpush.bf16.msrb.mxu3 %v8463_v15  ;;  %v8471_v8 = vld [vmem:[#allocation48_spill] sm:$0xff]  ;;  %v8472_v15 = vld [vmem:[#allocation35_spill] sm:$0xff] }
 0x537   :  { %2954 = vmatpush.bf16.msrb.mxu0 %v8464_v33  ;;  %2980 = vmatpush.bf16.msra.mxu2 %v8465_v12  ;;  %v8473_v33 = vld [vmem:[#allocation97_spill] sm:$0xff]  ;;  %v8474_v12 = vld [vmem:[#allocation14_spill] sm:$0xff] }
 0x53a   :  { %2912 = vmatpush.bf16.msra.mxu1 %v8466_v28  ;;  %2938 = vmatpush.bf16.msrb.mxu3 %v8467_v48  ;;  %v8477_v28 = vld [vmem:[#allocation101_spill] sm:$0xff]  ;;  %v8478_v48 = vld [vmem:[#allocation16_spill] sm:$0xff] }
 0x53b   :  { %2955 = vmatpush.bf16.msrb.mxu0 %v8468_v31  ;;  %2981 = vmatpush.bf16.msra.mxu2 %v8469_v7  ;;  %v8479_v31 = vld [vmem:[#allocation56_spill] sm:$0xff]  ;;  %v8480_v7 = vld [vmem:[#allocation18_spill] sm:$0xff] }
 0x53e   :  { %2913 = vmatpush.bf16.msra.mxu1 %v8470_v35  ;;  %2939 = vmatpush.bf16.msrb.mxu3 %v8471_v8  ;;  %v8481_v35 = vld [vmem:[#allocation60_spill] sm:$0xff] }
 0x53f   :  { %2956 = vmatpush.bf16.msrb.mxu0 %v8472_v15  ;;  %2982 = vmatpush.bf16.msra.mxu2 %v8473_v33  ;;  %v8482_v15 = vld [vmem:[#allocation20_spill] sm:$0xff] }
 0x540   :  { %v8483_v33 = vld [vmem:[#allocation64_spill] sm:$0xff] }
 0x542   :  { %2914 = vmatpush.bf16.msra.mxu1 %v8474_v12  ;;  %2940 = vmatpush.bf16.msrb.mxu3 %v8475_v47  ;;  %v2635_v8 = vpop.f32.mrf.mxu0  ;;  %v8485_v47 = vld [vmem:[#allocation68_spill] sm:$0xff] }
 0x543   :  { %2957 = vmatpush.bf16.msrb.mxu0 %v8476_v24  ;;  %2983 = vmatpush.bf16.msra.mxu2 %v8477_v28  ;;  %v8486_v28 = vld [vmem:[#allocation24_spill] sm:$0xff] }
 0x546   :  { %2915 = vmatpush.bf16.msra.mxu1 %v8478_v48  ;;  %2941 = vmatpush.bf16.msrb.mxu3 %v8479_v31  ;;  %v8487_v48 = vld [vmem:[#allocation72_spill] sm:$0xff]  ;;  %v8488_v31 = vld [vmem:[#allocation26_spill] sm:$0xff] }
 0x548   :  { %v2661_v12 = vpop.f32.mrf.mxu2 }
 0x54a   :  { %2916 = vmatpush.bf16.msra.mxu1 %v8480_v7  ;;  %2942 = vmatpush.bf16.msrb.mxu3 %v8481_v35  ;;  %v2637_v24 = vpop.f32.mrf.mxu0  ;;  %v8489_v7 = vld [vmem:[#allocation76_spill] sm:$0xff] }
 0x54e   :  { %2917 = vmatpush.bf16.msra.mxu1 %v8482_v15  ;;  %2943 = vmatpush.bf16.msrb.mxu3 %v8483_v33  ;;  %v8491_v15 = vld [vmem:[#allocation80_spill] sm:$0xff]  ;;  %v8492_v33 = vld [vmem:[#allocation30_spill] sm:$0xff] }
 0x550   :  { %v2663_v35 = vpop.f32.mrf.mxu2 }
 0x552   :  { %2918 = vmatpush.bf16.msra.mxu1 %v8484_v29  ;;  %2944 = vmatpush.bf16.msrb.mxu3 %v8485_v47  ;;  %v2687_v45 = vpop.f32.mrf.mxu0  ;;  %v8493_v29 = vld [vmem:[#allocation84_spill] sm:$0xff] }
 0x556   :  { %2963 = vmatpush.bf16.msrb.mxu1 %v8486_v28  ;;  %2989 = vmatpush.bf16.msra.mxu3 %v8487_v48  ;;  %v8495_v28 = vld [vmem:[#allocation88_spill] sm:$0xff]  ;;  %v8496_v48 = vld [vmem:[#allocation34_spill] sm:$0xff] }
 0x558   :  { %v2713_v47 = vpop.f32.mrf.mxu2 }
 0x55a   :  { %2964 = vmatpush.bf16.msrb.mxu1 %v8488_v31  ;;  %2990 = vmatpush.bf16.msra.mxu3 %v8489_v7  ;;  %v2689_v24 = vpop.f32.mrf.mxu0  ;;  %v8497_v31 = vld [vmem:[#allocation93_spill] sm:$0xff] }
 0x55e   :  { %2965 = vmatpush.bf16.msrb.mxu1 %v8490_v37  ;;  %2991 = vmatpush.bf16.msra.mxu3 %v8491_v15  ;;  %v8499_v37 = vld [vmem:[#allocation98_spill] sm:$0xff] }
 0x55f   :  { %v8500_v15 = vld [vmem:[#allocation38_spill] sm:$0xff] }
 0x560   :  { %v2715_v35 = vpop.f32.mrf.mxu2 }
 0x562   :  { %2966 = vmatpush.bf16.msrb.mxu1 %v8492_v33  ;;  %2992 = vmatpush.bf16.msra.mxu3 %v8493_v29  ;;  %v2739_v7 = vpop.f32.mrf.mxu0  ;;  %v8501_v33 = vld [vmem:[#allocation102_spill] sm:$0xff] }
 0x566   :  { %2967 = vmatpush.bf16.msrb.mxu1 %v8494_v52  ;;  %2993 = vmatpush.bf16.msra.mxu3 %v8495_v28  ;;  %v8502_v28 = vld [vmem:[#allocation108_spill] sm:$0xff] }
 0x567   :  { %v2837_v58 = vunpack.c.l.bf16 %v8502_v28  ;;  %v2838_v35 = vunpack.c.h.bf16 %v8502_v28 }
 0x568   :  { %v2765_v29 = vpop.f32.mrf.mxu2 }
 0x56a   :  { %2968 = vmatpush.bf16.msrb.mxu1 %v8496_v48  ;;  %2994 = vmatpush.bf16.msra.mxu3 %v8497_v31  ;;  %v2741_v24 = vpop.f32.mrf.mxu0 }
 0x56b   :  { %v8503_v24 = vld [vmem:[#allocation130_spill] sm:$0xff] }
 0x56c   :  { %v2839_v21 = vunpack.c.l.bf16 %v8503_v24 }
 0x56e   :  { %2969 = vmatpush.bf16.msrb.mxu1 %v8498_v20  ;;  %2995 = vmatpush.bf16.msra.mxu3 %v8499_v37 }
 0x570   :  { %v2767_v63 = vpop.f32.mrf.mxu2 }
 0x572   :  { %2970 = vmatpush.bf16.msrb.mxu1 %v8500_v15  ;;  %2996 = vmatpush.bf16.msra.mxu3 %v8501_v33  ;;  %v2648_v17 = vpop.f32.mrf.mxu1 }
 0x573   :  { %v2649_v52 = vadd.f32 %v2648_v17, %v2635_v8 }
 0x575   :  { %v2841_v48 = vadd.f32 %v2837_v58, %v2649_v52 }
 0x577   :  { %v2856_v16 = vmul.f32 0.5, %v2841_v48 }
 0x578   :  { %v2674_v18 = vpop.f32.mrf.mxu3 }
 0x579   :  { %v2675_v31 = vadd.f32 %v2674_v18, %v2661_v12  ;;  %4691 = vtanh.f32 %v2856_v16 }
 0x57a   :  { %v2650_v20 = vpop.f32.mrf.mxu1 }
 0x57b   :  { %v2842_v40 = vadd.f32 %v2838_v35, %v2675_v31  ;;  %v2840_v20 = vunpack.c.h.bf16 %v8503_v24 }
 0x57d   :  { %v2860_v37 = vmul.f32 0.5, %v2842_v40 }
 0x57f   :  { %4693 = vtanh.f32 %v2860_v37  ;;  %v4692_v17 = vpop.eup %4691 }
 0x580   :  { %v2676_v15 = vpop.f32.mrf.mxu3  ;;  %v2858_v18 = vmul.f32 0.5, %v4692_v17  ;;  %v8504_v17 = vld [vmem:[#allocation109_spill] sm:$0xff] }
 0x582   :  { %v2700_v33 = vpop.f32.mrf.mxu1  ;;  %v2859_v48 = vadd.f32 0.5, %v2858_v18 }
 0x583   :  { %v2701_v43 = vadd.f32 %v2700_v33, %v2687_v45 }
 0x585   :  { %v2791_v63 = vpop.f32.mrf.mxu0  ;;  %v4694_v8 = vpop.eup %4693  ;;  %v2843_v41 = vadd.f32 %v2839_v21, %v2701_v43 }
 0x586   :  { %v2862_v58 = vmul.f32 0.5, %v4694_v8  ;;  %v2848_v8 = vunpack.c.l.bf16 %v8504_v17 }
 0x587   :  { %4695 = vtanh.f32 %v2843_v41 }
 0x588   :  { %v2726_v52 = vpop.f32.mrf.mxu3  ;;  %v2863_v28 = vadd.f32 0.5, %v2862_v58 }
 0x589   :  { %v2727_v12 = vadd.f32 %v2726_v52, %v2713_v47 }
 0x58a   :  { %v2702_v16 = vpop.f32.mrf.mxu1  ;;  %v2869_v33 = vmul.f32 %v2863_v28, %v7051_v5 }
 0x58b   :  { %v2817_v40 = vpop.f32.mrf.mxu2  ;;  %v2844_v37 = vadd.f32 %v2840_v20, %v2727_v12 }
 0x58d   :  { %v2793_v31 = vpop.f32.mrf.mxu0  ;;  %v4696_v45 = vpop.eup %4695  ;;  %v2865_v15 = vmul.f32 0.5, %v2844_v37 }
 0x58e   :  { %v2870_v35 = vmul.f32 %v4696_v45, %v2859_v48 }
 0x58f   :  { %4697 = vtanh.f32 %v2865_v15 }
 0x590   :  { %v7217_v21 = vadd.f32 %v2870_v35, %v2869_v33  ;;  %v2728_v41 = vpop.f32.mrf.mxu3 }
 0x592   :  { %4699 = vtanh.f32 %v7217_v21  ;;  %v2752_v47 = vpop.f32.mrf.mxu1 }
 0x593   :  { %v2819_v43 = vpop.f32.mrf.mxu2  ;;  %v2753_v24 = vadd.f32 %v2752_v47, %v2739_v7  ;;  %v2849_v7 = vunpack.c.h.bf16 %v8504_v17 }
 0x594   :  { %v8505_v43 = vld [vmem:[#allocation139_spill] sm:$0xff] }
 0x595   :  { %v4698_v58 = vpop.eup %4697  ;;  %v2852_v52 = vadd.f32 %v2848_v8, %v2753_v24  ;;  %v2850_v47 = vunpack.c.l.bf16 %v8505_v43 }
 0x596   :  { %v2867_v18 = vmul.f32 0.5, %v4698_v58 }
 0x598   :  { %v4700_v12 = vpop.eup %4699  ;;  %v2868_v20 = vadd.f32 0.5, %v2867_v18  ;;  %v2778_v16 = vpop.f32.mrf.mxu3 }
 0x599   :  { %v2779_v48 = vadd.f32 %v2778_v16, %v2765_v29  ;;  %v2874_v29 = vmul.f32 0.5, %v2852_v52 }
 0x59a   :  { %v2873_v37 = vmul.f32 %v4700_v12, %v2868_v20  ;;  %v2754_v5 = vpop.f32.mrf.mxu1  ;;  %v2851_v12 = vunpack.c.h.bf16 %v8505_v43  ;;  %v8506_v43 = vld [vmem:[#allocation115_spill] sm:$0xff] }
 0x59b   :  { %v2853_v45 = vadd.f32 %v2849_v7, %v2779_v48 }
 0x59c   :  { %v7221_v28 = vpack.c.bf16 %v2873_v37, %v2873_v37 }
 0x59d   :  { %v2878_v15 = vmul.f32 0.5, %v2853_v45 }
 0x59e   :  { %2894 = vst [vmem:[#allocation4 + $0x14] sm:$0xf] %v7221_v28  ;;  %2906 = vmatmul.bf16.vlgmr.msra.gmra.mxu0 %v7221_v28  ;;  %2932 = vmatmul.bf16.vlgmr.msrb.gmra.mxu2 %v7221_v28 }
 0x59f   :  { %3002 = vmatpush.bf16.msra.mxu0 %v8033_v22  ;;  %3028 = vmatpush.bf16.msrb.mxu2 %v5942_v10  ;;  %4701 = vtanh.f32 %v2878_v15 }
 0x5a0   :  { %v2780_v31 = vpop.f32.mrf.mxu3  ;;  %4703 = vtanh.f32 %v2874_v29 }
 0x5a3   :  { %3003 = vmatpush.bf16.msra.mxu0 %v8034_v3  ;;  %3029 = vmatpush.bf16.msrb.mxu2 %v5975_v14 }
 0x5a5   :  { %v4702_v35 = vpop.eup %4701 }
 0x5a6   :  { %v4704_v24 = vpop.eup %4703  ;;  %v2880_v8 = vmul.f32 0.5, %v4702_v35 }
 0x5a7   :  { %3004 = vmatpush.bf16.msra.mxu0 %v8035_v60  ;;  %3030 = vmatpush.bf16.msrb.mxu2 %v5999_v51  ;;  %v2876_v58 = vmul.f32 0.5, %v4704_v24  ;;  %v8508_v24 = vld [vmem:[#allocation133_spill] sm:$0xff] }
 0x5a8   :  { %v2881_v20 = vadd.f32 0.5, %v2880_v8  ;;  %v8510_v8 = vld [vmem:[#allocation39_spill] sm:$0xff] }
 0x5a9   :  { %v2877_v37 = vadd.f32 0.5, %v2876_v58  ;;  %v8511_v58 = vld [vmem:[#allocation58_spill] sm:$0xff] }
 0x5aa   :  { %v2887_v7 = vmul.f32 %v2881_v20, %v7084_v39  ;;  %v8515_v20 = vld [vmem:[#allocation62_spill] sm:$0xff] }
 0x5ab   :  { %3005 = vmatpush.bf16.msra.mxu0 %v8036_v59  ;;  %3031 = vmatpush.bf16.msrb.mxu2 %v6025_v19 }
 0x5ae   :  { %2958 = vmatmul.bf16.vlgmr.msrb.gmra.mxu0 %v7221_v28  ;;  %2984 = vmatmul.bf16.vlgmr.msra.gmra.mxu2 %v7221_v28 }
 0x5af   :  { %3006 = vmatpush.bf16.msra.mxu0 %v8037_v55  ;;  %3032 = vmatpush.bf16.msrb.mxu2 %v6047_v1 }
 0x5b2   :  { %v2804_v33 = vpop.f32.mrf.mxu1 }
 0x5b3   :  { %v2805_v41 = vadd.f32 %v2804_v33, %v2791_v63  ;;  %3007 = vmatpush.bf16.msra.mxu0 %v8038_v38  ;;  %3033 = vmatpush.bf16.msrb.mxu2 %v6075_v53 }
 0x5b5   :  { %v2854_v17 = vadd.f32 %v2850_v47, %v2805_v41  ;;  %v8507_v47 = vld [vmem:[#allocation104_spill] sm:$0xff] }
 0x5b7   :  { %4705 = vtanh.f32 %v2854_v17  ;;  %3008 = vmatpush.bf16.msra.mxu0 %v8039_v54  ;;  %3034 = vmatpush.bf16.msrb.mxu2 %v6099_v44  ;;  %v8509_v17 = vld [vmem:[#allocation7_spill] sm:$0xff] }
 0x5b8   :  { %v2830_v52 = vpop.f32.mrf.mxu3 }
 0x5b9   :  { %v2831_v18 = vadd.f32 %v2830_v52, %v2817_v40  ;;  %v8512_v52 = vld [vmem:[#allocation116_spill] sm:$0xff] }
 0x5ba   :  { %v2806_v16 = vpop.f32.mrf.mxu1 }
 0x5bb   :  { %v2855_v63 = vadd.f32 %v2851_v12, %v2831_v18  ;;  %3009 = vmatpush.bf16.msra.mxu0 %v8040_v57  ;;  %3035 = vmatpush.bf16.msrb.mxu2 %v6135_v50  ;;  %v8513_v18 = vld [vmem:[#allocation9_spill] sm:$0xff]  ;;  %v8514_v12 = vld [vmem:[#allocation43_spill] sm:$0xff] }
 0x5bc   :  { %v8516_v16 = vld [vmem:[#allocation119_spill] sm:$0xff] }
 0x5bd   :  { %v4706_v5 = vpop.eup %4705  ;;  %v2883_v48 = vmul.f32 0.5, %v2855_v63  ;;  %v8517_v63 = vld [vmem:[#allocation11_spill] sm:$0xff] }
 0x5be   :  { %v2888_v31 = vmul.f32 %v4706_v5, %v2877_v37  ;;  %3010 = vmatmul.bf16.vlgmr.msra.gmra.mxu0 %v7221_v28  ;;  %3036 = vmatmul.bf16.vlgmr.msrb.gmra.mxu2 %v7221_v28  ;;  %v8518_v37 = vld [vmem:[#allocation47_spill] sm:$0xff]  ;;  %v8519_v5 = vld [vmem:[#allocation66_spill] sm:$0xff] }
 0x5bf   :  { %4707 = vtanh.f32 %v2883_v48  ;;  %3054 = vmatpush.bf16.msrb.mxu0 %v8041_v2  ;;  %3080 = vmatpush.bf16.msra.mxu2 %v6140_v25  ;;  %v8520_v48 = vld [vmem:[#allocation120_spill] sm:$0xff] }
 0x5c0   :  { %v7250_v40 = vadd.f32 %v2888_v31, %v2887_v7  ;;  %v2832_v45 = vpop.f32.mrf.mxu3  ;;  %v8521_v7 = vld [vmem:[#allocation13_spill] sm:$0xff]  ;;  %v8522_v31 = vld [vmem:[#allocation51_spill] sm:$0xff] }
 0x5c1   :  { %v8524_v45 = vld [vmem:[#allocation122_spill] sm:$0xff] }
 0x5c2   :  { %4709 = vtanh.f32 %v7250_v40 }
 0x5c3   :  { %3055 = vmatpush.bf16.msrb.mxu0 %v8042_v26  ;;  %3081 = vmatpush.bf16.msra.mxu2 %v6164_v30 }
 0x5c5   :  { %v4708_v39 = vpop.eup %4707 }
 0x5c6   :  { %v2885_v15 = vmul.f32 0.5, %v4708_v39  ;;  %v8525_v39 = vld [vmem:[#allocation74_spill] sm:$0xff] }
 0x5c7   :  { %3056 = vmatpush.bf16.msrb.mxu0 %v8043_v42  ;;  %3082 = vmatpush.bf16.msra.mxu2 %v6188_v6 }
 0x5c8   :  { %v4710_v29 = vpop.eup %4709  ;;  %v2886_v33 = vadd.f32 0.5, %v2885_v15  ;;  %v8526_v15 = vld [vmem:[#allocation123_spill] sm:$0xff] }
 0x5ca   :  { %v2891_v35 = vmul.f32 %v4710_v29, %v2886_v33  ;;  %v8527_v29 = vld [vmem:[#allocation15_spill] sm:$0xff] }
 0x5cb   :  { %3057 = vmatpush.bf16.msrb.mxu0 %v8044_v9  ;;  %3083 = vmatpush.bf16.msra.mxu2 %v6208_v34  ;;  %v8528_v33 = vld [vmem:[#allocation55_spill] sm:$0xff] }
 0x5cc   :  { %v7261_v41 = vpack.c.bf16 %v2891_v35, %v2891_v35  ;;  %v8529_v35 = vld [vmem:[#allocation78_spill] sm:$0xff] }
 0x5ce   :  { %2897 = vst [vmem:[#allocation5 + $0x8] sm:$0xf] %v7261_v41  ;;  %2919 = vmatmul.bf16.vlgmr.msra.gmra.mxu1 %v7261_v41  ;;  %2945 = vmatmul.bf16.vlgmr.msrb.gmra.mxu3 %v7261_v41 }
 0x5cf   :  { %3015 = vmatpush.bf16.msra.mxu1 %v8045_v11  ;;  %3041 = vmatpush.bf16.msrb.mxu3 %v5945_v49 }
 0x5d0   :  { %3058 = vmatpush.bf16.msrb.mxu0 %v8046_v0  ;;  %3084 = vmatpush.bf16.msra.mxu2 %v6228_v62 }
 0x5d3   :  { %3016 = vmatpush.bf16.msra.mxu1 %v8047_v61  ;;  %3042 = vmatpush.bf16.msrb.mxu3 %v5978_v56 }
 0x5d4   :  { %3059 = vmatpush.bf16.msrb.mxu0 %v8048_v46  ;;  %3085 = vmatpush.bf16.msra.mxu2 %v6248_v36 }
 0x5d7   :  { %3017 = vmatpush.bf16.msra.mxu1 %v8049_v32  ;;  %3043 = vmatpush.bf16.msrb.mxu3 %v6003_v13 }
 0x5d8   :  { %3060 = vmatpush.bf16.msrb.mxu0 %v5831_v23  ;;  %3086 = vmatpush.bf16.msra.mxu2 %v6269_v27 }
 0x5db   :  { %3018 = vmatpush.bf16.msra.mxu1 %v8050_v4  ;;  %3044 = vmatpush.bf16.msrb.mxu3 %v8506_v43 }
 0x5dc   :  { %3061 = vmatpush.bf16.msrb.mxu0 %v8507_v47  ;;  %3087 = vmatpush.bf16.msra.mxu2 %v8508_v24 }
 0x5de   :  { %2971 = vmatmul.bf16.vlgmr.msrb.gmra.mxu1 %v7261_v41  ;;  %2997 = vmatmul.bf16.vlgmr.msra.gmra.mxu3 %v7261_v41 }
 0x5df   :  { %3019 = vmatpush.bf16.msra.mxu1 %v8511_v58  ;;  %3045 = vmatpush.bf16.msrb.mxu3 %v8512_v52 }
 0x5e0   :  { %3170 = vmatpush.bf16.msra.mxu0 %v8509_v17  ;;  %3196 = vmatpush.bf16.msrb.mxu2 %v8510_v8  ;;  %v8530_v17 = vld [vmem:[#allocation125_spill] sm:$0xff] }
 0x5e1   :  { %3062 = vmatmul.bf16.vlgmr.msrb.gmra.mxu0 %v7221_v28  ;;  %3088 = vmatmul.bf16.vlgmr.msra.gmra.mxu2 %v7221_v28  ;;  %v8523_v28 = vld [vmem:[#allocation70_spill] sm:$0xff]  ;;  %v8531_v8 = vld [vmem:[#allocation17_spill] sm:$0xff] }
 0x5e3   :  { %3020 = vmatpush.bf16.msra.mxu1 %v8515_v20  ;;  %3046 = vmatpush.bf16.msrb.mxu3 %v8516_v16 }
 0x5e4   :  { %3171 = vmatpush.bf16.msra.mxu0 %v8513_v18  ;;  %3197 = vmatpush.bf16.msrb.mxu2 %v8514_v12  ;;  %v8532_v18 = vld [vmem:[#allocation59_spill] sm:$0xff]  ;;  %v8533_v12 = vld [vmem:[#allocation82_spill] sm:$0xff] }
 0x5e7   :  { %3021 = vmatpush.bf16.msra.mxu1 %v8519_v5  ;;  %3047 = vmatpush.bf16.msrb.mxu3 %v8520_v48 }
 0x5e8   :  { %3172 = vmatpush.bf16.msra.mxu0 %v8517_v63  ;;  %3198 = vmatpush.bf16.msrb.mxu2 %v8518_v37  ;;  %v8534_v63 = vld [vmem:[#allocation126_spill] sm:$0xff]  ;;  %v8535_v37 = vld [vmem:[#allocation19_spill] sm:$0xff] }
 0x5eb   :  { %3022 = vmatpush.bf16.msra.mxu1 %v8523_v28  ;;  %3048 = vmatpush.bf16.msrb.mxu3 %v8524_v45  ;;  %v8589_v45 = vld [vmem:[#allocation32_spill] sm:$0xff] }
 0x5ec   :  { %3173 = vmatpush.bf16.msra.mxu0 %v8521_v7  ;;  %3199 = vmatpush.bf16.msrb.mxu2 %v8522_v31  ;;  %v8536_v7 = vld [vmem:[#allocation63_spill] sm:$0xff]  ;;  %v8537_v31 = vld [vmem:[#allocation86_spill] sm:$0xff]  ;;  %v8593_v28 = vld [vmem:[#allocation36_spill] sm:$0xff] }
 0x5ee   :  { %3023 = vmatmul.bf16.vlgmr.msra.gmra.mxu1 %v7261_v41  ;;  %3049 = vmatmul.bf16.vlgmr.msrb.gmra.mxu3 %v7261_v41 }
 0x5ef   :  { %3067 = vmatpush.bf16.msrb.mxu1 %v8525_v39  ;;  %3093 = vmatpush.bf16.msra.mxu3 %v8526_v15  ;;  %v8585_v39 = vld [vmem:[#allocation28_spill] sm:$0xff] }
 0x5f0   :  { %3174 = vmatpush.bf16.msra.mxu0 %v8527_v29  ;;  %3200 = vmatpush.bf16.msrb.mxu2 %v8528_v33  ;;  %v8538_v29 = vld [vmem:[#allocation128_spill] sm:$0xff]  ;;  %v8539_v33 = vld [vmem:[#allocation21_spill] sm:$0xff] }
 0x5f3   :  { %3068 = vmatpush.bf16.msrb.mxu1 %v8529_v35  ;;  %3094 = vmatpush.bf16.msra.mxu3 %v8530_v17  ;;  %v8540_v35 = vld [vmem:[#allocation67_spill] sm:$0xff] }
 0x5f4   :  { %3175 = vmatpush.bf16.msra.mxu0 %v8531_v8  ;;  %3201 = vmatpush.bf16.msrb.mxu2 %v8532_v18  ;;  %v8541_v17 = vld [vmem:[#allocation23_spill] sm:$0xff]  ;;  %v8543_v18 = vld [vmem:[#allocation90_spill] sm:$0xff] }
 0x5f5   :  { %v8542_v8 = vld [vmem:[#allocation71_spill] sm:$0xff] }
 0x5f7   :  { %3069 = vmatpush.bf16.msrb.mxu1 %v8533_v12  ;;  %3095 = vmatpush.bf16.msra.mxu3 %v8534_v63  ;;  %v8544_v12 = vld [vmem:[#allocation129_spill] sm:$0xff] }
 0x5f8   :  { %3176 = vmatpush.bf16.msra.mxu0 %v8535_v37  ;;  %3202 = vmatpush.bf16.msrb.mxu2 %v8536_v7  ;;  %v8545_v63 = vld [vmem:[#allocation25_spill] sm:$0xff]  ;;  %v8546_v37 = vld [vmem:[#allocation75_spill] sm:$0xff]  ;;  %v8547_v7 = vld [vmem:[#allocation96_spill] sm:$0xff] }
 0x5fb   :  { %3070 = vmatpush.bf16.msrb.mxu1 %v8537_v31  ;;  %3096 = vmatpush.bf16.msra.mxu3 %v8538_v29  ;;  %v8548_v31 = vld [vmem:[#allocation131_spill] sm:$0xff] }
 0x5fc   :  { %3177 = vmatpush.bf16.msra.mxu0 %v8539_v33  ;;  %3203 = vmatpush.bf16.msrb.mxu2 %v8540_v35  ;;  %v8549_v29 = vld [vmem:[#allocation27_spill] sm:$0xff] }
 0x5fd   :  { %v8550_v33 = vld [vmem:[#allocation79_spill] sm:$0xff] }
 0x5fe   :  { %v8551_v35 = vld [vmem:[#allocation99_spill] sm:$0xff] }
 0x5ff   :  { %3071 = vmatpush.bf16.msrb.mxu1 %v8543_v18  ;;  %3097 = vmatpush.bf16.msra.mxu3 %v8544_v12  ;;  %v8554_v18 = vld [vmem:[#allocation83_spill] sm:$0xff]  ;;  %v8555_v12 = vld [vmem:[#allocation105_spill] sm:$0xff] }
 0x600   :  { %3222 = vmatpush.bf16.msrb.mxu0 %v8541_v17  ;;  %3248 = vmatpush.bf16.msra.mxu2 %v8542_v8  ;;  %v8552_v17 = vld [vmem:[#allocation132_spill] sm:$0xff]  ;;  %v8553_v8 = vld [vmem:[#allocation29_spill] sm:$0xff] }
 0x603   :  { %3072 = vmatpush.bf16.msrb.mxu1 %v8547_v7  ;;  %3098 = vmatpush.bf16.msra.mxu3 %v8548_v31  ;;  %v8558_v7 = vld [vmem:[#allocation40_spill] sm:$0xff]  ;;  %v8559_v31 = vld [vmem:[#allocation31_spill] sm:$0xff] }
 0x604   :  { %3223 = vmatpush.bf16.msrb.mxu0 %v8545_v63  ;;  %3249 = vmatpush.bf16.msra.mxu2 %v8546_v37  ;;  %v8556_v63 = vld [vmem:[#allocation135_spill] sm:$0xff]  ;;  %v8557_v37 = vld [vmem:[#allocation8_spill] sm:$0xff] }
 0x607   :  { %3073 = vmatpush.bf16.msrb.mxu1 %v8551_v35  ;;  %3099 = vmatpush.bf16.msra.mxu3 %v8552_v17  ;;  %v8570_v17 = vld [vmem:[#allocation52_spill] sm:$0xff]  ;;  %v8579_v35 = vld [vmem:[#allocation22_spill] sm:$0xff] }
 0x608   :  { %3224 = vmatpush.bf16.msrb.mxu0 %v8549_v29  ;;  %3250 = vmatpush.bf16.msra.mxu2 %v8550_v33  ;;  %v8560_v29 = vld [vmem:[#allocation87_spill] sm:$0xff]  ;;  %v8561_v33 = vld [vmem:[#allocation10_spill] sm:$0xff] }
 0x60b   :  { %3074 = vmatpush.bf16.msrb.mxu1 %v8555_v12  ;;  %3100 = vmatpush.bf16.msra.mxu3 %v8556_v63  ;;  %v8564_v12 = vld [vmem:[#allocation92_spill] sm:$0xff] }
 0x60c   :  { %3225 = vmatpush.bf16.msrb.mxu0 %v8553_v8  ;;  %3251 = vmatpush.bf16.msra.mxu2 %v8554_v18  ;;  %v8562_v8 = vld [vmem:[#allocation44_spill] sm:$0xff]  ;;  %v8563_v18 = vld [vmem:[#allocation33_spill] sm:$0xff] }
 0x60d   :  { %v8565_v63 = vld [vmem:[#allocation12_spill] sm:$0xff] }
 0x60e   :  { %3075 = vmatmul.bf16.vlgmr.msrb.gmra.mxu1 %v7261_v41  ;;  %3101 = vmatmul.bf16.vlgmr.msra.gmra.mxu3 %v7261_v41  ;;  %v8571_v41 = vld [vmem:[#allocation37_spill] sm:$0xff] }
 0x60f   :  { %3183 = vmatpush.bf16.msra.mxu1 %v8557_v37  ;;  %3209 = vmatpush.bf16.msrb.mxu3 %v8558_v7  ;;  %v8566_v37 = vld [vmem:[#allocation48_spill] sm:$0xff]  ;;  %v8567_v7 = vld [vmem:[#allocation35_spill] sm:$0xff] }
 0x610   :  { %3226 = vmatpush.bf16.msrb.mxu0 %v8559_v31  ;;  %3252 = vmatpush.bf16.msra.mxu2 %v8560_v29  ;;  %v8568_v31 = vld [vmem:[#allocation97_spill] sm:$0xff]  ;;  %v8569_v29 = vld [vmem:[#allocation14_spill] sm:$0xff] }
 0x613   :  { %3184 = vmatpush.bf16.msra.mxu1 %v8561_v33  ;;  %3210 = vmatpush.bf16.msrb.mxu3 %v8562_v8  ;;  %v8572_v33 = vld [vmem:[#allocation101_spill] sm:$0xff]  ;;  %v8573_v8 = vld [vmem:[#allocation16_spill] sm:$0xff] }
 0x614   :  { %3227 = vmatpush.bf16.msrb.mxu0 %v8563_v18  ;;  %3253 = vmatpush.bf16.msra.mxu2 %v8564_v12  ;;  %v8574_v18 = vld [vmem:[#allocation56_spill] sm:$0xff]  ;;  %v8575_v12 = vld [vmem:[#allocation18_spill] sm:$0xff] }
 0x617   :  { %3185 = vmatpush.bf16.msra.mxu1 %v8565_v63  ;;  %3211 = vmatpush.bf16.msrb.mxu3 %v8566_v37  ;;  %v8576_v63 = vld [vmem:[#allocation60_spill] sm:$0xff] }
 0x618   :  { %3228 = vmatpush.bf16.msrb.mxu0 %v8567_v7  ;;  %3254 = vmatpush.bf16.msra.mxu2 %v8568_v31  ;;  %v8577_v7 = vld [vmem:[#allocation20_spill] sm:$0xff] }
 0x619   :  { %v8578_v31 = vld [vmem:[#allocation64_spill] sm:$0xff] }
 0x61b   :  { %3186 = vmatpush.bf16.msra.mxu1 %v8569_v29  ;;  %3212 = vmatpush.bf16.msrb.mxu3 %v8570_v17  ;;  %v2907_v37 = vpop.f32.mrf.mxu0  ;;  %v8580_v17 = vld [vmem:[#allocation68_spill] sm:$0xff] }
 0x61c   :  { %3229 = vmatpush.bf16.msrb.mxu0 %v8571_v41  ;;  %3255 = vmatpush.bf16.msra.mxu2 %v8572_v33  ;;  %v8581_v33 = vld [vmem:[#allocation24_spill] sm:$0xff] }
 0x61f   :  { %3187 = vmatpush.bf16.msra.mxu1 %v8573_v8  ;;  %3213 = vmatpush.bf16.msrb.mxu3 %v8574_v18  ;;  %v8582_v8 = vld [vmem:[#allocation72_spill] sm:$0xff]  ;;  %v8583_v18 = vld [vmem:[#allocation26_spill] sm:$0xff] }
 0x621   :  { %v2933_v29 = vpop.f32.mrf.mxu2 }
 0x623   :  { %3188 = vmatpush.bf16.msra.mxu1 %v8575_v12  ;;  %3214 = vmatpush.bf16.msrb.mxu3 %v8576_v63  ;;  %v2909_v41 = vpop.f32.mrf.mxu0  ;;  %v8584_v12 = vld [vmem:[#allocation76_spill] sm:$0xff] }
 0x627   :  { %3189 = vmatpush.bf16.msra.mxu1 %v8577_v7  ;;  %3215 = vmatpush.bf16.msrb.mxu3 %v8578_v31  ;;  %v8586_v7 = vld [vmem:[#allocation80_spill] sm:$0xff]  ;;  %v8587_v31 = vld [vmem:[#allocation30_spill] sm:$0xff] }
 0x629   :  { %v2935_v63 = vpop.f32.mrf.mxu2 }
 0x62b   :  { %3190 = vmatpush.bf16.msra.mxu1 %v8579_v35  ;;  %3216 = vmatpush.bf16.msrb.mxu3 %v8580_v17  ;;  %v2959_v15 = vpop.f32.mrf.mxu0  ;;  %v8588_v35 = vld [vmem:[#allocation84_spill] sm:$0xff] }
 0x62f   :  { %3235 = vmatpush.bf16.msrb.mxu1 %v8581_v33  ;;  %3261 = vmatpush.bf16.msra.mxu3 %v8582_v8  ;;  %v8590_v33 = vld [vmem:[#allocation88_spill] sm:$0xff]  ;;  %v8591_v8 = vld [vmem:[#allocation34_spill] sm:$0xff] }
 0x631   :  { %v2985_v17 = vpop.f32.mrf.mxu2 }
 0x633   :  { %3236 = vmatpush.bf16.msrb.mxu1 %v8583_v18  ;;  %3262 = vmatpush.bf16.msra.mxu3 %v8584_v12  ;;  %v2961_v41 = vpop.f32.mrf.mxu0  ;;  %v8592_v18 = vld [vmem:[#allocation93_spill] sm:$0xff] }
 0x637   :  { %3237 = vmatpush.bf16.msrb.mxu1 %v8585_v39  ;;  %3263 = vmatpush.bf16.msra.mxu3 %v8586_v7  ;;  %v8594_v39 = vld [vmem:[#allocation98_spill] sm:$0xff] }
 0x638   :  { %v8595_v7 = vld [vmem:[#allocation38_spill] sm:$0xff] }
 0x639   :  { %v2987_v12 = vpop.f32.mrf.mxu2 }
 0x63b   :  { %3238 = vmatpush.bf16.msrb.mxu1 %v8587_v31  ;;  %3264 = vmatpush.bf16.msra.mxu3 %v8588_v35  ;;  %v3011_v63 = vpop.f32.mrf.mxu0  ;;  %v8596_v31 = vld [vmem:[#allocation102_spill] sm:$0xff] }
 0x63f   :  { %3239 = vmatpush.bf16.msrb.mxu1 %v8589_v45  ;;  %3265 = vmatpush.bf16.msra.mxu3 %v8590_v33  ;;  %v8597_v33 = vld [vmem:[#allocation110_spill] sm:$0xff] }
 0x640   :  { %v3109_v16 = vunpack.c.l.bf16 %v8597_v33  ;;  %v3110_v12 = vunpack.c.h.bf16 %v8597_v33 }
 0x641   :  { %v3037_v35 = vpop.f32.mrf.mxu2 }
 0x643   :  { %3240 = vmatpush.bf16.msrb.mxu1 %v8591_v8  ;;  %3266 = vmatpush.bf16.msra.mxu3 %v8592_v18  ;;  %v3013_v41 = vpop.f32.mrf.mxu0 }
 0x644   :  { %v8598_v41 = vld [vmem:[#allocation134_spill] sm:$0xff] }
 0x645   :  { %v3111_v47 = vunpack.c.l.bf16 %v8598_v41  ;;  %v3112_v33 = vunpack.c.h.bf16 %v8598_v41 }
 0x647   :  { %3241 = vmatpush.bf16.msrb.mxu1 %v8593_v28  ;;  %3267 = vmatpush.bf16.msra.mxu3 %v8594_v39 }
 0x649   :  { %v3039_v5 = vpop.f32.mrf.mxu2 }
 0x64b   :  { %3242 = vmatpush.bf16.msrb.mxu1 %v8595_v7  ;;  %3268 = vmatpush.bf16.msra.mxu3 %v8596_v31  ;;  %v2920_v48 = vpop.f32.mrf.mxu1 }
 0x64c   :  { %v2921_v45 = vadd.f32 %v2920_v48, %v2907_v37 }
 0x64e   :  { %v3113_v8 = vadd.f32 %v3109_v16, %v2921_v45 }
 0x650   :  { %v3128_v52 = vmul.f32 0.5, %v3113_v8 }
 0x651   :  { %v2946_v20 = vpop.f32.mrf.mxu3 }
 0x652   :  { %v2947_v18 = vadd.f32 %v2946_v20, %v2933_v29  ;;  %4711 = vtanh.f32 %v3128_v52 }
 0x653   :  { %v2922_v28 = vpop.f32.mrf.mxu1 }
 0x654   :  { %v3114_v58 = vadd.f32 %v3110_v12, %v2947_v18 }
 0x656   :  { %v3132_v39 = vmul.f32 0.5, %v3114_v58 }
 0x658   :  { %4713 = vtanh.f32 %v3132_v39  ;;  %v4712_v48 = vpop.eup %4711 }
 0x659   :  { %v2948_v7 = vpop.f32.mrf.mxu3  ;;  %v3130_v20 = vmul.f32 0.5, %v4712_v48  ;;  %v8599_v48 = vld [vmem:[#allocation107_spill] sm:$0xff] }
 0x65b   :  { %v2972_v31 = vpop.f32.mrf.mxu1  ;;  %v3131_v12 = vadd.f32 0.5, %v3130_v20 }
 0x65c   :  { %v2973_v24 = vadd.f32 %v2972_v31, %v2959_v15 }
 0x65e   :  { %v3063_v5 = vpop.f32.mrf.mxu0  ;;  %v4714_v37 = vpop.eup %4713  ;;  %v3115_v43 = vadd.f32 %v3111_v47, %v2973_v24 }
 0x65f   :  { %v3134_v16 = vmul.f32 0.5, %v4714_v37  ;;  %v3120_v37 = vunpack.c.l.bf16 %v8599_v48 }
 0x660   :  { %4715 = vtanh.f32 %v3115_v43 }
 0x661   :  { %v2998_v29 = vpop.f32.mrf.mxu3  ;;  %v3135_v8 = vadd.f32 0.5, %v3134_v16 }
 0x662   :  { %v2999_v45 = vadd.f32 %v2998_v29, %v2985_v17 }
 0x663   :  { %v2974_v52 = vpop.f32.mrf.mxu1  ;;  %v3141_v7 = vmul.f32 %v3135_v8, %v7217_v21 }
 0x664   :  { %v3089_v58 = vpop.f32.mrf.mxu2  ;;  %v3116_v18 = vadd.f32 %v3112_v33, %v2999_v45 }
 0x666   :  { %v3065_v28 = vpop.f32.mrf.mxu0  ;;  %v4716_v15 = vpop.eup %4715  ;;  %v3137_v39 = vmul.f32 0.5, %v3116_v18 }
 0x667   :  { %v3142_v31 = vmul.f32 %v4716_v15, %v3131_v12 }
 0x668   :  { %4717 = vtanh.f32 %v3137_v39 }
 0x669   :  { %v7383_v47 = vadd.f32 %v3142_v31, %v3141_v7  ;;  %v3000_v43 = vpop.f32.mrf.mxu3 }
 0x66b   :  { %4719 = vtanh.f32 %v7383_v47  ;;  %v3024_v17 = vpop.f32.mrf.mxu1 }
 0x66c   :  { %v3091_v24 = vpop.f32.mrf.mxu2  ;;  %v3025_v41 = vadd.f32 %v3024_v17, %v3011_v63  ;;  %v3121_v63 = vunpack.c.h.bf16 %v8599_v48 }
 0x66e   :  { %v4718_v16 = vpop.eup %4717  ;;  %v3124_v29 = vadd.f32 %v3120_v37, %v3025_v41 }
 0x66f   :  { %v3139_v20 = vmul.f32 0.5, %v4718_v16  ;;  %v8615_v16 = vld [vmem:[#allocation125_spill] sm:$0xff] }
 0x671   :  { %v4720_v45 = vpop.eup %4719  ;;  %v3140_v33 = vadd.f32 0.5, %v3139_v20  ;;  %v3050_v52 = vpop.f32.mrf.mxu3  ;;  %v8616_v20 = vld [vmem:[#allocation82_spill] sm:$0xff] }
 0x672   :  { %v3051_v12 = vadd.f32 %v3050_v52, %v3037_v35  ;;  %v3146_v35 = vmul.f32 0.5, %v3124_v29  ;;  %v4572_v29 = vld [vmem:[%s7613_s5 + $0x8] sm:$0xff]  ;;  %v8618_v52 = vld [vmem:[#allocation86_spill] sm:$0xff] }
 0x673   :  { %v3145_v18 = vmul.f32 %v4720_v45, %v3140_v33  ;;  %v3026_v21 = vpop.f32.mrf.mxu1  ;;  %v8617_v45 = vld [vmem:[#allocation126_spill] sm:$0xff]  ;;  %v4571_v33 = vld [vmem:[%s7613_s5] sm:$0xff] }
 0x674   :  { %v3125_v15 = vadd.f32 %v3121_v63, %v3051_v12  ;;  %v4563_v21 = vld [vmem:[#allocation4] sm:$0xff]  ;;  %v8621_v12 = vld [vmem:[#allocation129_spill] sm:$0xff]  ;;  %v8622_v63 = vld [vmem:[#allocation96_spill] sm:$0xff] }
 0x675   :  { %v7387_v8 = vpack.c.bf16 %v3145_v18, %v3145_v18  ;;  %v8619_v18 = vld [vmem:[#allocation128_spill] sm:$0xff] }
 0x676   :  { %v3150_v39 = vmul.f32 0.5, %v3125_v15  ;;  %v8624_v15 = vld [vmem:[#allocation99_spill] sm:$0xff] }
 0x677   :  { %3166 = vst [vmem:[#allocation4 + $0x18] sm:$0xf] %v7387_v8  ;;  %3178 = vmatmul.bf16.vlgmr.msra.gmra.mxu0 %v7387_v8  ;;  %3204 = vmatmul.bf16.vlgmr.msrb.gmra.mxu2 %v7387_v8 }
 0x678   :  { %3274 = vmatpush.bf16.msra.mxu0 %v8033_v22  ;;  %3300 = vmatpush.bf16.msrb.mxu2 %v5942_v10  ;;  %4721 = vtanh.f32 %v3150_v39  ;;  %v8625_v39 = vld [vmem:[#allocation132_spill] sm:$0xff] }
 0x679   :  { %v3052_v28 = vpop.f32.mrf.mxu3  ;;  %4723 = vtanh.f32 %v3146_v35  ;;  %v8626_v35 = vld [vmem:[#allocation105_spill] sm:$0xff] }
 0x67a   :  { %v8623_v28 = vld [vmem:[#allocation131_spill] sm:$0xff] }
 0x67c   :  { %3275 = vmatpush.bf16.msra.mxu0 %v8034_v3  ;;  %3301 = vmatpush.bf16.msrb.mxu2 %v5975_v14  ;;  %v8600_v3 = vld [vmem:[#allocation138_spill] sm:$0xff] }
 0x67d   :  { %v3123_v24 = vunpack.c.h.bf16 %v8600_v3 }
 0x67e   :  { %v4722_v14 = vpop.eup %4721 }
 0x67f   :  { %v3152_v31 = vmul.f32 0.5, %v4722_v14  ;;  %v4564_v14 = vld [vmem:[#allocation4 + $0x8] sm:$0xff] }
 0x680   :  { %3276 = vmatpush.bf16.msra.mxu0 %v8035_v60  ;;  %3302 = vmatpush.bf16.msrb.mxu2 %v5999_v51  ;;  %v3122_v51 = vunpack.c.l.bf16 %v8600_v3  ;;  %v4724_v60 = vpop.eup %4723 }
 0x684   :  { %3277 = vmatpush.bf16.msra.mxu0 %v8036_v59  ;;  %3303 = vmatpush.bf16.msrb.mxu2 %v6025_v19  ;;  %v3148_v19 = vmul.f32 0.5, %v4724_v60 }
 0x687   :  { %3230 = vmatmul.bf16.vlgmr.msrb.gmra.mxu0 %v7387_v8  ;;  %3256 = vmatmul.bf16.vlgmr.msra.gmra.mxu2 %v7387_v8 }
 0x688   :  { %3278 = vmatpush.bf16.msra.mxu0 %v8037_v55  ;;  %3304 = vmatpush.bf16.msrb.mxu2 %v6047_v1  ;;  %v3153_v55 = vadd.f32 0.5, %v3152_v31 }
 0x68b   :  { %v3076_v10 = vpop.f32.mrf.mxu1 }
 0x68c   :  { %v3077_v22 = vadd.f32 %v3076_v10, %v3063_v5  ;;  %3279 = vmatpush.bf16.msra.mxu0 %v8038_v38  ;;  %3305 = vmatpush.bf16.msrb.mxu2 %v6075_v53  ;;  %v3149_v5 = vadd.f32 0.5, %v3148_v19  ;;  %v3159_v38 = vmul.f32 %v3153_v55, %v7250_v40  ;;  %v8627_v10 = vld [vmem:[#allocation135_spill] sm:$0xff] }
 0x68e   :  { %v3126_v7 = vadd.f32 %v3122_v51, %v3077_v22  ;;  %v4565_v22 = vld [vmem:[#allocation4 + $0x10] sm:$0xff] }
 0x690   :  { %4725 = vtanh.f32 %v3126_v7  ;;  %3280 = vmatpush.bf16.msra.mxu0 %v8039_v54  ;;  %3306 = vmatpush.bf16.msrb.mxu2 %v6099_v44 }
 0x691   :  { %v3102_v59 = vpop.f32.mrf.mxu3 }
 0x692   :  { %v3103_v43 = vadd.f32 %v3102_v59, %v3089_v58  ;;  %v8614_v58 = vld [vmem:[#allocation78_spill] sm:$0xff] }
 0x693   :  { %v3078_v17 = vpop.f32.mrf.mxu1 }
 0x694   :  { %v3127_v1 = vadd.f32 %v3123_v24, %v3103_v43  ;;  %3281 = vmatpush.bf16.msra.mxu0 %v8040_v57  ;;  %3307 = vmatpush.bf16.msrb.mxu2 %v6135_v50 }
 0x696   :  { %v4726_v41 = vpop.eup %4725  ;;  %v3155_v48 = vmul.f32 0.5, %v3127_v1 }
 0x697   :  { %v3160_v37 = vmul.f32 %v4726_v41, %v3149_v5  ;;  %3282 = vmatmul.bf16.vlgmr.msra.gmra.mxu0 %v7387_v8  ;;  %3308 = vmatmul.bf16.vlgmr.msrb.gmra.mxu2 %v7387_v8 }
 0x698   :  { %4727 = vtanh.f32 %v3155_v48  ;;  %3326 = vmatpush.bf16.msrb.mxu0 %v8041_v2  ;;  %3352 = vmatpush.bf16.msra.mxu2 %v6140_v25  ;;  %v8628_v48 = vld [vmem:[#allocation112_spill] sm:$0xff] }
 0x699   :  { %v7416_v53 = vadd.f32 %v3160_v37, %v3159_v38  ;;  %v3104_v54 = vpop.f32.mrf.mxu3  ;;  %v3381_v38 = vunpack.c.l.bf16 %v8628_v48 }
 0x69b   :  { %4729 = vtanh.f32 %v7416_v53 }
 0x69c   :  { %3327 = vmatpush.bf16.msrb.mxu0 %v8042_v26  ;;  %3353 = vmatpush.bf16.msra.mxu2 %v6164_v30  ;;  %v8603_v30 = vld [vmem:[#allocation133_spill] sm:$0xff]  ;;  %v4575_v26 = vld [vmem:[%s7613_s5 + $0x20] sm:$0xff] }
 0x69e   :  { %v4728_v44 = vpop.eup %4727 }
 0x69f   :  { %v3157_v50 = vmul.f32 0.5, %v4728_v44 }
 0x6a0   :  { %3328 = vmatpush.bf16.msrb.mxu0 %v8043_v42  ;;  %3354 = vmatpush.bf16.msra.mxu2 %v6188_v6  ;;  %v4576_v6 = vld [vmem:[%s7613_s5 + $0x28] sm:$0xff]  ;;  %v8608_v42 = vld [vmem:[#allocation66_spill] sm:$0xff] }
 0x6a1   :  { %v4730_v25 = vpop.eup %4729  ;;  %v3158_v57 = vadd.f32 0.5, %v3157_v50  ;;  %v3382_v50 = vunpack.c.h.bf16 %v8628_v48 }
 0x6a3   :  { %v3163_v2 = vmul.f32 %v4730_v25, %v3158_v57 }
 0x6a4   :  { %3329 = vmatpush.bf16.msrb.mxu0 %v8044_v9  ;;  %3355 = vmatpush.bf16.msra.mxu2 %v6208_v34  ;;  %v4578_v34 = vld [vmem:[%s7613_s5 + $0x38] sm:$0xff]  ;;  %v8609_v9 = vld [vmem:[#allocation120_spill] sm:$0xff] }
 0x6a5   :  { %v7427_v40 = vpack.c.bf16 %v3163_v2, %v3163_v2 }
 0x6a7   :  { %3169 = vst [vmem:[#allocation5 + $0x4] sm:$0xf] %v7427_v40  ;;  %3191 = vmatmul.bf16.vlgmr.msra.gmra.mxu1 %v7427_v40  ;;  %3217 = vmatmul.bf16.vlgmr.msrb.gmra.mxu3 %v7427_v40 }
 0x6a8   :  { %3287 = vmatpush.bf16.msra.mxu1 %v8045_v11  ;;  %3313 = vmatpush.bf16.msrb.mxu3 %v5945_v49  ;;  %v8601_v49 = vld [vmem:[#allocation115_spill] sm:$0xff]  ;;  %v4574_v11 = vld [vmem:[%s7613_s5 + $0x18] sm:$0xff] }
 0x6a9   :  { %3330 = vmatpush.bf16.msrb.mxu0 %v8046_v0  ;;  %3356 = vmatpush.bf16.msra.mxu2 %v6228_v62  ;;  %v8606_v62 = vld [vmem:[#allocation62_spill] sm:$0xff] }
 0x6aa   :  { %v8610_v0 = vld [vmem:[#allocation70_spill] sm:$0xff] }
 0x6ac   :  { %3288 = vmatpush.bf16.msra.mxu1 %v8047_v61  ;;  %3314 = vmatpush.bf16.msrb.mxu3 %v5978_v56  ;;  %v8602_v56 = vld [vmem:[#allocation104_spill] sm:$0xff]  ;;  %v8611_v61 = vld [vmem:[#allocation122_spill] sm:$0xff] }
 0x6ad   :  { %3331 = vmatpush.bf16.msrb.mxu0 %v8048_v46  ;;  %3357 = vmatpush.bf16.msra.mxu2 %v6248_v36  ;;  %v8604_v36 = vld [vmem:[#allocation58_spill] sm:$0xff] }
 0x6ae   :  { %v8612_v46 = vld [vmem:[#allocation74_spill] sm:$0xff] }
 0x6b0   :  { %3289 = vmatpush.bf16.msra.mxu1 %v8049_v32  ;;  %3315 = vmatpush.bf16.msrb.mxu3 %v6003_v13  ;;  %v4577_v13 = vld [vmem:[%s7613_s5 + $0x30] sm:$0xff]  ;;  %v8613_v32 = vld [vmem:[#allocation123_spill] sm:$0xff] }
 0x6b1   :  { %3332 = vmatpush.bf16.msrb.mxu0 %v5831_v23  ;;  %3358 = vmatpush.bf16.msra.mxu2 %v6269_v27  ;;  %v8605_v23 = vld [vmem:[#allocation116_spill] sm:$0xff]  ;;  %v8607_v27 = vld [vmem:[#allocation119_spill] sm:$0xff] }
 0x6b4   :  { %3290 = vmatpush.bf16.msra.mxu1 %v8050_v4  ;;  %3316 = vmatpush.bf16.msrb.mxu3 %v8601_v49  ;;  %v4573_v4 = vld [vmem:[%s7613_s5 + $0x10] sm:$0xff] }
 0x6b5   :  { %3333 = vmatpush.bf16.msrb.mxu0 %v8602_v56  ;;  %3359 = vmatpush.bf16.msra.mxu2 %v8603_v30  ;;  %v8629_v30 = vld [vmem:[#allocation136_spill] sm:$0xff] }
 0x6b7   :  { %3243 = vmatmul.bf16.vlgmr.msrb.gmra.mxu1 %v7427_v40  ;;  %3269 = vmatmul.bf16.vlgmr.msra.gmra.mxu3 %v7427_v40 }
 0x6b8   :  { %3291 = vmatpush.bf16.msra.mxu1 %v8604_v36  ;;  %3317 = vmatpush.bf16.msrb.mxu3 %v8605_v23 }
 0x6b9   :  { %3552 = vmatpush.bf16.msra.mxu0 %v4578_v34  ;;  %3360 = vmatmul.bf16.vlgmr.msra.gmra.mxu2 %v7387_v8 }
 0x6ba   :  { %3334 = vmatmul.bf16.vlgmr.msrb.gmra.mxu0 %v7387_v8  ;;  %v8620_v8 = vld [vmem:[#allocation90_spill] sm:$0xff] }
 0x6bc   :  { %3292 = vmatpush.bf16.msra.mxu1 %v8606_v62  ;;  %3318 = vmatpush.bf16.msrb.mxu3 %v8607_v27 }
 0x6bd   :  { %3553 = vmatpush.bf16.msra.mxu0 %v4577_v13  ;;  %v3383_v13 = vunpack.c.l.bf16 %v8629_v30 }
 0x6c0   :  { %3293 = vmatpush.bf16.msra.mxu1 %v8608_v42  ;;  %3319 = vmatpush.bf16.msrb.mxu3 %v8609_v9 }
 0x6c1   :  { %3554 = vmatpush.bf16.msra.mxu0 %v4576_v6 }
 0x6c4   :  { %3294 = vmatpush.bf16.msra.mxu1 %v8610_v0  ;;  %3320 = vmatpush.bf16.msrb.mxu3 %v8611_v61 }
 0x6c5   :  { %3555 = vmatpush.bf16.msra.mxu0 %v4575_v26 }
 0x6c7   :  { %3295 = vmatmul.bf16.vlgmr.msra.gmra.mxu1 %v7427_v40  ;;  %3321 = vmatmul.bf16.vlgmr.msrb.gmra.mxu3 %v7427_v40 }
 0x6c8   :  { %3339 = vmatpush.bf16.msrb.mxu1 %v8612_v46  ;;  %3365 = vmatpush.bf16.msra.mxu3 %v8613_v32 }
 0x6c9   :  { %3556 = vmatpush.bf16.msra.mxu0 %v4574_v11  ;;  %v3384_v11 = vunpack.c.h.bf16 %v8629_v30 }
 0x6cc   :  { %3340 = vmatpush.bf16.msrb.mxu1 %v8614_v58  ;;  %3366 = vmatpush.bf16.msra.mxu3 %v8615_v16 }
 0x6cd   :  { %3557 = vmatpush.bf16.msra.mxu0 %v4573_v4 }
 0x6d0   :  { %3341 = vmatpush.bf16.msrb.mxu1 %v8616_v20  ;;  %3367 = vmatpush.bf16.msra.mxu3 %v8617_v45 }
 0x6d1   :  { %3558 = vmatpush.bf16.msra.mxu0 %v4572_v29 }
 0x6d4   :  { %3342 = vmatpush.bf16.msrb.mxu1 %v8618_v52  ;;  %3368 = vmatpush.bf16.msra.mxu3 %v8619_v18 }
 0x6d5   :  { %3559 = vmatpush.bf16.msra.mxu0 %v4571_v33 }
 0x6d8   :  { %3343 = vmatpush.bf16.msrb.mxu1 %v8620_v8  ;;  %3369 = vmatpush.bf16.msra.mxu3 %v8621_v12  ;;  %v8630_v12 = vld [vmem:[#allocation103_spill] sm:$0xff] }
 0x6d9   :  { %3560 = vmatmul.bf16.vlgmr.msra.gmra.mxu0 %v4563_v21 }
 0x6dc   :  { %3344 = vmatpush.bf16.msrb.mxu1 %v8622_v63  ;;  %3370 = vmatpush.bf16.msra.mxu3 %v8623_v28  ;;  %v3391_v63 = vunpack.c.l.bf16 %v8630_v12  ;;  %v4586_v28 = vld [vmem:[%s7615_s6 + $0x38] sm:$0xff] }
 0x6e0   :  { %3345 = vmatpush.bf16.msrb.mxu1 %v8624_v15  ;;  %3371 = vmatpush.bf16.msra.mxu3 %v8625_v39 }
 0x6e4   :  { %3346 = vmatpush.bf16.msrb.mxu1 %v8626_v35  ;;  %3372 = vmatpush.bf16.msra.mxu3 %v8627_v10 }
 0x6e7   :  { %3347 = vmatmul.bf16.vlgmr.msrb.gmra.mxu1 %v7427_v40  ;;  %3373 = vmatmul.bf16.vlgmr.msra.gmra.mxu3 %v7427_v40 }
 0x6e8   :  { %3669 = vmatpush.bf16.msra.mxu1 %v4586_v28 }
 0x6e9   :  { %3565 = vmatmul.bf16.gmra.mxu0 %v4564_v14 }
 0x6f4   :  { %v3179_v3 = vpop.f32.mrf.mxu0 }
 0x6f9   :  { %3570 = vmatmul.bf16.gmra.mxu0 %v4565_v22  ;;  %v4585_v22 = vld [vmem:[%s7615_s6 + $0x30] sm:$0xff] }
 0x6fa   :  { %v3205_v51 = vpop.f32.mrf.mxu2  ;;  %3670 = vmatpush.bf16.msra.mxu1 %v4585_v22 }
 0x6fc   :  { %v3181_v60 = vpop.f32.mrf.mxu0 }
 0x702   :  { %v3207_v7 = vpop.f32.mrf.mxu2 }
 0x703   :  { %v4584_v7 = vld [vmem:[%s7615_s6 + $0x28] sm:$0xff] }
 0x704   :  { %v3231_v31 = vpop.f32.mrf.mxu0  ;;  %3671 = vmatpush.bf16.msra.mxu1 %v4584_v7 }
 0x70a   :  { %v3257_v19 = vpop.f32.mrf.mxu2 }
 0x70c   :  { %v3233_v59 = vpop.f32.mrf.mxu0 }
 0x70d   :  { %v3392_v59 = vunpack.c.h.bf16 %v8630_v12 }
 0x712   :  { %v3259_v43 = vpop.f32.mrf.mxu2 }
 0x714   :  { %v3283_v24 = vpop.f32.mrf.mxu0 }
 0x71a   :  { %v7504_v55 = vpop.f32.mrf.mxu2 }
 0x71c   :  { %v3285_v17 = vpop.f32.mrf.mxu0 }
 0x722   :  { %v3311_v41 = vpop.f32.mrf.mxu2 }
 0x724   :  { %v3192_v1 = vpop.f32.mrf.mxu1 }
 0x725   :  { %v3193_v5 = vadd.f32 %v3192_v1, %v3179_v3 }
 0x727   :  { %v3385_v37 = vadd.f32 %v3381_v38, %v3193_v5 }
 0x729   :  { %v3399_v25 = vmul.f32 0.5, %v3385_v37  ;;  %v4581_v37 = vld [vmem:[%s7615_s6 + $0x10] sm:$0xff] }
 0x72a   :  { %v3218_v54 = vpop.f32.mrf.mxu3 }
 0x72b   :  { %v3219_v44 = vadd.f32 %v3218_v54, %v3205_v51  ;;  %4731 = vtanh.f32 %v3399_v25  ;;  %v4579_v25 = vld [vmem:[%s7615_s6] sm:$0xff] }
 0x72c   :  { %v3194_v57 = vpop.f32.mrf.mxu1 }
 0x72d   :  { %v3386_v2 = vadd.f32 %v3382_v50, %v3219_v44  ;;  %v4580_v50 = vld [vmem:[%s7615_s6 + $0x8] sm:$0xff] }
 0x72f   :  { %v3403_v40 = vmul.f32 0.5, %v3386_v2 }
 0x731   :  { %4733 = vtanh.f32 %v3403_v40  ;;  %v4732_v36 = vpop.eup %4731 }
 0x732   :  { %v3220_v34 = vpop.f32.mrf.mxu3  ;;  %v3401_v26 = vmul.f32 0.5, %v4732_v36 }
 0x733   :  { %v8631_v34 = vld [vmem:[#allocation137_spill] sm:$0xff] }
 0x734   :  { %v3244_v49 = vpop.f32.mrf.mxu1  ;;  %v3402_v4 = vadd.f32 0.5, %v3401_v26 }
 0x735   :  { %v3245_v56 = vadd.f32 %v3244_v49, %v3231_v31  ;;  %v3393_v49 = vunpack.c.l.bf16 %v8631_v34 }
 0x737   :  { %v7509_v23 = vpop.f32.mrf.mxu0  ;;  %v4734_v6 = vpop.eup %4733  ;;  %v3387_v62 = vadd.f32 %v3383_v13, %v3245_v56 }
 0x738   :  { %v3405_v27 = vmul.f32 0.5, %v4734_v6 }
 0x739   :  { %4735 = vtanh.f32 %v3387_v62 }
 0x73a   :  { %v3270_v42 = vpop.f32.mrf.mxu3  ;;  %v3406_v0 = vadd.f32 0.5, %v3405_v27 }
 0x73b   :  { %v3271_v9 = vadd.f32 %v3270_v42, %v3257_v19  ;;  %v7529_v19 = vld [vmem:[%s7614_s7] ss:$0 sm:$0xff] }
 0x73c   :  { %v7512_v61 = vpop.f32.mrf.mxu2  ;;  %v3246_v46 = vpop.f32.mrf.mxu1  ;;  %v3412_v20 = vmul.f32 %v3406_v0, %v7383_v47 }
 0x73d   :  { %v3388_v32 = vadd.f32 %v3384_v11, %v3271_v9 }
 0x73f   :  { %v3337_v58 = vpop.f32.mrf.mxu0  ;;  %v4736_v16 = vpop.eup %4735  ;;  %v3408_v29 = vmul.f32 0.5, %v3388_v32 }
 0x740   :  { %v3413_v45 = vmul.f32 %v4736_v16, %v3402_v4 }
 0x741   :  { %4737 = vtanh.f32 %v3408_v29 }
 0x742   :  { %v3414_v33 = vadd.f32 %v3413_v45, %v3412_v20  ;;  %v3272_v52 = vpop.f32.mrf.mxu3 }
 0x744   :  { %4739 = vtanh.f32 %v3414_v33  ;;  %v3363_v18 = vpop.f32.mrf.mxu2  ;;  %v3296_v21 = vpop.f32.mrf.mxu1 }
 0x745   :  { %v3297_v8 = vadd.f32 %v3296_v21, %v3283_v24  ;;  %v4583_v24 = vld [vmem:[%s7615_s6 + $0x20] sm:$0xff] }
 0x746   :  { %3672 = vmatpush.bf16.msra.mxu1 %v4583_v24 }
 0x747   :  { %v4738_v15 = vpop.eup %4737  ;;  %v3395_v39 = vadd.f32 %v3391_v63, %v3297_v8 }
 0x748   :  { %v3410_v35 = vmul.f32 0.5, %v4738_v15 }
 0x749   :  { %v3417_v38 = vmul.f32 0.5, %v3395_v39  ;;  %v4568_v39 = vld [vmem:[#allocation5 + $0x8] sm:$0xff] }
 0x74a   :  { %v4740_v10 = vpop.eup %4739  ;;  %v3411_v47 = vadd.f32 0.5, %v3410_v35  ;;  %v3322_v14 = vpop.f32.mrf.mxu3  ;;  %v4569_v35 = vld [vmem:[#allocation5 + $0x10] sm:$0xff] }
 0x74b   :  { %v3323_v31 = vadd.f32 %v3322_v14, %v7504_v55  ;;  %v4582_v55 = vld [vmem:[%s7615_s6 + $0x18] sm:$0xff] }
 0x74c   :  { %v3416_v3 = vmul.f32 %v4740_v10, %v3411_v47  ;;  %v3298_v51 = vpop.f32.mrf.mxu1  ;;  %3673 = vmatpush.bf16.msra.mxu1 %v4582_v55  ;;  %v4570_v10 = vld [vmem:[#allocation5 + $0x18] sm:$0xff] }
 0x74d   :  { %v3396_v1 = vadd.f32 %v3392_v59, %v3323_v31 }
 0x74e   :  { %v3435_v60 = vpack.c.bf16 %v3416_v3, %v3416_v3 }
 0x74f   :  { %v3421_v48 = vmul.f32 0.5, %v3396_v1 }
 0x750   :  { %3437 = vst [vmem:[#allocation4 + $0x1c] sm:$0xf] %v3435_v60  ;;  %3674 = vmatpush.bf16.msra.mxu1 %v4581_v37 }
 0x751   :  { %4741 = vtanh.f32 %v3421_v48 }
 0x752   :  { %v3324_v43 = vpop.f32.mrf.mxu3  ;;  %4743 = vtanh.f32 %v3417_v38 }
 0x754   :  { %3675 = vmatpush.bf16.msra.mxu1 %v4580_v50 }
 0x756   :  { %v3561_v17 = vpop.f32.mrf.mxu0 }
 0x757   :  { %v3562_v5 = vadd.f32 %v7529_v19, %v3561_v17  ;;  %v4566_v41 = vld [vmem:[#allocation4 + $0x18] sm:$0xff]  ;;  %v4742_v2 = vpop.eup %4741 }
 0x758   :  { %3575 = vmatmul.bf16.gmra.mxu0 %v4566_v41  ;;  %v4744_v30 = vpop.eup %4743  ;;  %3676 = vmatpush.bf16.msra.mxu1 %v4579_v25  ;;  %v3423_v6 = vmul.f32 0.5, %v4742_v2 }
 0x759   :  { %3698 = vst [vmem:[%s7616_s8] sm:$0xff] %v3562_v5  ;;  %v3419_v62 = vmul.f32 0.5, %v4744_v30 }
 0x75a   :  { %v3424_v42 = vadd.f32 0.5, %v3423_v6 }
 0x75b   :  { %v3420_v0 = vadd.f32 0.5, %v3419_v62 }
 0x75c   :  { %v3430_v16 = vmul.f32 %v3424_v42, %v7416_v53 }
 0x75e   :  { %v3563_v54 = vpop.f32.mrf.mxu0 }
 0x75f   :  { %v3564_v44 = vadd.f32 %v7529_v19, %v3563_v54 }
 0x761   :  { %3699 = vst [vmem:[%s7616_s8 + $0x8] sm:$0xff] %v3564_v44 }
 0x764   :  { %v3348_v57 = vpop.f32.mrf.mxu1 }
 0x765   :  { %v3349_v40 = vadd.f32 %v3348_v57, %v7509_v23  ;;  %v3394_v23 = vunpack.c.h.bf16 %v8631_v34 }
 0x766   :  { %v3566_v56 = vpop.f32.mrf.mxu0 }
 0x767   :  { %v3397_v13 = vadd.f32 %v3393_v49, %v3349_v40  ;;  %v3567_v36 = vadd.f32 %v7529_v19, %v3566_v56 }
 0x769   :  { %4745 = vtanh.f32 %v3397_v13  ;;  %3700 = vst [vmem:[%s7616_s8 + $0x10] sm:$0xff] %v3567_v36 }
 0x76a   :  { %v3374_v27 = vpop.f32.mrf.mxu3 }
 0x76b   :  { %v3375_v26 = vadd.f32 %v3374_v27, %v7512_v61 }
 0x76c   :  { %v3350_v9 = vpop.f32.mrf.mxu1 }
 0x76d   :  { %v3398_v11 = vadd.f32 %v3394_v23, %v3375_v26 }
 0x76e   :  { %v3568_v46 = vpop.f32.mrf.mxu0 }
 0x76f   :  { %v4746_v32 = vpop.eup %4745  ;;  %v3426_v4 = vmul.f32 0.5, %v3398_v11  ;;  %v3569_v58 = vadd.f32 %v7529_v19, %v3568_v46 }
 0x770   :  { %v3431_v29 = vmul.f32 %v4746_v32, %v3420_v0 }
 0x771   :  { %4747 = vtanh.f32 %v3426_v4  ;;  %3701 = vst [vmem:[%s7616_s8 + $0x18] sm:$0xff] %v3569_v58 }
 0x772   :  { %v3432_v61 = vadd.f32 %v3431_v29, %v3430_v16  ;;  %v3376_v20 = vpop.f32.mrf.mxu3 }
 0x774   :  { %4749 = vtanh.f32 %v3432_v61 }
 0x776   :  { %v3571_v45 = vpop.f32.mrf.mxu0 }
 0x777   :  { %v4748_v33 = vpop.eup %4747  ;;  %v3572_v52 = vadd.f32 %v7529_v19, %v3571_v45 }
 0x778   :  { %v3428_v18 = vmul.f32 0.5, %v4748_v33 }
 0x779   :  { %3702 = vst [vmem:[%s7616_s8 + $0x20] sm:$0xff] %v3572_v52 }
 0x77a   :  { %v4750_v21 = vpop.eup %4749  ;;  %v3429_v53 = vadd.f32 0.5, %v3428_v18 }
 0x77c   :  { %v3434_v8 = vmul.f32 %v4750_v21, %v3429_v53 }
 0x77e   :  { %v3438_v12 = vpack.c.bf16 %v3434_v8, %v3434_v8  ;;  %v3573_v63 = vpop.f32.mrf.mxu0 }
 0x77f   :  { %v3574_v28 = vadd.f32 %v7529_v19, %v3573_v63 }
 0x780   :  { %3439 = vst [vmem:[#allocation5] sm:$0xf] %v3438_v12 }
 0x781   :  { %3703 = vst [vmem:[%s7616_s8 + $0x28] sm:$0xff] %v3574_v28 }
 0x787   :  { %v4567_v15 = vld [vmem:[#allocation5] sm:$0xff] }
 0x788   :  { %3677 = vmatmul.bf16.vlgmr.msra.gmra.mxu1 %v4567_v15 }
 0x798   :  { %3682 = vmatmul.bf16.gmra.mxu1 %v4568_v39 }
 0x7a8   :  { %3687 = vmatmul.bf16.gmra.mxu1 %v4569_v35 }
 0x7b8   :  { %3692 = vmatmul.bf16.gmra.mxu1 %v4570_v10 }
 0x7d5   :  { %v3576_v47 = vpop.f32.mrf.mxu0 }
 0x7d6   :  { %v3577_v14 = vadd.f32 %v7529_v19, %v3576_v47 }
 0x7d8   :  { %3704 = vst [vmem:[%s7616_s8 + $0x30] sm:$0xff] %v3577_v14 }
 0x7dd   :  { %v3578_v22 = vpop.f32.mrf.mxu0 }
 0x7de   :  { %v3579_v3 = vadd.f32 %v7529_v19, %v3578_v22 }
 0x7e0   :  { %3705 = vst [vmem:[%s7616_s8 + $0x38] sm:$0xff] %v3579_v3 }
 0x805   :  { %v3678_v51 = vpop.f32.mrf.mxu1 }
 0x806   :  { %3706 = vst [vmem:[%s7617_s9] sm:$0xff] %v3678_v51 }
 0x80d   :  { %v3680_v60 = vpop.f32.mrf.mxu1 }
 0x80e   :  { %3707 = vst [vmem:[%s7617_s9 + $0x8] sm:$0xff] %v3680_v60 }
 0x815   :  { %v3683_v7 = vpop.f32.mrf.mxu1 }
 0x816   :  { %3708 = vst [vmem:[%s7617_s9 + $0x10] sm:$0xff] %v3683_v7 }
 0x81d   :  { %v3685_v31 = vpop.f32.mrf.mxu1 }
 0x81e   :  { %3709 = vst [vmem:[%s7617_s9 + $0x18] sm:$0xff] %v3685_v31 }
 0x825   :  { %v3688_v19 = vpop.f32.mrf.mxu1 }
 0x826   :  { %3710 = vst [vmem:[%s7617_s9 + $0x20] sm:$0xff] %v3688_v19 }
 0x82d   :  { %v3690_v59 = vpop.f32.mrf.mxu1 }
 0x82e   :  { %3711 = vst [vmem:[%s7617_s9 + $0x28] sm:$0xff] %v3690_v59 }
 0x835   :  { %v3693_v43 = vpop.f32.mrf.mxu1 }
 0x836   :  { %3712 = vst [vmem:[%s7617_s9 + $0x30] sm:$0xff] %v3693_v43 }
 0x83d   :  { %v3695_v24 = vpop.f32.mrf.mxu1 }
 0x83e   :  { %3713 = vst [vmem:[%s7617_s9 + $0x38] sm:$0xff] %v3695_v24 }

</bundles_post_ra>
